<compile_context>
chip_gen: v5e
topology: v5e:2x2
jax: 0.10.0
libtpu: 0.0.40
codegen_flags: <defaults>
</compile_context>

<pallas_src>
import functools

import jax
import jax.numpy as jnp
from jax import lax
from jax.experimental import pallas as pl
from jax.experimental.pallas import tpu as pltpu

_VMEM_LIMIT = 48 * 1024 * 1024  # ~24 MiB used at Cin=768 / TB=128 / 1000 classes


def _round_up(a, b):
    return (a + b - 1) // b * b


# ---------------------------------------------------------------------------
# Fused kernel: conv0(1x1)+BN+ReLU -> conv1(5x5)+BN+ReLU -> spatial sum -> fc
#   grid = (batch tiles,)  [parallel]
#   pooled_ref : (S1, TB, Cin)  bf16  avg-pool window *sums*, position-major
#   w0_ref     : (Cin, 128)     bf16  conv0 weight * bn0_scale / 25
#   shift0_ref : (1, 128)       f32   folded BN0 shift
#   w1_ref     : (25, 128, 768) bf16  conv1 weight per (kh,kw) tap * bn1_scale
#   shift1_ref : (1, 768)       f32   folded BN1 shift
#   fcw_ref    : (768, Cpad)    bf16  fc weight (1/S2 folded in, lane-padded)
#   fcb_ref    : (1, Cpad)      f32   fc bias (lane-padded)
#   o_ref      : (TB, Cpad)     f32   logits
# ---------------------------------------------------------------------------
def _inception_aux_kernel(pooled_ref, w0_ref, shift0_ref, w1_ref, shift1_ref,
                          fcw_ref, fcb_ref, o_ref, *, Hp, Wp, K1):
    Ho, Wo = Hp - K1 + 1, Wp - K1 + 1
    w0 = w0_ref[...]
    shift0 = shift0_ref[...]
    shift1 = shift1_ref[...]

    def conv0_at(p):
        # 1x1 conv (pool mean + BN0 scale folded into w0) + BN0 shift + ReLU.
        y = jnp.dot(pooled_ref[p], w0, preferred_element_type=jnp.float32)
        return jnp.maximum(y + shift0, 0.0).astype(jnp.bfloat16)      # (TB, 128)

    if Ho * Wo == 1:
        # Canonical Inception-v3 case (17x17 input -> 5x5 pooled map): conv1
        # tap (kh,kw) reads exactly pooled position p = kh*Wp + kw, so stream:
        # each conv0 position is folded straight into the conv1 accumulator and
        # only one (TB,128) activation is live at a time.
        acc = None
        for p in range(Hp * Wp):
            c = jnp.dot(conv0_at(p), w1_ref[p],
                        preferred_element_type=jnp.float32)           # (TB, 768)
            acc = c if acc is None else acc + c
        pooled1 = jnp.maximum(acc + shift1, 0.0)                      # (TB, 768)
    else:
        # General (small) spatial sizes: materialize all conv0 positions, slide
        # the 5x5 window, ReLU per conv1 output position, then spatial *sum*
        # (the 1/(Ho*Wo) mean is folded into fc_w).  Fully unrolled at trace
        # time — intended for the small maps InceptionAux actually sees.
        a0 = [conv0_at(p) for p in range(Hp * Wp)]
        pooled1 = None
        for oh in range(Ho):
            for ow in range(Wo):
                acc = None
                for kh in range(K1):
                    for kw in range(K1):
                        c = jnp.dot(a0[(oh + kh) * Wp + (ow + kw)],
                                    w1_ref[kh * K1 + kw],
                                    preferred_element_type=jnp.float32)
                        acc = c if acc is None else acc + c
                y = jnp.maximum(acc + shift1, 0.0)
                pooled1 = y if pooled1 is None else pooled1 + y

    out = jnp.dot(pooled1.astype(jnp.bfloat16), fcw_ref[...],
                  preferred_element_type=jnp.float32)                 # (TB, Cpad)
    o_ref[...] = (out + fcb_ref[...]).astype(o_ref.dtype)


# ---------------------------------------------------------------------------
# Wrapper: pooling in NCHW, tiny transpose, BN folding, padding, one launch.
# ---------------------------------------------------------------------------
def inception_aux_forward(x, params, num_classes):
    N, Cin, H, W = x.shape
    k, s, K1 = 5, 3, 5                           # avg_pool2d(5,3), conv1 kernel 5
    Hp = (H - k) // s + 1
    Wp = (W - k) // s + 1
    Ho, Wo = Hp - K1 + 1, Wp - K1 + 1
    assert Ho >= 1 and Wo >= 1, "input spatially too small for InceptionAux"
    S1, S2 = Hp * Wp, Ho * Wo

    # --- stage-1 glue: 5x5/stride-3 window *sum* in NCHW (small output), then
    # transpose only the tiny pooled tensor to position-major channels-last ---
    win_sum = lax.reduce_window(
        x.astype(jnp.float32), 0.0, lax.add,
        window_dimensions=(1, 1, k, k),
        window_strides=(1, 1, s, s),
        padding="VALID")                                              # (N,Cin,Hp,Wp)
    pooled = jnp.transpose(win_sum, (2, 3, 0, 1)).reshape(S1, N, Cin)
    pooled = pooled.astype(jnp.bfloat16)                              # (S1,N,Cin)

    # --- batch tiling: >=2 parallel steps when N allows (v7x megacore), rows a
    # multiple of 8, capped at 128 so the Cin=768 block stays ~5 MiB ---
    if N <= 8:
        TB = N
    else:
        TB = min(128, _round_up((N + 1) // 2, 8))
    N_pad = _round_up(N, TB)
    if N_pad != N:
        pooled = jnp.pad(pooled, ((0, 0), (0, N_pad - N), (0, 0)))

    # --- fold BN scales/shifts and the two spatial means into the weights ---
    scale0 = params["bn0_gamma"] / jnp.sqrt(params["bn0_var"] + 1e-3)
    shift0 = (params["bn0_beta"] - params["bn0_mean"] * scale0).reshape(1, 128)
    w0 = params["conv0_w"].reshape(128, Cin).T * (scale0[None, :] / float(k * k))
    w0 = w0.astype(jnp.bfloat16)                                      # (Cin, 128)

    scale1 = params["bn1_gamma"] / jnp.sqrt(params["bn1_var"] + 1e-3)
    shift1 = (params["bn1_beta"] - params["bn1_mean"] * scale1).reshape(1, 768)
    # (768,128,5,5) -> (kh,kw,cin,cout) -> (25,128,768), BN1 scale folded in.
    w1 = jnp.transpose(params["conv1_w"], (2, 3, 1, 0)).reshape(K1 * K1, 128, 768)
    w1 = (w1 * scale1).astype(jnp.bfloat16)

    C_pad = _round_up(num_classes, 128)
    fc_w = (params["fc_w"].T / float(S2)).astype(jnp.bfloat16)        # (768, nc)
    fc_w = jnp.pad(fc_w, ((0, 0), (0, C_pad - num_classes)))
    fc_b = jnp.pad(params["fc_b"].reshape(1, -1),
                   ((0, 0), (0, C_pad - num_classes))).astype(jnp.float32)

    kernel = functools.partial(_inception_aux_kernel, Hp=Hp, Wp=Wp, K1=K1)

    out = pl.pallas_call(
        kernel,
        out_shape=jax.ShapeDtypeStruct((N_pad, C_pad), jnp.float32),
        grid=(N_pad // TB,),
        in_specs=[
            pl.BlockSpec((S1, TB, Cin), lambda i: (0, i, 0)),         # per-tile
            pl.BlockSpec((Cin, 128), lambda i: (0, 0)),               # resident
            pl.BlockSpec((1, 128), lambda i: (0, 0)),                 # resident
            pl.BlockSpec((K1 * K1, 128, 768), lambda i: (0, 0, 0)),   # resident
            pl.BlockSpec((1, 768), lambda i: (0, 0)),                 # resident
            pl.BlockSpec((768, C_pad), lambda i: (0, 0)),             # resident
            pl.BlockSpec((1, C_pad), lambda i: (0, 0)),               # resident
        ],
        out_specs=pl.BlockSpec((TB, C_pad), lambda i: (i, 0)),
        compiler_params=pltpu.CompilerParams(
            dimension_semantics=("parallel",),
            vmem_limit_bytes=_VMEM_LIMIT,
        ),
    )(pooled, w0, shift0.astype(jnp.float32), w1, shift1.astype(jnp.float32),
      fc_w, fc_b)                                                     # (N_pad,C_pad)

    return out[:N, :num_classes]


# ---------------------------------------------------------------------------
# Deterministic parameter init (shapes follow InceptionAux.__init__)
# ---------------------------------------------------------------------------
def init_params(key, in_channels, num_classes):
    ks = jax.random.split(key, 12)
    p = {}
    p["conv0_w"] = 0.1 * jax.random.normal(ks[0], (128, in_channels, 1, 1), jnp.float32)
    p["bn0_gamma"] = 1.0 + 0.1 * jax.random.normal(ks[1], (128,), jnp.float32)
    p["bn0_beta"] = 0.1 * jax.random.normal(ks[2], (128,), jnp.float32)
    p["bn0_mean"] = 0.05 * jax.random.normal(ks[3], (128,), jnp.float32)
    p["bn0_var"] = jax.random.uniform(ks[4], (128,), jnp.float32, 0.5, 1.5)
    p["conv1_w"] = 0.01 * jax.random.normal(ks[5], (768, 128, 5, 5), jnp.float32)
    p["bn1_gamma"] = 1.0 + 0.1 * jax.random.normal(ks[6], (768,), jnp.float32)
    p["bn1_beta"] = 0.1 * jax.random.normal(ks[7], (768,), jnp.float32)
    p["bn1_mean"] = 0.05 * jax.random.normal(ks[8], (768,), jnp.float32)
    p["bn1_var"] = jax.random.uniform(ks[9], (768,), jnp.float32, 0.5, 1.5)
    p["fc_w"] = 0.001 * jax.random.normal(ks[10], (num_classes, 768), jnp.float32)
    p["fc_b"] = 0.001 * jax.random.normal(ks[11], (num_classes,), jnp.float32)
    return p


if __name__ == "__main__":
    key = jax.random.PRNGKey(0)
    kx, kp = jax.random.split(key)

    # Smallest valid spatial size: avg_pool(5,3) needs H>=17 so the 5x5 pooled
    # map feeds the 5x5 valid conv1 (-> 1x1), matching Inception-v3 usage.
    N, Cin, H, W = 2, 8, 17, 17
    num_classes = 10

    x = jax.random.normal(kx, (N, Cin, H, W), jnp.float32)
    params = init_params(kp, Cin, num_classes)

    fwd = jax.jit(functools.partial(inception_aux_forward, num_classes=num_classes))
    out = fwd(x, params)
    out = jax.block_until_ready(out)

    assert out.shape == (N, num_classes)
    assert bool(jnp.all(jnp.isfinite(out)))
    print("KERNEL_OK")
</pallas_src>

<mosaic_0001>
module attributes {stable_mosaic.version = 11 : i64} {
  func.func @_inception_aux_kernel(%arg0: i32, %arg1: memref<25x2x8xbf16, #tpu.memory_space<vmem>>, %arg2: memref<8x128xbf16, #tpu.memory_space<vmem>>, %arg3: memref<1x128xf32, #tpu.memory_space<vmem>>, %arg4: memref<25x128x768xbf16, #tpu.memory_space<vmem>>, %arg5: memref<1x768xf32, #tpu.memory_space<vmem>>, %arg6: memref<768x128xbf16, #tpu.memory_space<vmem>>, %arg7: memref<1x128xf32, #tpu.memory_space<vmem>>, %arg8: memref<2x128xf32, #tpu.memory_space<vmem>>) attributes {dimension_semantics = [#tpu.dimension_semantics<parallel>], iteration_bounds = array<i64: 1>, scalar_prefetch = 0 : i64, scratch_operands = 0 : i64, tpu.core_type = #tpu.core_type<tc>, window_params = [{transform_indices = @transform_0, window_bounds = array<i64: 25, 2, 8>}, {pipeline_mode = #tpu.pipeline_mode<synchronous>, transform_indices = @transform_1, window_bounds = array<i64: 8, 128>}, {pipeline_mode = #tpu.pipeline_mode<synchronous>, transform_indices = @transform_2, window_bounds = array<i64: 1, 128>}, {pipeline_mode = #tpu.pipeline_mode<synchronous>, transform_indices = @transform_3, window_bounds = array<i64: 25, 128, 768>}, {pipeline_mode = #tpu.pipeline_mode<synchronous>, transform_indices = @transform_4, window_bounds = array<i64: 1, 768>}, {pipeline_mode = #tpu.pipeline_mode<synchronous>, transform_indices = @transform_5, window_bounds = array<i64: 768, 128>}, {pipeline_mode = #tpu.pipeline_mode<synchronous>, transform_indices = @transform_6, window_bounds = array<i64: 1, 128>}, {transform_indices = @transform_7, window_bounds = array<i64: 2, 128>}]} {
    %c0 = arith.constant 0 : index
    %c0_0 = arith.constant 0 : index
    %0 = vector.load %arg2[%c0, %c0_0] : memref<8x128xbf16, #tpu.memory_space<vmem>>, vector<8x128xbf16>
    %c0_1 = arith.constant 0 : index
    %c0_2 = arith.constant 0 : index
    %1 = vector.load %arg3[%c0_1, %c0_2] : memref<1x128xf32, #tpu.memory_space<vmem>>, vector<1x128xf32>
    %c0_3 = arith.constant 0 : index
    %c0_4 = arith.constant 0 : index
    %2 = vector.load %arg5[%c0_3, %c0_4] : memref<1x768xf32, #tpu.memory_space<vmem>>, vector<1x768xf32>
    %c0_5 = arith.constant 0 : index
    %c0_6 = arith.constant 0 : index
    %c0_7 = arith.constant 0 : index
    %3 = vector.load %arg1[%c0_5, %c0_6, %c0_7] : memref<25x2x8xbf16, #tpu.memory_space<vmem>>, vector<1x2x8xbf16>
    %4 = vector.shape_cast %3 : vector<1x2x8xbf16> to vector<2x8xbf16>
    %cst = arith.constant dense<0.000000e+00> : vector<2x128xf32>
    %5 = tpu.matmul %4, %0, %cst {dimension_numbers = #tpu.dot_dimension_numbers<[1], [0], [0], [1], [0, 0, 1, 1], [], []>} : vector<2x8xbf16>, vector<8x128xbf16>, vector<2x128xf32> -> vector<2x128xf32>
    %6 = vector.broadcast %1 : vector<1x128xf32> to vector<2x128xf32>
    %7 = arith.addf %5, %6 : vector<2x128xf32>
    %cst_8 = arith.constant 0.000000e+00 : f32
    %8 = vector.broadcast %cst_8 : f32 to vector<2x128xf32>
    %9 = arith.maximumf %7, %8 : vector<2x128xf32>
    %10 = arith.truncf %9 : vector<2x128xf32> to vector<2x128xbf16>
    %c0_9 = arith.constant 0 : index
    %c0_10 = arith.constant 0 : index
    %c0_11 = arith.constant 0 : index
    %11 = vector.load %arg4[%c0_9, %c0_10, %c0_11] : memref<25x128x768xbf16, #tpu.memory_space<vmem>>, vector<1x128x768xbf16>
    %12 = vector.shape_cast %11 : vector<1x128x768xbf16> to vector<128x768xbf16>
    %cst_12 = arith.constant dense<0.000000e+00> : vector<2x768xf32>
    %13 = tpu.matmul %10, %12, %cst_12 {dimension_numbers = #tpu.dot_dimension_numbers<[1], [0], [0], [1], [0, 0, 1, 1], [], []>} : vector<2x128xbf16>, vector<128x768xbf16>, vector<2x768xf32> -> vector<2x768xf32>
    %c1 = arith.constant 1 : index
    %c0_13 = arith.constant 0 : index
    %c0_14 = arith.constant 0 : index
    %14 = vector.load %arg1[%c1, %c0_13, %c0_14] : memref<25x2x8xbf16, #tpu.memory_space<vmem>>, vector<1x2x8xbf16>
    %15 = vector.shape_cast %14 : vector<1x2x8xbf16> to vector<2x8xbf16>
    %cst_15 = arith.constant dense<0.000000e+00> : vector<2x128xf32>
    %16 = tpu.matmul %15, %0, %cst_15 {dimension_numbers = #tpu.dot_dimension_numbers<[1], [0], [0], [1], [0, 0, 1, 1], [], []>} : vector<2x8xbf16>, vector<8x128xbf16>, vector<2x128xf32> -> vector<2x128xf32>
    %17 = vector.broadcast %1 : vector<1x128xf32> to vector<2x128xf32>
    %18 = arith.addf %16, %17 : vector<2x128xf32>
    %cst_16 = arith.constant 0.000000e+00 : f32
    %19 = vector.broadcast %cst_16 : f32 to vector<2x128xf32>
    %20 = arith.maximumf %18, %19 : vector<2x128xf32>
    %21 = arith.truncf %20 : vector<2x128xf32> to vector<2x128xbf16>
    %c1_17 = arith.constant 1 : index
    %c0_18 = arith.constant 0 : index
    %c0_19 = arith.constant 0 : index
    %22 = vector.load %arg4[%c1_17, %c0_18, %c0_19] : memref<25x128x768xbf16, #tpu.memory_space<vmem>>, vector<1x128x768xbf16>
    %23 = vector.shape_cast %22 : vector<1x128x768xbf16> to vector<128x768xbf16>
    %cst_20 = arith.constant dense<0.000000e+00> : vector<2x768xf32>
    %24 = tpu.matmul %21, %23, %cst_20 {dimension_numbers = #tpu.dot_dimension_numbers<[1], [0], [0], [1], [0, 0, 1, 1], [], []>} : vector<2x128xbf16>, vector<128x768xbf16>, vector<2x768xf32> -> vector<2x768xf32>
    %25 = arith.addf %13, %24 : vector<2x768xf32>
    %c2 = arith.constant 2 : index
    %c0_21 = arith.constant 0 : index
    %c0_22 = arith.constant 0 : index
    %26 = vector.load %arg1[%c2, %c0_21, %c0_22] : memref<25x2x8xbf16, #tpu.memory_space<vmem>>, vector<1x2x8xbf16>
    %27 = vector.shape_cast %26 : vector<1x2x8xbf16> to vector<2x8xbf16>
    %cst_23 = arith.constant dense<0.000000e+00> : vector<2x128xf32>
    %28 = tpu.matmul %27, %0, %cst_23 {dimension_numbers = #tpu.dot_dimension_numbers<[1], [0], [0], [1], [0, 0, 1, 1], [], []>} : vector<2x8xbf16>, vector<8x128xbf16>, vector<2x128xf32> -> vector<2x128xf32>
    %29 = vector.broadcast %1 : vector<1x128xf32> to vector<2x128xf32>
    %30 = arith.addf %28, %29 : vector<2x128xf32>
    %cst_24 = arith.constant 0.000000e+00 : f32
    %31 = vector.broadcast %cst_24 : f32 to vector<2x128xf32>
    %32 = arith.maximumf %30, %31 : vector<2x128xf32>
    %33 = arith.truncf %32 : vector<2x128xf32> to vector<2x128xbf16>
    %c2_25 = arith.constant 2 : index
    %c0_26 = arith.constant 0 : index
    %c0_27 = arith.constant 0 : index
    %34 = vector.load %arg4[%c2_25, %c0_26, %c0_27] : memref<25x128x768xbf16, #tpu.memory_space<vmem>>, vector<1x128x768xbf16>
    %35 = vector.shape_cast %34 : vector<1x128x768xbf16> to vector<128x768xbf16>
    %cst_28 = arith.constant dense<0.000000e+00> : vector<2x768xf32>
    %36 = tpu.matmul %33, %35, %cst_28 {dimension_numbers = #tpu.dot_dimension_numbers<[1], [0], [0], [1], [0, 0, 1, 1], [], []>} : vector<2x128xbf16>, vector<128x768xbf16>, vector<2x768xf32> -> vector<2x768xf32>
    %37 = arith.addf %25, %36 : vector<2x768xf32>
    %c3 = arith.constant 3 : index
    %c0_29 = arith.constant 0 : index
    %c0_30 = arith.constant 0 : index
    %38 = vector.load %arg1[%c3, %c0_29, %c0_30] : memref<25x2x8xbf16, #tpu.memory_space<vmem>>, vector<1x2x8xbf16>
    %39 = vector.shape_cast %38 : vector<1x2x8xbf16> to vector<2x8xbf16>
    %cst_31 = arith.constant dense<0.000000e+00> : vector<2x128xf32>
    %40 = tpu.matmul %39, %0, %cst_31 {dimension_numbers = #tpu.dot_dimension_numbers<[1], [0], [0], [1], [0, 0, 1, 1], [], []>} : vector<2x8xbf16>, vector<8x128xbf16>, vector<2x128xf32> -> vector<2x128xf32>
    %41 = vector.broadcast %1 : vector<1x128xf32> to vector<2x128xf32>
    %42 = arith.addf %40, %41 : vector<2x128xf32>
    %cst_32 = arith.constant 0.000000e+00 : f32
    %43 = vector.broadcast %cst_32 : f32 to vector<2x128xf32>
    %44 = arith.maximumf %42, %43 : vector<2x128xf32>
    %45 = arith.truncf %44 : vector<2x128xf32> to vector<2x128xbf16>
    %c3_33 = arith.constant 3 : index
    %c0_34 = arith.constant 0 : index
    %c0_35 = arith.constant 0 : index
    %46 = vector.load %arg4[%c3_33, %c0_34, %c0_35] : memref<25x128x768xbf16, #tpu.memory_space<vmem>>, vector<1x128x768xbf16>
    %47 = vector.shape_cast %46 : vector<1x128x768xbf16> to vector<128x768xbf16>
    %cst_36 = arith.constant dense<0.000000e+00> : vector<2x768xf32>
    %48 = tpu.matmul %45, %47, %cst_36 {dimension_numbers = #tpu.dot_dimension_numbers<[1], [0], [0], [1], [0, 0, 1, 1], [], []>} : vector<2x128xbf16>, vector<128x768xbf16>, vector<2x768xf32> -> vector<2x768xf32>
    %49 = arith.addf %37, %48 : vector<2x768xf32>
    %c4 = arith.constant 4 : index
    %c0_37 = arith.constant 0 : index
    %c0_38 = arith.constant 0 : index
    %50 = vector.load %arg1[%c4, %c0_37, %c0_38] : memref<25x2x8xbf16, #tpu.memory_space<vmem>>, vector<1x2x8xbf16>
    %51 = vector.shape_cast %50 : vector<1x2x8xbf16> to vector<2x8xbf16>
    %cst_39 = arith.constant dense<0.000000e+00> : vector<2x128xf32>
    %52 = tpu.matmul %51, %0, %cst_39 {dimension_numbers = #tpu.dot_dimension_numbers<[1], [0], [0], [1], [0, 0, 1, 1], [], []>} : vector<2x8xbf16>, vector<8x128xbf16>, vector<2x128xf32> -> vector<2x128xf32>
    %53 = vector.broadcast %1 : vector<1x128xf32> to vector<2x128xf32>
    %54 = arith.addf %52, %53 : vector<2x128xf32>
    %cst_40 = arith.constant 0.000000e+00 : f32
    %55 = vector.broadcast %cst_40 : f32 to vector<2x128xf32>
    %56 = arith.maximumf %54, %55 : vector<2x128xf32>
    %57 = arith.truncf %56 : vector<2x128xf32> to vector<2x128xbf16>
    %c4_41 = arith.constant 4 : index
    %c0_42 = arith.constant 0 : index
    %c0_43 = arith.constant 0 : index
    %58 = vector.load %arg4[%c4_41, %c0_42, %c0_43] : memref<25x128x768xbf16, #tpu.memory_space<vmem>>, vector<1x128x768xbf16>
    %59 = vector.shape_cast %58 : vector<1x128x768xbf16> to vector<128x768xbf16>
    %cst_44 = arith.constant dense<0.000000e+00> : vector<2x768xf32>
    %60 = tpu.matmul %57, %59, %cst_44 {dimension_numbers = #tpu.dot_dimension_numbers<[1], [0], [0], [1], [0, 0, 1, 1], [], []>} : vector<2x128xbf16>, vector<128x768xbf16>, vector<2x768xf32> -> vector<2x768xf32>
    %61 = arith.addf %49, %60 : vector<2x768xf32>
    %c5 = arith.constant 5 : index
    %c0_45 = arith.constant 0 : index
    %c0_46 = arith.constant 0 : index
    %62 = vector.load %arg1[%c5, %c0_45, %c0_46] : memref<25x2x8xbf16, #tpu.memory_space<vmem>>, vector<1x2x8xbf16>
    %63 = vector.shape_cast %62 : vector<1x2x8xbf16> to vector<2x8xbf16>
    %cst_47 = arith.constant dense<0.000000e+00> : vector<2x128xf32>
    %64 = tpu.matmul %63, %0, %cst_47 {dimension_numbers = #tpu.dot_dimension_numbers<[1], [0], [0], [1], [0, 0, 1, 1], [], []>} : vector<2x8xbf16>, vector<8x128xbf16>, vector<2x128xf32> -> vector<2x128xf32>
    %65 = vector.broadcast %1 : vector<1x128xf32> to vector<2x128xf32>
    %66 = arith.addf %64, %65 : vector<2x128xf32>
    %cst_48 = arith.constant 0.000000e+00 : f32
    %67 = vector.broadcast %cst_48 : f32 to vector<2x128xf32>
    %68 = arith.maximumf %66, %67 : vector<2x128xf32>
    %69 = arith.truncf %68 : vector<2x128xf32> to vector<2x128xbf16>
    %c5_49 = arith.constant 5 : index
    %c0_50 = arith.constant 0 : index
    %c0_51 = arith.constant 0 : index
    %70 = vector.load %arg4[%c5_49, %c0_50, %c0_51] : memref<25x128x768xbf16, #tpu.memory_space<vmem>>, vector<1x128x768xbf16>
    %71 = vector.shape_cast %70 : vector<1x128x768xbf16> to vector<128x768xbf16>
    %cst_52 = arith.constant dense<0.000000e+00> : vector<2x768xf32>
    %72 = tpu.matmul %69, %71, %cst_52 {dimension_numbers = #tpu.dot_dimension_numbers<[1], [0], [0], [1], [0, 0, 1, 1], [], []>} : vector<2x128xbf16>, vector<128x768xbf16>, vector<2x768xf32> -> vector<2x768xf32>
    %73 = arith.addf %61, %72 : vector<2x768xf32>
    %c6 = arith.constant 6 : index
    %c0_53 = arith.constant 0 : index
    %c0_54 = arith.constant 0 : index
    %74 = vector.load %arg1[%c6, %c0_53, %c0_54] : memref<25x2x8xbf16, #tpu.memory_space<vmem>>, vector<1x2x8xbf16>
    %75 = vector.shape_cast %74 : vector<1x2x8xbf16> to vector<2x8xbf16>
    %cst_55 = arith.constant dense<0.000000e+00> : vector<2x128xf32>
    %76 = tpu.matmul %75, %0, %cst_55 {dimension_numbers = #tpu.dot_dimension_numbers<[1], [0], [0], [1], [0, 0, 1, 1], [], []>} : vector<2x8xbf16>, vector<8x128xbf16>, vector<2x128xf32> -> vector<2x128xf32>
    %77 = vector.broadcast %1 : vector<1x128xf32> to vector<2x128xf32>
    %78 = arith.addf %76, %77 : vector<2x128xf32>
    %cst_56 = arith.constant 0.000000e+00 : f32
    %79 = vector.broadcast %cst_56 : f32 to vector<2x128xf32>
    %80 = arith.maximumf %78, %79 : vector<2x128xf32>
    %81 = arith.truncf %80 : vector<2x128xf32> to vector<2x128xbf16>
    %c6_57 = arith.constant 6 : index
    %c0_58 = arith.constant 0 : index
    %c0_59 = arith.constant 0 : index
    %82 = vector.load %arg4[%c6_57, %c0_58, %c0_59] : memref<25x128x768xbf16, #tpu.memory_space<vmem>>, vector<1x128x768xbf16>
    %83 = vector.shape_cast %82 : vector<1x128x768xbf16> to vector<128x768xbf16>
    %cst_60 = arith.constant dense<0.000000e+00> : vector<2x768xf32>
    %84 = tpu.matmul %81, %83, %cst_60 {dimension_numbers = #tpu.dot_dimension_numbers<[1], [0], [0], [1], [0, 0, 1, 1], [], []>} : vector<2x128xbf16>, vector<128x768xbf16>, vector<2x768xf32> -> vector<2x768xf32>
    %85 = arith.addf %73, %84 : vector<2x768xf32>
    %c7 = arith.constant 7 : index
    %c0_61 = arith.constant 0 : index
    %c0_62 = arith.constant 0 : index
    %86 = vector.load %arg1[%c7, %c0_61, %c0_62] : memref<25x2x8xbf16, #tpu.memory_space<vmem>>, vector<1x2x8xbf16>
    %87 = vector.shape_cast %86 : vector<1x2x8xbf16> to vector<2x8xbf16>
    %cst_63 = arith.constant dense<0.000000e+00> : vector<2x128xf32>
    %88 = tpu.matmul %87, %0, %cst_63 {dimension_numbers = #tpu.dot_dimension_numbers<[1], [0], [0], [1], [0, 0, 1, 1], [], []>} : vector<2x8xbf16>, vector<8x128xbf16>, vector<2x128xf32> -> vector<2x128xf32>
    %89 = vector.broadcast %1 : vector<1x128xf32> to vector<2x128xf32>
    %90 = arith.addf %88, %89 : vector<2x128xf32>
    %cst_64 = arith.constant 0.000000e+00 : f32
    %91 = vector.broadcast %cst_64 : f32 to vector<2x128xf32>
    %92 = arith.maximumf %90, %91 : vector<2x128xf32>
    %93 = arith.truncf %92 : vector<2x128xf32> to vector<2x128xbf16>
    %c7_65 = arith.constant 7 : index
    %c0_66 = arith.constant 0 : index
    %c0_67 = arith.constant 0 : index
    %94 = vector.load %arg4[%c7_65, %c0_66, %c0_67] : memref<25x128x768xbf16, #tpu.memory_space<vmem>>, vector<1x128x768xbf16>
    %95 = vector.shape_cast %94 : vector<1x128x768xbf16> to vector<128x768xbf16>
    %cst_68 = arith.constant dense<0.000000e+00> : vector<2x768xf32>
    %96 = tpu.matmul %93, %95, %cst_68 {dimension_numbers = #tpu.dot_dimension_numbers<[1], [0], [0], [1], [0, 0, 1, 1], [], []>} : vector<2x128xbf16>, vector<128x768xbf16>, vector<2x768xf32> -> vector<2x768xf32>
    %97 = arith.addf %85, %96 : vector<2x768xf32>
    %c8 = arith.constant 8 : index
    %c0_69 = arith.constant 0 : index
    %c0_70 = arith.constant 0 : index
    %98 = vector.load %arg1[%c8, %c0_69, %c0_70] : memref<25x2x8xbf16, #tpu.memory_space<vmem>>, vector<1x2x8xbf16>
    %99 = vector.shape_cast %98 : vector<1x2x8xbf16> to vector<2x8xbf16>
    %cst_71 = arith.constant dense<0.000000e+00> : vector<2x128xf32>
    %100 = tpu.matmul %99, %0, %cst_71 {dimension_numbers = #tpu.dot_dimension_numbers<[1], [0], [0], [1], [0, 0, 1, 1], [], []>} : vector<2x8xbf16>, vector<8x128xbf16>, vector<2x128xf32> -> vector<2x128xf32>
    %101 = vector.broadcast %1 : vector<1x128xf32> to vector<2x128xf32>
    %102 = arith.addf %100, %101 : vector<2x128xf32>
    %cst_72 = arith.constant 0.000000e+00 : f32
    %103 = vector.broadcast %cst_72 : f32 to vector<2x128xf32>
    %104 = arith.maximumf %102, %103 : vector<2x128xf32>
    %105 = arith.truncf %104 : vector<2x128xf32> to vector<2x128xbf16>
    %c8_73 = arith.constant 8 : index
    %c0_74 = arith.constant 0 : index
    %c0_75 = arith.constant 0 : index
    %106 = vector.load %arg4[%c8_73, %c0_74, %c0_75] : memref<25x128x768xbf16, #tpu.memory_space<vmem>>, vector<1x128x768xbf16>
    %107 = vector.shape_cast %106 : vector<1x128x768xbf16> to vector<128x768xbf16>
    %cst_76 = arith.constant dense<0.000000e+00> : vector<2x768xf32>
    %108 = tpu.matmul %105, %107, %cst_76 {dimension_numbers = #tpu.dot_dimension_numbers<[1], [0], [0], [1], [0, 0, 1, 1], [], []>} : vector<2x128xbf16>, vector<128x768xbf16>, vector<2x768xf32> -> vector<2x768xf32>
    %109 = arith.addf %97, %108 : vector<2x768xf32>
    %c9 = arith.constant 9 : index
    %c0_77 = arith.constant 0 : index
    %c0_78 = arith.constant 0 : index
    %110 = vector.load %arg1[%c9, %c0_77, %c0_78] : memref<25x2x8xbf16, #tpu.memory_space<vmem>>, vector<1x2x8xbf16>
    %111 = vector.shape_cast %110 : vector<1x2x8xbf16> to vector<2x8xbf16>
    %cst_79 = arith.constant dense<0.000000e+00> : vector<2x128xf32>
    %112 = tpu.matmul %111, %0, %cst_79 {dimension_numbers = #tpu.dot_dimension_numbers<[1], [0], [0], [1], [0, 0, 1, 1], [], []>} : vector<2x8xbf16>, vector<8x128xbf16>, vector<2x128xf32> -> vector<2x128xf32>
    %113 = vector.broadcast %1 : vector<1x128xf32> to vector<2x128xf32>
    %114 = arith.addf %112, %113 : vector<2x128xf32>
    %cst_80 = arith.constant 0.000000e+00 : f32
    %115 = vector.broadcast %cst_80 : f32 to vector<2x128xf32>
    %116 = arith.maximumf %114, %115 : vector<2x128xf32>
    %117 = arith.truncf %116 : vector<2x128xf32> to vector<2x128xbf16>
    %c9_81 = arith.constant 9 : index
    %c0_82 = arith.constant 0 : index
    %c0_83 = arith.constant 0 : index
    %118 = vector.load %arg4[%c9_81, %c0_82, %c0_83] : memref<25x128x768xbf16, #tpu.memory_space<vmem>>, vector<1x128x768xbf16>
    %119 = vector.shape_cast %118 : vector<1x128x768xbf16> to vector<128x768xbf16>
    %cst_84 = arith.constant dense<0.000000e+00> : vector<2x768xf32>
    %120 = tpu.matmul %117, %119, %cst_84 {dimension_numbers = #tpu.dot_dimension_numbers<[1], [0], [0], [1], [0, 0, 1, 1], [], []>} : vector<2x128xbf16>, vector<128x768xbf16>, vector<2x768xf32> -> vector<2x768xf32>
    %121 = arith.addf %109, %120 : vector<2x768xf32>
    %c10 = arith.constant 10 : index
    %c0_85 = arith.constant 0 : index
    %c0_86 = arith.constant 0 : index
    %122 = vector.load %arg1[%c10, %c0_85, %c0_86] : memref<25x2x8xbf16, #tpu.memory_space<vmem>>, vector<1x2x8xbf16>
    %123 = vector.shape_cast %122 : vector<1x2x8xbf16> to vector<2x8xbf16>
    %cst_87 = arith.constant dense<0.000000e+00> : vector<2x128xf32>
    %124 = tpu.matmul %123, %0, %cst_87 {dimension_numbers = #tpu.dot_dimension_numbers<[1], [0], [0], [1], [0, 0, 1, 1], [], []>} : vector<2x8xbf16>, vector<8x128xbf16>, vector<2x128xf32> -> vector<2x128xf32>
    %125 = vector.broadcast %1 : vector<1x128xf32> to vector<2x128xf32>
    %126 = arith.addf %124, %125 : vector<2x128xf32>
    %cst_88 = arith.constant 0.000000e+00 : f32
    %127 = vector.broadcast %cst_88 : f32 to vector<2x128xf32>
    %128 = arith.maximumf %126, %127 : vector<2x128xf32>
    %129 = arith.truncf %128 : vector<2x128xf32> to vector<2x128xbf16>
    %c10_89 = arith.constant 10 : index
    %c0_90 = arith.constant 0 : index
    %c0_91 = arith.constant 0 : index
    %130 = vector.load %arg4[%c10_89, %c0_90, %c0_91] : memref<25x128x768xbf16, #tpu.memory_space<vmem>>, vector<1x128x768xbf16>
    %131 = vector.shape_cast %130 : vector<1x128x768xbf16> to vector<128x768xbf16>
    %cst_92 = arith.constant dense<0.000000e+00> : vector<2x768xf32>
    %132 = tpu.matmul %129, %131, %cst_92 {dimension_numbers = #tpu.dot_dimension_numbers<[1], [0], [0], [1], [0, 0, 1, 1], [], []>} : vector<2x128xbf16>, vector<128x768xbf16>, vector<2x768xf32> -> vector<2x768xf32>
    %133 = arith.addf %121, %132 : vector<2x768xf32>
    %c11 = arith.constant 11 : index
    %c0_93 = arith.constant 0 : index
    %c0_94 = arith.constant 0 : index
    %134 = vector.load %arg1[%c11, %c0_93, %c0_94] : memref<25x2x8xbf16, #tpu.memory_space<vmem>>, vector<1x2x8xbf16>
    %135 = vector.shape_cast %134 : vector<1x2x8xbf16> to vector<2x8xbf16>
    %cst_95 = arith.constant dense<0.000000e+00> : vector<2x128xf32>
    %136 = tpu.matmul %135, %0, %cst_95 {dimension_numbers = #tpu.dot_dimension_numbers<[1], [0], [0], [1], [0, 0, 1, 1], [], []>} : vector<2x8xbf16>, vector<8x128xbf16>, vector<2x128xf32> -> vector<2x128xf32>
    %137 = vector.broadcast %1 : vector<1x128xf32> to vector<2x128xf32>
    %138 = arith.addf %136, %137 : vector<2x128xf32>
    %cst_96 = arith.constant 0.000000e+00 : f32
    %139 = vector.broadcast %cst_96 : f32 to vector<2x128xf32>
    %140 = arith.maximumf %138, %139 : vector<2x128xf32>
    %141 = arith.truncf %140 : vector<2x128xf32> to vector<2x128xbf16>
    %c11_97 = arith.constant 11 : index
    %c0_98 = arith.constant 0 : index
    %c0_99 = arith.constant 0 : index
    %142 = vector.load %arg4[%c11_97, %c0_98, %c0_99] : memref<25x128x768xbf16, #tpu.memory_space<vmem>>, vector<1x128x768xbf16>
    %143 = vector.shape_cast %142 : vector<1x128x768xbf16> to vector<128x768xbf16>
    %cst_100 = arith.constant dense<0.000000e+00> : vector<2x768xf32>
    %144 = tpu.matmul %141, %143, %cst_100 {dimension_numbers = #tpu.dot_dimension_numbers<[1], [0], [0], [1], [0, 0, 1, 1], [], []>} : vector<2x128xbf16>, vector<128x768xbf16>, vector<2x768xf32> -> vector<2x768xf32>
    %145 = arith.addf %133, %144 : vector<2x768xf32>
    %c12 = arith.constant 12 : index
    %c0_101 = arith.constant 0 : index
    %c0_102 = arith.constant 0 : index
    %146 = vector.load %arg1[%c12, %c0_101, %c0_102] : memref<25x2x8xbf16, #tpu.memory_space<vmem>>, vector<1x2x8xbf16>
    %147 = vector.shape_cast %146 : vector<1x2x8xbf16> to vector<2x8xbf16>
    %cst_103 = arith.constant dense<0.000000e+00> : vector<2x128xf32>
    %148 = tpu.matmul %147, %0, %cst_103 {dimension_numbers = #tpu.dot_dimension_numbers<[1], [0], [0], [1], [0, 0, 1, 1], [], []>} : vector<2x8xbf16>, vector<8x128xbf16>, vector<2x128xf32> -> vector<2x128xf32>
    %149 = vector.broadcast %1 : vector<1x128xf32> to vector<2x128xf32>
    %150 = arith.addf %148, %149 : vector<2x128xf32>
    %cst_104 = arith.constant 0.000000e+00 : f32
    %151 = vector.broadcast %cst_104 : f32 to vector<2x128xf32>
    %152 = arith.maximumf %150, %151 : vector<2x128xf32>
    %153 = arith.truncf %152 : vector<2x128xf32> to vector<2x128xbf16>
    %c12_105 = arith.constant 12 : index
    %c0_106 = arith.constant 0 : index
    %c0_107 = arith.constant 0 : index
    %154 = vector.load %arg4[%c12_105, %c0_106, %c0_107] : memref<25x128x768xbf16, #tpu.memory_space<vmem>>, vector<1x128x768xbf16>
    %155 = vector.shape_cast %154 : vector<1x128x768xbf16> to vector<128x768xbf16>
    %cst_108 = arith.constant dense<0.000000e+00> : vector<2x768xf32>
    %156 = tpu.matmul %153, %155, %cst_108 {dimension_numbers = #tpu.dot_dimension_numbers<[1], [0], [0], [1], [0, 0, 1, 1], [], []>} : vector<2x128xbf16>, vector<128x768xbf16>, vector<2x768xf32> -> vector<2x768xf32>
    %157 = arith.addf %145, %156 : vector<2x768xf32>
    %c13 = arith.constant 13 : index
    %c0_109 = arith.constant 0 : index
    %c0_110 = arith.constant 0 : index
    %158 = vector.load %arg1[%c13, %c0_109, %c0_110] : memref<25x2x8xbf16, #tpu.memory_space<vmem>>, vector<1x2x8xbf16>
    %159 = vector.shape_cast %158 : vector<1x2x8xbf16> to vector<2x8xbf16>
    %cst_111 = arith.constant dense<0.000000e+00> : vector<2x128xf32>
    %160 = tpu.matmul %159, %0, %cst_111 {dimension_numbers = #tpu.dot_dimension_numbers<[1], [0], [0], [1], [0, 0, 1, 1], [], []>} : vector<2x8xbf16>, vector<8x128xbf16>, vector<2x128xf32> -> vector<2x128xf32>
    %161 = vector.broadcast %1 : vector<1x128xf32> to vector<2x128xf32>
    %162 = arith.addf %160, %161 : vector<2x128xf32>
    %cst_112 = arith.constant 0.000000e+00 : f32
    %163 = vector.broadcast %cst_112 : f32 to vector<2x128xf32>
    %164 = arith.maximumf %162, %163 : vector<2x128xf32>
    %165 = arith.truncf %164 : vector<2x128xf32> to vector<2x128xbf16>
    %c13_113 = arith.constant 13 : index
    %c0_114 = arith.constant 0 : index
    %c0_115 = arith.constant 0 : index
    %166 = vector.load %arg4[%c13_113, %c0_114, %c0_115] : memref<25x128x768xbf16, #tpu.memory_space<vmem>>, vector<1x128x768xbf16>
    %167 = vector.shape_cast %166 : vector<1x128x768xbf16> to vector<128x768xbf16>
    %cst_116 = arith.constant dense<0.000000e+00> : vector<2x768xf32>
    %168 = tpu.matmul %165, %167, %cst_116 {dimension_numbers = #tpu.dot_dimension_numbers<[1], [0], [0], [1], [0, 0, 1, 1], [], []>} : vector<2x128xbf16>, vector<128x768xbf16>, vector<2x768xf32> -> vector<2x768xf32>
    %169 = arith.addf %157, %168 : vector<2x768xf32>
    %c14 = arith.constant 14 : index
    %c0_117 = arith.constant 0 : index
    %c0_118 = arith.constant 0 : index
    %170 = vector.load %arg1[%c14, %c0_117, %c0_118] : memref<25x2x8xbf16, #tpu.memory_space<vmem>>, vector<1x2x8xbf16>
    %171 = vector.shape_cast %170 : vector<1x2x8xbf16> to vector<2x8xbf16>
    %cst_119 = arith.constant dense<0.000000e+00> : vector<2x128xf32>
    %172 = tpu.matmul %171, %0, %cst_119 {dimension_numbers = #tpu.dot_dimension_numbers<[1], [0], [0], [1], [0, 0, 1, 1], [], []>} : vector<2x8xbf16>, vector<8x128xbf16>, vector<2x128xf32> -> vector<2x128xf32>
    %173 = vector.broadcast %1 : vector<1x128xf32> to vector<2x128xf32>
    %174 = arith.addf %172, %173 : vector<2x128xf32>
    %cst_120 = arith.constant 0.000000e+00 : f32
    %175 = vector.broadcast %cst_120 : f32 to vector<2x128xf32>
    %176 = arith.maximumf %174, %175 : vector<2x128xf32>
    %177 = arith.truncf %176 : vector<2x128xf32> to vector<2x128xbf16>
    %c14_121 = arith.constant 14 : index
    %c0_122 = arith.constant 0 : index
    %c0_123 = arith.constant 0 : index
    %178 = vector.load %arg4[%c14_121, %c0_122, %c0_123] : memref<25x128x768xbf16, #tpu.memory_space<vmem>>, vector<1x128x768xbf16>
    %179 = vector.shape_cast %178 : vector<1x128x768xbf16> to vector<128x768xbf16>
    %cst_124 = arith.constant dense<0.000000e+00> : vector<2x768xf32>
    %180 = tpu.matmul %177, %179, %cst_124 {dimension_numbers = #tpu.dot_dimension_numbers<[1], [0], [0], [1], [0, 0, 1, 1], [], []>} : vector<2x128xbf16>, vector<128x768xbf16>, vector<2x768xf32> -> vector<2x768xf32>
    %181 = arith.addf %169, %180 : vector<2x768xf32>
    %c15 = arith.constant 15 : index
    %c0_125 = arith.constant 0 : index
    %c0_126 = arith.constant 0 : index
    %182 = vector.load %arg1[%c15, %c0_125, %c0_126] : memref<25x2x8xbf16, #tpu.memory_space<vmem>>, vector<1x2x8xbf16>
    %183 = vector.shape_cast %182 : vector<1x2x8xbf16> to vector<2x8xbf16>
    %cst_127 = arith.constant dense<0.000000e+00> : vector<2x128xf32>
    %184 = tpu.matmul %183, %0, %cst_127 {dimension_numbers = #tpu.dot_dimension_numbers<[1], [0], [0], [1], [0, 0, 1, 1], [], []>} : vector<2x8xbf16>, vector<8x128xbf16>, vector<2x128xf32> -> vector<2x128xf32>
    %185 = vector.broadcast %1 : vector<1x128xf32> to vector<2x128xf32>
    %186 = arith.addf %184, %185 : vector<2x128xf32>
    %cst_128 = arith.constant 0.000000e+00 : f32
    %187 = vector.broadcast %cst_128 : f32 to vector<2x128xf32>
    %188 = arith.maximumf %186, %187 : vector<2x128xf32>
    %189 = arith.truncf %188 : vector<2x128xf32> to vector<2x128xbf16>
    %c15_129 = arith.constant 15 : index
    %c0_130 = arith.constant 0 : index
    %c0_131 = arith.constant 0 : index
    %190 = vector.load %arg4[%c15_129, %c0_130, %c0_131] : memref<25x128x768xbf16, #tpu.memory_space<vmem>>, vector<1x128x768xbf16>
    %191 = vector.shape_cast %190 : vector<1x128x768xbf16> to vector<128x768xbf16>
    %cst_132 = arith.constant dense<0.000000e+00> : vector<2x768xf32>
    %192 = tpu.matmul %189, %191, %cst_132 {dimension_numbers = #tpu.dot_dimension_numbers<[1], [0], [0], [1], [0, 0, 1, 1], [], []>} : vector<2x128xbf16>, vector<128x768xbf16>, vector<2x768xf32> -> vector<2x768xf32>
    %193 = arith.addf %181, %192 : vector<2x768xf32>
    %c16 = arith.constant 16 : index
    %c0_133 = arith.constant 0 : index
    %c0_134 = arith.constant 0 : index
    %194 = vector.load %arg1[%c16, %c0_133, %c0_134] : memref<25x2x8xbf16, #tpu.memory_space<vmem>>, vector<1x2x8xbf16>
    %195 = vector.shape_cast %194 : vector<1x2x8xbf16> to vector<2x8xbf16>
    %cst_135 = arith.constant dense<0.000000e+00> : vector<2x128xf32>
    %196 = tpu.matmul %195, %0, %cst_135 {dimension_numbers = #tpu.dot_dimension_numbers<[1], [0], [0], [1], [0, 0, 1, 1], [], []>} : vector<2x8xbf16>, vector<8x128xbf16>, vector<2x128xf32> -> vector<2x128xf32>
    %197 = vector.broadcast %1 : vector<1x128xf32> to vector<2x128xf32>
    %198 = arith.addf %196, %197 : vector<2x128xf32>
    %cst_136 = arith.constant 0.000000e+00 : f32
    %199 = vector.broadcast %cst_136 : f32 to vector<2x128xf32>
    %200 = arith.maximumf %198, %199 : vector<2x128xf32>
    %201 = arith.truncf %200 : vector<2x128xf32> to vector<2x128xbf16>
    %c16_137 = arith.constant 16 : index
    %c0_138 = arith.constant 0 : index
    %c0_139 = arith.constant 0 : index
    %202 = vector.load %arg4[%c16_137, %c0_138, %c0_139] : memref<25x128x768xbf16, #tpu.memory_space<vmem>>, vector<1x128x768xbf16>
    %203 = vector.shape_cast %202 : vector<1x128x768xbf16> to vector<128x768xbf16>
    %cst_140 = arith.constant dense<0.000000e+00> : vector<2x768xf32>
    %204 = tpu.matmul %201, %203, %cst_140 {dimension_numbers = #tpu.dot_dimension_numbers<[1], [0], [0], [1], [0, 0, 1, 1], [], []>} : vector<2x128xbf16>, vector<128x768xbf16>, vector<2x768xf32> -> vector<2x768xf32>
    %205 = arith.addf %193, %204 : vector<2x768xf32>
    %c17 = arith.constant 17 : index
    %c0_141 = arith.constant 0 : index
    %c0_142 = arith.constant 0 : index
    %206 = vector.load %arg1[%c17, %c0_141, %c0_142] : memref<25x2x8xbf16, #tpu.memory_space<vmem>>, vector<1x2x8xbf16>
    %207 = vector.shape_cast %206 : vector<1x2x8xbf16> to vector<2x8xbf16>
    %cst_143 = arith.constant dense<0.000000e+00> : vector<2x128xf32>
    %208 = tpu.matmul %207, %0, %cst_143 {dimension_numbers = #tpu.dot_dimension_numbers<[1], [0], [0], [1], [0, 0, 1, 1], [], []>} : vector<2x8xbf16>, vector<8x128xbf16>, vector<2x128xf32> -> vector<2x128xf32>
    %209 = vector.broadcast %1 : vector<1x128xf32> to vector<2x128xf32>
    %210 = arith.addf %208, %209 : vector<2x128xf32>
    %cst_144 = arith.constant 0.000000e+00 : f32
    %211 = vector.broadcast %cst_144 : f32 to vector<2x128xf32>
    %212 = arith.maximumf %210, %211 : vector<2x128xf32>
    %213 = arith.truncf %212 : vector<2x128xf32> to vector<2x128xbf16>
    %c17_145 = arith.constant 17 : index
    %c0_146 = arith.constant 0 : index
    %c0_147 = arith.constant 0 : index
    %214 = vector.load %arg4[%c17_145, %c0_146, %c0_147] : memref<25x128x768xbf16, #tpu.memory_space<vmem>>, vector<1x128x768xbf16>
    %215 = vector.shape_cast %214 : vector<1x128x768xbf16> to vector<128x768xbf16>
    %cst_148 = arith.constant dense<0.000000e+00> : vector<2x768xf32>
    %216 = tpu.matmul %213, %215, %cst_148 {dimension_numbers = #tpu.dot_dimension_numbers<[1], [0], [0], [1], [0, 0, 1, 1], [], []>} : vector<2x128xbf16>, vector<128x768xbf16>, vector<2x768xf32> -> vector<2x768xf32>
    %217 = arith.addf %205, %216 : vector<2x768xf32>
    %c18 = arith.constant 18 : index
    %c0_149 = arith.constant 0 : index
    %c0_150 = arith.constant 0 : index
    %218 = vector.load %arg1[%c18, %c0_149, %c0_150] : memref<25x2x8xbf16, #tpu.memory_space<vmem>>, vector<1x2x8xbf16>
    %219 = vector.shape_cast %218 : vector<1x2x8xbf16> to vector<2x8xbf16>
    %cst_151 = arith.constant dense<0.000000e+00> : vector<2x128xf32>
    %220 = tpu.matmul %219, %0, %cst_151 {dimension_numbers = #tpu.dot_dimension_numbers<[1], [0], [0], [1], [0, 0, 1, 1], [], []>} : vector<2x8xbf16>, vector<8x128xbf16>, vector<2x128xf32> -> vector<2x128xf32>
    %221 = vector.broadcast %1 : vector<1x128xf32> to vector<2x128xf32>
    %222 = arith.addf %220, %221 : vector<2x128xf32>
    %cst_152 = arith.constant 0.000000e+00 : f32
    %223 = vector.broadcast %cst_152 : f32 to vector<2x128xf32>
    %224 = arith.maximumf %222, %223 : vector<2x128xf32>
    %225 = arith.truncf %224 : vector<2x128xf32> to vector<2x128xbf16>
    %c18_153 = arith.constant 18 : index
    %c0_154 = arith.constant 0 : index
    %c0_155 = arith.constant 0 : index
    %226 = vector.load %arg4[%c18_153, %c0_154, %c0_155] : memref<25x128x768xbf16, #tpu.memory_space<vmem>>, vector<1x128x768xbf16>
    %227 = vector.shape_cast %226 : vector<1x128x768xbf16> to vector<128x768xbf16>
    %cst_156 = arith.constant dense<0.000000e+00> : vector<2x768xf32>
    %228 = tpu.matmul %225, %227, %cst_156 {dimension_numbers = #tpu.dot_dimension_numbers<[1], [0], [0], [1], [0, 0, 1, 1], [], []>} : vector<2x128xbf16>, vector<128x768xbf16>, vector<2x768xf32> -> vector<2x768xf32>
    %229 = arith.addf %217, %228 : vector<2x768xf32>
    %c19 = arith.constant 19 : index
    %c0_157 = arith.constant 0 : index
    %c0_158 = arith.constant 0 : index
    %230 = vector.load %arg1[%c19, %c0_157, %c0_158] : memref<25x2x8xbf16, #tpu.memory_space<vmem>>, vector<1x2x8xbf16>
    %231 = vector.shape_cast %230 : vector<1x2x8xbf16> to vector<2x8xbf16>
    %cst_159 = arith.constant dense<0.000000e+00> : vector<2x128xf32>
    %232 = tpu.matmul %231, %0, %cst_159 {dimension_numbers = #tpu.dot_dimension_numbers<[1], [0], [0], [1], [0, 0, 1, 1], [], []>} : vector<2x8xbf16>, vector<8x128xbf16>, vector<2x128xf32> -> vector<2x128xf32>
    %233 = vector.broadcast %1 : vector<1x128xf32> to vector<2x128xf32>
    %234 = arith.addf %232, %233 : vector<2x128xf32>
    %cst_160 = arith.constant 0.000000e+00 : f32
    %235 = vector.broadcast %cst_160 : f32 to vector<2x128xf32>
    %236 = arith.maximumf %234, %235 : vector<2x128xf32>
    %237 = arith.truncf %236 : vector<2x128xf32> to vector<2x128xbf16>
    %c19_161 = arith.constant 19 : index
    %c0_162 = arith.constant 0 : index
    %c0_163 = arith.constant 0 : index
    %238 = vector.load %arg4[%c19_161, %c0_162, %c0_163] : memref<25x128x768xbf16, #tpu.memory_space<vmem>>, vector<1x128x768xbf16>
    %239 = vector.shape_cast %238 : vector<1x128x768xbf16> to vector<128x768xbf16>
    %cst_164 = arith.constant dense<0.000000e+00> : vector<2x768xf32>
    %240 = tpu.matmul %237, %239, %cst_164 {dimension_numbers = #tpu.dot_dimension_numbers<[1], [0], [0], [1], [0, 0, 1, 1], [], []>} : vector<2x128xbf16>, vector<128x768xbf16>, vector<2x768xf32> -> vector<2x768xf32>
    %241 = arith.addf %229, %240 : vector<2x768xf32>
    %c20 = arith.constant 20 : index
    %c0_165 = arith.constant 0 : index
    %c0_166 = arith.constant 0 : index
    %242 = vector.load %arg1[%c20, %c0_165, %c0_166] : memref<25x2x8xbf16, #tpu.memory_space<vmem>>, vector<1x2x8xbf16>
    %243 = vector.shape_cast %242 : vector<1x2x8xbf16> to vector<2x8xbf16>
    %cst_167 = arith.constant dense<0.000000e+00> : vector<2x128xf32>
    %244 = tpu.matmul %243, %0, %cst_167 {dimension_numbers = #tpu.dot_dimension_numbers<[1], [0], [0], [1], [0, 0, 1, 1], [], []>} : vector<2x8xbf16>, vector<8x128xbf16>, vector<2x128xf32> -> vector<2x128xf32>
    %245 = vector.broadcast %1 : vector<1x128xf32> to vector<2x128xf32>
    %246 = arith.addf %244, %245 : vector<2x128xf32>
    %cst_168 = arith.constant 0.000000e+00 : f32
    %247 = vector.broadcast %cst_168 : f32 to vector<2x128xf32>
    %248 = arith.maximumf %246, %247 : vector<2x128xf32>
    %249 = arith.truncf %248 : vector<2x128xf32> to vector<2x128xbf16>
    %c20_169 = arith.constant 20 : index
    %c0_170 = arith.constant 0 : index
    %c0_171 = arith.constant 0 : index
    %250 = vector.load %arg4[%c20_169, %c0_170, %c0_171] : memref<25x128x768xbf16, #tpu.memory_space<vmem>>, vector<1x128x768xbf16>
    %251 = vector.shape_cast %250 : vector<1x128x768xbf16> to vector<128x768xbf16>
    %cst_172 = arith.constant dense<0.000000e+00> : vector<2x768xf32>
    %252 = tpu.matmul %249, %251, %cst_172 {dimension_numbers = #tpu.dot_dimension_numbers<[1], [0], [0], [1], [0, 0, 1, 1], [], []>} : vector<2x128xbf16>, vector<128x768xbf16>, vector<2x768xf32> -> vector<2x768xf32>
    %253 = arith.addf %241, %252 : vector<2x768xf32>
    %c21 = arith.constant 21 : index
    %c0_173 = arith.constant 0 : index
    %c0_174 = arith.constant 0 : index
    %254 = vector.load %arg1[%c21, %c0_173, %c0_174] : memref<25x2x8xbf16, #tpu.memory_space<vmem>>, vector<1x2x8xbf16>
    %255 = vector.shape_cast %254 : vector<1x2x8xbf16> to vector<2x8xbf16>
    %cst_175 = arith.constant dense<0.000000e+00> : vector<2x128xf32>
    %256 = tpu.matmul %255, %0, %cst_175 {dimension_numbers = #tpu.dot_dimension_numbers<[1], [0], [0], [1], [0, 0, 1, 1], [], []>} : vector<2x8xbf16>, vector<8x128xbf16>, vector<2x128xf32> -> vector<2x128xf32>
    %257 = vector.broadcast %1 : vector<1x128xf32> to vector<2x128xf32>
    %258 = arith.addf %256, %257 : vector<2x128xf32>
    %cst_176 = arith.constant 0.000000e+00 : f32
    %259 = vector.broadcast %cst_176 : f32 to vector<2x128xf32>
    %260 = arith.maximumf %258, %259 : vector<2x128xf32>
    %261 = arith.truncf %260 : vector<2x128xf32> to vector<2x128xbf16>
    %c21_177 = arith.constant 21 : index
    %c0_178 = arith.constant 0 : index
    %c0_179 = arith.constant 0 : index
    %262 = vector.load %arg4[%c21_177, %c0_178, %c0_179] : memref<25x128x768xbf16, #tpu.memory_space<vmem>>, vector<1x128x768xbf16>
    %263 = vector.shape_cast %262 : vector<1x128x768xbf16> to vector<128x768xbf16>
    %cst_180 = arith.constant dense<0.000000e+00> : vector<2x768xf32>
    %264 = tpu.matmul %261, %263, %cst_180 {dimension_numbers = #tpu.dot_dimension_numbers<[1], [0], [0], [1], [0, 0, 1, 1], [], []>} : vector<2x128xbf16>, vector<128x768xbf16>, vector<2x768xf32> -> vector<2x768xf32>
    %265 = arith.addf %253, %264 : vector<2x768xf32>
    %c22 = arith.constant 22 : index
    %c0_181 = arith.constant 0 : index
    %c0_182 = arith.constant 0 : index
    %266 = vector.load %arg1[%c22, %c0_181, %c0_182] : memref<25x2x8xbf16, #tpu.memory_space<vmem>>, vector<1x2x8xbf16>
    %267 = vector.shape_cast %266 : vector<1x2x8xbf16> to vector<2x8xbf16>
    %cst_183 = arith.constant dense<0.000000e+00> : vector<2x128xf32>
    %268 = tpu.matmul %267, %0, %cst_183 {dimension_numbers = #tpu.dot_dimension_numbers<[1], [0], [0], [1], [0, 0, 1, 1], [], []>} : vector<2x8xbf16>, vector<8x128xbf16>, vector<2x128xf32> -> vector<2x128xf32>
    %269 = vector.broadcast %1 : vector<1x128xf32> to vector<2x128xf32>
    %270 = arith.addf %268, %269 : vector<2x128xf32>
    %cst_184 = arith.constant 0.000000e+00 : f32
    %271 = vector.broadcast %cst_184 : f32 to vector<2x128xf32>
    %272 = arith.maximumf %270, %271 : vector<2x128xf32>
    %273 = arith.truncf %272 : vector<2x128xf32> to vector<2x128xbf16>
    %c22_185 = arith.constant 22 : index
    %c0_186 = arith.constant 0 : index
    %c0_187 = arith.constant 0 : index
    %274 = vector.load %arg4[%c22_185, %c0_186, %c0_187] : memref<25x128x768xbf16, #tpu.memory_space<vmem>>, vector<1x128x768xbf16>
    %275 = vector.shape_cast %274 : vector<1x128x768xbf16> to vector<128x768xbf16>
    %cst_188 = arith.constant dense<0.000000e+00> : vector<2x768xf32>
    %276 = tpu.matmul %273, %275, %cst_188 {dimension_numbers = #tpu.dot_dimension_numbers<[1], [0], [0], [1], [0, 0, 1, 1], [], []>} : vector<2x128xbf16>, vector<128x768xbf16>, vector<2x768xf32> -> vector<2x768xf32>
    %277 = arith.addf %265, %276 : vector<2x768xf32>
    %c23 = arith.constant 23 : index
    %c0_189 = arith.constant 0 : index
    %c0_190 = arith.constant 0 : index
    %278 = vector.load %arg1[%c23, %c0_189, %c0_190] : memref<25x2x8xbf16, #tpu.memory_space<vmem>>, vector<1x2x8xbf16>
    %279 = vector.shape_cast %278 : vector<1x2x8xbf16> to vector<2x8xbf16>
    %cst_191 = arith.constant dense<0.000000e+00> : vector<2x128xf32>
    %280 = tpu.matmul %279, %0, %cst_191 {dimension_numbers = #tpu.dot_dimension_numbers<[1], [0], [0], [1], [0, 0, 1, 1], [], []>} : vector<2x8xbf16>, vector<8x128xbf16>, vector<2x128xf32> -> vector<2x128xf32>
    %281 = vector.broadcast %1 : vector<1x128xf32> to vector<2x128xf32>
    %282 = arith.addf %280, %281 : vector<2x128xf32>
    %cst_192 = arith.constant 0.000000e+00 : f32
    %283 = vector.broadcast %cst_192 : f32 to vector<2x128xf32>
    %284 = arith.maximumf %282, %283 : vector<2x128xf32>
    %285 = arith.truncf %284 : vector<2x128xf32> to vector<2x128xbf16>
    %c23_193 = arith.constant 23 : index
    %c0_194 = arith.constant 0 : index
    %c0_195 = arith.constant 0 : index
    %286 = vector.load %arg4[%c23_193, %c0_194, %c0_195] : memref<25x128x768xbf16, #tpu.memory_space<vmem>>, vector<1x128x768xbf16>
    %287 = vector.shape_cast %286 : vector<1x128x768xbf16> to vector<128x768xbf16>
    %cst_196 = arith.constant dense<0.000000e+00> : vector<2x768xf32>
    %288 = tpu.matmul %285, %287, %cst_196 {dimension_numbers = #tpu.dot_dimension_numbers<[1], [0], [0], [1], [0, 0, 1, 1], [], []>} : vector<2x128xbf16>, vector<128x768xbf16>, vector<2x768xf32> -> vector<2x768xf32>
    %289 = arith.addf %277, %288 : vector<2x768xf32>
    %c24 = arith.constant 24 : index
    %c0_197 = arith.constant 0 : index
    %c0_198 = arith.constant 0 : index
    %290 = vector.load %arg1[%c24, %c0_197, %c0_198] : memref<25x2x8xbf16, #tpu.memory_space<vmem>>, vector<1x2x8xbf16>
    %291 = vector.shape_cast %290 : vector<1x2x8xbf16> to vector<2x8xbf16>
    %cst_199 = arith.constant dense<0.000000e+00> : vector<2x128xf32>
    %292 = tpu.matmul %291, %0, %cst_199 {dimension_numbers = #tpu.dot_dimension_numbers<[1], [0], [0], [1], [0, 0, 1, 1], [], []>} : vector<2x8xbf16>, vector<8x128xbf16>, vector<2x128xf32> -> vector<2x128xf32>
    %293 = vector.broadcast %1 : vector<1x128xf32> to vector<2x128xf32>
    %294 = arith.addf %292, %293 : vector<2x128xf32>
    %cst_200 = arith.constant 0.000000e+00 : f32
    %295 = vector.broadcast %cst_200 : f32 to vector<2x128xf32>
    %296 = arith.maximumf %294, %295 : vector<2x128xf32>
    %297 = arith.truncf %296 : vector<2x128xf32> to vector<2x128xbf16>
    %c24_201 = arith.constant 24 : index
    %c0_202 = arith.constant 0 : index
    %c0_203 = arith.constant 0 : index
    %298 = vector.load %arg4[%c24_201, %c0_202, %c0_203] : memref<25x128x768xbf16, #tpu.memory_space<vmem>>, vector<1x128x768xbf16>
    %299 = vector.shape_cast %298 : vector<1x128x768xbf16> to vector<128x768xbf16>
    %cst_204 = arith.constant dense<0.000000e+00> : vector<2x768xf32>
    %300 = tpu.matmul %297, %299, %cst_204 {dimension_numbers = #tpu.dot_dimension_numbers<[1], [0], [0], [1], [0, 0, 1, 1], [], []>} : vector<2x128xbf16>, vector<128x768xbf16>, vector<2x768xf32> -> vector<2x768xf32>
    %301 = arith.addf %289, %300 : vector<2x768xf32>
    %302 = vector.broadcast %2 : vector<1x768xf32> to vector<2x768xf32>
    %303 = arith.addf %301, %302 : vector<2x768xf32>
    %cst_205 = arith.constant 0.000000e+00 : f32
    %304 = vector.broadcast %cst_205 : f32 to vector<2x768xf32>
    %305 = arith.maximumf %303, %304 : vector<2x768xf32>
    %306 = arith.truncf %305 : vector<2x768xf32> to vector<2x768xbf16>
    %c0_206 = arith.constant 0 : index
    %c0_207 = arith.constant 0 : index
    %307 = vector.load %arg6[%c0_206, %c0_207] : memref<768x128xbf16, #tpu.memory_space<vmem>>, vector<768x128xbf16>
    %cst_208 = arith.constant dense<0.000000e+00> : vector<2x128xf32>
    %308 = tpu.matmul %306, %307, %cst_208 {dimension_numbers = #tpu.dot_dimension_numbers<[1], [0], [0], [1], [0, 0, 1, 1], [], []>} : vector<2x768xbf16>, vector<768x128xbf16>, vector<2x128xf32> -> vector<2x128xf32>
    %c0_209 = arith.constant 0 : index
    %c0_210 = arith.constant 0 : index
    %309 = vector.load %arg7[%c0_209, %c0_210] : memref<1x128xf32, #tpu.memory_space<vmem>>, vector<1x128xf32>
    %310 = vector.broadcast %309 : vector<1x128xf32> to vector<2x128xf32>
    %311 = arith.addf %308, %310 : vector<2x128xf32>
    %c0_211 = arith.constant 0 : index
    %c0_212 = arith.constant 0 : index
    %312 = vector.load %arg8[%c0_211, %c0_212] : memref<2x128xf32, #tpu.memory_space<vmem>>, vector<2x128xf32>
    tpu.vector_store %arg8[%c0_211, %c0_212], %311 {strides = array<i32>} : memref<2x128xf32, #tpu.memory_space<vmem>>, vector<2x128xf32>,
    return
  }
  func.func @transform_0(%arg0: i32) -> (i32, i32, i32) {
    %c0_i32 = arith.constant 0 : i32
    %c0_i32_0 = arith.constant 0 : i32
    %c0_i32_1 = arith.constant 0 : i32
    return %c0_i32, %arg0, %c0_i32_0 : i32, i32, i32
  }
  func.func @transform_1(%arg0: i32) -> (i32, i32) {
    %c0_i32 = arith.constant 0 : i32
    %c0_i32_0 = arith.constant 0 : i32
    %c0_i32_1 = arith.constant 0 : i32
    return %c0_i32, %c0_i32_0 : i32, i32
  }
  func.func @transform_2(%arg0: i32) -> (i32, i32) {
    %c0_i32 = arith.constant 0 : i32
    %c0_i32_0 = arith.constant 0 : i32
    %c0_i32_1 = arith.constant 0 : i32
    return %c0_i32, %c0_i32_0 : i32, i32
  }
  func.func @transform_3(%arg0: i32) -> (i32, i32, i32) {
    %c0_i32 = arith.constant 0 : i32
    %c0_i32_0 = arith.constant 0 : i32
    %c0_i32_1 = arith.constant 0 : i32
    %c0_i32_2 = arith.constant 0 : i32
    return %c0_i32, %c0_i32_0, %c0_i32_1 : i32, i32, i32
  }
  func.func @transform_4(%arg0: i32) -> (i32, i32) {
    %c0_i32 = arith.constant 0 : i32
    %c0_i32_0 = arith.constant 0 : i32
    %c0_i32_1 = arith.constant 0 : i32
    return %c0_i32, %c0_i32_0 : i32, i32
  }
  func.func @transform_5(%arg0: i32) -> (i32, i32) {
    %c0_i32 = arith.constant 0 : i32
    %c0_i32_0 = arith.constant 0 : i32
    %c0_i32_1 = arith.constant 0 : i32
    return %c0_i32, %c0_i32_0 : i32, i32
  }
  func.func @transform_6(%arg0: i32) -> (i32, i32) {
    %c0_i32 = arith.constant 0 : i32
    %c0_i32_0 = arith.constant 0 : i32
    %c0_i32_1 = arith.constant 0 : i32
    return %c0_i32, %c0_i32_0 : i32, i32
  }
  func.func @transform_7(%arg0: i32) -> (i32, i32) {
    %c0_i32 = arith.constant 0 : i32
    %c0_i32_0 = arith.constant 0 : i32
    return %arg0, %c0_i32 : i32, i32
  }
}

</mosaic_0001>

<bundles_post_ra>
// kernel: inception_aux_forward.1
= control target key start
LH: loop header
LB: loop body
LE: loop exit
PB: predicated region body
PF: predicated region fallthrough
CT: control target
= control target key end

     0   :  { %vm39_vm0 = vcmask 1043456   ;;  %vm35_vm1 = vcmask 64512   ;;  %s25875_s0 = inlined_call_operand.vmem [shape: bf16[25,2,8], index: 0, kind: input, shape index: {}]   ;;  %s25876_s1 = inlined_call_operand.vmem [shape: bf16[8,128], index: 1, kind: input, shape index: {}]   ;;  %s25877_s2 = inlined_call_operand.vmem [shape: f32[1,128], index: 2, kind: input, shape index: {}]   ;;  %s25878_s3 = inlined_call_operand.vmem [shape: bf16[25,128,768], index: 3, kind: input, shape index: {}]   ;;  %s25879_s4 = inlined_call_operand.vmem [shape: f32[1,768], index: 4, kind: input, shape index: {}]   ;;  %s25880_s5 = inlined_call_operand.vmem [shape: bf16[768,128], index: 5, kind: input, shape index: {}]   ;;  %s25881_s6 = inlined_call_operand.vmem [shape: f32[1,128], index: 6, kind: input, shape index: {}]   ;;  %s25882_s7 = inlined_call_operand.hbm [shape: f32[2,128], index: 7, kind: output, shape index: {}]  }
   0x1   :  { %v28_v0 = vld [vmem:[%s25876_s1] sm:$0xf]  ;;  %v10585_v4 = vld [vmem:[%s25878_s3 + $0x2d0] sm:$0xf]  ;;  %v16650_v5 = vld [vmem:[%s25878_s3 + $0x2e4] sm:$0xf0] }
   0x2   :  { %v10365_v1 = vld [vmem:[%s25875_s0 + $0x1] sm:$0x1]  ;;  %v17889_v2 = vsel %vm39_vm0, %v28_v0, 0  ;;  %v31_v3 = vld [vmem:[%s25875_s0] sm:$0x1]  ;;  %v10586_v8 = vor.u32 %v16650_v5, %v10585_v4 }
   0x3   :  { %118 = vmatpush.bf16.msra.mxu1 %v17889_v2  ;;  %50 = vmatpush.bf16.msra.mxu0 %v17889_v2  ;;  %v16647_v6 = vld [vmem:[%s25878_s3 + $0x2d4] sm:$0xf]  ;;  %v10587_v7 = vld [vmem:[%s25878_s3 + $0x2e8] sm:$0xf0]  ;;  %v10593_v10 = vld [vmem:[%s25878_s3 + $0x2d8] sm:$0xf] }
   0x4   :  { %v10590_v9 = vor.u32 %v16647_v6, %v10587_v7  ;;  %v16651_v11 = vld [vmem:[%s25878_s3 + $0x2ec] sm:$0xf0]  ;;  %v16648_v12 = vld [vmem:[%s25878_s3 + $0x2dc] sm:$0xf]  ;;  %v10595_v14 = vld [vmem:[%s25878_s3 + $0x2f0] sm:$0xf0]  ;;  %415 = vmatpush.bf16.msra.mxu2 %v10586_v8 }
   0x5   :  { %v10594_v13 = vor.u32 %v16651_v11, %v10593_v10  ;;  %v10561_v15 = vld [vmem:[%s25878_s3 + $0x2a0] sm:$0xf]  ;;  %v16644_v16 = vld [vmem:[%s25878_s3 + $0x2b4] sm:$0xf0]  ;;  %v10598_v17 = vor.u32 %v16648_v12, %v10595_v14  ;;  %v16641_v18 = vld [vmem:[%s25878_s3 + $0x2a4] sm:$0xf] }
   0x6   :  { %10366 = vmatmul.msk.bf16.vlgmr.msra.gmra.mxu1 %vm35_vm1, %v10365_v1  ;;  %10364 = vmatmul.msk.bf16.vlgmr.msra.gmra.mxu0 %vm35_vm1, %v31_v3  ;;  %v10563_v19 = vld [vmem:[%s25878_s3 + $0x2b8] sm:$0xf0]  ;;  %v10569_v20 = vld [vmem:[%s25878_s3 + $0x2a8] sm:$0xf]  ;;  %v10562_v21 = vor.u32 %v16644_v16, %v10561_v15  ;;  %v16645_v23 = vld [vmem:[%s25878_s3 + $0x2bc] sm:$0xf0] }
   0x7   :  { %428 = vmatpush.bf16.msra.mxu3 %v10590_v9  ;;  %v10566_v22 = vor.u32 %v16641_v18, %v10563_v19  ;;  %v16642_v24 = vld [vmem:[%s25878_s3 + $0x2ac] sm:$0xf]  ;;  %v10571_v25 = vld [vmem:[%s25878_s3 + $0x2c0] sm:$0xf0]  ;;  %441 = vmatpush.bf16.msrb.mxu0 %v10594_v13  ;;  %v10570_v26 = vor.u32 %v16645_v23, %v10569_v20  ;;  %v10537_v28 = vld [vmem:[%s25878_s3 + $0x270] sm:$0xf] }
   0x8   :  { %454 = vmatpush.bf16.msrb.mxu1 %v10598_v17  ;;  %v10574_v27 = vor.u32 %v16642_v24, %v10571_v25  ;;  %v16638_v29 = vld [vmem:[%s25878_s3 + $0x284] sm:$0xf0]  ;;  %v16635_v30 = vld [vmem:[%s25878_s3 + $0x274] sm:$0xf]  ;;  %v10539_v31 = vld [vmem:[%s25878_s3 + $0x288] sm:$0xf0]  ;;  %416 = vmatpush.bf16.msra.mxu2 %v10562_v21 }
   0x9   :  { %v10545_v32 = vld [vmem:[%s25878_s3 + $0x278] sm:$0xf]  ;;  %v16639_v33 = vld [vmem:[%s25878_s3 + $0x28c] sm:$0xf0]  ;;  %v16636_v34 = vld [vmem:[%s25878_s3 + $0x27c] sm:$0xf]  ;;  %v10538_v36 = vor.u32 %v16638_v29, %v10537_v28  ;;  %v10542_v37 = vor.u32 %v16635_v30, %v10539_v31 }
   0xa   :  { %v10547_v35 = vld [vmem:[%s25878_s3 + $0x290] sm:$0xf0]  ;;  %v10513_v38 = vld [vmem:[%s25878_s3 + $0x240] sm:$0xf]  ;;  %v16632_v39 = vld [vmem:[%s25878_s3 + $0x254] sm:$0xf0]  ;;  %v10546_v40 = vor.u32 %v16639_v33, %v10545_v32 }
   0xb   :  { %429 = vmatpush.bf16.msra.mxu3 %v10566_v22  ;;  %442 = vmatpush.bf16.msrb.mxu0 %v10570_v26  ;;  %v10550_v41 = vor.u32 %v16636_v34, %v10547_v35  ;;  %v16629_v42 = vld [vmem:[%s25878_s3 + $0x244] sm:$0xf]  ;;  %v10515_v43 = vld [vmem:[%s25878_s3 + $0x258] sm:$0xf0]  ;;  %v10521_v44 = vld [vmem:[%s25878_s3 + $0x248] sm:$0xf]  ;;  %v10514_v48 = vor.u32 %v16632_v39, %v10513_v38 }
   0xc   :  { %455 = vmatpush.bf16.msrb.mxu1 %v10574_v27  ;;  %v16633_v45 = vld [vmem:[%s25878_s3 + $0x25c] sm:$0xf0]  ;;  %v16630_v46 = vld [vmem:[%s25878_s3 + $0x24c] sm:$0xf]  ;;  %v10523_v47 = vld [vmem:[%s25878_s3 + $0x260] sm:$0xf0]  ;;  %417 = vmatpush.bf16.msra.mxu2 %v10538_v36  ;;  %v10518_v49 = vor.u32 %v16629_v42, %v10515_v43 }
   0xd   :  { %v10489_v50 = vld [vmem:[%s25878_s3 + $0x210] sm:$0xf]  ;;  %v16626_v51 = vld [vmem:[%s25878_s3 + $0x224] sm:$0xf0]  ;;  %v10522_v52 = vor.u32 %v16633_v45, %v10521_v44  ;;  %v10526_v53 = vor.u32 %v16630_v46, %v10523_v47  ;;  %v16623_v54 = vld [vmem:[%s25878_s3 + $0x214] sm:$0xf] }
   0xe   :  { %v10491_v55 = vld [vmem:[%s25878_s3 + $0x228] sm:$0xf0]  ;;  %v10497_v56 = vld [vmem:[%s25878_s3 + $0x218] sm:$0xf]  ;;  %v16627_v57 = vld [vmem:[%s25878_s3 + $0x22c] sm:$0xf0]  ;;  %v10490_v60 = vor.u32 %v16626_v51, %v10489_v50 }
   0xf   :  { %430 = vmatpush.bf16.msra.mxu3 %v10542_v37  ;;  %443 = vmatpush.bf16.msrb.mxu0 %v10546_v40  ;;  %v16624_v58 = vld [vmem:[%s25878_s3 + $0x21c] sm:$0xf]  ;;  %v10499_v59 = vld [vmem:[%s25878_s3 + $0x230] sm:$0xf0]  ;;  %v10494_v61 = vor.u32 %v16623_v54, %v10491_v55  ;;  %v10465_v62 = vld [vmem:[%s25878_s3 + $0x1e0] sm:$0xf]  ;;  %v10498_v0 = vor.u32 %v16627_v57, %v10497_v56 }
  0x10   :  { %456 = vmatpush.bf16.msrb.mxu1 %v10550_v41  ;;  %418 = vmatpush.bf16.msra.mxu2 %v10514_v48  ;;  %v16620_v63 = vld [vmem:[%s25878_s3 + $0x1f4] sm:$0xf0]  ;;  %v10502_v1 = vor.u32 %v16624_v58, %v10499_v59  ;;  %v16617_v3 = vld [vmem:[%s25878_s3 + $0x1e4] sm:$0xf]  ;;  %v10467_v4 = vld [vmem:[%s25878_s3 + $0x1f8] sm:$0xf0] }
  0x11   :  { %v10473_v5 = vld [vmem:[%s25878_s3 + $0x1e8] sm:$0xf]  ;;  %v16621_v6 = vld [vmem:[%s25878_s3 + $0x1fc] sm:$0xf0]  ;;  %v16618_v7 = vld [vmem:[%s25878_s3 + $0x1ec] sm:$0xf]  ;;  %v10466_v9 = vor.u32 %v16620_v63, %v10465_v62  ;;  %v10470_v10 = vor.u32 %v16617_v3, %v10467_v4 }
  0x12   :  { %v10475_v8 = vld [vmem:[%s25878_s3 + $0x200] sm:$0xf0]  ;;  %v10441_v11 = vld [vmem:[%s25878_s3 + $0x1b0] sm:$0xf]  ;;  %v16614_v12 = vld [vmem:[%s25878_s3 + $0x1c4] sm:$0xf0]  ;;  %v10474_v13 = vor.u32 %v16621_v6, %v10473_v5 }
  0x13   :  { %431 = vmatpush.bf16.msra.mxu3 %v10518_v49  ;;  %444 = vmatpush.bf16.msrb.mxu0 %v10522_v52  ;;  %v10478_v14 = vor.u32 %v16618_v7, %v10475_v8  ;;  %v16611_v15 = vld [vmem:[%s25878_s3 + $0x1b4] sm:$0xf]  ;;  %v10443_v16 = vld [vmem:[%s25878_s3 + $0x1c8] sm:$0xf0]  ;;  %v10449_v17 = vld [vmem:[%s25878_s3 + $0x1b8] sm:$0xf]  ;;  %v10442_v22 = vor.u32 %v16614_v12, %v10441_v11 }
  0x14   :  { %457 = vmatpush.bf16.msrb.mxu1 %v10526_v53  ;;  %419 = vmatpush.bf16.msra.mxu2 %v10490_v60  ;;  %v16615_v18 = vld [vmem:[%s25878_s3 + $0x1cc] sm:$0xf0]  ;;  %v16612_v19 = vld [vmem:[%s25878_s3 + $0x1bc] sm:$0xf]  ;;  %v10451_v20 = vld [vmem:[%s25878_s3 + $0x1d0] sm:$0xf0]  ;;  %v10446_v23 = vor.u32 %v16611_v15, %v10443_v16 }
  0x15   :  { %v10417_v21 = vld [vmem:[%s25878_s3 + $0x180] sm:$0xf]  ;;  %v16608_v24 = vld [vmem:[%s25878_s3 + $0x194] sm:$0xf0]  ;;  %v16605_v25 = vld [vmem:[%s25878_s3 + $0x184] sm:$0xf]  ;;  %v10450_v27 = vor.u32 %v16615_v18, %v10449_v17  ;;  %v10454_v28 = vor.u32 %v16612_v19, %v10451_v20 }
  0x16   :  { %v10419_v26 = vld [vmem:[%s25878_s3 + $0x198] sm:$0xf0]  ;;  %v10425_v29 = vld [vmem:[%s25878_s3 + $0x188] sm:$0xf]  ;;  %v16609_v30 = vld [vmem:[%s25878_s3 + $0x19c] sm:$0xf0]  ;;  %v10418_v38 = vor.u32 %v16608_v24, %v10417_v21 }
  0x17   :  { %432 = vmatpush.bf16.msra.mxu3 %v10494_v61  ;;  %445 = vmatpush.bf16.msrb.mxu0 %v10498_v0  ;;  %v16606_v31 = vld [vmem:[%s25878_s3 + $0x18c] sm:$0xf]  ;;  %v10427_v32 = vld [vmem:[%s25878_s3 + $0x1a0] sm:$0xf0]  ;;  %v10601_v33 = vld [vmem:[%s25878_s3 + $0x2e0] sm:$0xf]  ;;  %v10422_v39 = vor.u32 %v16605_v25, %v10419_v26  ;;  %v10426_v43 = vor.u32 %v16609_v30, %v10425_v29 }
  0x18   :  { %458 = vmatpush.bf16.msrb.mxu1 %v10502_v1  ;;  %420 = vmatpush.bf16.msra.mxu2 %v10466_v9  ;;  %v16652_v34 = vld [vmem:[%s25878_s3 + $0x2f4] sm:$0xf0]  ;;  %v16649_v35 = vld [vmem:[%s25878_s3 + $0x2e4] sm:$0xf]  ;;  %v10603_v36 = vld [vmem:[%s25878_s3 + $0x2f8] sm:$0xf0]  ;;  %v10430_v44 = vor.u32 %v16606_v31, %v10427_v32 }
  0x19   :  { %v10777_v37 = vld [vmem:[%s25878_s3 + $0x150] sm:$0xf]  ;;  %v16602_v40 = vld [vmem:[%s25878_s3 + $0x164] sm:$0xf0]  ;;  %v16599_v41 = vld [vmem:[%s25878_s3 + $0x154] sm:$0xf]  ;;  %v10602_v45 = vor.u32 %v16652_v34, %v10601_v33  ;;  %v10606_v46 = vor.u32 %v16649_v35, %v10603_v36 }
  0x1a   :  { %v10779_v42 = vld [vmem:[%s25878_s3 + $0x168] sm:$0xf0]  ;;  %v10577_v47 = vld [vmem:[%s25878_s3 + $0x2b0] sm:$0xf]  ;;  %v16646_v48 = vld [vmem:[%s25878_s3 + $0x2c4] sm:$0xf0]  ;;  %v10778_v49 = vor.u32 %v16602_v40, %v10777_v37 }
  0x1b   :  { %433 = vmatpush.bf16.msra.mxu3 %v10470_v10  ;;  %446 = vmatpush.bf16.msrb.mxu0 %v10474_v13  ;;  %v10782_v50 = vor.u32 %v16599_v41, %v10779_v42  ;;  %v16643_v51 = vld [vmem:[%s25878_s3 + $0x2b4] sm:$0xf]  ;;  %v10579_v52 = vld [vmem:[%s25878_s3 + $0x2c8] sm:$0xf0]  ;;  %v10753_v53 = vld [vmem:[%s25878_s3 + $0x120] sm:$0xf]  ;;  %v10578_v57 = vor.u32 %v16646_v48, %v10577_v47 }
  0x1c   :  { %459 = vmatpush.bf16.msrb.mxu1 %v10478_v14  ;;  %421 = vmatpush.bf16.msra.mxu2 %v10442_v22  ;;  %v16596_v54 = vld [vmem:[%s25878_s3 + $0x134] sm:$0xf0]  ;;  %v16593_v55 = vld [vmem:[%s25878_s3 + $0x124] sm:$0xf]  ;;  %v10755_v56 = vld [vmem:[%s25878_s3 + $0x138] sm:$0xf0]  ;;  %v10582_v58 = vor.u32 %v16643_v51, %v10579_v52 }
  0x1d   :  { %v10553_v59 = vld [vmem:[%s25878_s3 + $0x280] sm:$0xf]  ;;  %v16640_v60 = vld [vmem:[%s25878_s3 + $0x294] sm:$0xf0]  ;;  %v10754_v61 = vor.u32 %v16596_v54, %v10753_v53  ;;  %v10758_v62 = vor.u32 %v16593_v55, %v10755_v56  ;;  %v16637_v63 = vld [vmem:[%s25878_s3 + $0x284] sm:$0xf] }
  0x1e   :  { %v10555_v0 = vld [vmem:[%s25878_s3 + $0x298] sm:$0xf0]  ;;  %v10729_v1 = vld [vmem:[%s25878_s3 + $0xf0] sm:$0xf]  ;;  %v16590_v3 = vld [vmem:[%s25878_s3 + $0x104] sm:$0xf0]  ;;  %v10554_v6 = vor.u32 %v16640_v60, %v10553_v59 }
  0x1f   :  { %434 = vmatpush.bf16.msra.mxu3 %v10446_v23  ;;  %447 = vmatpush.bf16.msrb.mxu0 %v10450_v27  ;;  %v16587_v4 = vld [vmem:[%s25878_s3 + $0xf4] sm:$0xf]  ;;  %v10731_v5 = vld [vmem:[%s25878_s3 + $0x108] sm:$0xf0]  ;;  %v10558_v7 = vor.u32 %v16637_v63, %v10555_v0  ;;  %v10529_v8 = vld [vmem:[%s25878_s3 + $0x250] sm:$0xf] }
  0x20   :  { %460 = vmatpush.bf16.msrb.mxu1 %v10454_v28  ;;  %422 = vmatpush.bf16.msra.mxu2 %v10418_v38  ;;  %v16634_v9 = vld [vmem:[%s25878_s3 + $0x264] sm:$0xf0] }
  0x23   :  { %435 = vmatpush.bf16.msra.mxu3 %v10422_v39  ;;  %448 = vmatpush.bf16.msrb.mxu0 %v10426_v43 }
  0x24   :  { %461 = vmatpush.bf16.msrb.mxu1 %v10430_v44  ;;  %467 = vmatpush.bf16.msrb.mxu2 %v10602_v45 }
  0x27   :  { %480 = vmatpush.bf16.msrb.mxu3 %v10606_v46  ;;  %733 = vmatpush.bf16.msra.mxu0 %v10778_v49 }
  0x28   :  { %746 = vmatpush.bf16.msra.mxu1 %v10782_v50  ;;  %468 = vmatpush.bf16.msrb.mxu2 %v10578_v57 }
  0x2b   :  { %481 = vmatpush.bf16.msrb.mxu3 %v10582_v58 }
  0x2c   :  { %12 = vsyncpa [#allocation3], 0  ;;  %734 = vmatpush.bf16.msra.mxu0 %v10754_v61  ;;  %747 = vmatpush.bf16.msra.mxu1 %v10758_v62  ;;  %v10730_v10 = vor.u32 %v16590_v3, %v10729_v1  ;;  %v10734_v11 = vor.u32 %v16587_v4, %v10731_v5  ;;  %v16631_v12 = vld [vmem:[%s25878_s3 + $0x254] sm:$0xf]  ;;  %v10531_v13 = vld [vmem:[%s25878_s3 + $0x268] sm:$0xf0]  ;;  %v10530_v18 = vor.u32 %v16634_v9, %v10529_v8 }
  0x2d   :  { %v10705_v14 = vld [vmem:[%s25878_s3 + $0xc0] sm:$0xf]  ;;  %v16584_v15 = vld [vmem:[%s25878_s3 + $0xd4] sm:$0xf0]  ;;  %v16581_v16 = vld [vmem:[%s25878_s3 + $0xc4] sm:$0xf]  ;;  %469 = vmatpush.bf16.msrb.mxu2 %v10554_v6  ;;  %v10534_v19 = vor.u32 %v16631_v12, %v10531_v13 }
  0x2e   :  { %v10707_v17 = vld [vmem:[%s25878_s3 + $0xd8] sm:$0xf0]  ;;  %v10505_v20 = vld [vmem:[%s25878_s3 + $0x220] sm:$0xf]  ;;  %v16628_v21 = vld [vmem:[%s25878_s3 + $0x234] sm:$0xf0]  ;;  %v10706_v22 = vor.u32 %v16584_v15, %v10705_v14 }
  0x2f   :  { %482 = vmatpush.bf16.msrb.mxu3 %v10558_v7  ;;  %v10710_v23 = vor.u32 %v16581_v16, %v10707_v17  ;;  %v16625_v24 = vld [vmem:[%s25878_s3 + $0x224] sm:$0xf]  ;;  %v10507_v25 = vld [vmem:[%s25878_s3 + $0x238] sm:$0xf0]  ;;  %v10681_v26 = vld [vmem:[%s25878_s3 + $0x90] sm:$0xf]  ;;  %v10506_v30 = vor.u32 %v16628_v21, %v10505_v20 }
  0x30   :  { %735 = vmatpush.bf16.msra.mxu0 %v10730_v10  ;;  %748 = vmatpush.bf16.msra.mxu1 %v10734_v11  ;;  %v16578_v27 = vld [vmem:[%s25878_s3 + $0xa4] sm:$0xf0]  ;;  %v16575_v28 = vld [vmem:[%s25878_s3 + $0x94] sm:$0xf]  ;;  %v10683_v29 = vld [vmem:[%s25878_s3 + $0xa8] sm:$0xf0]  ;;  %v10510_v31 = vor.u32 %v16625_v24, %v10507_v25 }
  0x31   :  { %470 = vmatpush.bf16.msrb.mxu2 %v10530_v18  ;;  %v10481_v32 = vld [vmem:[%s25878_s3 + $0x1f0] sm:$0xf]  ;;  %v16622_v33 = vld [vmem:[%s25878_s3 + $0x204] sm:$0xf0]  ;;  %v10682_v34 = vor.u32 %v16578_v27, %v10681_v26  ;;  %v10686_v35 = vor.u32 %v16575_v28, %v10683_v29  ;;  %v16619_v36 = vld [vmem:[%s25878_s3 + $0x1f4] sm:$0xf] }
  0x32   :  { %v10483_v37 = vld [vmem:[%s25878_s3 + $0x208] sm:$0xf0]  ;;  %v10657_v38 = vld [vmem:[%s25878_s3 + $0x60] sm:$0xf]  ;;  %v16572_v39 = vld [vmem:[%s25878_s3 + $0x74] sm:$0xf0]  ;;  %v10482_v42 = vor.u32 %v16622_v33, %v10481_v32 }
  0x33   :  { %483 = vmatpush.bf16.msrb.mxu3 %v10534_v19  ;;  %v16569_v40 = vld [vmem:[%s25878_s3 + $0x64] sm:$0xf]  ;;  %v10659_v41 = vld [vmem:[%s25878_s3 + $0x78] sm:$0xf0]  ;;  %v10486_v43 = vor.u32 %v16619_v36, %v10483_v37  ;;  %v10658_v44 = vor.u32 %v16572_v39, %v10657_v38  ;;  %v10457_v46 = vld [vmem:[%s25878_s3 + $0x1c0] sm:$0xf] }
  0x34   :  { %736 = vmatpush.bf16.msra.mxu0 %v10706_v22  ;;  %749 = vmatpush.bf16.msra.mxu1 %v10710_v23  ;;  %v10662_v45 = vor.u32 %v16569_v40, %v10659_v41  ;;  %v16616_v47 = vld [vmem:[%s25878_s3 + $0x1d4] sm:$0xf0]  ;;  %v16613_v48 = vld [vmem:[%s25878_s3 + $0x1c4] sm:$0xf]  ;;  %v10459_v50 = vld [vmem:[%s25878_s3 + $0x1d8] sm:$0xf0] }
  0x35   :  { %471 = vmatpush.bf16.msrb.mxu2 %v10506_v30  ;;  %v10458_v49 = vor.u32 %v16616_v47, %v10457_v46  ;;  %v10633_v51 = vld [vmem:[%s25878_s3 + $0x30] sm:$0xf]  ;;  %v16566_v52 = vld [vmem:[%s25878_s3 + $0x44] sm:$0xf0]  ;;  %v10462_v53 = vor.u32 %v16613_v48, %v10459_v50  ;;  %v16563_v55 = vld [vmem:[%s25878_s3 + $0x34] sm:$0xf] }
  0x36   :  { %v10634_v54 = vor.u32 %v16566_v52, %v10633_v51  ;;  %v10635_v56 = vld [vmem:[%s25878_s3 + $0x48] sm:$0xf0]  ;;  %v10433_v58 = vld [vmem:[%s25878_s3 + $0x190] sm:$0xf]  ;;  %v16610_v59 = vld [vmem:[%s25878_s3 + $0x1a4] sm:$0xf0] }
  0x37   :  { %484 = vmatpush.bf16.msrb.mxu3 %v10510_v31  ;;  %v10638_v57 = vor.u32 %v16563_v55, %v10635_v56  ;;  %v16607_v60 = vld [vmem:[%s25878_s3 + $0x194] sm:$0xf]  ;;  %v10434_v61 = vor.u32 %v16610_v59, %v10433_v58  ;;  %v10435_v62 = vld [vmem:[%s25878_s3 + $0x1a8] sm:$0xf0]  ;;  %v10609_v63 = vld [vmem:[%s25878_s3] sm:$0xf] }
  0x38   :  { %737 = vmatpush.bf16.msra.mxu0 %v10682_v34  ;;  %750 = vmatpush.bf16.msra.mxu1 %v10686_v35  ;;  %v16560_v0 = vld [vmem:[%s25878_s3 + $0x14] sm:$0xf0]  ;;  %v10438_v1 = vor.u32 %v16607_v60, %v10435_v62  ;;  %v16557_v4 = vld [vmem:[%s25878_s3 + $0x4] sm:$0xf]  ;;  %v10611_v5 = vld [vmem:[%s25878_s3 + $0x18] sm:$0xf0] }
  0x39   :  { %472 = vmatpush.bf16.msrb.mxu2 %v10482_v42  ;;  %v10610_v3 = vor.u32 %v16560_v0, %v10609_v63  ;;  %v10614_v6 = vor.u32 %v16557_v4, %v10611_v5  ;;  %v18285_v7 = vld [vmem:[%s25877_s2] ss:$0 sm:$0xff]  ;;  %v10785_v11 = vld [vmem:[%s25878_s3 + $0x158] sm:$0xf]  ;;  %v16603_v12 = vld [vmem:[%s25878_s3 + $0x16c] sm:$0xf0] }
  0x3a   :  { %v16600_v13 = vld [vmem:[%s25878_s3 + $0x15c] sm:$0xf]  ;;  %v10787_v14 = vld [vmem:[%s25878_s3 + $0x170] sm:$0xf0]  ;;  %v10793_v15 = vld [vmem:[%s25878_s3 + $0x160] sm:$0xf]  ;;  %v10786_v21 = vor.u32 %v16603_v12, %v10785_v11 }
  0x3b   :  { %485 = vmatpush.bf16.msrb.mxu3 %v10486_v43  ;;  %v16604_v16 = vld [vmem:[%s25878_s3 + $0x174] sm:$0xf0]  ;;  %v16601_v18 = vld [vmem:[%s25878_s3 + $0x164] sm:$0xf]  ;;  %v10795_v19 = vld [vmem:[%s25878_s3 + $0x178] sm:$0xf0]  ;;  %v10790_v22 = vor.u32 %v16600_v13, %v10787_v14 }
  0x3c   :  { %738 = vmatpush.bf16.msra.mxu0 %v10658_v44  ;;  %751 = vmatpush.bf16.msra.mxu1 %v10662_v45  ;;  %v10761_v23 = vld [vmem:[%s25878_s3 + $0x128] sm:$0xf]  ;;  %v16597_v24 = vld [vmem:[%s25878_s3 + $0x13c] sm:$0xf0]  ;;  %v10794_v25 = vor.u32 %v16604_v16, %v10793_v15  ;;  %v10798_v26 = vor.u32 %v16601_v18, %v10795_v19  ;;  %v16594_v27 = vld [vmem:[%s25878_s3 + $0x12c] sm:$0xf] }
  0x3d   :  { %473 = vmatpush.bf16.msrb.mxu2 %v10458_v49  ;;  %v10763_v28 = vld [vmem:[%s25878_s3 + $0x140] sm:$0xf0]  ;;  %v10769_v29 = vld [vmem:[%s25878_s3 + $0x130] sm:$0xf]  ;;  %v16598_v30 = vld [vmem:[%s25878_s3 + $0x144] sm:$0xf0]  ;;  %v10762_v35 = vor.u32 %v16597_v24, %v10761_v23 }
  0x3e   :  { %v16595_v31 = vld [vmem:[%s25878_s3 + $0x134] sm:$0xf]  ;;  %v10771_v32 = vld [vmem:[%s25878_s3 + $0x148] sm:$0xf0]  ;;  %v10766_v36 = vor.u32 %v16594_v27, %v10763_v28  ;;  %v10737_v37 = vld [vmem:[%s25878_s3 + $0xf8] sm:$0xf]  ;;  %v10770_v39 = vor.u32 %v16598_v30, %v10769_v29 }
  0x3f   :  { %486 = vmatpush.bf16.msrb.mxu3 %v10462_v53  ;;  %v16591_v38 = vld [vmem:[%s25878_s3 + $0x10c] sm:$0xf0]  ;;  %v10774_v40 = vor.u32 %v16595_v31, %v10771_v32  ;;  %v16588_v41 = vld [vmem:[%s25878_s3 + $0xfc] sm:$0xf]  ;;  %v10739_v42 = vld [vmem:[%s25878_s3 + $0x110] sm:$0xf0] }
  0x40   :  { %739 = vmatpush.bf16.msra.mxu0 %v10634_v54  ;;  %752 = vmatpush.bf16.msra.mxu1 %v10638_v57  ;;  %v10745_v43 = vld [vmem:[%s25878_s3 + $0x100] sm:$0xf]  ;;  %v16592_v44 = vld [vmem:[%s25878_s3 + $0x114] sm:$0xf0]  ;;  %v16589_v45 = vld [vmem:[%s25878_s3 + $0x104] sm:$0xf]  ;;  %v10738_v48 = vor.u32 %v16591_v38, %v10737_v37  ;;  %v10742_v49 = vor.u32 %v16588_v41, %v10739_v42 }
  0x41   :  { %474 = vmatpush.bf16.msrb.mxu2 %v10434_v61  ;;  %v10747_v46 = vld [vmem:[%s25878_s3 + $0x118] sm:$0xf0]  ;;  %v10713_v50 = vld [vmem:[%s25878_s3 + $0xc8] sm:$0xf]  ;;  %v16585_v51 = vld [vmem:[%s25878_s3 + $0xdc] sm:$0xf0]  ;;  %v10746_v52 = vor.u32 %v16592_v44, %v10745_v43 }
  0x42   :  { %v10750_v53 = vor.u32 %v16589_v45, %v10747_v46  ;;  %v16582_v54 = vld [vmem:[%s25878_s3 + $0xcc] sm:$0xf]  ;;  %v10715_v55 = vld [vmem:[%s25878_s3 + $0xe0] sm:$0xf0]  ;;  %v10721_v56 = vld [vmem:[%s25878_s3 + $0xd0] sm:$0xf]  ;;  %v10714_v61 = vor.u32 %v16585_v51, %v10713_v50 }
  0x43   :  { %487 = vmatpush.bf16.msrb.mxu3 %v10438_v1  ;;  %v16586_v57 = vld [vmem:[%s25878_s3 + $0xe4] sm:$0xf0]  ;;  %v16583_v58 = vld [vmem:[%s25878_s3 + $0xd4] sm:$0xf]  ;;  %v10723_v59 = vld [vmem:[%s25878_s3 + $0xe8] sm:$0xf0]  ;;  %v10718_v62 = vor.u32 %v16582_v54, %v10715_v55 }
  0x44   :  { %740 = vmatpush.bf16.msra.mxu0 %v10610_v3  ;;  %753 = vmatpush.bf16.msra.mxu1 %v10614_v6  ;;  %v10689_v63 = vld [vmem:[%s25878_s3 + $0x98] sm:$0xf]  ;;  %v16579_v0 = vld [vmem:[%s25878_s3 + $0xac] sm:$0xf0]  ;;  %v10722_v1 = vor.u32 %v16586_v57, %v10721_v56  ;;  %v10726_v3 = vor.u32 %v16583_v58, %v10723_v59  ;;  %v16576_v4 = vld [vmem:[%s25878_s3 + $0x9c] sm:$0xf] }
  0x45   :  { %v10691_v5 = vld [vmem:[%s25878_s3 + $0xb0] sm:$0xf0]  ;;  %v10697_v6 = vld [vmem:[%s25878_s3 + $0xa0] sm:$0xf]  ;;  %v10690_v12 = vor.u32 %v16579_v0, %v10689_v63  ;;  %v10665_v14 = vld [vmem:[%s25878_s3 + $0x68] sm:$0xf] }
  0x46   :  { %v10694_v13 = vor.u32 %v16576_v4, %v10691_v5  ;;  %v16573_v15 = vld [vmem:[%s25878_s3 + $0x7c] sm:$0xf0]  ;;  %v16570_v18 = vld [vmem:[%s25878_s3 + $0x6c] sm:$0xf]  ;;  %v10667_v19 = vld [vmem:[%s25878_s3 + $0x80] sm:$0xf0] }
  0x47   :  { %v16571_v23 = vld [vmem:[%s25878_s3 + $0x74] sm:$0xf]  ;;  %v10675_v24 = vld [vmem:[%s25878_s3 + $0x88] sm:$0xf0]  ;;  %v16567_v27 = vld [vmem:[%s25878_s3 + $0x4c] sm:$0xf0] }
  0x48   :  { %v10678_v29 = vor.u32 %v16571_v23, %v10675_v24  ;;  %v16564_v30 = vld [vmem:[%s25878_s3 + $0x3c] sm:$0xf]  ;;  %v10643_v31 = vld [vmem:[%s25878_s3 + $0x50] sm:$0xf0]  ;;  %v10649_v32 = vld [vmem:[%s25878_s3 + $0x40] sm:$0xf] }
  0x49   :  { %v10646_v37 = vor.u32 %v16564_v30, %v10643_v31  ;;  %v10617_v38 = vld [vmem:[%s25878_s3 + $0x8] sm:$0xf]  ;;  %v16558_v42 = vld [vmem:[%s25878_s3 + $0xc] sm:$0xf]  ;;  %v10619_v43 = vld [vmem:[%s25878_s3 + $0x20] sm:$0xf0] }
  0x4a   :  { %v10625_v44 = vld [vmem:[%s25878_s3 + $0x10] sm:$0xf]  ;;  %v16562_v45 = vld [vmem:[%s25878_s3 + $0x24] sm:$0xf0]  ;;  %v16559_v46 = vld [vmem:[%s25878_s3 + $0x14] sm:$0xf] }
  0x4b   :  { %v10626_v50 = vor.u32 %v16562_v45, %v10625_v44  ;;  %v16698_v54 = vld [vmem:[%s25878_s3 + $0x464] sm:$0xf0]  ;;  %v16695_v55 = vld [vmem:[%s25878_s3 + $0x454] sm:$0xf]  ;;  %v11021_v57 = vld [vmem:[%s25878_s3 + $0x468] sm:$0xf0] }
  0x4c   :  { %v11024_v58 = vor.u32 %v16695_v55, %v11021_v57  ;;  %v10995_v59 = vld [vmem:[%s25878_s3 + $0x420] sm:$0xf]  ;;  %v10997_v63 = vld [vmem:[%s25878_s3 + $0x438] sm:$0xf0]  ;;  %v16683_v4 = vld [vmem:[%s25878_s3 + $0x3f4] sm:$0xf] }
  0x4d   :  { %v16674_v23 = vld [vmem:[%s25878_s3 + $0x3a4] sm:$0xf0]  ;;  %v16671_v24 = vld [vmem:[%s25878_s3 + $0x394] sm:$0xf]  ;;  %v10877_v55 = vld [vmem:[%s25878_s3 + $0x348] sm:$0xf0] }
  0x4e   :  { %v16681_v57 = vld [vmem:[%s25878_s3 + $0x3dc] sm:$0xf0]  ;;  %s17842_s8 = smov [#allocation2]  }
  0x83   :  { %v120_v8 = vpop.f32.mrf.mxu1  ;;  %v52_v9 = vpop.f32.mrf.mxu0 }
  0x84   :  { %v121_v10 = vadd.f32 %v18285_v7, %v120_v8  ;;  %v53_v47 = vadd.f32 %v18285_v7, %v52_v9  ;;  %v16580_v8 = vld [vmem:[%s25878_s3 + $0xb4] sm:$0xf0]  ;;  %v16577_v9 = vld [vmem:[%s25878_s3 + $0xa4] sm:$0xf] }
  0x85   :  { %v10698_v16 = vor.u32 %v16580_v8, %v10697_v6  ;;  %v10973_v6 = vld [vmem:[%s25878_s3 + $0x408] sm:$0xf0]  ;;  %v10947_v8 = vld [vmem:[%s25878_s3 + $0x3c0] sm:$0xf] }
  0x86   :  { %v124_v17 = vmax.f32 %v121_v10, 0.0  ;;  %v56_v60 = vmax.f32 %v53_v47, 0.0  ;;  %v10699_v10 = vld [vmem:[%s25878_s3 + $0xb8] sm:$0xf0]  ;;  %v10627_v47 = vld [vmem:[%s25878_s3 + $0x28] sm:$0xf0] }
  0x87   :  { %v10630_v51 = vor.u32 %v16559_v46, %v10627_v47  ;;  %v10981_v47 = vld [vmem:[%s25878_s3 + $0x410] sm:$0xf0] }
  0x88   :  { %v18312_v20 = vpack.c.bf16 %v124_v17, %v124_v17  ;;  %v18415_v11 = vpack.c.bf16 %v56_v60, %v56_v60  ;;  %v10702_v17 = vor.u32 %v16577_v9, %v10699_v10  ;;  %v16692_v60 = vld [vmem:[%s25878_s3 + $0x434] sm:$0xf0]  ;;  %v10976_v10 = vor.u32 %v16683_v4, %v10973_v6 }
  0x89   :  { %v16680_v9 = vld [vmem:[%s25878_s3 + $0x3d4] sm:$0xf0] }
  0x8a   :  { %423 = vmatmul.bf16.vlgmr.msra.gmra.mxu2 %v18312_v20  ;;  %436 = vmatmul.bf16.vlgmr.msra.gmra.mxu3 %v18312_v20  ;;  %v10931_v6 = vld [vmem:[%s25878_s3 + $0x398] sm:$0xf] }
  0x8b   :  { %449 = vmatmul.bf16.vlgmr.msrb.gmra.mxu0 %v18312_v20  ;;  %462 = vmatmul.bf16.vlgmr.msrb.gmra.mxu1 %v18312_v20  ;;  %v122_v33 = vpop.f32.mrf.mxu1  ;;  %v54_v34 = vpop.f32.mrf.mxu0 }
  0x8c   :  { %759 = vmatpush.bf16.msra.mxu2 %v10786_v21  ;;  %772 = vmatpush.bf16.msra.mxu3 %v10790_v22  ;;  %v10673_v21 = vld [vmem:[%s25878_s3 + $0x70] sm:$0xf]  ;;  %v16574_v22 = vld [vmem:[%s25878_s3 + $0x84] sm:$0xf0]  ;;  %v16568_v33 = vld [vmem:[%s25878_s3 + $0x54] sm:$0xf0] }
  0x8d   :  { %785 = vmatpush.bf16.msrb.mxu0 %v10794_v25  ;;  %798 = vmatpush.bf16.msrb.mxu1 %v10798_v26  ;;  %v10666_v25 = vor.u32 %v16573_v15, %v10665_v14  ;;  %v10641_v26 = vld [vmem:[%s25878_s3 + $0x38] sm:$0xf]  ;;  %v10674_v28 = vor.u32 %v16574_v22, %v10673_v21  ;;  %v16565_v34 = vld [vmem:[%s25878_s3 + $0x44] sm:$0xf]  ;;  %v10923_v22 = vld [vmem:[%s25878_s3 + $0x390] sm:$0xf] }
  0x8e   :  { %v11027_v15 = vld [vmem:[%s25878_s3 + $0x458] sm:$0xf] }
  0x90   :  { %760 = vmatpush.bf16.msra.mxu2 %v10762_v35  ;;  %773 = vmatpush.bf16.msra.mxu3 %v10766_v36  ;;  %v10651_v35 = vld [vmem:[%s25878_s3 + $0x58] sm:$0xf0]  ;;  %v10642_v36 = vor.u32 %v16567_v27, %v10641_v26  ;;  %v10924_v26 = vor.u32 %v16674_v23, %v10923_v22  ;;  %v10925_v27 = vld [vmem:[%s25878_s3 + $0x3a8] sm:$0xf0]  ;;  %v16669_v23 = vld [vmem:[%s25878_s3 + $0x37c] sm:$0xf0] }
  0x91   :  { %786 = vmatpush.bf16.msrb.mxu0 %v10770_v39  ;;  %799 = vmatpush.bf16.msrb.mxu1 %v10774_v40  ;;  %v16561_v39 = vld [vmem:[%s25878_s3 + $0x1c] sm:$0xf0]  ;;  %v10650_v40 = vor.u32 %v16568_v33, %v10649_v32  ;;  %v10654_v41 = vor.u32 %v16565_v34, %v10651_v35  ;;  %v10928_v30 = vor.u32 %v16671_v24, %v10925_v27  ;;  %v16690_v32 = vld [vmem:[%s25878_s3 + $0x42c] sm:$0xf]  ;;  %v11005_v33 = vld [vmem:[%s25878_s3 + $0x440] sm:$0xf0] }
  0x92   :  { %v11008_v34 = vor.u32 %v16690_v32, %v11005_v33  ;;  %v10899_v35 = vld [vmem:[%s25878_s3 + $0x360] sm:$0xf]  ;;  %v16666_v24 = vld [vmem:[%s25878_s3 + $0x36c] sm:$0xf]  ;;  %v16694_v32 = vld [vmem:[%s25878_s3 + $0x444] sm:$0xf0] }
  0x93   :  { %v16691_v33 = vld [vmem:[%s25878_s3 + $0x434] sm:$0xf] }
  0x94   :  { %761 = vmatpush.bf16.msra.mxu2 %v10738_v48  ;;  %774 = vmatpush.bf16.msra.mxu3 %v10742_v49  ;;  %v10618_v48 = vor.u32 %v16561_v39, %v10617_v38  ;;  %v10622_v49 = vor.u32 %v16558_v42, %v10619_v43  ;;  %v10901_v39 = vld [vmem:[%s25878_s3 + $0x378] sm:$0xf0]  ;;  %v16687_v42 = vld [vmem:[%s25878_s3 + $0x40c] sm:$0xf0] }
  0x95   :  { %787 = vmatpush.bf16.msrb.mxu0 %v10746_v52  ;;  %800 = vmatpush.bf16.msrb.mxu1 %v10750_v53  ;;  %v10799_v52 = vld [vmem:[%s25875_s0 + $0x2] sm:$0x1]  ;;  %v11019_v53 = vld [vmem:[%s25878_s3 + $0x450] sm:$0xf]  ;;  %v16684_v43 = vld [vmem:[%s25878_s3 + $0x3fc] sm:$0xf] }
  0x96   :  { %v11020_v56 = vor.u32 %v16698_v54, %v11019_v53 }
  0x98   :  { %762 = vmatpush.bf16.msra.mxu2 %v10714_v61  ;;  %775 = vmatpush.bf16.msra.mxu3 %v10718_v62  ;;  %v16689_v61 = vld [vmem:[%s25878_s3 + $0x424] sm:$0xf]  ;;  %v10996_v62 = vor.u32 %v16692_v60, %v10995_v59  ;;  %v16678_v60 = vld [vmem:[%s25878_s3 + $0x3cc] sm:$0xf] }
  0x99   :  { %788 = vmatpush.bf16.msrb.mxu0 %v10722_v1  ;;  %801 = vmatpush.bf16.msrb.mxu1 %v10726_v3  ;;  %v11000_v0 = vor.u32 %v16689_v61, %v10997_v63  ;;  %v10971_v1 = vld [vmem:[%s25878_s3 + $0x3f0] sm:$0xf]  ;;  %v16686_v3 = vld [vmem:[%s25878_s3 + $0x404] sm:$0xf0]  ;;  %v10957_v61 = vld [vmem:[%s25878_s3 + $0x3e0] sm:$0xf0] }
  0x9a   :  { %475 = vmatmul.bf16.vlgmr.msrb.gmra.mxu2 %v18312_v20  ;;  %488 = vmatmul.bf16.vlgmr.msrb.gmra.mxu3 %v18312_v20  ;;  %v10670_v20 = vor.u32 %v16570_v18, %v10667_v19  ;;  %v10972_v5 = vor.u32 %v16686_v3, %v10971_v1  ;;  %v11029_v19 = vld [vmem:[%s25878_s3 + $0x470] sm:$0xf0]  ;;  %v10960_v63 = vor.u32 %v16678_v60, %v10957_v61  ;;  %v16653_v1 = vld [vmem:[%s25878_s3 + $0x304] sm:$0xf]  ;;  %v10853_v3 = vld [vmem:[%s25878_s3 + $0x318] sm:$0xf0] }
  0x9b   :  { %741 = vmatmul.bf16.vlgmr.msra.gmra.mxu0 %v18415_v11  ;;  %754 = vmatmul.bf16.vlgmr.msra.gmra.mxu1 %v18415_v11  ;;  %v10963_v60 = vld [vmem:[%s25878_s3 + $0x3d0] sm:$0xf]  ;;  %v16682_v61 = vld [vmem:[%s25878_s3 + $0x3e4] sm:$0xf0] }
  0x9c   :  { %763 = vmatpush.bf16.msra.mxu2 %v10690_v12  ;;  %776 = vmatpush.bf16.msra.mxu3 %v10694_v13  ;;  %v10949_v12 = vld [vmem:[%s25878_s3 + $0x3d8] sm:$0xf0]  ;;  %v10948_v13 = vor.u32 %v16680_v9, %v10947_v8  ;;  %v16675_v8 = vld [vmem:[%s25878_s3 + $0x3ac] sm:$0xf0] }
  0x9d   :  { %789 = vmatpush.bf16.msrb.mxu0 %v10698_v16  ;;  %802 = vmatpush.bf16.msrb.mxu1 %v10702_v17  ;;  %v16699_v16 = vld [vmem:[%s25878_s3 + $0x46c] sm:$0xf0]  ;;  %v16696_v17 = vld [vmem:[%s25878_s3 + $0x45c] sm:$0xf] }
  0x9e   :  { %v11028_v18 = vor.u32 %v16699_v16, %v11027_v15  ;;  %v11032_v21 = vor.u32 %v16696_v17, %v11029_v19  ;;  %v16672_v9 = vld [vmem:[%s25878_s3 + $0x39c] sm:$0xf]  ;;  %v16700_v15 = vld [vmem:[%s25878_s3 + $0x474] sm:$0xf0] }
  0x9f   :  { %v11037_v19 = vld [vmem:[%s25878_s3 + $0x478] sm:$0xf0] }
  0xa0   :  { %764 = vmatpush.bf16.msra.mxu2 %v10666_v25  ;;  %777 = vmatpush.bf16.msra.mxu3 %v10670_v20 }
  0xa1   :  { %790 = vmatpush.bf16.msrb.mxu0 %v10674_v28  ;;  %803 = vmatpush.bf16.msrb.mxu1 %v10678_v29  ;;  %v11003_v28 = vld [vmem:[%s25878_s3 + $0x428] sm:$0xf]  ;;  %v16693_v29 = vld [vmem:[%s25878_s3 + $0x43c] sm:$0xf0] }
  0xa2   :  { %v11004_v31 = vor.u32 %v16693_v29, %v11003_v28 }
  0xa4   :  { %765 = vmatpush.bf16.msra.mxu2 %v10642_v36  ;;  %778 = vmatpush.bf16.msra.mxu3 %v10646_v37  ;;  %v16668_v36 = vld [vmem:[%s25878_s3 + $0x374] sm:$0xf0]  ;;  %v16665_v37 = vld [vmem:[%s25878_s3 + $0x364] sm:$0xf] }
  0xa5   :  { %791 = vmatpush.bf16.msrb.mxu0 %v10650_v40  ;;  %804 = vmatpush.bf16.msrb.mxu1 %v10654_v41  ;;  %v10900_v38 = vor.u32 %v16668_v36, %v10899_v35  ;;  %v10904_v40 = vor.u32 %v16665_v37, %v10901_v39  ;;  %v10979_v41 = vld [vmem:[%s25878_s3 + $0x3f8] sm:$0xf]  ;;  %v11013_v37 = vld [vmem:[%s25878_s3 + $0x448] sm:$0xf0] }
  0xa6   :  { %v10980_v46 = vor.u32 %v16687_v42, %v10979_v41  ;;  %v10883_v39 = vld [vmem:[%s25878_s3 + $0x338] sm:$0xf]  ;;  %v16660_v41 = vld [vmem:[%s25878_s3 + $0x33c] sm:$0xf] }
  0xa8   :  { %766 = vmatpush.bf16.msra.mxu2 %v10618_v48  ;;  %779 = vmatpush.bf16.msra.mxu3 %v10622_v49  ;;  %v10984_v48 = vor.u32 %v16684_v43, %v10981_v47  ;;  %v10875_v49 = vld [vmem:[%s25878_s3 + $0x330] sm:$0xf]  ;;  %v16688_v47 = vld [vmem:[%s25878_s3 + $0x414] sm:$0xf0] }
  0xa9   :  { %792 = vmatpush.bf16.msrb.mxu0 %v10626_v50  ;;  %805 = vmatpush.bf16.msrb.mxu1 %v10630_v51  ;;  %v16662_v50 = vld [vmem:[%s25878_s3 + $0x344] sm:$0xf0]  ;;  %v16659_v51 = vld [vmem:[%s25878_s3 + $0x334] sm:$0xf] }
  0xaa   :  { %v10876_v54 = vor.u32 %v16662_v50, %v10875_v49  ;;  %v16685_v50 = vld [vmem:[%s25878_s3 + $0x404] sm:$0xf] }
  0xab   :  { %767 = vmatmul.bf16.vlgmr.msra.gmra.mxu2 %v18415_v11  ;;  %780 = vmatmul.bf16.vlgmr.msra.gmra.mxu3 %v18415_v11 }
  0xac   :  { %823 = vmatpush.bf16.msrb.mxu2 %v17889_v2  ;;  %793 = vmatmul.bf16.vlgmr.msrb.gmra.mxu0 %v18415_v11 }
  0xad   :  { %806 = vmatmul.bf16.vlgmr.msrb.gmra.mxu1 %v18415_v11  ;;  %1120 = vmatpush.bf16.msrb.mxu3 %v11020_v56  ;;  %v16677_v11 = vld [vmem:[%s25878_s3 + $0x3c4] sm:$0xf]  ;;  %v10955_v56 = vld [vmem:[%s25878_s3 + $0x3c8] sm:$0xf] }
  0xae   :  { %1133 = vmatpush.bf16.msra.mxu0 %v11024_v58  ;;  %v10952_v14 = vor.u32 %v16677_v11, %v10949_v12  ;;  %1146 = vmatpush.bf16.msra.mxu1 %v11028_v18  ;;  %v10880_v58 = vor.u32 %v16659_v51, %v10877_v55  ;;  %v10956_v59 = vor.u32 %v16681_v57, %v10955_v56  ;;  %v16697_v18 = vld [vmem:[%s25878_s3 + $0x464] sm:$0xf]  ;;  %v10989_v51 = vld [vmem:[%s25878_s3 + $0x418] sm:$0xf0]  ;;  %v10859_v55 = vld [vmem:[%s25878_s3 + $0x308] sm:$0xf] }
  0xaf   :  { %v10932_v12 = vor.u32 %v16675_v8, %v10931_v6  ;;  %v11040_v22 = vor.u32 %v16697_v18, %v11037_v19  ;;  %v16657_v56 = vld [vmem:[%s25878_s3 + $0x31c] sm:$0xf0]  ;;  %v16654_v57 = vld [vmem:[%s25878_s3 + $0x30c] sm:$0xf]  ;;  %v16673_v6 = vld [vmem:[%s25878_s3 + $0x3a4] sm:$0xf] }
  0xb0   :  { %1159 = vmatpush.bf16.msra.mxu2 %v11032_v21  ;;  %v10907_v21 = vld [vmem:[%s25878_s3 + $0x368] sm:$0xf] }
  0xb1   :  { %1121 = vmatpush.bf16.msrb.mxu3 %v10996_v62  ;;  %v10851_v62 = vld [vmem:[%s25878_s3 + $0x300] sm:$0xf]  ;;  %v10908_v29 = vor.u32 %v16669_v23, %v10907_v21  ;;  %v16664_v23 = vld [vmem:[%s25878_s3 + $0x354] sm:$0xf0] }
  0xb2   :  { %1134 = vmatpush.bf16.msra.mxu0 %v11000_v0  ;;  %1147 = vmatpush.bf16.msra.mxu1 %v11004_v31  ;;  %v16656_v0 = vld [vmem:[%s25878_s3 + $0x314] sm:$0xf0]  ;;  %v11011_v31 = vld [vmem:[%s25878_s3 + $0x430] sm:$0xf] }
  0xb3   :  { %v10852_v4 = vor.u32 %v16656_v0, %v10851_v62  ;;  %v11012_v36 = vor.u32 %v16694_v32, %v11011_v31  ;;  %v16679_v0 = vld [vmem:[%s25878_s3 + $0x3d4] sm:$0xf]  ;;  %v10867_v31 = vld [vmem:[%s25878_s3 + $0x310] sm:$0xf]  ;;  %v16658_v32 = vld [vmem:[%s25878_s3 + $0x324] sm:$0xf0] }
  0xb4   :  { %1160 = vmatpush.bf16.msra.mxu2 %v11008_v34 }
  0xb5   :  { %1122 = vmatpush.bf16.msrb.mxu3 %v10972_v5  ;;  %v10856_v5 = vor.u32 %v16653_v1, %v10853_v3  ;;  %v10965_v1 = vld [vmem:[%s25878_s3 + $0x3e8] sm:$0xf0] }
  0xb6   :  { %1135 = vmatpush.bf16.msra.mxu0 %v10976_v10  ;;  %1148 = vmatpush.bf16.msra.mxu1 %v10980_v46  ;;  %v10987_v46 = vld [vmem:[%s25878_s3 + $0x400] sm:$0xf]  ;;  %v10968_v3 = vor.u32 %v16679_v0, %v10965_v1 }
  0xb7   :  { %v10988_v49 = vor.u32 %v16688_v47, %v10987_v46  ;;  %v11261_v47 = vld [vmem:[%s25878_s3 + $0x5d0] sm:$0xf] }
  0xb8   :  { %1161 = vmatpush.bf16.msra.mxu2 %v10984_v48 }
  0xb9   :  { %1123 = vmatpush.bf16.msrb.mxu3 %v10948_v13  ;;  %v10933_v13 = vld [vmem:[%s25878_s3 + $0x3b0] sm:$0xf0] }
  0xba   :  { %1136 = vmatpush.bf16.msra.mxu0 %v10952_v14  ;;  %1149 = vmatpush.bf16.msra.mxu1 %v10956_v59  ;;  %v11035_v14 = vld [vmem:[%s25878_s3 + $0x460] sm:$0xf]  ;;  %v10936_v16 = vor.u32 %v16672_v9, %v10933_v13  ;;  %v10861_v59 = vld [vmem:[%s25878_s3 + $0x320] sm:$0xf0]  ;;  %v10915_v13 = vld [vmem:[%s25878_s3 + $0x370] sm:$0xf] }
  0xbb   :  { %10800 = vmatmul.msk.bf16.vlgmr.msrb.gmra.mxu2 %vm35_vm1, %v10799_v52  ;;  %v11036_v17 = vor.u32 %v16700_v15, %v11035_v14  ;;  %v10864_v62 = vor.u32 %v16654_v57, %v10861_v59  ;;  %v16670_v14 = vld [vmem:[%s25878_s3 + $0x384] sm:$0xf0]  ;;  %v16667_v15 = vld [vmem:[%s25878_s3 + $0x374] sm:$0xf]  ;;  %v11263_v57 = vld [vmem:[%s25878_s3 + $0x5e8] sm:$0xf0] }
  0xbc   :  { %1162 = vmatpush.bf16.msra.mxu2 %v10960_v63  ;;  %v10964_v63 = vor.u32 %v16682_v61, %v10963_v60  ;;  %v16728_v59 = vld [vmem:[%s25878_s3 + $0x554] sm:$0xf0]  ;;  %v16747_v60 = vld [vmem:[%s25878_s3 + $0x5ec] sm:$0xf0] }
  0xbd   :  { %1124 = vmatpush.bf16.msrb.mxu3 %v10924_v26  ;;  %v10909_v26 = vld [vmem:[%s25878_s3 + $0x380] sm:$0xf0] }
  0xbe   :  { %1137 = vmatpush.bf16.msra.mxu0 %v10928_v30  ;;  %1150 = vmatpush.bf16.msra.mxu1 %v10932_v12  ;;  %v10912_v30 = vor.u32 %v16666_v24, %v10909_v26 }
  0xc0   :  { %1163 = vmatpush.bf16.msra.mxu2 %v10936_v16  ;;  %v10917_v16 = vld [vmem:[%s25878_s3 + $0x388] sm:$0xf0] }
  0xc1   :  { %1125 = vmatpush.bf16.msrb.mxu3 %v10900_v38  ;;  %v11016_v38 = vor.u32 %v16691_v33, %v11013_v37  ;;  %v10920_v21 = vor.u32 %v16667_v15, %v10917_v16  ;;  %v16655_v37 = vld [vmem:[%s25878_s3 + $0x314] sm:$0xf] }
  0xc2   :  { %1138 = vmatpush.bf16.msra.mxu0 %v10904_v40  ;;  %1151 = vmatpush.bf16.msra.mxu1 %v10908_v29  ;;  %v16663_v40 = vld [vmem:[%s25878_s3 + $0x34c] sm:$0xf0] }
  0xc4   :  { %1164 = vmatpush.bf16.msra.mxu2 %v10912_v30 }
  0xc5   :  { %1126 = vmatpush.bf16.msrb.mxu3 %v10876_v54 }
  0xc6   :  { %1139 = vmatpush.bf16.msra.mxu0 %v10880_v58  ;;  %v10860_v58 = vor.u32 %v16657_v56, %v10859_v55  ;;  %v16743_v56 = vld [vmem:[%s25878_s3 + $0x5d4] sm:$0xf] }
  0xc7   :  { %v11266_v1 = vor.u32 %v16743_v56, %v11263_v57  ;;  %v16726_v57 = vld [vmem:[%s25878_s3 + $0x54c] sm:$0xf] }
  0xc9   :  { %1127 = vmatpush.bf16.msrb.mxu3 %v10852_v4  ;;  %v10939_v4 = vld [vmem:[%s25878_s3 + $0x3a0] sm:$0xf] }
  0xca   :  { %1140 = vmatpush.bf16.msra.mxu0 %v10856_v5  ;;  %v16676_v5 = vld [vmem:[%s25878_s3 + $0x3b4] sm:$0xf0] }
  0xcd   :  { %1172 = vmatpush.bf16.msra.mxu3 %v11036_v17  ;;  %v10916_v17 = vor.u32 %v16670_v14, %v10915_v13  ;;  %v16738_v13 = vld [vmem:[%s25878_s3 + $0x5ac] sm:$0xf]  ;;  %v11247_v14 = vld [vmem:[%s25878_s3 + $0x5c0] sm:$0xf0] }
  0xce   :  { %1185 = vmatpush.bf16.msrb.mxu0 %v11040_v22  ;;  %v10891_v22 = vld [vmem:[%s25878_s3 + $0x340] sm:$0xf] }
  0xcf   :  { %v10892_v29 = vor.u32 %v16664_v23, %v10891_v22  ;;  %v11250_v22 = vor.u32 %v16738_v13, %v11247_v14  ;;  %v11141_v23 = vld [vmem:[%s25878_s3 + $0x4e0] sm:$0xf] }
  0xd1   :  { %1173 = vmatpush.bf16.msra.mxu3 %v11012_v36 }
  0xd2   :  { %1186 = vmatpush.bf16.msrb.mxu0 %v11016_v38  ;;  %v10869_v38 = vld [vmem:[%s25878_s3 + $0x328] sm:$0xf0] }
  0xd5   :  { %1174 = vmatpush.bf16.msra.mxu3 %v10988_v49  ;;  %v16740_v49 = vld [vmem:[%s25878_s3 + $0x5b4] sm:$0xf0] }
  0xd9   :  { %1175 = vmatpush.bf16.msra.mxu3 %v10964_v63  ;;  %v11271_v63 = vld [vmem:[%s25878_s3 + $0x5f0] sm:$0xf0] }
 0x108   :  { %v18571_v25 = vpop.f32.mrf.mxu0  ;;  %v18573_v20 = vpop.f32.mrf.mxu1 }
 0x10d   :  { %v18611_v44 = vpop.f32.mrf.mxu2  ;;  %v18613_v45 = vpop.f32.mrf.mxu3 }
 0x110   :  { %v452_v52 = vpop.f32.mrf.mxu0  ;;  %v465_v53 = vpop.f32.mrf.mxu1 }
 0x111   :  { %v10992_v52 = vor.u32 %v16685_v50, %v10989_v51  ;;  %v11213_v51 = vld [vmem:[%s25878_s3 + $0x570] sm:$0xf] }
 0x113   :  { %1187 = vmatpush.bf16.msrb.mxu0 %v10992_v52  ;;  %v16734_v52 = vld [vmem:[%s25878_s3 + $0x584] sm:$0xf0] }
 0x115   :  { %v426_v10 = vpop.f32.mrf.mxu2  ;;  %v439_v11 = vpop.f32.mrf.mxu3 }
 0x116   :  { %v10940_v10 = vor.u32 %v16676_v5, %v10939_v4  ;;  %v10941_v11 = vld [vmem:[%s25878_s3 + $0x3b8] sm:$0xf0] }
 0x117   :  { %1188 = vmatpush.bf16.msrb.mxu0 %v10968_v3  ;;  %v10944_v12 = vor.u32 %v16673_v6, %v10941_v11  ;;  %v16737_v3 = vld [vmem:[%s25878_s3 + $0x5a4] sm:$0xf]  ;;  %v11239_v4 = vld [vmem:[%s25878_s3 + $0x5b8] sm:$0xf0]  ;;  %v11245_v11 = vld [vmem:[%s25878_s3 + $0x5a8] sm:$0xf] }
 0x118   :  { %v742_v27 = vpop.f32.mrf.mxu0  ;;  %v755_v28 = vpop.f32.mrf.mxu1  ;;  %1176 = vmatpush.bf16.msra.mxu3 %v10940_v10  ;;  %v16722_v10 = vld [vmem:[%s25878_s3 + $0x524] sm:$0xf0]  ;;  %v11242_v16 = vor.u32 %v16737_v3, %v11239_v4 }
 0x119   :  { %v18700_v34 = vadd.f32 %v742_v27, %v18611_v44  ;;  %v18703_v35 = vadd.f32 %v755_v28, %v18613_v45  ;;  %v10884_v44 = vor.u32 %v16663_v40, %v10883_v39  ;;  %v10885_v45 = vld [vmem:[%s25878_s3 + $0x350] sm:$0xf0]  ;;  %v16661_v27 = vld [vmem:[%s25878_s3 + $0x344] sm:$0xf]  ;;  %v10893_v28 = vld [vmem:[%s25878_s3 + $0x358] sm:$0xf0] }
 0x11a   :  { %v10888_v48 = vor.u32 %v16660_v41, %v10885_v45  ;;  %v10896_v30 = vor.u32 %v16661_v27, %v10893_v28  ;;  %v10868_v41 = vor.u32 %v16658_v32, %v10867_v31  ;;  %v16716_v27 = vld [vmem:[%s25878_s3 + $0x4f4] sm:$0xf0]  ;;  %v11191_v31 = vld [vmem:[%s25878_s3 + $0x558] sm:$0xf0] }
 0x11b   :  { %1152 = vmatpush.bf16.msra.mxu1 %v10884_v44  ;;  %1189 = vmatpush.bf16.msrb.mxu0 %v10944_v12  ;;  %v10872_v44 = vor.u32 %v16655_v37, %v10869_v38  ;;  %v16741_v12 = vld [vmem:[%s25878_s3 + $0x5bc] sm:$0xf0] }
 0x11c   :  { %1165 = vmatpush.bf16.msra.mxu2 %v10888_v48  ;;  %1177 = vmatpush.bf16.msra.mxu3 %v10916_v17  ;;  %v11237_v48 = vld [vmem:[%s25878_s3 + $0x5a0] sm:$0xf]  ;;  %v16731_v17 = vld [vmem:[%s25878_s3 + $0x574] sm:$0xf] }
 0x11d   :  { %v476_v42 = vpop.f32.mrf.mxu2  ;;  %v489_v43 = vpop.f32.mrf.mxu3  ;;  %v11238_v50 = vor.u32 %v16740_v49, %v11237_v48  ;;  %v11041_v37 = vld [vmem:[%s25875_s0 + $0x3] sm:$0x1]  ;;  %v11117_v48 = vld [vmem:[%s25878_s3 + $0x4b0] sm:$0xf]  ;;  %v16710_v49 = vld [vmem:[%s25878_s3 + $0x4c4] sm:$0xf0] }
 0x11f   :  { %1153 = vmatpush.bf16.msra.mxu1 %v10860_v58  ;;  %1190 = vmatpush.bf16.msrb.mxu0 %v10920_v21  ;;  %v11189_v58 = vld [vmem:[%s25878_s3 + $0x540] sm:$0xf]  ;;  %v11246_v21 = vor.u32 %v16741_v12, %v11245_v11  ;;  %v16745_v11 = vld [vmem:[%s25878_s3 + $0x5e4] sm:$0xf]  ;;  %v11279_v12 = vld [vmem:[%s25878_s3 + $0x5f8] sm:$0xf0] }
 0x120   :  { %v744_v53 = vpop.f32.mrf.mxu0  ;;  %v757_v54 = vpop.f32.mrf.mxu1  ;;  %1166 = vmatpush.bf16.msra.mxu2 %v10864_v62  ;;  %1178 = vmatpush.bf16.msra.mxu3 %v10892_v29  ;;  %v16744_v62 = vld [vmem:[%s25878_s3 + $0x5dc] sm:$0xf]  ;;  %v11190_v5 = vor.u32 %v16728_v59, %v11189_v58  ;;  %v11142_v29 = vor.u32 %v16716_v27, %v11141_v23  ;;  %v11199_v58 = vld [vmem:[%s25878_s3 + $0x560] sm:$0xf0]  ;;  %v11282_v14 = vor.u32 %v16745_v11, %v11279_v12  ;;  %v11109_v11 = vld [vmem:[%s25878_s3 + $0x490] sm:$0xf] }
 0x121   :  { %v11214_v53 = vor.u32 %v16734_v52, %v11213_v51  ;;  %v11118_v51 = vor.u32 %v16710_v49, %v11117_v48  ;;  %v11119_v52 = vld [vmem:[%s25878_s3 + $0x4c8] sm:$0xf0]  ;;  %v11202_v59 = vor.u32 %v16726_v57, %v11199_v58  ;;  %v11103_v49 = vld [vmem:[%s25878_s3 + $0x4a0] sm:$0xf0]  ;;  %v11181_v57 = vld [vmem:[%s25878_s3 + $0x520] sm:$0xf] }
 0x122   :  { %v16724_v58 = vld [vmem:[%s25878_s3 + $0x534] sm:$0xf0] }
 0x123   :  { %1216 = vmatpush.bf16.msrb.mxu1 %v17889_v2  ;;  %1191 = vmatpush.bf16.msrb.mxu0 %v10896_v30  ;;  %v16725_v30 = vld [vmem:[%s25878_s3 + $0x544] sm:$0xf] }
 0x124   :  { %1179 = vmatpush.bf16.msra.mxu3 %v10868_v41  ;;  %v11194_v32 = vor.u32 %v16725_v30, %v11191_v31  ;;  %v16713_v41 = vld [vmem:[%s25878_s3 + $0x4e4] sm:$0xf]  ;;  %v11125_v31 = vld [vmem:[%s25878_s3 + $0x4b8] sm:$0xf] }
 0x125   :  { %v478_v8 = vpop.f32.mrf.mxu2  ;;  %v491_v9 = vpop.f32.mrf.mxu3 }
 0x126   :  { %v11274_v8 = vor.u32 %v16744_v62, %v11271_v63  ;;  %v11165_v9 = vld [vmem:[%s25878_s3 + $0x510] sm:$0xf]  ;;  %v11095_v63 = vld [vmem:[%s25878_s3 + $0x498] sm:$0xf0] }
 0x127   :  { %1192 = vmatpush.bf16.msrb.mxu0 %v10872_v44  ;;  %v11221_v44 = vld [vmem:[%s25878_s3 + $0x578] sm:$0xf] }
 0x129   :  { %v794_v18 = vpop.f32.mrf.mxu0 }
 0x12a   :  { %v807_v19 = vpop.f32.mrf.mxu1  ;;  %v18787_v24 = vadd.f32 %v794_v18, %v476_v42  ;;  %v11166_v18 = vor.u32 %v16722_v10, %v11165_v9  ;;  %v16748_v10 = vld [vmem:[%s25878_s3 + $0x5f4] sm:$0xf0] }
 0x12b   :  { %v18789_v26 = vadd.f32 %v807_v19, %v489_v43  ;;  %v11215_v19 = vld [vmem:[%s25878_s3 + $0x588] sm:$0xf0] }
 0x12c   :  { %v11218_v28 = vor.u32 %v16731_v17, %v11215_v19  ;;  %v16714_v17 = vld [vmem:[%s25878_s3 + $0x4ec] sm:$0xf]  ;;  %v11151_v19 = vld [vmem:[%s25878_s3 + $0x500] sm:$0xf0] }
 0x12d   :  { %v11154_v23 = vor.u32 %v16714_v17, %v11151_v19 }
 0x12e   :  { %v768_v33 = vpop.f32.mrf.mxu2  ;;  %v781_v36 = vpop.f32.mrf.mxu3 }
 0x12f   :  { %v18810_v39 = vadd.f32 %v768_v33, %v18571_v25  ;;  %v18813_v40 = vadd.f32 %v781_v36, %v18573_v20  ;;  %v16746_v25 = vld [vmem:[%s25878_s3 + $0x5e4] sm:$0xf0]  ;;  %v16719_v33 = vld [vmem:[%s25878_s3 + $0x514] sm:$0xf]  ;;  %v11167_v36 = vld [vmem:[%s25878_s3 + $0x528] sm:$0xf0] }
 0x130   :  { %v11262_v20 = vor.u32 %v16746_v25, %v11261_v47  ;;  %v11170_v38 = vor.u32 %v16719_v33, %v11167_v36  ;;  %v11223_v25 = vld [vmem:[%s25878_s3 + $0x590] sm:$0xf0]  ;;  %v16708_v33 = vld [vmem:[%s25878_s3 + $0x4bc] sm:$0xf] }
 0x131   :  { %v796_v42 = vpop.f32.mrf.mxu0 }
 0x132   :  { %v809_v43 = vpop.f32.mrf.mxu1  ;;  %1513 = vmatpush.bf16.msrb.mxu2 %v11262_v20  ;;  %v11143_v42 = vld [vmem:[%s25878_s3 + $0x4f8] sm:$0xf0] }
 0x133   :  { %v11146_v43 = vor.u32 %v16713_v41, %v11143_v42  ;;  %v16736_v41 = vld [vmem:[%s25878_s3 + $0x594] sm:$0xf0] }
 0x136   :  { %v770_v45 = vpop.f32.mrf.mxu2  ;;  %v783_v46 = vpop.f32.mrf.mxu3  ;;  %1514 = vmatpush.bf16.msrb.mxu2 %v11238_v50  ;;  %v16707_v50 = vld [vmem:[%s25878_s3 + $0x4b4] sm:$0xf] }
 0x137   :  { %v16735_v45 = vld [vmem:[%s25878_s3 + $0x58c] sm:$0xf0]  ;;  %v16732_v46 = vld [vmem:[%s25878_s3 + $0x57c] sm:$0xf] }
 0x138   :  { %v11222_v47 = vor.u32 %v16735_v45, %v11221_v44  ;;  %v11226_v20 = vor.u32 %v16732_v46, %v11223_v25  ;;  %v16733_v44 = vld [vmem:[%s25878_s3 + $0x584] sm:$0xf]  ;;  %v11231_v45 = vld [vmem:[%s25878_s3 + $0x598] sm:$0xf0]  ;;  %v16705_v25 = vld [vmem:[%s25878_s3 + $0x49c] sm:$0xf0] }
 0x139   :  { %v11234_v46 = vor.u32 %v16733_v44, %v11231_v45 }
 0x13a   :  { %1515 = vmatpush.bf16.msrb.mxu2 %v11214_v53  ;;  %v11197_v53 = vld [vmem:[%s25878_s3 + $0x548] sm:$0xf] }
 0x13e   :  { %v825_v54 = vpop.f32.mrf.mxu2  ;;  %1516 = vmatpush.bf16.msrb.mxu2 %v11190_v5  ;;  %v16720_v5 = vld [vmem:[%s25878_s3 + $0x51c] sm:$0xf] }
 0x13f   :  { %v826_v55 = vadd.f32 %v18285_v7, %v825_v54  ;;  %v11269_v7 = vld [vmem:[%s25878_s3 + $0x5d8] sm:$0xf]  ;;  %v16729_v54 = vld [vmem:[%s25878_s3 + $0x55c] sm:$0xf0] }
 0x140   :  { %v11270_v6 = vor.u32 %v16747_v60, %v11269_v7  ;;  %v11198_v56 = vor.u32 %v16729_v54, %v11197_v53  ;;  %v11093_v7 = vld [vmem:[%s25878_s3 + $0x480] sm:$0xf]  ;;  %v16704_v60 = vld [vmem:[%s25878_s3 + $0x494] sm:$0xf0]  ;;  %v16727_v54 = vld [vmem:[%s25878_s3 + $0x554] sm:$0xf] }
 0x141   :  { %v829_v61 = vmax.f32 %v826_v55, 0.0  ;;  %v11122_v55 = vor.u32 %v16707_v50, %v11119_v52  ;;  %v11094_v62 = vor.u32 %v16704_v60, %v11093_v7  ;;  %v11205_v50 = vld [vmem:[%s25878_s3 + $0x550] sm:$0xf]  ;;  %v11182_v7 = vor.u32 %v16724_v58, %v11181_v57  ;;  %v11183_v60 = vld [vmem:[%s25878_s3 + $0x538] sm:$0xf0] }
 0x142   :  { %1517 = vmatpush.bf16.msrb.mxu2 %v11166_v18 }
 0x143   :  { %v830_v0 = vpack.c.bf16 %v829_v61, %v829_v61  ;;  %v16701_v61 = vld [vmem:[%s25878_s3 + $0x484] sm:$0xf] }
 0x144   :  { %v11098_v3 = vor.u32 %v16701_v61, %v11095_v63  ;;  %v16718_v63 = vld [vmem:[%s25878_s3 + $0x504] sm:$0xf0] }
 0x145   :  { %1128 = vmatmul.bf16.vlgmr.msrb.gmra.mxu3 %v830_v0  ;;  %1141 = vmatmul.bf16.vlgmr.msra.gmra.mxu0 %v830_v0 }
 0x146   :  { %1154 = vmatmul.bf16.vlgmr.msra.gmra.mxu1 %v830_v0  ;;  %1167 = vmatmul.bf16.vlgmr.msra.gmra.mxu2 %v830_v0  ;;  %v827_v15 = vpop.f32.mrf.mxu2 }
 0x147   :  { %1526 = vmatpush.bf16.msra.mxu1 %v11266_v1  ;;  %1539 = vmatpush.bf16.msrb.mxu3 %v11270_v6  ;;  %v16723_v1 = vld [vmem:[%s25878_s3 + $0x52c] sm:$0xf0]  ;;  %v11175_v6 = vld [vmem:[%s25878_s3 + $0x530] sm:$0xf0]  ;;  %v11149_v15 = vld [vmem:[%s25878_s3 + $0x4e8] sm:$0xf] }
 0x148   :  { %1552 = vmatpush.bf16.msra.mxu0 %v11274_v8  ;;  %1518 = vmatpush.bf16.msrb.mxu2 %v11142_v29  ;;  %v11277_v8 = vld [vmem:[%s25878_s3 + $0x5e0] sm:$0xf]  ;;  %v11178_v9 = vor.u32 %v16720_v5, %v11175_v6  ;;  %v11255_v29 = vld [vmem:[%s25878_s3 + $0x5c8] sm:$0xf0]  ;;  %v16712_v6 = vld [vmem:[%s25878_s3 + $0x4d4] sm:$0xf0] }
 0x149   :  { %v11278_v13 = vor.u32 %v16748_v10, %v11277_v8  ;;  %v11133_v5 = vld [vmem:[%s25878_s3 + $0x4c0] sm:$0xf]  ;;  %v16709_v8 = vld [vmem:[%s25878_s3 + $0x4c4] sm:$0xf]  ;;  %v11135_v10 = vld [vmem:[%s25878_s3 + $0x4d8] sm:$0xf0] }
 0x14b   :  { %1527 = vmatpush.bf16.msra.mxu1 %v11242_v16  ;;  %1540 = vmatpush.bf16.msrb.mxu3 %v11246_v21  ;;  %v16717_v16 = vld [vmem:[%s25878_s3 + $0x4fc] sm:$0xf0]  ;;  %v11253_v21 = vld [vmem:[%s25878_s3 + $0x5b0] sm:$0xf] }
 0x14c   :  { %1553 = vmatpush.bf16.msra.mxu0 %v11250_v22  ;;  %1519 = vmatpush.bf16.msrb.mxu2 %v11118_v51  ;;  %v11150_v18 = vor.u32 %v16717_v16, %v11149_v15  ;;  %v16742_v22 = vld [vmem:[%s25878_s3 + $0x5c4] sm:$0xf0]  ;;  %v16703_v15 = vld [vmem:[%s25878_s3 + $0x494] sm:$0xf]  ;;  %v11111_v16 = vld [vmem:[%s25878_s3 + $0x4a8] sm:$0xf0] }
 0x14d   :  { %v11254_v27 = vor.u32 %v16742_v22, %v11253_v21  ;;  %v16730_v51 = vld [vmem:[%s25878_s3 + $0x564] sm:$0xf0]  ;;  %v11114_v22 = vor.u32 %v16703_v15, %v11111_v16  ;;  %v16789_v16 = vld [vmem:[%s25878_s3 + $0x73c] sm:$0xf0] }
 0x14e   :  { %v11206_v53 = vor.u32 %v16730_v51, %v11205_v50  ;;  %v16795_v50 = vld [vmem:[%s25878_s3 + $0x76c] sm:$0xf0]  ;;  %v11487_v15 = vld [vmem:[%s25878_s3 + $0x728] sm:$0xf] }
 0x14f   :  { %1528 = vmatpush.bf16.msra.mxu1 %v11218_v28  ;;  %1541 = vmatpush.bf16.msrb.mxu3 %v11222_v47  ;;  %v16739_v28 = vld [vmem:[%s25878_s3 + $0x5b4] sm:$0xf]  ;;  %v11101_v47 = vld [vmem:[%s25878_s3 + $0x488] sm:$0xf] }
 0x150   :  { %1554 = vmatpush.bf16.msra.mxu0 %v11226_v20  ;;  %1520 = vmatpush.bf16.msrb.mxu2 %v11094_v62  ;;  %v11258_v30 = vor.u32 %v16739_v28, %v11255_v29  ;;  %v16702_v20 = vld [vmem:[%s25878_s3 + $0x48c] sm:$0xf]  ;;  %v11102_v48 = vor.u32 %v16705_v25, %v11101_v47  ;;  %v11157_v62 = vld [vmem:[%s25878_s3 + $0x4f0] sm:$0xf]  ;;  %v16791_v25 = vld [vmem:[%s25878_s3 + $0x754] sm:$0xf] }
 0x151   :  { %v11106_v52 = vor.u32 %v16702_v20, %v11103_v49  ;;  %v11505_v20 = vld [vmem:[%s25878_s3 + $0x768] sm:$0xf0]  ;;  %v11511_v49 = vld [vmem:[%s25878_s3 + $0x758] sm:$0xf] }
 0x153   :  { %1529 = vmatpush.bf16.msra.mxu1 %v11194_v32  ;;  %1542 = vmatpush.bf16.msrb.mxu3 %v11198_v56  ;;  %v16711_v32 = vld [vmem:[%s25878_s3 + $0x4cc] sm:$0xf0] }
 0x154   :  { %1555 = vmatpush.bf16.msra.mxu0 %v11202_v59  ;;  %1565 = vmatpush.bf16.msra.mxu2 %v11278_v13  ;;  %v11126_v36 = vor.u32 %v16711_v32, %v11125_v31  ;;  %v16721_v59 = vld [vmem:[%s25878_s3 + $0x524] sm:$0xf]  ;;  %v11138_v13 = vor.u32 %v16709_v8, %v11135_v10  ;;  %v16794_v31 = vld [vmem:[%s25878_s3 + $0x764] sm:$0xf0]  ;;  %v11407_v10 = vld [vmem:[%s25878_s3 + $0x690] sm:$0xf] }
 0x155   :  { %1180 = vmatmul.bf16.vlgmr.msra.gmra.mxu3 %v830_v0  ;;  %1193 = vmatmul.bf16.vlgmr.msrb.gmra.mxu0 %v830_v0  ;;  %v11173_v0 = vld [vmem:[%s25878_s3 + $0x518] sm:$0xf]  ;;  %v11186_v61 = vor.u32 %v16721_v59, %v11183_v60  ;;  %v16785_v59 = vld [vmem:[%s25878_s3 + $0x724] sm:$0xf]  ;;  %v11512_v60 = vor.u32 %v16795_v50, %v11511_v49  ;;  %v16774_v50 = vld [vmem:[%s25878_s3 + $0x6cc] sm:$0xf] }
 0x156   :  { %11042 = vmatmul.msk.bf16.vlgmr.msrb.gmra.mxu1 %vm35_vm1, %v11041_v37  ;;  %v11174_v4 = vor.u32 %v16723_v1, %v11173_v0  ;;  %v11127_v37 = vld [vmem:[%s25878_s3 + $0x4d0] sm:$0xf0]  ;;  %v11159_v1 = vld [vmem:[%s25878_s3 + $0x508] sm:$0xf0] }
 0x157   :  { %1530 = vmatpush.bf16.msra.mxu1 %v11170_v38  ;;  %v11229_v38 = vld [vmem:[%s25878_s3 + $0x580] sm:$0xf]  ;;  %v11130_v42 = vor.u32 %v16708_v33, %v11127_v37  ;;  %v16715_v0 = vld [vmem:[%s25878_s3 + $0x4f4] sm:$0xf]  ;;  %v16782_v37 = vld [vmem:[%s25878_s3 + $0x704] sm:$0xf0] }
 0x158   :  { %1543 = vmatpush.bf16.msrb.mxu3 %v11174_v4  ;;  %1556 = vmatpush.bf16.msra.mxu0 %v11178_v9  ;;  %v11162_v4 = vor.u32 %v16715_v0, %v11159_v1  ;;  %v11134_v9 = vor.u32 %v16712_v6, %v11133_v5  ;;  %v11457_v1 = vld [vmem:[%s25878_s3 + $0x708] sm:$0xf0]  ;;  %v16773_v5 = vld [vmem:[%s25878_s3 + $0x6c4] sm:$0xf]  ;;  %v11433_v6 = vld [vmem:[%s25878_s3 + $0x6d8] sm:$0xf0] }
 0x159   :  { %1566 = vmatpush.bf16.msra.mxu2 %v11254_v27  ;;  %v11436_v8 = vor.u32 %v16773_v5, %v11433_v6  ;;  %v11521_v5 = vld [vmem:[%s25878_s3 + $0x778] sm:$0xf0] }
 0x15b   :  { %1531 = vmatpush.bf16.msra.mxu1 %v11146_v43  ;;  %v11230_v43 = vor.u32 %v16736_v41, %v11229_v38 }
 0x15c   :  { %1544 = vmatpush.bf16.msrb.mxu3 %v11150_v18  ;;  %1557 = vmatpush.bf16.msra.mxu0 %v11154_v23 }
 0x15d   :  { %1567 = vmatpush.bf16.msra.mxu2 %v11230_v43 }
 0x15f   :  { %1532 = vmatpush.bf16.msra.mxu1 %v11122_v55  ;;  %v11207_v55 = vld [vmem:[%s25878_s3 + $0x568] sm:$0xf0] }
 0x160   :  { %1545 = vmatpush.bf16.msrb.mxu3 %v11126_v36  ;;  %1558 = vmatpush.bf16.msra.mxu0 %v11130_v42  ;;  %v11210_v56 = vor.u32 %v16727_v54, %v11207_v55  ;;  %v11455_v36 = vld [vmem:[%s25878_s3 + $0x6f0] sm:$0xf] }
 0x161   :  { %1568 = vmatpush.bf16.msra.mxu2 %v11206_v53  ;;  %v11456_v43 = vor.u32 %v16782_v37, %v11455_v36  ;;  %v11513_v53 = vld [vmem:[%s25878_s3 + $0x770] sm:$0xf0]  ;;  %v16780_v36 = vld [vmem:[%s25878_s3 + $0x6fc] sm:$0xf] }
 0x163   :  { %1533 = vmatpush.bf16.msra.mxu1 %v11098_v3  ;;  %v11158_v3 = vor.u32 %v16718_v63, %v11157_v62 }
 0x164   :  { %1546 = vmatpush.bf16.msrb.mxu3 %v11102_v48  ;;  %1559 = vmatpush.bf16.msra.mxu0 %v11106_v52  ;;  %v16776_v48 = vld [vmem:[%s25878_s3 + $0x6d4] sm:$0xf0]  ;;  %v16792_v52 = vld [vmem:[%s25878_s3 + $0x75c] sm:$0xf] }
 0x165   :  { %1569 = vmatpush.bf16.msra.mxu2 %v11182_v7  ;;  %v11481_v7 = vld [vmem:[%s25878_s3 + $0x738] sm:$0xf0] }
 0x166   :  { %v11484_v0 = vor.u32 %v16785_v59, %v11481_v7  ;;  %v11415_v7 = vld [vmem:[%s25878_s3 + $0x698] sm:$0xf] }
 0x167   :  { %1578 = vmatpush.bf16.msrb.mxu1 %v11282_v14  ;;  %v16706_v14 = vld [vmem:[%s25878_s3 + $0x4a4] sm:$0xf0] }
 0x168   :  { %1609 = vmatpush.bf16.msra.mxu3 %v17889_v2  ;;  %v11110_v21 = vor.u32 %v16706_v14, %v11109_v11  ;;  %v16770_v11 = vld [vmem:[%s25878_s3 + $0x6a4] sm:$0xf0]  ;;  %v11409_v14 = vld [vmem:[%s25878_s3 + $0x6a8] sm:$0xf0] }
 0x169   :  { %1570 = vmatpush.bf16.msra.mxu2 %v11158_v3 }
 0x16b   :  { %1579 = vmatpush.bf16.msrb.mxu1 %v11258_v30 }
 0x16d   :  { %1571 = vmatpush.bf16.msra.mxu2 %v11134_v9  ;;  %v11283_v9 = vld [vmem:[%s25875_s0 + $0x4] sm:$0x1] }
 0x16f   :  { %1580 = vmatpush.bf16.msrb.mxu1 %v11234_v46  ;;  %v19145_v46 = vld [vmem:[%s25877_s2] ss:$0 sm:$0xff] }
 0x171   :  { %1572 = vmatpush.bf16.msra.mxu2 %v11110_v21  ;;  %v11488_v21 = vor.u32 %v16789_v16, %v11487_v15 }
 0x173   :  { %1581 = vmatpush.bf16.msrb.mxu1 %v11210_v56  ;;  %v11508_v56 = vor.u32 %v16791_v25, %v11505_v20  ;;  %v11361_v25 = vld [vmem:[%s25878_s3 + $0x648] sm:$0xf0]  ;;  %v11439_v20 = vld [vmem:[%s25878_s3 + $0x6c8] sm:$0xf] }
 0x177   :  { %1582 = vmatpush.bf16.msrb.mxu1 %v11186_v61  ;;  %v11516_v61 = vor.u32 %v16792_v52, %v11513_v53  ;;  %v11335_v52 = vld [vmem:[%s25878_s3 + $0x600] sm:$0xf] }
 0x17b   :  { %1583 = vmatpush.bf16.msrb.mxu1 %v11162_v4 }
 0x17f   :  { %1584 = vmatpush.bf16.msrb.mxu1 %v11138_v13  ;;  %v11408_v13 = vor.u32 %v16770_v11, %v11407_v10  ;;  %v16762_v10 = vld [vmem:[%s25878_s3 + $0x66c] sm:$0xf] }
 0x183   :  { %1585 = vmatpush.bf16.msrb.mxu1 %v11114_v22  ;;  %v16786_v22 = vld [vmem:[%s25878_s3 + $0x72c] sm:$0xf] }
 0x1c2   :  { %v1142_v12 = vpop.f32.mrf.mxu0 }
 0x1c3   :  { %v19110_v17 = vadd.f32 %v1142_v12, %v18703_v35  ;;  %v1155_v18 = vpop.f32.mrf.mxu1  ;;  %v16767_v12 = vld [vmem:[%s25878_s3 + $0x694] sm:$0xf] }
 0x1c4   :  { %v19113_v19 = vadd.f32 %v1155_v18, %v18810_v39  ;;  %v11503_v39 = vld [vmem:[%s25878_s3 + $0x750] sm:$0xf]  ;;  %v11412_v18 = vor.u32 %v16767_v12, %v11409_v14  ;;  %v11393_v12 = vld [vmem:[%s25878_s3 + $0x680] sm:$0xf0]  ;;  %v16790_v14 = vld [vmem:[%s25878_s3 + $0x744] sm:$0xf0] }
 0x1c5   :  { %v11504_v32 = vor.u32 %v16794_v31, %v11503_v39  ;;  %v16761_v39 = vld [vmem:[%s25878_s3 + $0x664] sm:$0xf]  ;;  %v11396_v15 = vor.u32 %v16762_v10, %v11393_v12  ;;  %v11353_v12 = vld [vmem:[%s25878_s3 + $0x628] sm:$0xf0] }
 0x1c7   :  { %1906 = vmatpush.bf16.msrb.mxu0 %v11504_v32  ;;  %v11385_v32 = vld [vmem:[%s25878_s3 + $0x678] sm:$0xf0] }
 0x1c8   :  { %v1129_v23 = vpop.f32.mrf.mxu3 }
 0x1c9   :  { %v19116_v27 = vadd.f32 %v1129_v23, %v18700_v34  ;;  %v1168_v28 = vpop.f32.mrf.mxu2  ;;  %v11479_v34 = vld [vmem:[%s25878_s3 + $0x720] sm:$0xf]  ;;  %v11489_v23 = vld [vmem:[%s25878_s3 + $0x740] sm:$0xf0] }
 0x1ca   :  { %v19119_v29 = vadd.f32 %v1168_v28, %v18813_v40  ;;  %v1144_v35 = vpop.f32.mrf.mxu0  ;;  %v16788_v40 = vld [vmem:[%s25878_s3 + $0x734] sm:$0xf0]  ;;  %v11492_v28 = vor.u32 %v16786_v22, %v11489_v23 }
 0x1cb   :  { %v1157_v30 = vpop.f32.mrf.mxu1  ;;  %v11480_v33 = vor.u32 %v16788_v40, %v11479_v34  ;;  %v11383_v35 = vld [vmem:[%s25878_s3 + $0x660] sm:$0xf]  ;;  %v11388_v34 = vor.u32 %v16761_v39, %v11385_v32  ;;  %v11463_v40 = vld [vmem:[%s25878_s3 + $0x6f8] sm:$0xf]  ;;  %v11369_v39 = vld [vmem:[%s25878_s3 + $0x650] sm:$0xf0] }
 0x1cc   :  { %v16764_v30 = vld [vmem:[%s25878_s3 + $0x674] sm:$0xf0] }
 0x1cd   :  { %1907 = vmatpush.bf16.msrb.mxu0 %v11480_v33  ;;  %v11384_v31 = vor.u32 %v16764_v30, %v11383_v35  ;;  %v16783_v33 = vld [vmem:[%s25878_s3 + $0x70c] sm:$0xf0]  ;;  %v11367_v23 = vld [vmem:[%s25878_s3 + $0x638] sm:$0xf]  ;;  %v16756_v35 = vld [vmem:[%s25878_s3 + $0x63c] sm:$0xf] }
 0x1ce   :  { %v11464_v37 = vor.u32 %v16783_v33, %v11463_v40  ;;  %v16784_v32 = vld [vmem:[%s25878_s3 + $0x714] sm:$0xf0]  ;;  %v16781_v33 = vld [vmem:[%s25878_s3 + $0x704] sm:$0xf] }
 0x1d0   :  { %v1131_v38 = vpop.f32.mrf.mxu3 }
 0x1d1   :  { %v1170_v41 = vpop.f32.mrf.mxu2  ;;  %1908 = vmatpush.bf16.msrb.mxu0 %v11456_v43  ;;  %v11465_v38 = vld [vmem:[%s25878_s3 + $0x710] sm:$0xf0]  ;;  %v16758_v43 = vld [vmem:[%s25878_s3 + $0x644] sm:$0xf0] }
 0x1d2   :  { %v1194_v42 = vpop.f32.mrf.mxu0  ;;  %v11468_v41 = vor.u32 %v16780_v36, %v11465_v38  ;;  %v11473_v36 = vld [vmem:[%s25878_s3 + $0x718] sm:$0xf0]  ;;  %v11343_v38 = vld [vmem:[%s25878_s3 + $0x608] sm:$0xf] }
 0x1d3   :  { %v19140_v44 = vadd.f32 %v1194_v42, %v18789_v26  ;;  %v1218_v45 = vpop.f32.mrf.mxu1  ;;  %v11431_v26 = vld [vmem:[%s25878_s3 + $0x6c0] sm:$0xf]  ;;  %v11359_v42 = vld [vmem:[%s25878_s3 + $0x630] sm:$0xf] }
 0x1d4   :  { %v1219_v47 = vadd.f32 %v19145_v46, %v1218_v45  ;;  %v11432_v57 = vor.u32 %v16776_v48, %v11431_v26  ;;  %v16755_v45 = vld [vmem:[%s25878_s3 + $0x634] sm:$0xf]  ;;  %v16777_v26 = vld [vmem:[%s25878_s3 + $0x6dc] sm:$0xf0] }
 0x1d5   :  { %v11364_v48 = vor.u32 %v16755_v45, %v11361_v25  ;;  %v11440_v49 = vor.u32 %v16777_v26, %v11439_v20  ;;  %v11345_v45 = vld [vmem:[%s25878_s3 + $0x620] sm:$0xf0]  ;;  %v16778_v25 = vld [vmem:[%s25878_s3 + $0x6e4] sm:$0xf0] }
 0x1d6   :  { %v1222_v51 = vmax.f32 %v1219_v47, 0.0  ;;  %1909 = vmatpush.bf16.msrb.mxu0 %v11432_v57  ;;  %v11360_v47 = vor.u32 %v16758_v43, %v11359_v42  ;;  %v16750_v42 = vld [vmem:[%s25878_s3 + $0x60c] sm:$0xf] }
 0x1d7   :  { %v11348_v20 = vor.u32 %v16750_v42, %v11345_v45  ;;  %v11747_v45 = vld [vmem:[%s25878_s3 + $0x8e8] sm:$0xf0] }
 0x1d8   :  { %v1223_v54 = vpack.c.bf16 %v1222_v51, %v1222_v51  ;;  %v1181_v55 = vpop.f32.mrf.mxu3  ;;  %v11441_v51 = vld [vmem:[%s25878_s3 + $0x6e0] sm:$0xf0] }
 0x1d9   :  { %v19173_v58 = vadd.f32 %v1181_v55, %v18787_v24  ;;  %v16779_v24 = vld [vmem:[%s25878_s3 + $0x6f4] sm:$0xf]  ;;  %v11444_v53 = vor.u32 %v16774_v50, %v11441_v51  ;;  %v16749_v55 = vld [vmem:[%s25878_s3 + $0x604] sm:$0xf]  ;;  %v11423_v51 = vld [vmem:[%s25878_s3 + $0x6a0] sm:$0xf] }
 0x1da   :  { %1521 = vmatmul.bf16.vlgmr.msrb.gmra.mxu2 %v1223_v54  ;;  %1534 = vmatmul.bf16.vlgmr.msra.gmra.mxu1 %v1223_v54  ;;  %v1196_v62 = vpop.f32.mrf.mxu0  ;;  %v11460_v4 = vor.u32 %v16779_v24, %v11457_v1  ;;  %v16796_v24 = vld [vmem:[%s25878_s3 + $0x774] sm:$0xf0] }
 0x1db   :  { %1547 = vmatmul.bf16.vlgmr.msrb.gmra.mxu3 %v1223_v54  ;;  %1560 = vmatmul.bf16.vlgmr.msra.gmra.mxu0 %v1223_v54  ;;  %v1220_v63 = vpop.f32.mrf.mxu1 }
 0x1dc   :  { %1919 = vmatpush.bf16.msrb.mxu2 %v11508_v56  ;;  %1932 = vmatpush.bf16.msrb.mxu3 %v11512_v60  ;;  %v11337_v56 = vld [vmem:[%s25878_s3 + $0x618] sm:$0xf0]  ;;  %v16771_v60 = vld [vmem:[%s25878_s3 + $0x6ac] sm:$0xf0]  ;;  %v11417_v63 = vld [vmem:[%s25878_s3 + $0x6b0] sm:$0xf0] }
 0x1dd   :  { %1945 = vmatpush.bf16.msra.mxu1 %v11516_v61  ;;  %1910 = vmatpush.bf16.msrb.mxu0 %v11408_v13  ;;  %v11340_v59 = vor.u32 %v16749_v55, %v11337_v56  ;;  %v16768_v61 = vld [vmem:[%s25878_s3 + $0x69c] sm:$0xf]  ;;  %v11416_v62 = vor.u32 %v16771_v60, %v11415_v7  ;;  %v11495_v13 = vld [vmem:[%s25878_s3 + $0x730] sm:$0xf]  ;;  %v16763_v7 = vld [vmem:[%s25878_s3 + $0x674] sm:$0xf] }
 0x1de   :  { %v11420_v1 = vor.u32 %v16768_v61, %v11417_v63  ;;  %v11496_v16 = vor.u32 %v16790_v14, %v11495_v13  ;;  %v11425_v55 = vld [vmem:[%s25878_s3 + $0x6b8] sm:$0xf0] }
 0x1e0   :  { %v1183_v3 = vpop.f32.mrf.mxu3  ;;  %1920 = vmatpush.bf16.msrb.mxu2 %v11484_v0  ;;  %1933 = vmatpush.bf16.msrb.mxu3 %v11488_v21  ;;  %v11519_v0 = vld [vmem:[%s25878_s3 + $0x760] sm:$0xf]  ;;  %v11497_v21 = vld [vmem:[%s25878_s3 + $0x748] sm:$0xf0] }
 0x1e1   :  { %1946 = vmatpush.bf16.msra.mxu1 %v11492_v28  ;;  %1911 = vmatpush.bf16.msrb.mxu0 %v11384_v31  ;;  %v11520_v3 = vor.u32 %v16796_v24, %v11519_v0  ;;  %v16759_v28 = vld [vmem:[%s25878_s3 + $0x64c] sm:$0xf0]  ;;  %v11471_v31 = vld [vmem:[%s25878_s3 + $0x700] sm:$0xf] }
 0x1e2   :  { %v11368_v30 = vor.u32 %v16759_v28, %v11367_v23  ;;  %v11472_v40 = vor.u32 %v16784_v32, %v11471_v31  ;;  %v16836_v31 = vld [vmem:[%s25878_s3 + $0x8b4] sm:$0xf0] }
 0x1e4   :  { %1921 = vmatpush.bf16.msrb.mxu2 %v11460_v4  ;;  %1934 = vmatpush.bf16.msrb.mxu3 %v11464_v37  ;;  %v16793_v4 = vld [vmem:[%s25878_s3 + $0x764] sm:$0xf]  ;;  %v11476_v37 = vor.u32 %v16781_v33, %v11473_v36  ;;  %v16830_v33 = vld [vmem:[%s25878_s3 + $0x884] sm:$0xf0] }
 0x1e5   :  { %1947 = vmatpush.bf16.msra.mxu1 %v11468_v41  ;;  %1912 = vmatpush.bf16.msrb.mxu0 %v11360_v47  ;;  %v11524_v6 = vor.u32 %v16793_v4, %v11521_v5  ;;  %v16753_v41 = vld [vmem:[%s25878_s3 + $0x61c] sm:$0xf0]  ;;  %v11447_v47 = vld [vmem:[%s25878_s3 + $0x6d0] sm:$0xf]  ;;  %v16757_v5 = vld [vmem:[%s25878_s3 + $0x644] sm:$0xf] }
 0x1e6   :  { %v11344_v43 = vor.u32 %v16753_v41, %v11343_v38  ;;  %v11448_v26 = vor.u32 %v16778_v25, %v11447_v47  ;;  %v11673_v47 = vld [vmem:[%s25878_s3 + $0x840] sm:$0xf]  ;;  %v11753_v25 = vld [vmem:[%s25878_s3 + $0x8d8] sm:$0xf] }
 0x1e8   :  { %1922 = vmatpush.bf16.msrb.mxu2 %v11436_v8  ;;  %1935 = vmatpush.bf16.msrb.mxu3 %v11440_v49  ;;  %v11391_v8 = vld [vmem:[%s25878_s3 + $0x668] sm:$0xf]  ;;  %v11449_v49 = vld [vmem:[%s25878_s3 + $0x6e8] sm:$0xf0] }
 0x1e9   :  { %1948 = vmatpush.bf16.msra.mxu1 %v11444_v53  ;;  %v16769_v53 = vld [vmem:[%s25878_s3 + $0x6a4] sm:$0xf] }
 0x1ea   :  { %1573 = vmatmul.bf16.vlgmr.msra.gmra.mxu2 %v1223_v54  ;;  %1586 = vmatmul.bf16.vlgmr.msrb.gmra.mxu1 %v1223_v54  ;;  %v16752_v54 = vld [vmem:[%s25878_s3 + $0x614] sm:$0xf0]  ;;  %v11428_v56 = vor.u32 %v16769_v53, %v11425_v55  ;;  %v16833_v53 = vld [vmem:[%s25878_s3 + $0x8a4] sm:$0xf] }
 0x1eb   :  { %11284 = vmatmul.msk.bf16.vlgmr.msra.gmra.mxu3 %vm35_vm1, %v11283_v9  ;;  %v11336_v57 = vor.u32 %v16752_v54, %v11335_v52  ;;  %v16765_v9 = vld [vmem:[%s25878_s3 + $0x67c] sm:$0xf0]  ;;  %v16772_v52 = vld [vmem:[%s25878_s3 + $0x6b4] sm:$0xf0] }
 0x1ec   :  { %1923 = vmatpush.bf16.msrb.mxu2 %v11412_v18  ;;  %1936 = vmatpush.bf16.msrb.mxu3 %v11416_v62  ;;  %v11392_v11 = vor.u32 %v16765_v9, %v11391_v8  ;;  %v16787_v18 = vld [vmem:[%s25878_s3 + $0x734] sm:$0xf]  ;;  %v11424_v54 = vor.u32 %v16772_v52, %v11423_v51  ;;  %v11401_v62 = vld [vmem:[%s25878_s3 + $0x688] sm:$0xf0]  ;;  %v11351_v9 = vld [vmem:[%s25878_s3 + $0x610] sm:$0xf] }
 0x1ed   :  { %1913 = vmatpush.bf16.msrb.mxu0 %v11336_v57  ;;  %1949 = vmatpush.bf16.msra.mxu1 %v11420_v1  ;;  %v11500_v22 = vor.u32 %v16787_v18, %v11497_v21  ;;  %v11399_v57 = vld [vmem:[%s25878_s3 + $0x670] sm:$0xf]  ;;  %v11404_v24 = vor.u32 %v16763_v7, %v11401_v62  ;;  %v11375_v1 = vld [vmem:[%s25878_s3 + $0x640] sm:$0xf] }
 0x1f0   :  { %1924 = vmatpush.bf16.msrb.mxu2 %v11388_v34  ;;  %1937 = vmatpush.bf16.msrb.mxu3 %v11392_v11  ;;  %v11372_v34 = vor.u32 %v16756_v35, %v11369_v39  ;;  %v16751_v11 = vld [vmem:[%s25878_s3 + $0x614] sm:$0xf]  ;;  %v11745_v35 = vld [vmem:[%s25878_s3 + $0x8d0] sm:$0xf]  ;;  %v11721_v39 = vld [vmem:[%s25878_s3 + $0x8a0] sm:$0xf] }
 0x1f1   :  { %1958 = vmatpush.bf16.msra.mxu0 %v11520_v3  ;;  %1950 = vmatpush.bf16.msra.mxu1 %v11396_v15  ;;  %v16760_v3 = vld [vmem:[%s25878_s3 + $0x654] sm:$0xf0] }
 0x1f4   :  { %1925 = vmatpush.bf16.msrb.mxu2 %v11364_v48  ;;  %1938 = vmatpush.bf16.msrb.mxu3 %v11368_v30  ;;  %v16775_v48 = vld [vmem:[%s25878_s3 + $0x6d4] sm:$0xf] }
 0x1f5   :  { %1959 = vmatpush.bf16.msra.mxu0 %v11496_v16  ;;  %1951 = vmatpush.bf16.msra.mxu1 %v11372_v34  ;;  %v11452_v50 = vor.u32 %v16775_v48, %v11449_v49  ;;  %v11722_v34 = vor.u32 %v16836_v31, %v11721_v39  ;;  %v16840_v48 = vld [vmem:[%s25878_s3 + $0x8dc] sm:$0xf]  ;;  %v11755_v49 = vld [vmem:[%s25878_s3 + $0x8f0] sm:$0xf0] }
 0x1f6   :  { %v16828_v39 = vld [vmem:[%s25878_s3 + $0x87c] sm:$0xf] }
 0x1f8   :  { %1926 = vmatpush.bf16.msrb.mxu2 %v11340_v59  ;;  %1939 = vmatpush.bf16.msrb.mxu3 %v11344_v43  ;;  %v16766_v59 = vld [vmem:[%s25878_s3 + $0x684] sm:$0xf0]  ;;  %v16839_v43 = vld [vmem:[%s25878_s3 + $0x8d4] sm:$0xf] }
 0x1f9   :  { %1960 = vmatpush.bf16.msra.mxu0 %v11472_v40  ;;  %1952 = vmatpush.bf16.msra.mxu1 %v11348_v20  ;;  %v11400_v61 = vor.u32 %v16766_v59, %v11399_v57  ;;  %v11697_v40 = vld [vmem:[%s25878_s3 + $0x870] sm:$0xf]  ;;  %v11750_v51 = vor.u32 %v16839_v43, %v11747_v45  ;;  %v16825_v43 = vld [vmem:[%s25878_s3 + $0x85c] sm:$0xf0] }
 0x1fa   :  { %v16843_v20 = vld [vmem:[%s25878_s3 + $0x8ec] sm:$0xf0] }
 0x1fb   :  { %v11754_v55 = vor.u32 %v16843_v20, %v11753_v25  ;;  %v11683_v25 = vld [vmem:[%s25878_s3 + $0x860] sm:$0xf0]  ;;  %v11577_v20 = vld [vmem:[%s25878_s3 + $0x780] sm:$0xf] }
 0x1fc   :  { %1971 = vmatpush.bf16.msra.mxu2 %v11524_v6  ;;  %2002 = vmatpush.bf16.msra.mxu3 %v17889_v2  ;;  %v11376_v6 = vor.u32 %v16760_v3, %v11375_v1  ;;  %v11525_v3 = vld [vmem:[%s25875_s0 + $0x5] sm:$0x1] }
 0x1fd   :  { %1961 = vmatpush.bf16.msra.mxu0 %v11448_v26 }
 0x200   :  { %1972 = vmatpush.bf16.msra.mxu2 %v11500_v22  ;;  %v11356_v22 = vor.u32 %v16751_v11, %v11353_v12 }
 0x201   :  { %1962 = vmatpush.bf16.msra.mxu0 %v11424_v54  ;;  %v11723_v54 = vld [vmem:[%s25878_s3 + $0x8b8] sm:$0xf0] }
 0x202   :  { %v11726_v7 = vor.u32 %v16833_v53, %v11723_v54  ;;  %v11657_v53 = vld [vmem:[%s25878_s3 + $0x818] sm:$0xf]  ;;  %v16819_v54 = vld [vmem:[%s25878_s3 + $0x82c] sm:$0xf0] }
 0x204   :  { %1973 = vmatpush.bf16.msra.mxu2 %v11476_v37  ;;  %v11698_v37 = vor.u32 %v16830_v33, %v11697_v40  ;;  %v11601_v33 = vld [vmem:[%s25878_s3 + $0x7b0] sm:$0xf] }
 0x205   :  { %1963 = vmatpush.bf16.msra.mxu0 %v11400_v61  ;;  %v11699_v61 = vld [vmem:[%s25878_s3 + $0x888] sm:$0xf0] }
 0x208   :  { %1974 = vmatpush.bf16.msra.mxu2 %v11452_v50 }
 0x209   :  { %1964 = vmatpush.bf16.msra.mxu0 %v11376_v6  ;;  %v16815_v6 = vld [vmem:[%s25878_s3 + $0x814] sm:$0xf] }
 0x20c   :  { %1975 = vmatpush.bf16.msra.mxu2 %v11428_v56  ;;  %v11758_v56 = vor.u32 %v16840_v48, %v11755_v49  ;;  %v16800_v48 = vld [vmem:[%s25878_s3 + $0x794] sm:$0xf0]  ;;  %v16797_v49 = vld [vmem:[%s25878_s3 + $0x784] sm:$0xf] }
 0x210   :  { %1976 = vmatpush.bf16.msra.mxu2 %v11404_v24  ;;  %v11675_v24 = vld [vmem:[%s25878_s3 + $0x858] sm:$0xf0] }
 0x257   :  { %v1535_v60 = vpop.f32.mrf.mxu1 }
 0x258   :  { %v19403_v63 = vadd.f32 %v1535_v60, %v19110_v17  ;;  %v1561_v0 = vpop.f32.mrf.mxu0  ;;  %v11377_v17 = vld [vmem:[%s25878_s3 + $0x658] sm:$0xf0]  ;;  %v16827_v60 = vld [vmem:[%s25878_s3 + $0x874] sm:$0xf] }
 0x259   :  { %v19412_v4 = vadd.f32 %v1561_v0, %v19119_v29  ;;  %v11380_v8 = vor.u32 %v16757_v5, %v11377_v17  ;;  %v16754_v29 = vld [vmem:[%s25878_s3 + $0x624] sm:$0xf0]  ;;  %v11702_v62 = vor.u32 %v16827_v60, %v11699_v61  ;;  %v16821_v0 = vld [vmem:[%s25878_s3 + $0x844] sm:$0xf]  ;;  %v11649_v5 = vld [vmem:[%s25878_s3 + $0x810] sm:$0xf] }
 0x25a   :  { %v11352_v18 = vor.u32 %v16754_v29, %v11351_v9  ;;  %v11678_v1 = vor.u32 %v16821_v0, %v11675_v24  ;;  %v16818_v17 = vld [vmem:[%s25878_s3 + $0x824] sm:$0xf0]  ;;  %v11651_v9 = vld [vmem:[%s25878_s3 + $0x828] sm:$0xf0]  ;;  %v11763_v0 = vld [vmem:[%s25878_s3 + $0x8f8] sm:$0xf0] }
 0x25b   :  { %1977 = vmatpush.bf16.msra.mxu2 %v11380_v8  ;;  %v11650_v8 = vor.u32 %v16818_v17, %v11649_v5  ;;  %v11729_v29 = vld [vmem:[%s25878_s3 + $0x8a8] sm:$0xf]  ;;  %v11654_v11 = vor.u32 %v16815_v6, %v11651_v9  ;;  %v16810_v5 = vld [vmem:[%s25878_s3 + $0x7ec] sm:$0xf]  ;;  %v11635_v6 = vld [vmem:[%s25878_s3 + $0x800] sm:$0xf0] }
 0x25c   :  { %1965 = vmatpush.bf16.msra.mxu0 %v11352_v18  ;;  %v16838_v9 = vld [vmem:[%s25878_s3 + $0x8c4] sm:$0xf0] }
 0x25d   :  { %v1522_v10 = vpop.f32.mrf.mxu2 }
 0x25e   :  { %v19433_v13 = vadd.f32 %v1522_v10, %v19116_v27  ;;  %v1548_v14 = vpop.f32.mrf.mxu3  ;;  %v16842_v27 = vld [vmem:[%s25878_s3 + $0x8e4] sm:$0xf0]  ;;  %v16837_v10 = vld [vmem:[%s25878_s3 + $0x8bc] sm:$0xf0] }
 0x25f   :  { %v19436_v15 = vadd.f32 %v1548_v14, %v19113_v19  ;;  %v1537_v16 = vpop.f32.mrf.mxu1  ;;  %1978 = vmatpush.bf16.msra.mxu2 %v11356_v22  ;;  %v11746_v30 = vor.u32 %v16842_v27, %v11745_v35  ;;  %v11730_v12 = vor.u32 %v16837_v10, %v11729_v29  ;;  %v16834_v14 = vld [vmem:[%s25878_s3 + $0x8ac] sm:$0xf]  ;;  %v16812_v22 = vld [vmem:[%s25878_s3 + $0x7f4] sm:$0xf0]  ;;  %v11627_v35 = vld [vmem:[%s25878_s3 + $0x7f8] sm:$0xf0]  ;;  %v11638_v29 = vor.u32 %v16810_v5, %v11635_v6 }
 0x260   :  { %v1563_v21 = vpop.f32.mrf.mxu0  ;;  %v11731_v16 = vld [vmem:[%s25878_s3 + $0x8c0] sm:$0xf0]  ;;  %v11595_v6 = vld [vmem:[%s25878_s3 + $0x7a8] sm:$0xf0] }
 0x261   :  { %2299 = vmatpush.bf16.msrb.mxu1 %v11746_v30  ;;  %v11734_v18 = vor.u32 %v16834_v14, %v11731_v16  ;;  %v11625_v21 = vld [vmem:[%s25878_s3 + $0x7e0] sm:$0xf]  ;;  %v16831_v30 = vld [vmem:[%s25878_s3 + $0x88c] sm:$0xf0]  ;;  %v11609_v16 = vld [vmem:[%s25878_s3 + $0x7b8] sm:$0xf] }
 0x265   :  { %v1524_v23 = vpop.f32.mrf.mxu2  ;;  %2300 = vmatpush.bf16.msrb.mxu1 %v11722_v34  ;;  %v11707_v34 = vld [vmem:[%s25878_s3 + $0x890] sm:$0xf0] }
 0x266   :  { %v1550_v28 = vpop.f32.mrf.mxu3  ;;  %v16809_v23 = vld [vmem:[%s25878_s3 + $0x7e4] sm:$0xf]  ;;  %v11710_v40 = vor.u32 %v16828_v39, %v11707_v34  ;;  %v11715_v39 = vld [vmem:[%s25878_s3 + $0x898] sm:$0xf0]  ;;  %v11585_v34 = vld [vmem:[%s25878_s3 + $0x788] sm:$0xf] }
 0x267   :  { %v1587_v19 = vpop.f32.mrf.mxu1  ;;  %v11626_v28 = vor.u32 %v16812_v22, %v11625_v21  ;;  %v11630_v27 = vor.u32 %v16809_v23, %v11627_v35  ;;  %v16804_v21 = vld [vmem:[%s25878_s3 + $0x7bc] sm:$0xf]  ;;  %v11611_v23 = vld [vmem:[%s25878_s3 + $0x7d0] sm:$0xf0]  ;;  %v16832_v35 = vld [vmem:[%s25878_s3 + $0x894] sm:$0xf0] }
 0x268   :  { %v19451_v32 = vadd.f32 %v1587_v19, %v19140_v44  ;;  %v11705_v19 = vld [vmem:[%s25878_s3 + $0x878] sm:$0xf] }
 0x269   :  { %2301 = vmatpush.bf16.msrb.mxu1 %v11698_v37  ;;  %v11706_v31 = vor.u32 %v16831_v30, %v11705_v19  ;;  %v16803_v37 = vld [vmem:[%s25878_s3 + $0x7b4] sm:$0xf]  ;;  %v16829_v30 = vld [vmem:[%s25878_s3 + $0x884] sm:$0xf] }
 0x26d   :  { %v1574_v36 = vpop.f32.mrf.mxu2 }
 0x26e   :  { %v19460_v38 = vadd.f32 %v1574_v36, %v19173_v58  ;;  %v1611_v41 = vpop.f32.mrf.mxu3  ;;  %v16824_v58 = vld [vmem:[%s25878_s3 + $0x854] sm:$0xf0]  ;;  %v16806_v36 = vld [vmem:[%s25878_s3 + $0x7c4] sm:$0xf0] }
 0x26f   :  { %v1612_v44 = vadd.f32 %v19145_v46, %v1611_v41  ;;  %v1589_v42 = vpop.f32.mrf.mxu1  ;;  %v11674_v52 = vor.u32 %v16824_v58, %v11673_v47  ;;  %v11602_v41 = vor.u32 %v16806_v36, %v11601_v33  ;;  %v16822_v58 = vld [vmem:[%s25878_s3 + $0x84c] sm:$0xf] }
 0x270   :  { %v11681_v42 = vld [vmem:[%s25878_s3 + $0x848] sm:$0xf]  ;;  %v16798_v33 = vld [vmem:[%s25878_s3 + $0x78c] sm:$0xf] }
 0x271   :  { %v1615_v26 = vmax.f32 %v1612_v44, 0.0  ;;  %2302 = vmatpush.bf16.msrb.mxu1 %v11674_v52  ;;  %v11603_v44 = vld [vmem:[%s25878_s3 + $0x7c8] sm:$0xf0]  ;;  %v11682_v47 = vor.u32 %v16825_v43, %v11681_v42 }
 0x272   :  { %v11606_v45 = vor.u32 %v16803_v37, %v11603_v44  ;;  %v11587_v37 = vld [vmem:[%s25878_s3 + $0x7a0] sm:$0xf0]  ;;  %v16826_v44 = vld [vmem:[%s25878_s3 + $0x864] sm:$0xf0] }
 0x273   :  { %v1616_v50 = vpack.c.bf16 %v1615_v26, %v1615_v26  ;;  %v11686_v26 = vor.u32 %v16822_v58, %v11683_v25  ;;  %v11590_v42 = vor.u32 %v16798_v33, %v11587_v37  ;;  %v11665_v25 = vld [vmem:[%s25878_s3 + $0x820] sm:$0xf]  ;;  %v11989_v37 = vld [vmem:[%s25878_s3 + $0xa68] sm:$0xf0] }
 0x275   :  { %1914 = vmatmul.bf16.vlgmr.msrb.gmra.mxu0 %v1616_v50  ;;  %1927 = vmatmul.bf16.vlgmr.msrb.gmra.mxu2 %v1616_v50  ;;  %v1576_v57 = vpop.f32.mrf.mxu2 }
 0x276   :  { %1940 = vmatmul.bf16.vlgmr.msrb.gmra.mxu3 %v1616_v50  ;;  %1953 = vmatmul.bf16.vlgmr.msra.gmra.mxu1 %v1616_v50  ;;  %v1613_v59 = vpop.f32.mrf.mxu3  ;;  %v11659_v57 = vld [vmem:[%s25878_s3 + $0x830] sm:$0xf0] }
 0x277   :  { %2312 = vmatpush.bf16.msrb.mxu3 %v11750_v51  ;;  %2325 = vmatpush.bf16.msrb.mxu0 %v11754_v55  ;;  %v11578_v51 = vor.u32 %v16800_v48, %v11577_v20  ;;  %v16816_v55 = vld [vmem:[%s25878_s3 + $0x81c] sm:$0xf]  ;;  %v11761_v59 = vld [vmem:[%s25878_s3 + $0x8e0] sm:$0xf]  ;;  %v16820_v20 = vld [vmem:[%s25878_s3 + $0x834] sm:$0xf0] }
 0x278   :  { %2338 = vmatpush.bf16.msrb.mxu2 %v11758_v56  ;;  %2303 = vmatpush.bf16.msrb.mxu1 %v11650_v8  ;;  %v11658_v56 = vor.u32 %v16819_v54, %v11657_v53  ;;  %v11662_v60 = vor.u32 %v16816_v55, %v11659_v57  ;;  %v11737_v8 = vld [vmem:[%s25878_s3 + $0x8b0] sm:$0xf]  ;;  %v11666_v48 = vor.u32 %v16820_v20, %v11665_v25  ;;  %v16811_v53 = vld [vmem:[%s25878_s3 + $0x7f4] sm:$0xf]  ;;  %v16881_v25 = vld [vmem:[%s25878_s3 + $0xa24] sm:$0xf] }
 0x279   :  { %v11738_v10 = vor.u32 %v16838_v9, %v11737_v8  ;;  %v11965_v20 = vld [vmem:[%s25878_s3 + $0xa38] sm:$0xf0] }
 0x27b   :  { %2313 = vmatpush.bf16.msrb.mxu3 %v11726_v7  ;;  %2326 = vmatpush.bf16.msrb.mxu0 %v11730_v12  ;;  %v16844_v7 = vld [vmem:[%s25878_s3 + $0x8f4] sm:$0xf0]  ;;  %v11739_v12 = vld [vmem:[%s25878_s3 + $0x8c8] sm:$0xf0] }
 0x27c   :  { %2339 = vmatpush.bf16.msrb.mxu2 %v11734_v18  ;;  %2304 = vmatpush.bf16.msrb.mxu1 %v11626_v28  ;;  %v11762_v61 = vor.u32 %v16844_v7, %v11761_v59  ;;  %v16807_v18 = vld [vmem:[%s25878_s3 + $0x7cc] sm:$0xf0]  ;;  %v11713_v28 = vld [vmem:[%s25878_s3 + $0x880] sm:$0xf] }
 0x27d   :  { %v11610_v22 = vor.u32 %v16807_v18, %v11609_v16  ;;  %v11714_v19 = vor.u32 %v16832_v35, %v11713_v28  ;;  %v16884_v28 = vld [vmem:[%s25878_s3 + $0xa34] sm:$0xf0] }
 0x27f   :  { %2314 = vmatpush.bf16.msrb.mxu3 %v11702_v62  ;;  %2327 = vmatpush.bf16.msrb.mxu0 %v11706_v31  ;;  %v16841_v62 = vld [vmem:[%s25878_s3 + $0x8e4] sm:$0xf]  ;;  %v11718_v31 = vor.u32 %v16829_v30, %v11715_v39  ;;  %v16878_v30 = vld [vmem:[%s25878_s3 + $0xa04] sm:$0xf0] }
 0x280   :  { %2340 = vmatpush.bf16.msrb.mxu2 %v11710_v40  ;;  %2305 = vmatpush.bf16.msrb.mxu1 %v11602_v41  ;;  %v11766_v24 = vor.u32 %v16841_v62, %v11763_v0  ;;  %v16801_v40 = vld [vmem:[%s25878_s3 + $0x79c] sm:$0xf0]  ;;  %v11689_v41 = vld [vmem:[%s25878_s3 + $0x850] sm:$0xf]  ;;  %v16805_v0 = vld [vmem:[%s25878_s3 + $0x7c4] sm:$0xf] }
 0x281   :  { %v11586_v36 = vor.u32 %v16801_v40, %v11585_v34  ;;  %v11690_v43 = vor.u32 %v16826_v44, %v11689_v41  ;;  %v11915_v41 = vld [vmem:[%s25878_s3 + $0x9c0] sm:$0xf]  ;;  %v16891_v44 = vld [vmem:[%s25878_s3 + $0xa6c] sm:$0xf0] }
 0x283   :  { %2315 = vmatpush.bf16.msrb.mxu3 %v11678_v1  ;;  %2328 = vmatpush.bf16.msrb.mxu0 %v11682_v47  ;;  %v11633_v1 = vld [vmem:[%s25878_s3 + $0x7e8] sm:$0xf]  ;;  %v11691_v47 = vld [vmem:[%s25878_s3 + $0x868] sm:$0xf0] }
 0x284   :  { %2341 = vmatpush.bf16.msrb.mxu2 %v11686_v26  ;;  %2306 = vmatpush.bf16.msrb.mxu1 %v11578_v51  ;;  %v16817_v26 = vld [vmem:[%s25878_s3 + $0x824] sm:$0xf]  ;;  %v11641_v51 = vld [vmem:[%s25878_s3 + $0x7f0] sm:$0xf] }
 0x285   :  { %1966 = vmatmul.bf16.vlgmr.msra.gmra.mxu0 %v1616_v50  ;;  %1979 = vmatmul.bf16.vlgmr.msra.gmra.mxu2 %v1616_v50  ;;  %v11579_v50 = vld [vmem:[%s25878_s3 + $0x798] sm:$0xf0] }
 0x286   :  { %11526 = vmatmul.msk.bf16.vlgmr.msra.gmra.mxu3 %vm35_vm1, %v11525_v3  ;;  %v11582_v52 = vor.u32 %v16797_v49, %v11579_v50  ;;  %v16813_v3 = vld [vmem:[%s25878_s3 + $0x7fc] sm:$0xf0]  ;;  %v11667_v49 = vld [vmem:[%s25878_s3 + $0x838] sm:$0xf0] }
 0x287   :  { %2316 = vmatpush.bf16.msrb.mxu3 %v11654_v11  ;;  %2329 = vmatpush.bf16.msrb.mxu0 %v11658_v56  ;;  %v11634_v17 = vor.u32 %v16813_v3, %v11633_v1  ;;  %v16835_v11 = vld [vmem:[%s25878_s3 + $0x8b4] sm:$0xf]  ;;  %v11670_v50 = vor.u32 %v16817_v26, %v11667_v49  ;;  %v11643_v56 = vld [vmem:[%s25878_s3 + $0x808] sm:$0xf0]  ;;  %v11593_v3 = vld [vmem:[%s25878_s3 + $0x790] sm:$0xf] }
 0x288   :  { %2342 = vmatpush.bf16.msrb.mxu2 %v11662_v60  ;;  %2351 = vmatpush.bf16.msra.mxu1 %v11762_v61  ;;  %v11742_v14 = vor.u32 %v16835_v11, %v11739_v12  ;;  %v11646_v7 = vor.u32 %v16811_v53, %v11643_v56  ;;  %v11617_v60 = vld [vmem:[%s25878_s3 + $0x7c0] sm:$0xf]  ;;  %v16808_v61 = vld [vmem:[%s25878_s3 + $0x7d4] sm:$0xf0]  ;;  %v11973_v56 = vld [vmem:[%s25878_s3 + $0xa40] sm:$0xf0] }
 0x28b   :  { %2317 = vmatpush.bf16.msrb.mxu3 %v11630_v27  ;;  %2330 = vmatpush.bf16.msrb.mxu0 %v11634_v17  ;;  %v11614_v27 = vor.u32 %v16804_v21, %v11611_v23  ;;  %v16799_v17 = vld [vmem:[%s25878_s3 + $0x794] sm:$0xf]  ;;  %v11987_v21 = vld [vmem:[%s25878_s3 + $0xa50] sm:$0xf]  ;;  %v11963_v23 = vld [vmem:[%s25878_s3 + $0xa20] sm:$0xf] }
 0x28c   :  { %2343 = vmatpush.bf16.msrb.mxu2 %v11638_v29  ;;  %2352 = vmatpush.bf16.msra.mxu1 %v11738_v10 }
 0x28f   :  { %2318 = vmatpush.bf16.msrb.mxu3 %v11606_v45  ;;  %2331 = vmatpush.bf16.msrb.mxu0 %v11610_v22  ;;  %v16823_v45 = vld [vmem:[%s25878_s3 + $0x854] sm:$0xf] }
 0x290   :  { %2344 = vmatpush.bf16.msrb.mxu2 %v11614_v27  ;;  %2353 = vmatpush.bf16.msra.mxu1 %v11714_v19  ;;  %v11694_v58 = vor.u32 %v16823_v45, %v11691_v47  ;;  %v11964_v27 = vor.u32 %v16884_v28, %v11963_v23  ;;  %v11939_v19 = vld [vmem:[%s25878_s3 + $0x9f0] sm:$0xf]  ;;  %v11997_v45 = vld [vmem:[%s25878_s3 + $0xa70] sm:$0xf0] }
 0x291   :  { %v11949_v28 = vld [vmem:[%s25878_s3 + $0xa10] sm:$0xf0] }
 0x293   :  { %2319 = vmatpush.bf16.msrb.mxu3 %v11582_v52  ;;  %2332 = vmatpush.bf16.msrb.mxu0 %v11586_v36  ;;  %v16814_v52 = vld [vmem:[%s25878_s3 + $0x804] sm:$0xf0]  ;;  %v16887_v36 = vld [vmem:[%s25878_s3 + $0xa54] sm:$0xf] }
 0x294   :  { %2345 = vmatpush.bf16.msrb.mxu2 %v11590_v42  ;;  %2354 = vmatpush.bf16.msra.mxu1 %v11690_v43  ;;  %v11642_v55 = vor.u32 %v16814_v52, %v11641_v51  ;;  %v16888_v43 = vld [vmem:[%s25878_s3 + $0xa5c] sm:$0xf]  ;;  %v16866_v51 = vld [vmem:[%s25878_s3 + $0x9a4] sm:$0xf0] }
 0x295   :  { %v12000_v49 = vor.u32 %v16888_v43, %v11997_v45  ;;  %v11971_v52 = vld [vmem:[%s25878_s3 + $0xa28] sm:$0xf]  ;;  %v16845_v43 = vld [vmem:[%s25878_s3 + $0x904] sm:$0xf] }
 0x297   :  { %2364 = vmatpush.bf16.msra.mxu3 %v11766_v24  ;;  %2395 = vmatpush.bf16.msra.mxu0 %v17889_v2  ;;  %v11618_v24 = vor.u32 %v16808_v61, %v11617_v60  ;;  %v16875_v60 = vld [vmem:[%s25878_s3 + $0x9f4] sm:$0xf] }
 0x298   :  { %2355 = vmatpush.bf16.msra.mxu1 %v11666_v48 }
 0x29b   :  { %2365 = vmatpush.bf16.msra.mxu3 %v11742_v14  ;;  %v11598_v14 = vor.u32 %v16799_v17, %v11595_v6  ;;  %v16869_v17 = vld [vmem:[%s25878_s3 + $0x9c4] sm:$0xf]  ;;  %v11917_v6 = vld [vmem:[%s25878_s3 + $0x9d8] sm:$0xf0] }
 0x29c   :  { %2356 = vmatpush.bf16.msra.mxu1 %v11642_v55  ;;  %v16882_v55 = vld [vmem:[%s25878_s3 + $0xa2c] sm:$0xf] }
 0x29f   :  { %2366 = vmatpush.bf16.msra.mxu3 %v11718_v31  ;;  %v11940_v31 = vor.u32 %v16878_v30, %v11939_v19  ;;  %v11843_v19 = vld [vmem:[%s25878_s3 + $0x930] sm:$0xf]  ;;  %v16854_v30 = vld [vmem:[%s25878_s3 + $0x944] sm:$0xf0] }
 0x2a0   :  { %2357 = vmatpush.bf16.msra.mxu1 %v11618_v24  ;;  %v11976_v24 = vor.u32 %v16882_v55, %v11973_v56 }
 0x2a3   :  { %2367 = vmatpush.bf16.msra.mxu3 %v11694_v58  ;;  %v11992_v58 = vor.u32 %v16887_v36, %v11989_v37 }
 0x2a7   :  { %2368 = vmatpush.bf16.msra.mxu3 %v11670_v50  ;;  %v11891_v50 = vld [vmem:[%s25878_s3 + $0x990] sm:$0xf] }
 0x2a8   :  { %v11892_v61 = vor.u32 %v16866_v51, %v11891_v50  ;;  %v12003_v50 = vld [vmem:[%s25878_s3 + $0xa60] sm:$0xf] }
 0x2ab   :  { %2369 = vmatpush.bf16.msra.mxu3 %v11646_v7  ;;  %v11968_v7 = vor.u32 %v16881_v25, %v11965_v20  ;;  %v16867_v25 = vld [vmem:[%s25878_s3 + $0x9ac] sm:$0xf0] }
 0x2f2   :  { %v1915_v54 = vpop.f32.mrf.mxu0 }
 0x2f3   :  { %v19715_v57 = vadd.f32 %v1915_v54, %v19433_v13  ;;  %v1954_v59 = vpop.f32.mrf.mxu1  ;;  %v11619_v13 = vld [vmem:[%s25878_s3 + $0x7d8] sm:$0xf0]  ;;  %v16885_v54 = vld [vmem:[%s25878_s3 + $0xa3c] sm:$0xf0] }
 0x2f4   :  { %v19724_v62 = vadd.f32 %v1954_v59, %v19412_v4  ;;  %v11622_v1 = vor.u32 %v16805_v0, %v11619_v13  ;;  %v16802_v4 = vld [vmem:[%s25878_s3 + $0x7a4] sm:$0xf0]  ;;  %v11941_v0 = vld [vmem:[%s25878_s3 + $0xa08] sm:$0xf0]  ;;  %v11972_v13 = vor.u32 %v16885_v54, %v11971_v52  ;;  %v16892_v52 = vld [vmem:[%s25878_s3 + $0xa74] sm:$0xf0] }
 0x2f5   :  { %v11594_v11 = vor.u32 %v16802_v4, %v11593_v3  ;;  %v16860_v3 = vld [vmem:[%s25878_s3 + $0x974] sm:$0xf0]  ;;  %v11944_v4 = vor.u32 %v16875_v60, %v11941_v0  ;;  %v12005_v54 = vld [vmem:[%s25878_s3 + $0xa78] sm:$0xf0]  ;;  %v12004_v55 = vor.u32 %v16892_v52, %v12003_v50  ;;  %v16858_v60 = vld [vmem:[%s25878_s3 + $0x96c] sm:$0xf] }
 0x2f6   :  { %2370 = vmatpush.bf16.msra.mxu3 %v11622_v1  ;;  %v11867_v1 = vld [vmem:[%s25878_s3 + $0x960] sm:$0xf]  ;;  %v11877_v0 = vld [vmem:[%s25878_s3 + $0x980] sm:$0xf0]  ;;  %v11861_v52 = vld [vmem:[%s25878_s3 + $0x958] sm:$0xf0] }
 0x2f7   :  { %2358 = vmatpush.bf16.msra.mxu1 %v11594_v11  ;;  %v11893_v11 = vld [vmem:[%s25878_s3 + $0x9a8] sm:$0xf0]  ;;  %v16853_v50 = vld [vmem:[%s25878_s3 + $0x944] sm:$0xf] }
 0x2f8   :  { %v1928_v5 = vpop.f32.mrf.mxu2 }
 0x2f9   :  { %v19745_v8 = vadd.f32 %v1928_v5, %v19403_v63  ;;  %v1941_v9 = vpop.f32.mrf.mxu3  ;;  %v16890_v63 = vld [vmem:[%s25878_s3 + $0xa64] sm:$0xf0]  ;;  %v11868_v5 = vor.u32 %v16860_v3, %v11867_v1  ;;  %v11880_v1 = vor.u32 %v16858_v60, %v11877_v0 }
 0x2fa   :  { %v19748_v29 = vadd.f32 %v1941_v9, %v19436_v15  ;;  %v1917_v10 = vpop.f32.mrf.mxu0  ;;  %2371 = vmatpush.bf16.msra.mxu3 %v11598_v14  ;;  %v11988_v22 = vor.u32 %v16890_v63, %v11987_v21  ;;  %v11920_v9 = vor.u32 %v16869_v17, %v11917_v6  ;;  %v11947_v63 = vld [vmem:[%s25878_s3 + $0x9f8] sm:$0xf] }
 0x2fb   :  { %v1956_v12 = vpop.f32.mrf.mxu1  ;;  %v16863_v10 = vld [vmem:[%s25878_s3 + $0x994] sm:$0xf]  ;;  %v11851_v6 = vld [vmem:[%s25878_s3 + $0x938] sm:$0xf] }
 0x2fc   :  { %2692 = vmatpush.bf16.msra.mxu2 %v11988_v22  ;;  %v11767_v12 = vld [vmem:[%s25875_s0 + $0x6] sm:$0x1]  ;;  %v11896_v14 = vor.u32 %v16863_v10, %v11893_v11  ;;  %v16876_v22 = vld [vmem:[%s25878_s3 + $0x9fc] sm:$0xf] }
 0x2fd   :  { %v16852_v10 = vld [vmem:[%s25878_s3 + $0x93c] sm:$0xf] }
 0x300   :  { %v1930_v16 = vpop.f32.mrf.mxu2  ;;  %2693 = vmatpush.bf16.msra.mxu2 %v11964_v27  ;;  %v11952_v27 = vor.u32 %v16876_v22, %v11949_v28  ;;  %v16849_v28 = vld [vmem:[%s25878_s3 + $0x91c] sm:$0xf0] }
 0x301   :  { %v1943_v18 = vpop.f32.mrf.mxu3  ;;  %v16857_v16 = vld [vmem:[%s25878_s3 + $0x964] sm:$0xf] }
 0x302   :  { %v1967_v15 = vpop.f32.mrf.mxu0  ;;  %v11869_v18 = vld [vmem:[%s25878_s3 + $0x978] sm:$0xf0] }
 0x303   :  { %v19763_v35 = vadd.f32 %v1967_v15, %v19460_v38  ;;  %v11872_v21 = vor.u32 %v16857_v16, %v11869_v18  ;;  %v16879_v15 = vld [vmem:[%s25878_s3 + $0xa0c] sm:$0xf0]  ;;  %v16880_v16 = vld [vmem:[%s25878_s3 + $0xa14] sm:$0xf0] }
 0x304   :  { %2694 = vmatpush.bf16.msra.mxu2 %v11940_v31  ;;  %v11948_v23 = vor.u32 %v16879_v15, %v11947_v63  ;;  %v11844_v31 = vor.u32 %v16854_v30, %v11843_v19  ;;  %v16877_v63 = vld [vmem:[%s25878_s3 + $0xa04] sm:$0xf]  ;;  %v11957_v15 = vld [vmem:[%s25878_s3 + $0xa18] sm:$0xf0] }
 0x305   :  { %v11960_v22 = vor.u32 %v16877_v63, %v11957_v15  ;;  %v11829_v30 = vld [vmem:[%s25878_s3 + $0x920] sm:$0xf0] }
 0x308   :  { %v1980_v39 = vpop.f32.mrf.mxu2 }
 0x309   :  { %v19772_v34 = vadd.f32 %v1980_v39, %v19451_v32  ;;  %v2004_v40 = vpop.f32.mrf.mxu3  ;;  %v16872_v32 = vld [vmem:[%s25878_s3 + $0x9d4] sm:$0xf0]  ;;  %v16851_v39 = vld [vmem:[%s25878_s3 + $0x934] sm:$0xf] }
 0x30a   :  { %v2005_v38 = vadd.f32 %v19145_v46, %v2004_v40  ;;  %v1969_v33 = vpop.f32.mrf.mxu0  ;;  %v11995_v46 = vld [vmem:[%s25878_s3 + $0xa58] sm:$0xf]  ;;  %v11916_v26 = vor.u32 %v16872_v32, %v11915_v41  ;;  %v11845_v40 = vld [vmem:[%s25878_s3 + $0x948] sm:$0xf0]  ;;  %v11925_v32 = vld [vmem:[%s25878_s3 + $0x9e0] sm:$0xf0] }
 0x30b   :  { %v11996_v48 = vor.u32 %v16891_v44, %v11995_v46  ;;  %v16873_v33 = vld [vmem:[%s25878_s3 + $0x9dc] sm:$0xf0]  ;;  %v11848_v36 = vor.u32 %v16851_v39, %v11845_v40  ;;  %v16870_v41 = vld [vmem:[%s25878_s3 + $0x9cc] sm:$0xf]  ;;  %v11931_v39 = vld [vmem:[%s25878_s3 + $0x9d0] sm:$0xf] }
 0x30c   :  { %v2008_v42 = vmax.f32 %v2005_v38, 0.0  ;;  %2695 = vmatpush.bf16.msra.mxu2 %v11916_v26  ;;  %v11923_v38 = vld [vmem:[%s25878_s3 + $0x9c8] sm:$0xf]  ;;  %v11928_v46 = vor.u32 %v16870_v41, %v11925_v32  ;;  %v11819_v44 = vld [vmem:[%s25878_s3 + $0x900] sm:$0xf] }
 0x30d   :  { %v11924_v37 = vor.u32 %v16873_v33, %v11923_v38  ;;  %v16871_v33 = vld [vmem:[%s25878_s3 + $0x9d4] sm:$0xf]  ;;  %v11907_v41 = vld [vmem:[%s25878_s3 + $0x9a0] sm:$0xf]  ;;  %v16868_v32 = vld [vmem:[%s25878_s3 + $0x9b4] sm:$0xf0] }
 0x30e   :  { %v2009_v47 = vpack.c.bf16 %v2008_v42, %v2008_v42  ;;  %v16848_v42 = vld [vmem:[%s25878_s3 + $0x914] sm:$0xf0] }
 0x30f   :  { %v11820_v45 = vor.u32 %v16848_v42, %v11819_v44  ;;  %v11908_v44 = vor.u32 %v16868_v32, %v11907_v41  ;;  %v11909_v42 = vld [vmem:[%s25878_s3 + $0x9b8] sm:$0xf0]  ;;  %v16929_v41 = vld [vmem:[%s25878_s3 + $0xba4] sm:$0xf] }
 0x310   :  { %2307 = vmatmul.bf16.vlgmr.msrb.gmra.mxu1 %v2009_v47  ;;  %2320 = vmatmul.bf16.vlgmr.msrb.gmra.mxu3 %v2009_v47  ;;  %v1982_v53 = vpop.f32.mrf.mxu2  ;;  %v12207_v32 = vld [vmem:[%s25878_s3 + $0xbb8] sm:$0xf0] }
 0x311   :  { %2333 = vmatmul.bf16.vlgmr.msrb.gmra.mxu0 %v2009_v47  ;;  %2346 = vmatmul.bf16.vlgmr.msrb.gmra.mxu2 %v2009_v47  ;;  %v2006_v59 = vpop.f32.mrf.mxu3  ;;  %v16889_v53 = vld [vmem:[%s25878_s3 + $0xa64] sm:$0xf] }
 0x312   :  { %2705 = vmatpush.bf16.msrb.mxu0 %v11992_v58  ;;  %2718 = vmatpush.bf16.msrb.mxu1 %v11996_v48  ;;  %v11899_v58 = vld [vmem:[%s25878_s3 + $0x998] sm:$0xf]  ;;  %v16864_v48 = vld [vmem:[%s25878_s3 + $0x99c] sm:$0xf]  ;;  %v12008_v56 = vor.u32 %v16889_v53, %v12005_v54  ;;  %v11875_v59 = vld [vmem:[%s25878_s3 + $0x968] sm:$0xf] }
 0x313   :  { %2731 = vmatpush.bf16.msrb.mxu3 %v12000_v49  ;;  %2696 = vmatpush.bf16.msra.mxu2 %v11892_v61  ;;  %v11900_v26 = vor.u32 %v16867_v25, %v11899_v58  ;;  %v11901_v49 = vld [vmem:[%s25878_s3 + $0x9b0] sm:$0xf0]  ;;  %v11885_v25 = vld [vmem:[%s25878_s3 + $0x988] sm:$0xf0]  ;;  %v11835_v53 = vld [vmem:[%s25878_s3 + $0x910] sm:$0xf] }
 0x314   :  { %v11904_v51 = vor.u32 %v16864_v48, %v11901_v49  ;;  %v16859_v58 = vld [vmem:[%s25878_s3 + $0x974] sm:$0xf]  ;;  %v11859_v48 = vld [vmem:[%s25878_s3 + $0x940] sm:$0xf]  ;;  %v16856_v49 = vld [vmem:[%s25878_s3 + $0x954] sm:$0xf0] }
 0x316   :  { %2706 = vmatpush.bf16.msrb.mxu0 %v11968_v7  ;;  %2719 = vmatpush.bf16.msrb.mxu1 %v11972_v13  ;;  %v16861_v7 = vld [vmem:[%s25878_s3 + $0x97c] sm:$0xf0]  ;;  %v11979_v13 = vld [vmem:[%s25878_s3 + $0xa30] sm:$0xf] }
 0x317   :  { %2732 = vmatpush.bf16.msrb.mxu3 %v11976_v24  ;;  %2697 = vmatpush.bf16.msra.mxu2 %v11868_v5  ;;  %v11876_v61 = vor.u32 %v16861_v7, %v11875_v59  ;;  %v16886_v24 = vld [vmem:[%s25878_s3 + $0xa44] sm:$0xf0]  ;;  %v11981_v5 = vld [vmem:[%s25878_s3 + $0xa48] sm:$0xf0]  ;;  %v16847_v59 = vld [vmem:[%s25878_s3 + $0x914] sm:$0xf] }
 0x318   :  { %v11980_v3 = vor.u32 %v16886_v24, %v11979_v13  ;;  %v11837_v7 = vld [vmem:[%s25878_s3 + $0x928] sm:$0xf0] }
 0x319   :  { %v11840_v24 = vor.u32 %v16847_v59, %v11837_v7 }
 0x31a   :  { %2707 = vmatpush.bf16.msrb.mxu0 %v11944_v4  ;;  %2720 = vmatpush.bf16.msrb.mxu1 %v11948_v23  ;;  %v16883_v4 = vld [vmem:[%s25878_s3 + $0xa34] sm:$0xf]  ;;  %v11827_v23 = vld [vmem:[%s25878_s3 + $0x908] sm:$0xf] }
 0x31b   :  { %2733 = vmatpush.bf16.msrb.mxu3 %v11952_v27  ;;  %2698 = vmatpush.bf16.msra.mxu2 %v11844_v31  ;;  %v11984_v17 = vor.u32 %v16883_v4, %v11981_v5  ;;  %v16846_v27 = vld [vmem:[%s25878_s3 + $0x90c] sm:$0xf]  ;;  %v11828_v19 = vor.u32 %v16849_v28, %v11827_v23  ;;  %v16874_v31 = vld [vmem:[%s25878_s3 + $0x9e4] sm:$0xf0]  ;;  %v16935_v28 = vld [vmem:[%s25878_s3 + $0xbd4] sm:$0xf] }
 0x31c   :  { %v11832_v40 = vor.u32 %v16846_v27, %v11829_v30  ;;  %v11932_v38 = vor.u32 %v16874_v31, %v11931_v39  ;;  %v12231_v27 = vld [vmem:[%s25878_s3 + $0xbe8] sm:$0xf0]  ;;  %v12237_v30 = vld [vmem:[%s25878_s3 + $0xbd8] sm:$0xf]  ;;  %v16939_v39 = vld [vmem:[%s25878_s3 + $0xbec] sm:$0xf0] }
 0x31e   :  { %2708 = vmatpush.bf16.msrb.mxu0 %v11920_v9  ;;  %2721 = vmatpush.bf16.msrb.mxu1 %v11924_v37  ;;  %v16855_v9 = vld [vmem:[%s25878_s3 + $0x94c] sm:$0xf0] }
 0x31f   :  { %2734 = vmatpush.bf16.msrb.mxu3 %v11928_v46  ;;  %2699 = vmatpush.bf16.msra.mxu2 %v11820_v45  ;;  %v11852_v11 = vor.u32 %v16855_v9, %v11851_v6  ;;  %v16865_v46 = vld [vmem:[%s25878_s3 + $0x9a4] sm:$0xf]  ;;  %v11883_v45 = vld [vmem:[%s25878_s3 + $0x970] sm:$0xf]  ;;  %v16938_v6 = vld [vmem:[%s25878_s3 + $0xbe4] sm:$0xf0] }
 0x320   :  { %2359 = vmatmul.bf16.vlgmr.msra.gmra.mxu1 %v2009_v47  ;;  %2372 = vmatmul.bf16.vlgmr.msra.gmra.mxu3 %v2009_v47  ;;  %v11821_v47 = vld [vmem:[%s25878_s3 + $0x918] sm:$0xf0] }
 0x321   :  { %11768 = vmatmul.msk.bf16.vlgmr.msra.gmra.mxu0 %vm35_vm1, %v11767_v12  ;;  %v11824_v20 = vor.u32 %v16845_v43, %v11821_v47  ;;  %v11853_v12 = vld [vmem:[%s25878_s3 + $0x950] sm:$0xf0]  ;;  %v11912_v43 = vor.u32 %v16865_v46, %v11909_v42  ;;  %v16862_v47 = vld [vmem:[%s25878_s3 + $0x984] sm:$0xf0]  ;;  %v12238_v42 = vor.u32 %v16939_v39, %v12237_v30  ;;  %v16918_v39 = vld [vmem:[%s25878_s3 + $0xb4c] sm:$0xf] }
 0x322   :  { %2709 = vmatpush.bf16.msrb.mxu0 %v11896_v14  ;;  %2722 = vmatpush.bf16.msrb.mxu1 %v11900_v26  ;;  %v11955_v14 = vld [vmem:[%s25878_s3 + $0xa00] sm:$0xf]  ;;  %v11856_v18 = vor.u32 %v16852_v10, %v11853_v12  ;;  %v11888_v26 = vor.u32 %v16859_v58, %v11885_v25  ;;  %v16926_v12 = vld [vmem:[%s25878_s3 + $0xb84] sm:$0xf0] }
 0x323   :  { %2735 = vmatpush.bf16.msrb.mxu3 %v11904_v51  ;;  %2744 = vmatpush.bf16.msrb.mxu2 %v12004_v55  ;;  %v11860_v51 = vor.u32 %v16856_v49, %v11859_v48  ;;  %v11864_v55 = vor.u32 %v16853_v50, %v11861_v52  ;;  %v12213_v58 = vld [vmem:[%s25878_s3 + $0xba8] sm:$0xf]  ;;  %v12210_v49 = vor.u32 %v16929_v41, %v12207_v32  ;;  %v16923_v50 = vld [vmem:[%s25878_s3 + $0xb74] sm:$0xf]  ;;  %v12183_v52 = vld [vmem:[%s25878_s3 + $0xb88] sm:$0xf0] }
 0x324   :  { %v12186_v7 = vor.u32 %v16923_v50, %v12183_v52  ;;  %v12063_v41 = vld [vmem:[%s25878_s3 + $0xa98] sm:$0xf0]  ;;  %v12141_v32 = vld [vmem:[%s25878_s3 + $0xb18] sm:$0xf]  ;;  %v12117_v50 = vld [vmem:[%s25878_s3 + $0xae8] sm:$0xf] }
 0x325   :  { %v16906_v52 = vld [vmem:[%s25878_s3 + $0xaec] sm:$0xf] }
 0x326   :  { %2710 = vmatpush.bf16.msrb.mxu0 %v11872_v21  ;;  %2723 = vmatpush.bf16.msrb.mxu1 %v11876_v61  ;;  %v11956_v21 = vor.u32 %v16880_v16, %v11955_v14 }
 0x327   :  { %2736 = vmatpush.bf16.msrb.mxu3 %v11880_v1  ;;  %2745 = vmatpush.bf16.msrb.mxu2 %v11980_v3 }
 0x32a   :  { %2711 = vmatpush.bf16.msrb.mxu0 %v11848_v36  ;;  %2724 = vmatpush.bf16.msrb.mxu1 %v11852_v11  ;;  %v11933_v36 = vld [vmem:[%s25878_s3 + $0x9e8] sm:$0xf0]  ;;  %v12181_v11 = vld [vmem:[%s25878_s3 + $0xb70] sm:$0xf] }
 0x32b   :  { %2737 = vmatpush.bf16.msrb.mxu3 %v11856_v18  ;;  %2746 = vmatpush.bf16.msrb.mxu2 %v11956_v21  ;;  %v11936_v37 = vor.u32 %v16871_v33, %v11933_v36  ;;  %v12182_v21 = vor.u32 %v16926_v12, %v12181_v11  ;;  %v16924_v11 = vld [vmem:[%s25878_s3 + $0xb7c] sm:$0xf] }
 0x32e   :  { %2712 = vmatpush.bf16.msrb.mxu0 %v11824_v20  ;;  %2725 = vmatpush.bf16.msrb.mxu1 %v11828_v19  ;;  %v11884_v20 = vor.u32 %v16862_v47, %v11883_v45  ;;  %v16920_v19 = vld [vmem:[%s25878_s3 + $0xb54] sm:$0xf0]  ;;  %v12133_v45 = vld [vmem:[%s25878_s3 + $0xb10] sm:$0xf]  ;;  %v16914_v47 = vld [vmem:[%s25878_s3 + $0xb24] sm:$0xf0] }
 0x32f   :  { %2738 = vmatpush.bf16.msrb.mxu3 %v11832_v40  ;;  %2747 = vmatpush.bf16.msrb.mxu2 %v11932_v38  ;;  %v16936_v40 = vld [vmem:[%s25878_s3 + $0xbdc] sm:$0xf]  ;;  %v12239_v38 = vld [vmem:[%s25878_s3 + $0xbf0] sm:$0xf0] }
 0x332   :  { %2757 = vmatpush.bf16.msra.mxu0 %v12008_v56  ;;  %2788 = vmatpush.bf16.msra.mxu1 %v17889_v2  ;;  %v16850_v56 = vld [vmem:[%s25878_s3 + $0x924] sm:$0xf0] }
 0x333   :  { %2748 = vmatpush.bf16.msrb.mxu2 %v11908_v44  ;;  %v11836_v13 = vor.u32 %v16850_v56, %v11835_v53  ;;  %v16908_v56 = vld [vmem:[%s25878_s3 + $0xaf4] sm:$0xf0] }
 0x336   :  { %2758 = vmatpush.bf16.msra.mxu0 %v11984_v17 }
 0x337   :  { %2749 = vmatpush.bf16.msrb.mxu2 %v11884_v20  ;;  %v16930_v20 = vld [vmem:[%s25878_s3 + $0xbac] sm:$0xf] }
 0x33a   :  { %2759 = vmatpush.bf16.msra.mxu0 %v11960_v22  ;;  %v20086_v22 = vld [vmem:[%s25877_s2] ss:$0 sm:$0xff] }
 0x33b   :  { %2750 = vmatpush.bf16.msrb.mxu2 %v11860_v51  ;;  %v12134_v51 = vor.u32 %v16914_v47, %v12133_v45  ;;  %v16912_v45 = vld [vmem:[%s25878_s3 + $0xb1c] sm:$0xf]  ;;  %v12143_v47 = vld [vmem:[%s25878_s3 + $0xb30] sm:$0xf0] }
 0x33e   :  { %2760 = vmatpush.bf16.msra.mxu0 %v11936_v37  ;;  %v12234_v37 = vor.u32 %v16935_v28, %v12231_v27  ;;  %v12087_v28 = vld [vmem:[%s25878_s3 + $0xac8] sm:$0xf0]  ;;  %v12165_v27 = vld [vmem:[%s25878_s3 + $0xb48] sm:$0xf] }
 0x33f   :  { %2751 = vmatpush.bf16.msrb.mxu2 %v11836_v13  ;;  %v16917_v13 = vld [vmem:[%s25878_s3 + $0xb44] sm:$0xf] }
 0x342   :  { %2761 = vmatpush.bf16.msra.mxu0 %v11912_v43  ;;  %v12242_v43 = vor.u32 %v16936_v40, %v12239_v38  ;;  %v12061_v38 = vld [vmem:[%s25878_s3 + $0xa80] sm:$0xf] }
 0x346   :  { %2762 = vmatpush.bf16.msra.mxu0 %v11888_v26  ;;  %v12215_v26 = vld [vmem:[%s25878_s3 + $0xbc0] sm:$0xf0] }
 0x34a   :  { %2763 = vmatpush.bf16.msra.mxu0 %v11864_v55  ;;  %v12109_v55 = vld [vmem:[%s25878_s3 + $0xae0] sm:$0xf] }
 0x34e   :  { %2764 = vmatpush.bf16.msra.mxu0 %v11840_v24  ;;  %v12159_v24 = vld [vmem:[%s25878_s3 + $0xb58] sm:$0xf0] }
 0x38d   :  { %v2308_v54 = vpop.f32.mrf.mxu1 }
 0x38e   :  { %v20051_v60 = vadd.f32 %v2308_v54, %v19715_v57  ;;  %v2334_v61 = vpop.f32.mrf.mxu0  ;;  %v12218_v54 = vor.u32 %v16930_v20, %v12215_v26  ;;  %v16937_v20 = vld [vmem:[%s25878_s3 + $0xbe4] sm:$0xf]  ;;  %v12247_v26 = vld [vmem:[%s25878_s3 + $0xbf8] sm:$0xf0] }
 0x38f   :  { %v20054_v0 = vadd.f32 %v2334_v61, %v19748_v29  ;;  %v12229_v29 = vld [vmem:[%s25878_s3 + $0xbd0] sm:$0xf]  ;;  %v12110_v61 = vor.u32 %v16908_v56, %v12109_v55  ;;  %v16934_v56 = vld [vmem:[%s25878_s3 + $0xbc4] sm:$0xf0] }
 0x390   :  { %v12230_v9 = vor.u32 %v16938_v6, %v12229_v29  ;;  %v16905_v6 = vld [vmem:[%s25878_s3 + $0xae4] sm:$0xf]  ;;  %v12221_v55 = vld [vmem:[%s25878_s3 + $0xbb0] sm:$0xf] }
 0x392   :  { %3085 = vmatpush.bf16.msra.mxu3 %v12230_v9  ;;  %v12111_v9 = vld [vmem:[%s25878_s3 + $0xaf8] sm:$0xf0] }
 0x393   :  { %v2321_v1 = vpop.f32.mrf.mxu3 }
 0x394   :  { %v20057_v3 = vadd.f32 %v2321_v1, %v19745_v8  ;;  %v2347_v4 = vpop.f32.mrf.mxu2  ;;  %v12205_v8 = vld [vmem:[%s25878_s3 + $0xba0] sm:$0xf]  ;;  %v12162_v1 = vor.u32 %v16917_v13, %v12159_v24  ;;  %v12223_v13 = vld [vmem:[%s25878_s3 + $0xbc8] sm:$0xf0] }
 0x395   :  { %v20060_v5 = vadd.f32 %v2347_v4, %v19724_v62  ;;  %v2310_v57 = vpop.f32.mrf.mxu1  ;;  %v16932_v62 = vld [vmem:[%s25878_s3 + $0xbb4] sm:$0xf0]  ;;  %v16911_v4 = vld [vmem:[%s25878_s3 + $0xb14] sm:$0xf] }
 0x396   :  { %v2336_v17 = vpop.f32.mrf.mxu0  ;;  %v12206_v10 = vor.u32 %v16932_v62, %v12205_v8  ;;  %v12135_v57 = vld [vmem:[%s25878_s3 + $0xb28] sm:$0xf0]  ;;  %v12114_v8 = vor.u32 %v16905_v6, %v12111_v9  ;;  %v12189_v62 = vld [vmem:[%s25878_s3 + $0xb78] sm:$0xf]  ;;  %v12197_v6 = vld [vmem:[%s25878_s3 + $0xb80] sm:$0xf] }
 0x397   :  { %v12009_v17 = vld [vmem:[%s25875_s0 + $0x7] sm:$0x1]  ;;  %v12138_v29 = vor.u32 %v16911_v4, %v12135_v57  ;;  %v16903_v4 = vld [vmem:[%s25878_s3 + $0xacc] sm:$0xf0]  ;;  %v16900_v57 = vld [vmem:[%s25878_s3 + $0xabc] sm:$0xf] }
 0x398   :  { %3086 = vmatpush.bf16.msra.mxu3 %v12206_v10  ;;  %v16927_v10 = vld [vmem:[%s25878_s3 + $0xb8c] sm:$0xf0]  ;;  %v16928_v9 = vld [vmem:[%s25878_s3 + $0xb94] sm:$0xf0] }
 0x399   :  { %v12190_v12 = vor.u32 %v16927_v10, %v12189_v62  ;;  %v12198_v62 = vor.u32 %v16928_v9, %v12197_v6  ;;  %v16925_v10 = vld [vmem:[%s25878_s3 + $0xb84] sm:$0xf]  ;;  %v16974_v6 = vld [vmem:[%s25878_s3 + $0xd04] sm:$0xf0] }
 0x39b   :  { %v2323_v14 = vpop.f32.mrf.mxu3 }
 0x39c   :  { %v2349_v16 = vpop.f32.mrf.mxu2  ;;  %3087 = vmatpush.bf16.msra.mxu3 %v12182_v21  ;;  %v12191_v14 = vld [vmem:[%s25878_s3 + $0xb90] sm:$0xf0]  ;;  %v16902_v21 = vld [vmem:[%s25878_s3 + $0xac4] sm:$0xf0] }
 0x39d   :  { %v2360_v18 = vpop.f32.mrf.mxu1  ;;  %v12194_v16 = vor.u32 %v16924_v11, %v12191_v14  ;;  %v12199_v11 = vld [vmem:[%s25878_s3 + $0xb98] sm:$0xf0]  ;;  %v12069_v14 = vld [vmem:[%s25878_s3 + $0xa88] sm:$0xf] }
 0x39e   :  { %v20081_v63 = vadd.f32 %v2360_v18, %v19763_v35  ;;  %v2397_v15 = vpop.f32.mrf.mxu0  ;;  %v12157_v35 = vld [vmem:[%s25878_s3 + $0xb40] sm:$0xf]  ;;  %v12085_v18 = vld [vmem:[%s25878_s3 + $0xab0] sm:$0xf] }
 0x39f   :  { %v2398_v23 = vadd.f32 %v20086_v22, %v2397_v15  ;;  %v12158_v46 = vor.u32 %v16920_v19, %v12157_v35  ;;  %v16899_v15 = vld [vmem:[%s25878_s3 + $0xab4] sm:$0xf]  ;;  %v16921_v35 = vld [vmem:[%s25878_s3 + $0xb5c] sm:$0xf0] }
 0x3a0   :  { %v12090_v19 = vor.u32 %v16899_v15, %v12087_v28  ;;  %v12166_v30 = vor.u32 %v16921_v35, %v12165_v27  ;;  %v12071_v15 = vld [vmem:[%s25878_s3 + $0xaa0] sm:$0xf0]  ;;  %v16922_v28 = vld [vmem:[%s25878_s3 + $0xb64] sm:$0xf0] }
 0x3a1   :  { %v2401_v31 = vmax.f32 %v2398_v23, 0.0  ;;  %3088 = vmatpush.bf16.msra.mxu3 %v12158_v46  ;;  %v12086_v23 = vor.u32 %v16902_v21, %v12085_v18  ;;  %v16915_v46 = vld [vmem:[%s25878_s3 + $0xb2c] sm:$0xf0]  ;;  %v16894_v18 = vld [vmem:[%s25878_s3 + $0xa8c] sm:$0xf] }
 0x3a2   :  { %v12074_v27 = vor.u32 %v16894_v18, %v12071_v15  ;;  %v12473_v18 = vld [vmem:[%s25878_s3 + $0xd68] sm:$0xf0]  ;;  %v12479_v15 = vld [vmem:[%s25878_s3 + $0xd58] sm:$0xf] }
 0x3a3   :  { %v2402_v33 = vpack.c.bf16 %v2401_v31, %v2401_v31  ;;  %v2373_v36 = vpop.f32.mrf.mxu3  ;;  %v12167_v31 = vld [vmem:[%s25878_s3 + $0xb60] sm:$0xf0] }
 0x3a4   :  { %v20120_v44 = vadd.f32 %v2373_v36, %v19772_v34  ;;  %v16933_v34 = vld [vmem:[%s25878_s3 + $0xbbc] sm:$0xf0]  ;;  %v12170_v40 = vor.u32 %v16918_v39, %v12167_v31  ;;  %v16893_v36 = vld [vmem:[%s25878_s3 + $0xa84] sm:$0xf] }
 0x3a5   :  { %2700 = vmatmul.bf16.vlgmr.msra.gmra.mxu2 %v2402_v33  ;;  %2713 = vmatmul.bf16.vlgmr.msrb.gmra.mxu0 %v2402_v33  ;;  %v2362_v25 = vpop.f32.mrf.mxu1  ;;  %v12214_v53 = vor.u32 %v16933_v34, %v12213_v58  ;;  %v12245_v58 = vld [vmem:[%s25878_s3 + $0xbe0] sm:$0xf]  ;;  %v16940_v34 = vld [vmem:[%s25878_s3 + $0xbf4] sm:$0xf0] }
 0x3a6   :  { %2726 = vmatmul.bf16.vlgmr.msrb.gmra.mxu1 %v2402_v33  ;;  %2739 = vmatmul.bf16.vlgmr.msrb.gmra.mxu3 %v2402_v33  ;;  %v2399_v48 = vpop.f32.mrf.mxu0  ;;  %v12146_v25 = vor.u32 %v16912_v45, %v12143_v47  ;;  %v12149_v31 = vld [vmem:[%s25878_s3 + $0xb20] sm:$0xf] }
 0x3a7   :  { %3098 = vmatpush.bf16.msrb.mxu1 %v12234_v37  ;;  %3111 = vmatpush.bf16.msra.mxu2 %v12238_v42  ;;  %v12066_v42 = vor.u32 %v16893_v36, %v12063_v41  ;;  %v12246_v48 = vor.u32 %v16940_v34, %v12245_v58  ;;  %v12151_v36 = vld [vmem:[%s25878_s3 + $0xb38] sm:$0xf0]  ;;  %v12125_v41 = vld [vmem:[%s25878_s3 + $0xaf0] sm:$0xf]  ;;  %v12101_v47 = vld [vmem:[%s25878_s3 + $0xac0] sm:$0xf] }
 0x3a8   :  { %3124 = vmatpush.bf16.msrb.mxu0 %v12242_v43  ;;  %3089 = vmatpush.bf16.msra.mxu3 %v12134_v51  ;;  %v12142_v43 = vor.u32 %v16915_v46, %v12141_v32  ;;  %v16909_v51 = vld [vmem:[%s25878_s3 + $0xafc] sm:$0xf0]  ;;  %v16910_v32 = vld [vmem:[%s25878_s3 + $0xb04] sm:$0xf0]  ;;  %v16907_v46 = vld [vmem:[%s25878_s3 + $0xaf4] sm:$0xf] }
 0x3a9   :  { %v16904_v58 = vld [vmem:[%s25878_s3 + $0xad4] sm:$0xf0] }
 0x3aa   :  { %v12102_v34 = vor.u32 %v16904_v58, %v12101_v47  ;;  %v16965_v47 = vld [vmem:[%s25878_s3 + $0xcc4] sm:$0xf]  ;;  %v12401_v58 = vld [vmem:[%s25878_s3 + $0xcd8] sm:$0xf0] }
 0x3ab   :  { %v2375_v59 = vpop.f32.mrf.mxu3  ;;  %3099 = vmatpush.bf16.msrb.mxu1 %v12210_v49  ;;  %3112 = vmatpush.bf16.msra.mxu2 %v12214_v53  ;;  %v12250_v49 = vor.u32 %v16937_v20, %v12247_v26  ;;  %v12118_v53 = vor.u32 %v16909_v51, %v12117_v50  ;;  %v12103_v20 = vld [vmem:[%s25878_s3 + $0xad8] sm:$0xf0]  ;;  %v12077_v26 = vld [vmem:[%s25878_s3 + $0xa90] sm:$0xf]  ;;  %v16898_v50 = vld [vmem:[%s25878_s3 + $0xaa4] sm:$0xf0] }
 0x3ac   :  { %3125 = vmatpush.bf16.msrb.mxu0 %v12218_v54  ;;  %3090 = vmatpush.bf16.msra.mxu3 %v12110_v61  ;;  %v12119_v54 = vld [vmem:[%s25878_s3 + $0xb00] sm:$0xf0]  ;;  %v16931_v61 = vld [vmem:[%s25878_s3 + $0xbb4] sm:$0xf] }
 0x3ad   :  { %v12122_v59 = vor.u32 %v16906_v52, %v12119_v54  ;;  %v12226_v24 = vor.u32 %v16931_v61, %v12223_v13  ;;  %v16895_v51 = vld [vmem:[%s25878_s3 + $0xa94] sm:$0xf]  ;;  %v12079_v52 = vld [vmem:[%s25878_s3 + $0xaa8] sm:$0xf0] }
 0x3af   :  { %3100 = vmatpush.bf16.msrb.mxu1 %v12186_v7  ;;  %3113 = vmatpush.bf16.msra.mxu2 %v12190_v12  ;;  %v12222_v7 = vor.u32 %v16934_v56, %v12221_v55  ;;  %v12202_v12 = vor.u32 %v16925_v10, %v12199_v11  ;;  %v12078_v56 = vor.u32 %v16898_v50, %v12077_v26  ;;  %v16962_v26 = vld [vmem:[%s25878_s3 + $0xca4] sm:$0xf0]  ;;  %v12377_v50 = vld [vmem:[%s25878_s3 + $0xca8] sm:$0xf0] }
 0x3b0   :  { %3126 = vmatpush.bf16.msrb.mxu0 %v12194_v16  ;;  %3091 = vmatpush.bf16.msra.mxu3 %v12086_v23  ;;  %v16897_v16 = vld [vmem:[%s25878_s3 + $0xa9c] sm:$0xf0]  ;;  %v12173_v23 = vld [vmem:[%s25878_s3 + $0xb50] sm:$0xf] }
 0x3b1   :  { %v12070_v21 = vor.u32 %v16897_v16, %v12069_v14  ;;  %v12174_v35 = vor.u32 %v16922_v28, %v12173_v23  ;;  %v16983_v16 = vld [vmem:[%s25878_s3 + $0xd54] sm:$0xf]  ;;  %v16987_v23 = vld [vmem:[%s25878_s3 + $0xd6c] sm:$0xf0] }
 0x3b3   :  { %3101 = vmatpush.bf16.msrb.mxu1 %v12162_v1  ;;  %3114 = vmatpush.bf16.msra.mxu2 %v12166_v30  ;;  %v12093_v1 = vld [vmem:[%s25878_s3 + $0xab8] sm:$0xf]  ;;  %v12175_v30 = vld [vmem:[%s25878_s3 + $0xb68] sm:$0xf0] }
 0x3b4   :  { %3127 = vmatpush.bf16.msrb.mxu0 %v12170_v40  ;;  %v16916_v40 = vld [vmem:[%s25878_s3 + $0xb34] sm:$0xf0] }
 0x3b5   :  { %2752 = vmatmul.bf16.vlgmr.msrb.gmra.mxu2 %v2402_v33  ;;  %2765 = vmatmul.bf16.vlgmr.msra.gmra.mxu0 %v2402_v33  ;;  %v16896_v33 = vld [vmem:[%s25878_s3 + $0xa94] sm:$0xf0] }
 0x3b6   :  { %12010 = vmatmul.msk.bf16.vlgmr.msra.gmra.mxu1 %vm35_vm1, %v12009_v17  ;;  %v12062_v37 = vor.u32 %v16896_v33, %v12061_v38  ;;  %v12094_v17 = vor.u32 %v16903_v4, %v12093_v1  ;;  %v16913_v38 = vld [vmem:[%s25878_s3 + $0xb24] sm:$0xf]  ;;  %v12150_v33 = vor.u32 %v16916_v40, %v12149_v31  ;;  %v16986_v4 = vld [vmem:[%s25878_s3 + $0xd64] sm:$0xf0] }
 0x3b7   :  { %3102 = vmatpush.bf16.msrb.mxu1 %v12138_v29  ;;  %3115 = vmatpush.bf16.msra.mxu2 %v12142_v43  ;;  %v12095_v29 = vld [vmem:[%s25878_s3 + $0xad0] sm:$0xf0]  ;;  %v12126_v43 = vor.u32 %v16910_v32, %v12125_v41 }
 0x3b8   :  { %3092 = vmatpush.bf16.msra.mxu3 %v12062_v37  ;;  %3128 = vmatpush.bf16.msrb.mxu0 %v12146_v25  ;;  %v12154_v37 = vor.u32 %v16913_v38, %v12151_v36  ;;  %v16901_v25 = vld [vmem:[%s25878_s3 + $0xac4] sm:$0xf]  ;;  %v12480_v36 = vor.u32 %v16987_v23, %v12479_v15  ;;  %v16966_v23 = vld [vmem:[%s25878_s3 + $0xccc] sm:$0xf] }
 0x3b9   :  { %v16977_v38 = vld [vmem:[%s25878_s3 + $0xd24] sm:$0xf] }
 0x3bb   :  { %3103 = vmatpush.bf16.msrb.mxu1 %v12114_v8  ;;  %3116 = vmatpush.bf16.msra.mxu2 %v12118_v53  ;;  %v12098_v8 = vor.u32 %v16900_v57, %v12095_v29  ;;  %v12423_v29 = vld [vmem:[%s25878_s3 + $0xcf0] sm:$0xf] }
 0x3bc   :  { %3137 = vmatpush.bf16.msrb.mxu3 %v12246_v48  ;;  %3129 = vmatpush.bf16.msrb.mxu0 %v12122_v59  ;;  %v12082_v59 = vor.u32 %v16895_v51, %v12079_v52  ;;  %v12424_v10 = vor.u32 %v16974_v6, %v12423_v29  ;;  %v12455_v51 = vld [vmem:[%s25878_s3 + $0xd28] sm:$0xf]  ;;  %v16981_v52 = vld [vmem:[%s25878_s3 + $0xd3c] sm:$0xf0]  ;;  %v16972_v29 = vld [vmem:[%s25878_s3 + $0xcfc] sm:$0xf] }
 0x3bf   :  { %3104 = vmatpush.bf16.msrb.mxu1 %v12090_v19  ;;  %3117 = vmatpush.bf16.msra.mxu2 %v12094_v17  ;;  %v16919_v19 = vld [vmem:[%s25878_s3 + $0xb54] sm:$0xf] }
 0x3c0   :  { %3138 = vmatpush.bf16.msrb.mxu3 %v12222_v7  ;;  %3130 = vmatpush.bf16.msrb.mxu0 %v12098_v8  ;;  %v12178_v39 = vor.u32 %v16919_v19, %v12175_v30 }
 0x3c3   :  { %3105 = vmatpush.bf16.msrb.mxu1 %v12066_v42  ;;  %3118 = vmatpush.bf16.msra.mxu2 %v12070_v21  ;;  %v12127_v42 = vld [vmem:[%s25878_s3 + $0xb08] sm:$0xf0]  ;;  %v12399_v21 = vld [vmem:[%s25878_s3 + $0xcc0] sm:$0xf] }
 0x3c4   :  { %3139 = vmatpush.bf16.msrb.mxu3 %v12198_v62  ;;  %3131 = vmatpush.bf16.msrb.mxu0 %v12074_v27  ;;  %v12130_v45 = vor.u32 %v16907_v46, %v12127_v42  ;;  %v16984_v27 = vld [vmem:[%s25878_s3 + $0xd5c] sm:$0xf]  ;;  %v12425_v42 = vld [vmem:[%s25878_s3 + $0xd08] sm:$0xf0] }
 0x3c7   :  { %3150 = vmatpush.bf16.msra.mxu1 %v12250_v49  ;;  %3181 = vmatpush.bf16.msrb.mxu2 %v17889_v2  ;;  %v12106_v49 = vor.u32 %v16901_v25, %v12103_v20  ;;  %v12404_v25 = vor.u32 %v16965_v47, %v12401_v58  ;;  %v12375_v20 = vld [vmem:[%s25878_s3 + $0xc90] sm:$0xf]  ;;  %v12489_v47 = vld [vmem:[%s25878_s3 + $0xd78] sm:$0xf0] }
 0x3c8   :  { %3140 = vmatpush.bf16.msrb.mxu3 %v12174_v35  ;;  %v12481_v35 = vld [vmem:[%s25878_s3 + $0xd70] sm:$0xf0] }
 0x3cb   :  { %3151 = vmatpush.bf16.msra.mxu1 %v12226_v24 }
 0x3cc   :  { %3141 = vmatpush.bf16.msrb.mxu3 %v12150_v33  ;;  %v12449_v33 = vld [vmem:[%s25878_s3 + $0xd38] sm:$0xf0] }
 0x3cd   :  { %v12452_v46 = vor.u32 %v16977_v38, %v12449_v33  ;;  %v12383_v33 = vld [vmem:[%s25878_s3 + $0xc98] sm:$0xf] }
 0x3cf   :  { %3152 = vmatpush.bf16.msra.mxu1 %v12202_v12 }
 0x3d0   :  { %3142 = vmatpush.bf16.msrb.mxu3 %v12126_v43 }
 0x3d3   :  { %3153 = vmatpush.bf16.msra.mxu1 %v12178_v39  ;;  %v12476_v39 = vor.u32 %v16983_v16, %v12473_v18  ;;  %v12329_v16 = vld [vmem:[%s25878_s3 + $0xc48] sm:$0xf0]  ;;  %v12407_v18 = vld [vmem:[%s25878_s3 + $0xcc8] sm:$0xf] }
 0x3d4   :  { %3143 = vmatpush.bf16.msrb.mxu3 %v12102_v34  ;;  %v12251_v34 = vld [vmem:[%s25875_s0 + $0x8] sm:$0x1] }
 0x3d7   :  { %3154 = vmatpush.bf16.msra.mxu1 %v12154_v37  ;;  %v12484_v37 = vor.u32 %v16984_v27, %v12481_v35  ;;  %v12303_v27 = vld [vmem:[%s25878_s3 + $0xc00] sm:$0xf] }
 0x3d8   :  { %3144 = vmatpush.bf16.msrb.mxu3 %v12078_v56  ;;  %v12456_v56 = vor.u32 %v16981_v52, %v12455_v51 }
 0x3db   :  { %3155 = vmatpush.bf16.msra.mxu1 %v12130_v45 }
 0x3df   :  { %3156 = vmatpush.bf16.msra.mxu1 %v12106_v49  ;;  %v12376_v49 = vor.u32 %v16962_v26, %v12375_v20  ;;  %v16954_v20 = vld [vmem:[%s25878_s3 + $0xc6c] sm:$0xf] }
 0x3e3   :  { %3157 = vmatpush.bf16.msra.mxu1 %v12082_v59  ;;  %v16978_v59 = vld [vmem:[%s25878_s3 + $0xd2c] sm:$0xf] }
 0x422   :  { %v2714_v48 = vpop.f32.mrf.mxu0 }
 0x423   :  { %v20368_v53 = vadd.f32 %v2714_v48, %v20057_v3  ;;  %v2727_v54 = vpop.f32.mrf.mxu1  ;;  %v16959_v48 = vld [vmem:[%s25878_s3 + $0xc94] sm:$0xf] }
 0x424   :  { %v20371_v55 = vadd.f32 %v2727_v54, %v20054_v0  ;;  %v12471_v0 = vld [vmem:[%s25878_s3 + $0xd50] sm:$0xf]  ;;  %v12380_v54 = vor.u32 %v16959_v48, %v12377_v50  ;;  %v12361_v48 = vld [vmem:[%s25878_s3 + $0xc80] sm:$0xf0]  ;;  %v16982_v50 = vld [vmem:[%s25878_s3 + $0xd44] sm:$0xf0] }
 0x425   :  { %v12472_v57 = vor.u32 %v16986_v4, %v12471_v0  ;;  %v16953_v0 = vld [vmem:[%s25878_s3 + $0xc64] sm:$0xf]  ;;  %v12364_v51 = vor.u32 %v16954_v20, %v12361_v48  ;;  %v12321_v48 = vld [vmem:[%s25878_s3 + $0xc28] sm:$0xf0] }
 0x427   :  { %3478 = vmatpush.bf16.msra.mxu0 %v12472_v57  ;;  %v12353_v57 = vld [vmem:[%s25878_s3 + $0xc78] sm:$0xf0] }
 0x428   :  { %v2701_v7 = vpop.f32.mrf.mxu2 }
 0x429   :  { %v20374_v61 = vadd.f32 %v2701_v7, %v20051_v60  ;;  %v2740_v13 = vpop.f32.mrf.mxu3  ;;  %v12447_v60 = vld [vmem:[%s25878_s3 + $0xd20] sm:$0xf]  ;;  %v12457_v7 = vld [vmem:[%s25878_s3 + $0xd40] sm:$0xf0] }
 0x42a   :  { %v20377_v24 = vadd.f32 %v2740_v13, %v20060_v5  ;;  %v2716_v3 = vpop.f32.mrf.mxu0  ;;  %v16980_v5 = vld [vmem:[%s25878_s3 + $0xd34] sm:$0xf0]  ;;  %v12460_v13 = vor.u32 %v16978_v59, %v12457_v7 }
 0x42b   :  { %v2729_v1 = vpop.f32.mrf.mxu1  ;;  %v12448_v17 = vor.u32 %v16980_v5, %v12447_v60  ;;  %v12351_v3 = vld [vmem:[%s25878_s3 + $0xc60] sm:$0xf]  ;;  %v12356_v60 = vor.u32 %v16953_v0, %v12353_v57  ;;  %v12431_v5 = vld [vmem:[%s25878_s3 + $0xcf8] sm:$0xf]  ;;  %v12337_v0 = vld [vmem:[%s25878_s3 + $0xc50] sm:$0xf0] }
 0x42c   :  { %v16956_v1 = vld [vmem:[%s25878_s3 + $0xc74] sm:$0xf0] }
 0x42d   :  { %3479 = vmatpush.bf16.msra.mxu0 %v12448_v17  ;;  %v12352_v4 = vor.u32 %v16956_v1, %v12351_v3  ;;  %v16975_v17 = vld [vmem:[%s25878_s3 + $0xd0c] sm:$0xf0]  ;;  %v12335_v7 = vld [vmem:[%s25878_s3 + $0xc38] sm:$0xf]  ;;  %v16948_v3 = vld [vmem:[%s25878_s3 + $0xc3c] sm:$0xf] }
 0x42e   :  { %v12432_v6 = vor.u32 %v16975_v17, %v12431_v5  ;;  %v16976_v57 = vld [vmem:[%s25878_s3 + $0xd14] sm:$0xf0]  ;;  %v16973_v17 = vld [vmem:[%s25878_s3 + $0xd04] sm:$0xf] }
 0x430   :  { %v2703_v9 = vpop.f32.mrf.mxu2 }
 0x431   :  { %v2742_v8 = vpop.f32.mrf.mxu3  ;;  %3480 = vmatpush.bf16.msra.mxu0 %v12424_v10  ;;  %v12433_v9 = vld [vmem:[%s25878_s3 + $0xd10] sm:$0xf0]  ;;  %v16950_v10 = vld [vmem:[%s25878_s3 + $0xc44] sm:$0xf0] }
 0x432   :  { %v2766_v62 = vpop.f32.mrf.mxu0  ;;  %v12436_v8 = vor.u32 %v16972_v29, %v12433_v9  ;;  %v12441_v29 = vld [vmem:[%s25878_s3 + $0xd18] sm:$0xf0]  ;;  %v12311_v9 = vld [vmem:[%s25878_s3 + $0xc08] sm:$0xf] }
 0x433   :  { %v20398_v11 = vadd.f32 %v2766_v62, %v20120_v44  ;;  %v2790_v12 = vpop.f32.mrf.mxu1  ;;  %v16968_v44 = vld [vmem:[%s25878_s3 + $0xcd4] sm:$0xf0]  ;;  %v12327_v62 = vld [vmem:[%s25878_s3 + $0xc30] sm:$0xf] }
 0x434   :  { %v2791_v14 = vadd.f32 %v20086_v22, %v2790_v12  ;;  %v12400_v31 = vor.u32 %v16968_v44, %v12399_v21  ;;  %v16947_v12 = vld [vmem:[%s25878_s3 + $0xc34] sm:$0xf]  ;;  %v16969_v21 = vld [vmem:[%s25878_s3 + $0xcdc] sm:$0xf0] }
 0x435   :  { %v12332_v44 = vor.u32 %v16947_v12, %v12329_v16  ;;  %v12408_v15 = vor.u32 %v16969_v21, %v12407_v18  ;;  %v12313_v12 = vld [vmem:[%s25878_s3 + $0xc20] sm:$0xf0]  ;;  %v16970_v16 = vld [vmem:[%s25878_s3 + $0xce4] sm:$0xf0] }
 0x436   :  { %v2794_v28 = vmax.f32 %v2791_v14, 0.0  ;;  %3481 = vmatpush.bf16.msra.mxu0 %v12400_v31  ;;  %v12328_v14 = vor.u32 %v16950_v10, %v12327_v62  ;;  %v16942_v62 = vld [vmem:[%s25878_s3 + $0xc0c] sm:$0xf] }
 0x437   :  { %v12316_v18 = vor.u32 %v16942_v62, %v12313_v12  ;;  %v12715_v12 = vld [vmem:[%s25878_s3 + $0xee8] sm:$0xf0] }
 0x438   :  { %v2795_v19 = vpack.c.bf16 %v2794_v28, %v2794_v28  ;;  %v2753_v30 = vpop.f32.mrf.mxu2  ;;  %v12409_v28 = vld [vmem:[%s25878_s3 + $0xce0] sm:$0xf0] }
 0x439   :  { %v20426_v40 = vadd.f32 %v2753_v30, %v20081_v63  ;;  %v16971_v63 = vld [vmem:[%s25878_s3 + $0xcf4] sm:$0xf]  ;;  %v12412_v35 = vor.u32 %v16966_v23, %v12409_v28  ;;  %v16941_v30 = vld [vmem:[%s25878_s3 + $0xc04] sm:$0xf]  ;;  %v12391_v28 = vld [vmem:[%s25878_s3 + $0xca0] sm:$0xf] }
 0x43a   :  { %3093 = vmatmul.bf16.vlgmr.msra.gmra.mxu3 %v2795_v19  ;;  %3106 = vmatmul.bf16.vlgmr.msrb.gmra.mxu1 %v2795_v19  ;;  %v2768_v41 = vpop.f32.mrf.mxu0  ;;  %v12428_v45 = vor.u32 %v16971_v63, %v12425_v42  ;;  %v16988_v63 = vld [vmem:[%s25878_s3 + $0xd74] sm:$0xf0] }
 0x43b   :  { %3119 = vmatmul.bf16.vlgmr.msra.gmra.mxu2 %v2795_v19  ;;  %3132 = vmatmul.bf16.vlgmr.msrb.gmra.mxu0 %v2795_v19  ;;  %v2792_v32 = vpop.f32.mrf.mxu1 }
 0x43c   :  { %3491 = vmatpush.bf16.msra.mxu2 %v12476_v39  ;;  %3504 = vmatpush.bf16.msra.mxu3 %v12480_v36  ;;  %v12305_v39 = vld [vmem:[%s25878_s3 + $0xc18] sm:$0xf0]  ;;  %v16963_v36 = vld [vmem:[%s25878_s3 + $0xcac] sm:$0xf0]  ;;  %v12385_v32 = vld [vmem:[%s25878_s3 + $0xcb0] sm:$0xf0] }
 0x43d   :  { %3517 = vmatpush.bf16.msrb.mxu1 %v12484_v37  ;;  %3482 = vmatpush.bf16.msra.mxu0 %v12376_v49  ;;  %v12308_v38 = vor.u32 %v16941_v30, %v12305_v39  ;;  %v16960_v37 = vld [vmem:[%s25878_s3 + $0xc9c] sm:$0xf]  ;;  %v12384_v41 = vor.u32 %v16963_v36, %v12383_v33  ;;  %v12463_v49 = vld [vmem:[%s25878_s3 + $0xd30] sm:$0xf]  ;;  %v16955_v33 = vld [vmem:[%s25878_s3 + $0xc74] sm:$0xf] }
 0x43e   :  { %v12388_v42 = vor.u32 %v16960_v37, %v12385_v32  ;;  %v12464_v52 = vor.u32 %v16982_v50, %v12463_v49  ;;  %v12393_v30 = vld [vmem:[%s25878_s3 + $0xcb8] sm:$0xf0] }
 0x440   :  { %v2755_v43 = vpop.f32.mrf.mxu2  ;;  %3492 = vmatpush.bf16.msra.mxu2 %v12452_v46  ;;  %3505 = vmatpush.bf16.msra.mxu3 %v12456_v56  ;;  %v12487_v46 = vld [vmem:[%s25878_s3 + $0xd60] sm:$0xf]  ;;  %v12465_v56 = vld [vmem:[%s25878_s3 + $0xd48] sm:$0xf0] }
 0x441   :  { %3518 = vmatpush.bf16.msrb.mxu1 %v12460_v13  ;;  %3483 = vmatpush.bf16.msra.mxu0 %v12352_v4  ;;  %v12488_v43 = vor.u32 %v16988_v63, %v12487_v46  ;;  %v16951_v13 = vld [vmem:[%s25878_s3 + $0xc4c] sm:$0xf0]  ;;  %v12439_v4 = vld [vmem:[%s25878_s3 + $0xd00] sm:$0xf] }
 0x442   :  { %v12336_v1 = vor.u32 %v16951_v13, %v12335_v7  ;;  %v12440_v5 = vor.u32 %v16976_v57, %v12439_v4  ;;  %v17028_v4 = vld [vmem:[%s25878_s3 + $0xeb4] sm:$0xf0] }
 0x444   :  { %3493 = vmatpush.bf16.msra.mxu2 %v12428_v45  ;;  %3506 = vmatpush.bf16.msra.mxu3 %v12432_v6  ;;  %v16985_v45 = vld [vmem:[%s25878_s3 + $0xd64] sm:$0xf]  ;;  %v12444_v6 = vor.u32 %v16973_v17, %v12441_v29  ;;  %v17022_v17 = vld [vmem:[%s25878_s3 + $0xe84] sm:$0xf0] }
 0x445   :  { %3519 = vmatpush.bf16.msrb.mxu1 %v12436_v8  ;;  %3484 = vmatpush.bf16.msra.mxu0 %v12328_v14  ;;  %v12492_v58 = vor.u32 %v16985_v45, %v12489_v47  ;;  %v16945_v8 = vld [vmem:[%s25878_s3 + $0xc1c] sm:$0xf0]  ;;  %v12415_v14 = vld [vmem:[%s25878_s3 + $0xcd0] sm:$0xf]  ;;  %v16949_v47 = vld [vmem:[%s25878_s3 + $0xc44] sm:$0xf] }
 0x446   :  { %v12312_v10 = vor.u32 %v16945_v8, %v12311_v9  ;;  %v12416_v21 = vor.u32 %v16970_v16, %v12415_v14  ;;  %v12641_v14 = vld [vmem:[%s25878_s3 + $0xe40] sm:$0xf]  ;;  %v17035_v16 = vld [vmem:[%s25878_s3 + $0xeec] sm:$0xf0] }
 0x448   :  { %3494 = vmatpush.bf16.msra.mxu2 %v12404_v25  ;;  %3507 = vmatpush.bf16.msra.mxu3 %v12408_v15  ;;  %v12359_v25 = vld [vmem:[%s25878_s3 + $0xc68] sm:$0xf]  ;;  %v12417_v15 = vld [vmem:[%s25878_s3 + $0xce8] sm:$0xf0] }
 0x449   :  { %3520 = vmatpush.bf16.msrb.mxu1 %v12412_v35  ;;  %v16961_v35 = vld [vmem:[%s25878_s3 + $0xca4] sm:$0xf] }
 0x44a   :  { %3145 = vmatmul.bf16.vlgmr.msrb.gmra.mxu3 %v2795_v19  ;;  %3158 = vmatmul.bf16.vlgmr.msra.gmra.mxu1 %v2795_v19  ;;  %v16944_v19 = vld [vmem:[%s25878_s3 + $0xc14] sm:$0xf0]  ;;  %v12396_v39 = vor.u32 %v16961_v35, %v12393_v30  ;;  %v12691_v35 = vld [vmem:[%s25878_s3 + $0xeb8] sm:$0xf0] }
 0x44b   :  { %12252 = vmatmul.msk.bf16.vlgmr.msrb.gmra.mxu2 %vm35_vm1, %v12251_v34  ;;  %v12304_v31 = vor.u32 %v16944_v19, %v12303_v27  ;;  %v16957_v34 = vld [vmem:[%s25878_s3 + $0xc7c] sm:$0xf0]  ;;  %v16964_v27 = vld [vmem:[%s25878_s3 + $0xcb4] sm:$0xf0] }
 0x44c   :  { %3495 = vmatpush.bf16.msra.mxu2 %v12380_v54  ;;  %3508 = vmatpush.bf16.msra.mxu3 %v12384_v41  ;;  %v12360_v26 = vor.u32 %v16957_v34, %v12359_v25  ;;  %v16979_v54 = vld [vmem:[%s25878_s3 + $0xd34] sm:$0xf]  ;;  %v12392_v19 = vor.u32 %v16964_v27, %v12391_v28  ;;  %v12369_v41 = vld [vmem:[%s25878_s3 + $0xc88] sm:$0xf0]  ;;  %v12319_v34 = vld [vmem:[%s25878_s3 + $0xc10] sm:$0xf] }
 0x44d   :  { %3485 = vmatpush.bf16.msra.mxu0 %v12304_v31  ;;  %3521 = vmatpush.bf16.msrb.mxu1 %v12388_v42  ;;  %v12468_v59 = vor.u32 %v16979_v54, %v12465_v56  ;;  %v12367_v31 = vld [vmem:[%s25878_s3 + $0xc70] sm:$0xf]  ;;  %v12372_v63 = vor.u32 %v16955_v33, %v12369_v41  ;;  %v12343_v42 = vld [vmem:[%s25878_s3 + $0xc40] sm:$0xf]  ;;  %v17025_v27 = vld [vmem:[%s25878_s3 + $0xea4] sm:$0xf] }
 0x44e   :  { %v17019_v33 = vld [vmem:[%s25878_s3 + $0xe74] sm:$0xf]  ;;  %v17013_v41 = vld [vmem:[%s25878_s3 + $0xe44] sm:$0xf] }
 0x450   :  { %3496 = vmatpush.bf16.msra.mxu2 %v12356_v60  ;;  %3509 = vmatpush.bf16.msra.mxu3 %v12360_v26  ;;  %v12340_v60 = vor.u32 %v16948_v3, %v12337_v0  ;;  %v16943_v26 = vld [vmem:[%s25878_s3 + $0xc14] sm:$0xf]  ;;  %v12713_v3 = vld [vmem:[%s25878_s3 + $0xed0] sm:$0xf]  ;;  %v12689_v0 = vld [vmem:[%s25878_s3 + $0xea0] sm:$0xf] }
 0x451   :  { %3530 = vmatpush.bf16.msrb.mxu0 %v12488_v43  ;;  %3522 = vmatpush.bf16.msrb.mxu1 %v12364_v51  ;;  %v16952_v43 = vld [vmem:[%s25878_s3 + $0xc54] sm:$0xf0] }
 0x454   :  { %3497 = vmatpush.bf16.msra.mxu2 %v12332_v44  ;;  %3510 = vmatpush.bf16.msra.mxu3 %v12336_v1  ;;  %v16967_v44 = vld [vmem:[%s25878_s3 + $0xcd4] sm:$0xf] }
 0x455   :  { %3531 = vmatpush.bf16.msrb.mxu0 %v12464_v52  ;;  %3523 = vmatpush.bf16.msrb.mxu1 %v12340_v60  ;;  %v12420_v23 = vor.u32 %v16967_v44, %v12417_v15  ;;  %v12690_v60 = vor.u32 %v17028_v4, %v12689_v0  ;;  %v12723_v44 = vld [vmem:[%s25878_s3 + $0xef0] sm:$0xf0] }
 0x456   :  { %v12675_v4 = vld [vmem:[%s25878_s3 + $0xe90] sm:$0xf0] }
 0x458   :  { %3498 = vmatpush.bf16.msra.mxu2 %v12308_v38  ;;  %3511 = vmatpush.bf16.msra.mxu3 %v12312_v10  ;;  %v16958_v38 = vld [vmem:[%s25878_s3 + $0xc84] sm:$0xf0]  ;;  %v17031_v10 = vld [vmem:[%s25878_s3 + $0xed4] sm:$0xf] }
 0x459   :  { %3532 = vmatpush.bf16.msrb.mxu0 %v12440_v5  ;;  %3524 = vmatpush.bf16.msrb.mxu1 %v12316_v18  ;;  %v12368_v37 = vor.u32 %v16958_v38, %v12367_v31  ;;  %v12665_v5 = vld [vmem:[%s25878_s3 + $0xe70] sm:$0xf]  ;;  %v12694_v38 = vor.u32 %v17025_v27, %v12691_v35  ;;  %v17008_v35 = vld [vmem:[%s25878_s3 + $0xe1c] sm:$0xf] }
 0x45a   :  { %v17011_v27 = vld [vmem:[%s25878_s3 + $0xe2c] sm:$0xf0] }
 0x45c   :  { %3543 = vmatpush.bf16.msrb.mxu2 %v12492_v58  ;;  %3574 = vmatpush.bf16.msrb.mxu3 %v17889_v2  ;;  %v12344_v58 = vor.u32 %v16952_v43, %v12343_v42  ;;  %v12493_v42 = vld [vmem:[%s25875_s0 + $0x9] sm:$0x1]  ;;  %v12617_v43 = vld [vmem:[%s25878_s3 + $0xe10] sm:$0xf] }
 0x45d   :  { %3533 = vmatpush.bf16.msrb.mxu0 %v12416_v21  ;;  %v17032_v21 = vld [vmem:[%s25878_s3 + $0xedc] sm:$0xf] }
 0x45e   :  { %v12726_v30 = vor.u32 %v17032_v21, %v12723_v44  ;;  %v16989_v21 = vld [vmem:[%s25878_s3 + $0xd84] sm:$0xf]  ;;  %v12547_v44 = vld [vmem:[%s25878_s3 + $0xd98] sm:$0xf0] }
 0x460   :  { %3544 = vmatpush.bf16.msrb.mxu2 %v12468_v59  ;;  %v12324_v59 = vor.u32 %v16943_v26, %v12321_v48  ;;  %v17026_v48 = vld [vmem:[%s25878_s3 + $0xeac] sm:$0xf] }
 0x461   :  { %3534 = vmatpush.bf16.msrb.mxu0 %v12392_v19 }
 0x464   :  { %3545 = vmatpush.bf16.msrb.mxu2 %v12444_v6  ;;  %v12666_v6 = vor.u32 %v17022_v17, %v12665_v5  ;;  %v12569_v5 = vld [vmem:[%s25878_s3 + $0xdb0] sm:$0xf]  ;;  %v16998_v17 = vld [vmem:[%s25878_s3 + $0xdc4] sm:$0xf0] }
 0x465   :  { %3535 = vmatpush.bf16.msrb.mxu0 %v12368_v37 }
 0x468   :  { %3546 = vmatpush.bf16.msrb.mxu2 %v12420_v23  ;;  %v12718_v23 = vor.u32 %v17031_v10, %v12715_v12 }
 0x469   :  { %3536 = vmatpush.bf16.msrb.mxu0 %v12344_v58 }
 0x46c   :  { %3547 = vmatpush.bf16.msrb.mxu2 %v12396_v39 }
 0x470   :  { %3548 = vmatpush.bf16.msrb.mxu2 %v12372_v63 }
 0x4b7   :  { %v3107_v36 = vpop.f32.mrf.mxu1 }
 0x4b8   :  { %v20656_v32 = vadd.f32 %v3107_v36, %v20368_v53  ;;  %v3133_v46 = vpop.f32.mrf.mxu0  ;;  %v12345_v53 = vld [vmem:[%s25878_s3 + $0xc58] sm:$0xf0]  ;;  %v12667_v36 = vld [vmem:[%s25878_s3 + $0xe88] sm:$0xf0] }
 0x4b9   :  { %v20665_v45 = vadd.f32 %v3133_v46, %v20377_v24  ;;  %v12348_v25 = vor.u32 %v16949_v47, %v12345_v53  ;;  %v16946_v24 = vld [vmem:[%s25878_s3 + $0xc24] sm:$0xf0]  ;;  %v12670_v37 = vor.u32 %v17019_v33, %v12667_v36  ;;  %v12643_v46 = vld [vmem:[%s25878_s3 + $0xe58] sm:$0xf0]  ;;  %v17007_v53 = vld [vmem:[%s25878_s3 + $0xe14] sm:$0xf] }
 0x4ba   :  { %v12320_v54 = vor.u32 %v16946_v24, %v12319_v34  ;;  %v12646_v63 = vor.u32 %v17013_v41, %v12643_v46  ;;  %v17010_v47 = vld [vmem:[%s25878_s3 + $0xe24] sm:$0xf0]  ;;  %v17029_v24 = vld [vmem:[%s25878_s3 + $0xebc] sm:$0xf0]  ;;  %v17033_v36 = vld [vmem:[%s25878_s3 + $0xee4] sm:$0xf] }
 0x4bb   :  { %3549 = vmatpush.bf16.msrb.mxu2 %v12348_v25  ;;  %v12618_v58 = vor.u32 %v17010_v47, %v12617_v43  ;;  %v12619_v25 = vld [vmem:[%s25878_s3 + $0xe28] sm:$0xf0]  ;;  %v12697_v34 = vld [vmem:[%s25878_s3 + $0xea8] sm:$0xf]  ;;  %v12603_v47 = vld [vmem:[%s25878_s3 + $0xe00] sm:$0xf0] }
 0x4bc   :  { %3537 = vmatpush.bf16.msrb.mxu0 %v12320_v54  ;;  %v12698_v26 = vor.u32 %v17029_v24, %v12697_v34  ;;  %v12593_v54 = vld [vmem:[%s25878_s3 + $0xde0] sm:$0xf]  ;;  %v12601_v46 = vld [vmem:[%s25878_s3 + $0xde8] sm:$0xf]  ;;  %v17027_v24 = vld [vmem:[%s25878_s3 + $0xeb4] sm:$0xf] }
 0x4bd   :  { %v3094_v20 = vpop.f32.mrf.mxu3 }
 0x4be   :  { %v20686_v49 = vadd.f32 %v3094_v20, %v20374_v61  ;;  %v3120_v50 = vpop.f32.mrf.mxu2  ;;  %v17034_v61 = vld [vmem:[%s25878_s3 + $0xee4] sm:$0xf0]  ;;  %v12622_v20 = vor.u32 %v17007_v53, %v12619_v25  ;;  %v12705_v53 = vld [vmem:[%s25878_s3 + $0xeb0] sm:$0xf] }
 0x4bf   :  { %v20689_v51 = vadd.f32 %v3120_v50, %v20371_v55  ;;  %v3109_v52 = vpop.f32.mrf.mxu1  ;;  %3550 = vmatpush.bf16.msrb.mxu2 %v12324_v59  ;;  %v12714_v1 = vor.u32 %v17034_v61, %v12713_v3  ;;  %v12699_v50 = vld [vmem:[%s25878_s3 + $0xec0] sm:$0xf0]  ;;  %v12673_v61 = vld [vmem:[%s25878_s3 + $0xe78] sm:$0xf] }
 0x4c0   :  { %v3135_v56 = vpop.f32.mrf.mxu0  ;;  %v12702_v52 = vor.u32 %v17026_v48, %v12699_v50  ;;  %v17001_v59 = vld [vmem:[%s25878_s3 + $0xde4] sm:$0xf]  ;;  %v12577_v48 = vld [vmem:[%s25878_s3 + $0xdb8] sm:$0xf]  ;;  %v16999_v50 = vld [vmem:[%s25878_s3 + $0xdcc] sm:$0xf0] }
 0x4c1   :  { %3871 = vmatpush.bf16.msra.mxu1 %v12714_v1  ;;  %v17004_v56 = vld [vmem:[%s25878_s3 + $0xdf4] sm:$0xf0]  ;;  %v17020_v1 = vld [vmem:[%s25878_s3 + $0xe7c] sm:$0xf] }
 0x4c5   :  { %v3096_v7 = vpop.f32.mrf.mxu3  ;;  %3872 = vmatpush.bf16.msra.mxu1 %v12690_v60  ;;  %v12678_v60 = vor.u32 %v17020_v1, %v12675_v4  ;;  %v16993_v4 = vld [vmem:[%s25878_s3 + $0xd9c] sm:$0xf0] }
 0x4c6   :  { %v3122_v13 = vpop.f32.mrf.mxu2  ;;  %v12594_v7 = vor.u32 %v17004_v56, %v12593_v54  ;;  %v12578_v54 = vor.u32 %v16999_v50, %v12577_v48  ;;  %v12579_v56 = vld [vmem:[%s25878_s3 + $0xdd0] sm:$0xf0]  ;;  %v12955_v50 = vld [vmem:[%s25878_s3 + $0x1050] sm:$0xf] }
 0x4c7   :  { %v3159_v55 = vpop.f32.mrf.mxu1  ;;  %v12595_v13 = vld [vmem:[%s25878_s3 + $0xdf8] sm:$0xf0] }
 0x4c8   :  { %v20704_v57 = vadd.f32 %v3159_v55, %v20398_v11  ;;  %v12598_v3 = vor.u32 %v17001_v59, %v12595_v13  ;;  %v17023_v55 = vld [vmem:[%s25878_s3 + $0xe8c] sm:$0xf0]  ;;  %v12681_v59 = vld [vmem:[%s25878_s3 + $0xe80] sm:$0xf] }
 0x4c9   :  { %3873 = vmatpush.bf16.msra.mxu1 %v12666_v6  ;;  %v12674_v0 = vor.u32 %v17023_v55, %v12673_v61  ;;  %v12570_v6 = vor.u32 %v16998_v17, %v12569_v5  ;;  %v17021_v61 = vld [vmem:[%s25878_s3 + $0xe84] sm:$0xf]  ;;  %v12683_v55 = vld [vmem:[%s25878_s3 + $0xe98] sm:$0xf0] }
 0x4ca   :  { %v12686_v1 = vor.u32 %v17021_v61, %v12683_v55  ;;  %v12555_v17 = vld [vmem:[%s25878_s3 + $0xda0] sm:$0xf0] }
 0x4cd   :  { %v3146_v29 = vpop.f32.mrf.mxu3 }
 0x4ce   :  { %v20713_v9 = vadd.f32 %v3146_v29, %v20426_v40  ;;  %v3183_v8 = vpop.f32.mrf.mxu2  ;;  %v17016_v40 = vld [vmem:[%s25878_s3 + $0xe54] sm:$0xf0]  ;;  %v16995_v29 = vld [vmem:[%s25878_s3 + $0xdb4] sm:$0xf] }
 0x4cf   :  { %v3184_v11 = vadd.f32 %v20086_v22, %v3183_v8  ;;  %v3161_v62 = vpop.f32.mrf.mxu1  ;;  %v12721_v22 = vld [vmem:[%s25878_s3 + $0xed8] sm:$0xf]  ;;  %v12642_v28 = vor.u32 %v17016_v40, %v12641_v14  ;;  %v12571_v8 = vld [vmem:[%s25878_s3 + $0xdc8] sm:$0xf0]  ;;  %v12651_v40 = vld [vmem:[%s25878_s3 + $0xe60] sm:$0xf0] }
 0x4d0   :  { %v12722_v19 = vor.u32 %v17035_v16, %v12721_v22  ;;  %v17017_v62 = vld [vmem:[%s25878_s3 + $0xe5c] sm:$0xf0]  ;;  %v12574_v10 = vor.u32 %v16995_v29, %v12571_v8  ;;  %v17014_v14 = vld [vmem:[%s25878_s3 + $0xe4c] sm:$0xf]  ;;  %v12657_v29 = vld [vmem:[%s25878_s3 + $0xe50] sm:$0xf] }
 0x4d1   :  { %v3187_v18 = vmax.f32 %v3184_v11, 0.0  ;;  %3874 = vmatpush.bf16.msra.mxu1 %v12642_v28  ;;  %v12649_v11 = vld [vmem:[%s25878_s3 + $0xe48] sm:$0xf]  ;;  %v12545_v22 = vld [vmem:[%s25878_s3 + $0xd80] sm:$0xf]  ;;  %v12654_v16 = vor.u32 %v17014_v14, %v12651_v40 }
 0x4d2   :  { %v12650_v12 = vor.u32 %v17017_v62, %v12649_v11  ;;  %v12625_v28 = vld [vmem:[%s25878_s3 + $0xe18] sm:$0xf]  ;;  %v17015_v62 = vld [vmem:[%s25878_s3 + $0xe54] sm:$0xf]  ;;  %v12633_v14 = vld [vmem:[%s25878_s3 + $0xe20] sm:$0xf] }
 0x4d3   :  { %v3188_v15 = vpack.c.bf16 %v3187_v18, %v3187_v18  ;;  %v16992_v18 = vld [vmem:[%s25878_s3 + $0xd94] sm:$0xf0] }
 0x4d4   :  { %v17012_v40 = vld [vmem:[%s25878_s3 + $0xe34] sm:$0xf0] }
 0x4d5   :  { %3486 = vmatmul.bf16.vlgmr.msra.gmra.mxu0 %v3188_v15  ;;  %3499 = vmatmul.bf16.vlgmr.msra.gmra.mxu2 %v3188_v15  ;;  %v3148_v39 = vpop.f32.mrf.mxu3 }
 0x4d6   :  { %3512 = vmatmul.bf16.vlgmr.msra.gmra.mxu3 %v3188_v15  ;;  %3525 = vmatmul.bf16.vlgmr.msrb.gmra.mxu1 %v3188_v15  ;;  %v3185_v31 = vpop.f32.mrf.mxu2  ;;  %v12729_v39 = vld [vmem:[%s25878_s3 + $0xee0] sm:$0xf] }
 0x4d7   :  { %3884 = vmatpush.bf16.msra.mxu3 %v12718_v23  ;;  %3897 = vmatpush.bf16.msra.mxu0 %v12722_v19  ;;  %v12550_v23 = vor.u32 %v16989_v21, %v12547_v44  ;;  %v12626_v19 = vor.u32 %v17011_v27, %v12625_v28  ;;  %v17036_v31 = vld [vmem:[%s25878_s3 + $0xef4] sm:$0xf0]  ;;  %v12609_v44 = vld [vmem:[%s25878_s3 + $0xdf0] sm:$0xf] }
 0x4d8   :  { %3910 = vmatpush.bf16.msra.mxu2 %v12726_v30  ;;  %3875 = vmatpush.bf16.msra.mxu1 %v12618_v58  ;;  %v12627_v30 = vld [vmem:[%s25878_s3 + $0xe30] sm:$0xf0]  ;;  %v12730_v33 = vor.u32 %v17036_v31, %v12729_v39  ;;  %v17030_v58 = vld [vmem:[%s25878_s3 + $0xec4] sm:$0xf0]  ;;  %v12585_v31 = vld [vmem:[%s25878_s3 + $0xdc0] sm:$0xf] }
 0x4d9   :  { %v12706_v34 = vor.u32 %v17030_v58, %v12705_v53 }
 0x4db   :  { %3885 = vmatpush.bf16.msra.mxu3 %v12694_v38  ;;  %3898 = vmatpush.bf16.msra.mxu0 %v12698_v26  ;;  %v12630_v38 = vor.u32 %v17008_v35, %v12627_v30  ;;  %v12611_v35 = vld [vmem:[%s25878_s3 + $0xe08] sm:$0xf0] }
 0x4dc   :  { %3911 = vmatpush.bf16.msra.mxu2 %v12702_v52  ;;  %3876 = vmatpush.bf16.msra.mxu1 %v12594_v7  ;;  %v16996_v52 = vld [vmem:[%s25878_s3 + $0xdbc] sm:$0xf]  ;;  %v17024_v7 = vld [vmem:[%s25878_s3 + $0xe94] sm:$0xf0] }
 0x4dd   :  { %v12582_v13 = vor.u32 %v16996_v52, %v12579_v56  ;;  %v17076_v56 = vld [vmem:[%s25878_s3 + $0x1034] sm:$0xf0] }
 0x4df   :  { %3886 = vmatpush.bf16.msra.mxu3 %v12670_v37  ;;  %3899 = vmatpush.bf16.msra.mxu0 %v12674_v0  ;;  %v12731_v37 = vld [vmem:[%s25878_s3 + $0xef8] sm:$0xf0]  ;;  %v12553_v0 = vld [vmem:[%s25878_s3 + $0xd88] sm:$0xf] }
 0x4e0   :  { %3912 = vmatpush.bf16.msra.mxu2 %v12678_v60  ;;  %3877 = vmatpush.bf16.msra.mxu1 %v12570_v6  ;;  %v12734_v41 = vor.u32 %v17033_v36, %v12731_v37  ;;  %v16990_v60 = vld [vmem:[%s25878_s3 + $0xd8c] sm:$0xf]  ;;  %v12554_v5 = vor.u32 %v16993_v4, %v12553_v0  ;;  %v17018_v6 = vld [vmem:[%s25878_s3 + $0xe64] sm:$0xf0]  ;;  %v16997_v36 = vld [vmem:[%s25878_s3 + $0xdc4] sm:$0xf] }
 0x4e1   :  { %v12558_v8 = vor.u32 %v16990_v60, %v12555_v17  ;;  %v12658_v11 = vor.u32 %v17018_v6, %v12657_v29  ;;  %v12957_v17 = vld [vmem:[%s25878_s3 + $0x1068] sm:$0xf0]  ;;  %v17064_v29 = vld [vmem:[%s25878_s3 + $0xfd4] sm:$0xf0] }
 0x4e2   :  { %v12963_v6 = vld [vmem:[%s25878_s3 + $0x1058] sm:$0xf] }
 0x4e3   :  { %3887 = vmatpush.bf16.msra.mxu3 %v12646_v63  ;;  %3900 = vmatpush.bf16.msra.mxu0 %v12650_v12  ;;  %v17005_v63 = vld [vmem:[%s25878_s3 + $0xdfc] sm:$0xf0] }
 0x4e4   :  { %3913 = vmatpush.bf16.msra.mxu2 %v12654_v16  ;;  %v12602_v43 = vor.u32 %v17005_v63, %v12601_v46  ;;  %v12634_v16 = vor.u32 %v17012_v40, %v12633_v14  ;;  %v12561_v46 = vld [vmem:[%s25878_s3 + $0xd90] sm:$0xf]  ;;  %v17073_v40 = vld [vmem:[%s25878_s3 + $0x1024] sm:$0xf] }
 0x4e5   :  { %3538 = vmatmul.bf16.vlgmr.msrb.gmra.mxu0 %v3188_v15  ;;  %3551 = vmatmul.bf16.vlgmr.msrb.gmra.mxu2 %v3188_v15  ;;  %v12546_v15 = vor.u32 %v16992_v18, %v12545_v22  ;;  %v17009_v22 = vld [vmem:[%s25878_s3 + $0xe24] sm:$0xf]  ;;  %v12635_v18 = vld [vmem:[%s25878_s3 + $0xe38] sm:$0xf0] }
 0x4e6   :  { %12494 = vmatmul.msk.bf16.vlgmr.msrb.gmra.mxu3 %vm35_vm1, %v12493_v42  ;;  %v17002_v42 = vld [vmem:[%s25878_s3 + $0xdec] sm:$0xf]  ;;  %v12638_v21 = vor.u32 %v17009_v22, %v12635_v18  ;;  %v12933_v22 = vld [vmem:[%s25878_s3 + $0x1038] sm:$0xf0] }
 0x4e7   :  { %3888 = vmatpush.bf16.msra.mxu3 %v12622_v20  ;;  %3878 = vmatpush.bf16.msra.mxu1 %v12546_v15  ;;  %v12606_v25 = vor.u32 %v17002_v42, %v12603_v47  ;;  %v12707_v20 = vld [vmem:[%s25878_s3 + $0xec8] sm:$0xf0]  ;;  %v17006_v15 = vld [vmem:[%s25878_s3 + $0xe04] sm:$0xf0]  ;;  %v16991_v42 = vld [vmem:[%s25878_s3 + $0xd94] sm:$0xf] }
 0x4e8   :  { %3901 = vmatpush.bf16.msra.mxu0 %v12626_v19  ;;  %3914 = vmatpush.bf16.msra.mxu2 %v12630_v38  ;;  %v12710_v26 = vor.u32 %v17027_v24, %v12707_v20  ;;  %v12610_v27 = vor.u32 %v17006_v15, %v12609_v44  ;;  %v17000_v38 = vld [vmem:[%s25878_s3 + $0xdd4] sm:$0xf0]  ;;  %v12859_v44 = vld [vmem:[%s25878_s3 + $0xf90] sm:$0xf]  ;;  %v17058_v15 = vld [vmem:[%s25878_s3 + $0xfa4] sm:$0xf0] }
 0x4e9   :  { %v12586_v37 = vor.u32 %v17000_v38, %v12585_v31  ;;  %v12936_v31 = vor.u32 %v17073_v40, %v12933_v22  ;;  %v17067_v38 = vld [vmem:[%s25878_s3 + $0xff4] sm:$0xf]  ;;  %v12867_v40 = vld [vmem:[%s25878_s3 + $0xf98] sm:$0xf]  ;;  %v17059_v22 = vld [vmem:[%s25878_s3 + $0xfac] sm:$0xf0] }
 0x4eb   :  { %3889 = vmatpush.bf16.msra.mxu3 %v12598_v3  ;;  %3923 = vmatpush.bf16.msrb.mxu1 %v12730_v33  ;;  %v12682_v3 = vor.u32 %v17024_v7, %v12681_v59 }
 0x4ec   :  { %3902 = vmatpush.bf16.msra.mxu0 %v12602_v43  ;;  %3915 = vmatpush.bf16.msra.mxu2 %v12606_v25  ;;  %v12563_v43 = vld [vmem:[%s25878_s3 + $0xda8] sm:$0xf0] }
 0x4ed   :  { %v12566_v20 = vor.u32 %v16991_v42, %v12563_v43  ;;  %v17061_v43 = vld [vmem:[%s25878_s3 + $0xfc4] sm:$0xf] }
 0x4ef   :  { %3890 = vmatpush.bf16.msra.mxu3 %v12574_v10  ;;  %3924 = vmatpush.bf16.msrb.mxu1 %v12706_v34  ;;  %v12659_v10 = vld [vmem:[%s25878_s3 + $0xe68] sm:$0xf0] }
 0x4f0   :  { %3903 = vmatpush.bf16.msra.mxu0 %v12578_v54  ;;  %3916 = vmatpush.bf16.msra.mxu2 %v12582_v13  ;;  %v12662_v12 = vor.u32 %v17015_v62, %v12659_v10  ;;  %v12931_v54 = vld [vmem:[%s25878_s3 + $0x1020] sm:$0xf]  ;;  %v12907_v13 = vld [vmem:[%s25878_s3 + $0xff0] sm:$0xf]  ;;  %v17080_v62 = vld [vmem:[%s25878_s3 + $0x105c] sm:$0xf] }
 0x4f1   :  { %v12932_v7 = vor.u32 %v17076_v56, %v12931_v54  ;;  %v12965_v10 = vld [vmem:[%s25878_s3 + $0x1070] sm:$0xf0]  ;;  %v17068_v54 = vld [vmem:[%s25878_s3 + $0xffc] sm:$0xf] }
 0x4f3   :  { %3891 = vmatpush.bf16.msra.mxu3 %v12550_v23  ;;  %3925 = vmatpush.bf16.msrb.mxu1 %v12682_v3  ;;  %v17003_v23 = vld [vmem:[%s25878_s3 + $0xdf4] sm:$0xf]  ;;  %v17070_v3 = vld [vmem:[%s25878_s3 + $0x1004] sm:$0xf0] }
 0x4f4   :  { %3904 = vmatpush.bf16.msra.mxu0 %v12554_v5  ;;  %3917 = vmatpush.bf16.msra.mxu2 %v12558_v8  ;;  %v12614_v39 = vor.u32 %v17003_v23, %v12611_v35  ;;  %v12908_v55 = vor.u32 %v17070_v3, %v12907_v13  ;;  %v17079_v5 = vld [vmem:[%s25878_s3 + $0x1054] sm:$0xf]  ;;  %v17083_v8 = vld [vmem:[%s25878_s3 + $0x106c] sm:$0xf0]  ;;  %v12939_v23 = vld [vmem:[%s25878_s3 + $0x1028] sm:$0xf] }
 0x4f5   :  { %v12960_v14 = vor.u32 %v17079_v5, %v12957_v17  ;;  %v12964_v18 = vor.u32 %v17083_v8, %v12963_v6  ;;  %v17074_v35 = vld [vmem:[%s25878_s3 + $0x102c] sm:$0xf]  ;;  %v12811_v3 = vld [vmem:[%s25878_s3 + $0xf30] sm:$0xf]  ;;  %v17065_v5 = vld [vmem:[%s25878_s3 + $0xfdc] sm:$0xf0] }
 0x4f6   :  { %v12893_v6 = vld [vmem:[%s25878_s3 + $0xfe0] sm:$0xf0] }
 0x4f7   :  { %3936 = vmatpush.bf16.msrb.mxu3 %v12734_v41  ;;  %3926 = vmatpush.bf16.msrb.mxu1 %v12658_v11 }
 0x4f8   :  { %3967 = vmatpush.bf16.msrb.mxu0 %v17889_v2 }
 0x4fb   :  { %3937 = vmatpush.bf16.msrb.mxu3 %v12710_v26  ;;  %3927 = vmatpush.bf16.msrb.mxu1 %v12634_v16 }
 0x4ff   :  { %3938 = vmatpush.bf16.msrb.mxu3 %v12686_v1  ;;  %3928 = vmatpush.bf16.msrb.mxu1 %v12610_v27  ;;  %v17077_v27 = vld [vmem:[%s25878_s3 + $0x103c] sm:$0xf0] }
 0x503   :  { %3939 = vmatpush.bf16.msrb.mxu3 %v12662_v12  ;;  %3929 = vmatpush.bf16.msrb.mxu1 %v12586_v37  ;;  %v12940_v37 = vor.u32 %v17077_v27, %v12939_v23  ;;  %v17081_v27 = vld [vmem:[%s25878_s3 + $0x1064] sm:$0xf] }
 0x507   :  { %3940 = vmatpush.bf16.msrb.mxu3 %v12638_v21  ;;  %v12968_v21 = vor.u32 %v17080_v62, %v12965_v10  ;;  %v17040_v62 = vld [vmem:[%s25878_s3 + $0xf14] sm:$0xf0]  ;;  %v17037_v10 = vld [vmem:[%s25878_s3 + $0xf04] sm:$0xf] }
 0x50b   :  { %3941 = vmatpush.bf16.msrb.mxu3 %v12614_v39 }
 0x552   :  { %v3487_v28 = vpop.f32.mrf.mxu0 }
 0x553   :  { %v20968_v19 = vadd.f32 %v3487_v28, %v20686_v49  ;;  %v3526_v30 = vpop.f32.mrf.mxu1  ;;  %v12587_v49 = vld [vmem:[%s25878_s3 + $0xdd8] sm:$0xf0] }
 0x554   :  { %v20977_v33 = vadd.f32 %v3526_v30, %v20665_v45  ;;  %v12590_v41 = vor.u32 %v16997_v36, %v12587_v49  ;;  %v16994_v45 = vld [vmem:[%s25878_s3 + $0xda4] sm:$0xf0]  ;;  %v12941_v30 = vld [vmem:[%s25878_s3 + $0x1040] sm:$0xf0]  ;;  %v12860_v36 = vor.u32 %v17058_v15, %v12859_v44  ;;  %v12909_v49 = vld [vmem:[%s25878_s3 + $0x1008] sm:$0xf0] }
 0x555   :  { %v12562_v34 = vor.u32 %v16994_v45, %v12561_v46  ;;  %v12835_v46 = vld [vmem:[%s25878_s3 + $0xf60] sm:$0xf]  ;;  %v17052_v45 = vld [vmem:[%s25878_s3 + $0xf74] sm:$0xf0]  ;;  %v12869_v44 = vld [vmem:[%s25878_s3 + $0xfb0] sm:$0xf0] }
 0x556   :  { %3942 = vmatpush.bf16.msrb.mxu3 %v12590_v41  ;;  %v12944_v41 = vor.u32 %v17074_v35, %v12941_v30  ;;  %v12836_v42 = vor.u32 %v17052_v45, %v12835_v46  ;;  %v12971_v15 = vld [vmem:[%s25878_s3 + $0x1060] sm:$0xf]  ;;  %v12973_v35 = vld [vmem:[%s25878_s3 + $0x1078] sm:$0xf0]  ;;  %v17078_v46 = vld [vmem:[%s25878_s3 + $0x1044] sm:$0xf0] }
 0x557   :  { %3930 = vmatpush.bf16.msrb.mxu1 %v12562_v34  ;;  %v17055_v34 = vld [vmem:[%s25878_s3 + $0xf94] sm:$0xf] }
 0x558   :  { %v3500_v63 = vpop.f32.mrf.mxu2 }
 0x559   :  { %v20998_v47 = vadd.f32 %v3500_v63, %v20656_v32  ;;  %v3513_v53 = vpop.f32.mrf.mxu3  ;;  %v17082_v32 = vld [vmem:[%s25878_s3 + $0x1064] sm:$0xf0]  ;;  %v12912_v63 = vor.u32 %v17067_v38, %v12909_v49  ;;  %v17053_v38 = vld [vmem:[%s25878_s3 + $0xf7c] sm:$0xf0] }
 0x55a   :  { %v21001_v58 = vadd.f32 %v3513_v53, %v20689_v51  ;;  %v3489_v25 = vpop.f32.mrf.mxu0  ;;  %3943 = vmatpush.bf16.msrb.mxu3 %v12566_v20  ;;  %v12956_v52 = vor.u32 %v17082_v32, %v12955_v50  ;;  %v12885_v53 = vld [vmem:[%s25878_s3 + $0xfd8] sm:$0xf0]  ;;  %v12735_v20 = vld [vmem:[%s25875_s0 + $0xa] sm:$0x1] }
 0x55b   :  { %v3528_v24 = vpop.f32.mrf.mxu1  ;;  %v12888_v25 = vor.u32 %v17061_v43, %v12885_v53  ;;  %v12837_v50 = vld [vmem:[%s25878_s3 + $0xf78] sm:$0xf0]  ;;  %v12949_v43 = vld [vmem:[%s25878_s3 + $0x1048] sm:$0xf0] }
 0x55c   :  { %4264 = vmatpush.bf16.msrb.mxu2 %v12956_v52  ;;  %v12861_v24 = vld [vmem:[%s25878_s3 + $0xfa8] sm:$0xf0]  ;;  %v17071_v52 = vld [vmem:[%s25878_s3 + $0x100c] sm:$0xf0] }
 0x560   :  { %v3502_v26 = vpop.f32.mrf.mxu2  ;;  %4265 = vmatpush.bf16.msrb.mxu2 %v12932_v7  ;;  %v12917_v7 = vld [vmem:[%s25878_s3 + $0x1010] sm:$0xf0] }
 0x561   :  { %v3515_v48 = vpop.f32.mrf.mxu3  ;;  %v12864_v26 = vor.u32 %v17055_v34, %v12861_v24  ;;  %v12920_v13 = vor.u32 %v17068_v54, %v12917_v7  ;;  %v17047_v34 = vld [vmem:[%s25878_s3 + $0xf4c] sm:$0xf0]  ;;  %v17044_v24 = vld [vmem:[%s25878_s3 + $0xf3c] sm:$0xf]  ;;  %v12795_v7 = vld [vmem:[%s25878_s3 + $0xf08] sm:$0xf] }
 0x562   :  { %v3539_v51 = vpop.f32.mrf.mxu0  ;;  %v17049_v48 = vld [vmem:[%s25878_s3 + $0xf64] sm:$0xf]  ;;  %v12925_v54 = vld [vmem:[%s25878_s3 + $0x1018] sm:$0xf0] }
 0x563   :  { %v21016_v59 = vadd.f32 %v3539_v51, %v20713_v9  ;;  %v21030_v9 = vld [vmem:[%s25877_s2] ss:$0 sm:$0xff]  ;;  %v12840_v32 = vor.u32 %v17049_v48, %v12837_v50  ;;  %v12915_v51 = vld [vmem:[%s25878_s3 + $0xff8] sm:$0xf] }
 0x564   :  { %4266 = vmatpush.bf16.msrb.mxu2 %v12908_v55  ;;  %v12916_v56 = vor.u32 %v17071_v52, %v12915_v51  ;;  %v17043_v55 = vld [vmem:[%s25878_s3 + $0xf34] sm:$0xf]  ;;  %v12923_v48 = vld [vmem:[%s25878_s3 + $0x1000] sm:$0xf]  ;;  %v17072_v50 = vld [vmem:[%s25878_s3 + $0x1014] sm:$0xf0] }
 0x565   :  { %v12924_v51 = vor.u32 %v17072_v50, %v12923_v48  ;;  %v17069_v52 = vld [vmem:[%s25878_s3 + $0x1004] sm:$0xf]  ;;  %v17118_v48 = vld [vmem:[%s25878_s3 + $0x1184] sm:$0xf0] }
 0x568   :  { %v3552_v61 = vpop.f32.mrf.mxu2 }
 0x569   :  { %v21025_v1 = vadd.f32 %v3552_v61, %v20704_v57  ;;  %v3576_v0 = vpop.f32.mrf.mxu3  ;;  %v12883_v57 = vld [vmem:[%s25878_s3 + $0xfc0] sm:$0xf]  ;;  %v17046_v61 = vld [vmem:[%s25878_s3 + $0xf44] sm:$0xf0] }
 0x56a   :  { %v3577_v4 = vadd.f32 %v21030_v9, %v3576_v0  ;;  %v3541_v60 = vpop.f32.mrf.mxu0  ;;  %v12884_v16 = vor.u32 %v17064_v29, %v12883_v57  ;;  %v12812_v0 = vor.u32 %v17046_v61, %v12811_v3  ;;  %v17062_v29 = vld [vmem:[%s25878_s3 + $0xfcc] sm:$0xf] }
 0x56b   :  { %v12891_v60 = vld [vmem:[%s25878_s3 + $0xfc8] sm:$0xf]  ;;  %v12896_v8 = vor.u32 %v17062_v29, %v12893_v6  ;;  %v17038_v3 = vld [vmem:[%s25878_s3 + $0xf0c] sm:$0xf]  ;;  %v12875_v6 = vld [vmem:[%s25878_s3 + $0xfa0] sm:$0xf] }
 0x56c   :  { %v3580_v11 = vmax.f32 %v3577_v4, 0.0  ;;  %4267 = vmatpush.bf16.msrb.mxu2 %v12884_v16  ;;  %v12813_v4 = vld [vmem:[%s25878_s3 + $0xf48] sm:$0xf0]  ;;  %v12892_v57 = vor.u32 %v17065_v5, %v12891_v60 }
 0x56d   :  { %v12816_v17 = vor.u32 %v17043_v55, %v12813_v4  ;;  %v12797_v55 = vld [vmem:[%s25878_s3 + $0xf20] sm:$0xf0]  ;;  %v17066_v4 = vld [vmem:[%s25878_s3 + $0xfe4] sm:$0xf0] }
 0x56e   :  { %v3581_v12 = vpack.c.bf16 %v3580_v11, %v3580_v11  ;;  %v12787_v11 = vld [vmem:[%s25878_s3 + $0xf00] sm:$0xf]  ;;  %v12800_v60 = vor.u32 %v17038_v3, %v12797_v55  ;;  %v13199_v3 = vld [vmem:[%s25878_s3 + $0x11e8] sm:$0xf0]  ;;  %v13205_v55 = vld [vmem:[%s25878_s3 + $0x11d8] sm:$0xf] }
 0x570   :  { %3879 = vmatmul.bf16.vlgmr.msra.gmra.mxu1 %v3581_v12  ;;  %3892 = vmatmul.bf16.vlgmr.msra.gmra.mxu3 %v3581_v12  ;;  %v3554_v28 = vpop.f32.mrf.mxu2 }
 0x571   :  { %3905 = vmatmul.bf16.vlgmr.msra.gmra.mxu0 %v3581_v12  ;;  %3918 = vmatmul.bf16.vlgmr.msra.gmra.mxu2 %v3581_v12  ;;  %v3578_v39 = vpop.f32.mrf.mxu3  ;;  %v17084_v28 = vld [vmem:[%s25878_s3 + $0x1074] sm:$0xf0] }
 0x572   :  { %4277 = vmatpush.bf16.msra.mxu0 %v12960_v14  ;;  %4290 = vmatpush.bf16.msra.mxu1 %v12964_v18  ;;  %v12789_v14 = vld [vmem:[%s25878_s3 + $0xf18] sm:$0xf0]  ;;  %v12868_v18 = vor.u32 %v17059_v22, %v12867_v40  ;;  %v12972_v30 = vor.u32 %v17084_v28, %v12971_v15  ;;  %v12976_v39 = vor.u32 %v17081_v27, %v12973_v35  ;;  %v17054_v40 = vld [vmem:[%s25878_s3 + $0xf84] sm:$0xf0]  ;;  %v17051_v22 = vld [vmem:[%s25878_s3 + $0xf74] sm:$0xf] }
 0x573   :  { %4303 = vmatpush.bf16.msra.mxu3 %v12968_v21  ;;  %4268 = vmatpush.bf16.msrb.mxu2 %v12860_v36  ;;  %v12792_v16 = vor.u32 %v17037_v10, %v12789_v14  ;;  %v17056_v21 = vld [vmem:[%s25878_s3 + $0xf9c] sm:$0xf]  ;;  %v17050_v36 = vld [vmem:[%s25878_s3 + $0xf6c] sm:$0xf]  ;;  %v12851_v14 = vld [vmem:[%s25878_s3 + $0xf70] sm:$0xf] }
 0x574   :  { %v12872_v23 = vor.u32 %v17056_v21, %v12869_v44  ;;  %v12877_v10 = vld [vmem:[%s25878_s3 + $0xfb8] sm:$0xf0]  ;;  %v12827_v44 = vld [vmem:[%s25878_s3 + $0xf40] sm:$0xf]  ;;  %v17048_v15 = vld [vmem:[%s25878_s3 + $0xf54] sm:$0xf0] }
 0x575   :  { %v12828_v28 = vor.u32 %v17048_v15, %v12827_v44  ;;  %v12829_v27 = vld [vmem:[%s25878_s3 + $0xf58] sm:$0xf0]  ;;  %v12803_v35 = vld [vmem:[%s25878_s3 + $0xf10] sm:$0xf] }
 0x576   :  { %4278 = vmatpush.bf16.msra.mxu0 %v12936_v31  ;;  %4291 = vmatpush.bf16.msra.mxu1 %v12940_v37  ;;  %v12843_v31 = vld [vmem:[%s25878_s3 + $0xf68] sm:$0xf]  ;;  %v12845_v37 = vld [vmem:[%s25878_s3 + $0xf80] sm:$0xf0] }
 0x577   :  { %4304 = vmatpush.bf16.msra.mxu3 %v12944_v41  ;;  %4269 = vmatpush.bf16.msrb.mxu2 %v12836_v42  ;;  %v12844_v49 = vor.u32 %v17053_v38, %v12843_v31  ;;  %v12947_v41 = vld [vmem:[%s25878_s3 + $0x1030] sm:$0xf]  ;;  %v12848_v45 = vor.u32 %v17050_v36, %v12845_v37  ;;  %v17075_v42 = vld [vmem:[%s25878_s3 + $0x1034] sm:$0xf]  ;;  %v17042_v31 = vld [vmem:[%s25878_s3 + $0xf24] sm:$0xf0] }
 0x578   :  { %v12952_v53 = vor.u32 %v17075_v42, %v12949_v43  ;;  %v17039_v38 = vld [vmem:[%s25878_s3 + $0xf14] sm:$0xf]  ;;  %v12805_v36 = vld [vmem:[%s25878_s3 + $0xf28] sm:$0xf0] }
 0x57a   :  { %4279 = vmatpush.bf16.msra.mxu0 %v12912_v63  ;;  %4292 = vmatpush.bf16.msra.mxu1 %v12916_v56  ;;  %v12948_v63 = vor.u32 %v17078_v46, %v12947_v41  ;;  %v12928_v56 = vor.u32 %v17069_v52, %v12925_v54  ;;  %v12804_v46 = vor.u32 %v17042_v31, %v12803_v35  ;;  %v17100_v31 = vld [vmem:[%s25878_s3 + $0x10f4] sm:$0xf0] }
 0x57b   :  { %4305 = vmatpush.bf16.msra.mxu3 %v12920_v13  ;;  %4270 = vmatpush.bf16.msrb.mxu2 %v12812_v0  ;;  %v17041_v13 = vld [vmem:[%s25878_s3 + $0xf1c] sm:$0xf0]  ;;  %v12899_v0 = vld [vmem:[%s25878_s3 + $0xfd0] sm:$0xf] }
 0x57c   :  { %v12796_v61 = vor.u32 %v17041_v13, %v12795_v7  ;;  %v12900_v5 = vor.u32 %v17066_v4, %v12899_v0  ;;  %v17127_v13 = vld [vmem:[%s25878_s3 + $0x11d4] sm:$0xf]  ;;  %v17131_v0 = vld [vmem:[%s25878_s3 + $0x11ec] sm:$0xf0] }
 0x57e   :  { %4280 = vmatpush.bf16.msra.mxu0 %v12888_v25  ;;  %4293 = vmatpush.bf16.msra.mxu1 %v12892_v57  ;;  %v12819_v25 = vld [vmem:[%s25878_s3 + $0xf38] sm:$0xf]  ;;  %v12901_v57 = vld [vmem:[%s25878_s3 + $0xfe8] sm:$0xf0] }
 0x57f   :  { %4306 = vmatpush.bf16.msra.mxu3 %v12896_v8  ;;  %v17060_v8 = vld [vmem:[%s25878_s3 + $0xfb4] sm:$0xf0] }
 0x580   :  { %3931 = vmatmul.bf16.vlgmr.msrb.gmra.mxu1 %v3581_v12  ;;  %3944 = vmatmul.bf16.vlgmr.msrb.gmra.mxu3 %v3581_v12  ;;  %v12788_v12 = vor.u32 %v17040_v62, %v12787_v11  ;;  %v17057_v11 = vld [vmem:[%s25878_s3 + $0xfa4] sm:$0xf]  ;;  %v12876_v62 = vor.u32 %v17060_v8, %v12875_v6  ;;  %v13175_v8 = vld [vmem:[%s25878_s3 + $0x11b8] sm:$0xf0] }
 0x581   :  { %12736 = vmatmul.msk.bf16.vlgmr.msrb.gmra.mxu0 %vm35_vm1, %v12735_v20  ;;  %v12820_v20 = vor.u32 %v17047_v34, %v12819_v25  ;;  %v17130_v34 = vld [vmem:[%s25878_s3 + $0x11e4] sm:$0xf0]  ;;  %v17121_v6 = vld [vmem:[%s25878_s3 + $0x11a4] sm:$0xf] }
 0x582   :  { %4281 = vmatpush.bf16.msra.mxu0 %v12864_v26  ;;  %4271 = vmatpush.bf16.msrb.mxu2 %v12788_v12  ;;  %v12821_v26 = vld [vmem:[%s25878_s3 + $0xf50] sm:$0xf0]  ;;  %v12880_v12 = vor.u32 %v17057_v11, %v12877_v10  ;;  %v13206_v10 = vor.u32 %v17131_v0, %v13205_v55  ;;  %v13178_v15 = vor.u32 %v17121_v6, %v13175_v8  ;;  %v17110_v0 = vld [vmem:[%s25878_s3 + $0x114c] sm:$0xf]  ;;  %v13031_v6 = vld [vmem:[%s25878_s3 + $0x1098] sm:$0xf0] }
 0x583   :  { %4294 = vmatpush.bf16.msra.mxu1 %v12868_v18  ;;  %4307 = vmatpush.bf16.msra.mxu3 %v12872_v23  ;;  %v12852_v18 = vor.u32 %v17054_v40, %v12851_v14  ;;  %v17045_v23 = vld [vmem:[%s25878_s3 + $0xf44] sm:$0xf]  ;;  %v13101_v14 = vld [vmem:[%s25878_s3 + $0x1110] sm:$0xf]  ;;  %v17106_v40 = vld [vmem:[%s25878_s3 + $0x1124] sm:$0xf0] }
 0x584   :  { %v13109_v8 = vld [vmem:[%s25878_s3 + $0x1118] sm:$0xf] }
 0x586   :  { %4282 = vmatpush.bf16.msra.mxu0 %v12840_v32  ;;  %4316 = vmatpush.bf16.msra.mxu2 %v12972_v30  ;;  %v12824_v32 = vor.u32 %v17044_v24, %v12821_v26  ;;  %v13149_v26 = vld [vmem:[%s25878_s3 + $0x1170] sm:$0xf] }
 0x587   :  { %4295 = vmatpush.bf16.msra.mxu1 %v12844_v49  ;;  %4308 = vmatpush.bf16.msra.mxu3 %v12848_v45  ;;  %v12808_v45 = vor.u32 %v17039_v38, %v12805_v36  ;;  %v13150_v52 = vor.u32 %v17118_v48, %v13149_v26  ;;  %v17116_v26 = vld [vmem:[%s25878_s3 + $0x117c] sm:$0xf] }
 0x58a   :  { %4283 = vmatpush.bf16.msra.mxu0 %v12816_v17  ;;  %4317 = vmatpush.bf16.msra.mxu2 %v12948_v63  ;;  %v17063_v17 = vld [vmem:[%s25878_s3 + $0xfd4] sm:$0xf] }
 0x58b   :  { %4296 = vmatpush.bf16.msra.mxu1 %v12820_v20  ;;  %4309 = vmatpush.bf16.msra.mxu3 %v12824_v32  ;;  %v12904_v29 = vor.u32 %v17063_v17, %v12901_v57 }
 0x58e   :  { %4284 = vmatpush.bf16.msra.mxu0 %v12792_v16  ;;  %4318 = vmatpush.bf16.msra.mxu2 %v12924_v51  ;;  %v12853_v16 = vld [vmem:[%s25878_s3 + $0xf88] sm:$0xf0] }
 0x58f   :  { %4297 = vmatpush.bf16.msra.mxu1 %v12796_v61  ;;  %4310 = vmatpush.bf16.msra.mxu3 %v12800_v60  ;;  %v12856_v21 = vor.u32 %v17051_v22, %v12853_v16  ;;  %v13125_v61 = vld [vmem:[%s25878_s3 + $0x1140] sm:$0xf]  ;;  %v17128_v60 = vld [vmem:[%s25878_s3 + $0x11dc] sm:$0xf]  ;;  %v13181_v22 = vld [vmem:[%s25878_s3 + $0x11a8] sm:$0xf] }
 0x592   :  { %4329 = vmatpush.bf16.msrb.mxu0 %v12976_v39  ;;  %4319 = vmatpush.bf16.msra.mxu2 %v12900_v5  ;;  %v12832_v39 = vor.u32 %v17045_v23, %v12829_v27  ;;  %v13207_v5 = vld [vmem:[%s25878_s3 + $0x11f0] sm:$0xf0]  ;;  %v13151_v27 = vld [vmem:[%s25878_s3 + $0x1188] sm:$0xf0] }
 0x593   :  { %4360 = vmatpush.bf16.msrb.mxu1 %v17889_v2  ;;  %v17115_v23 = vld [vmem:[%s25878_s3 + $0x1174] sm:$0xf] }
 0x594   :  { %v13154_v36 = vor.u32 %v17115_v23, %v13151_v27  ;;  %v13085_v23 = vld [vmem:[%s25878_s3 + $0x10e8] sm:$0xf]  ;;  %v17098_v27 = vld [vmem:[%s25878_s3 + $0x10ec] sm:$0xf] }
 0x596   :  { %4330 = vmatpush.bf16.msrb.mxu0 %v12952_v53  ;;  %4320 = vmatpush.bf16.msra.mxu2 %v12876_v62 }
 0x59a   :  { %4331 = vmatpush.bf16.msrb.mxu0 %v12928_v56  ;;  %4321 = vmatpush.bf16.msra.mxu2 %v12852_v18  ;;  %v17122_v18 = vld [vmem:[%s25878_s3 + $0x11ac] sm:$0xf] }
 0x59e   :  { %4332 = vmatpush.bf16.msrb.mxu0 %v12904_v29  ;;  %4322 = vmatpush.bf16.msra.mxu2 %v12828_v28  ;;  %v13202_v29 = vor.u32 %v17127_v13, %v13199_v3  ;;  %v13102_v28 = vor.u32 %v17106_v40, %v13101_v14  ;;  %v13055_v13 = vld [vmem:[%s25878_s3 + $0x10c8] sm:$0xf0]  ;;  %v13133_v3 = vld [vmem:[%s25878_s3 + $0x1148] sm:$0xf]  ;;  %v17104_v14 = vld [vmem:[%s25878_s3 + $0x111c] sm:$0xf] }
 0x59f   :  { %v13111_v40 = vld [vmem:[%s25878_s3 + $0x1130] sm:$0xf0] }
 0x5a2   :  { %4333 = vmatpush.bf16.msrb.mxu0 %v12880_v12  ;;  %4323 = vmatpush.bf16.msra.mxu2 %v12804_v46  ;;  %v13210_v12 = vor.u32 %v17128_v60, %v13207_v5  ;;  %v17109_v46 = vld [vmem:[%s25878_s3 + $0x1144] sm:$0xf]  ;;  %v13029_v5 = vld [vmem:[%s25878_s3 + $0x1080] sm:$0xf] }
 0x5a6   :  { %4334 = vmatpush.bf16.msrb.mxu0 %v12856_v21  ;;  %v13183_v21 = vld [vmem:[%s25878_s3 + $0x11c0] sm:$0xf0] }
 0x5aa   :  { %4335 = vmatpush.bf16.msrb.mxu0 %v12832_v39  ;;  %v13077_v39 = vld [vmem:[%s25878_s3 + $0x10e0] sm:$0xf] }
 0x5ae   :  { %4336 = vmatpush.bf16.msrb.mxu0 %v12808_v45  ;;  %v13127_v45 = vld [vmem:[%s25878_s3 + $0x1158] sm:$0xf0] }
 0x5ed   :  { %v3880_v30 = vpop.f32.mrf.mxu1 }
 0x5ee   :  { %v21309_v49 = vadd.f32 %v3880_v30, %v20968_v19  ;;  %v3906_v37 = vpop.f32.mrf.mxu0  ;;  %v13186_v30 = vor.u32 %v17122_v18, %v13183_v21  ;;  %v17129_v18 = vld [vmem:[%s25878_s3 + $0x11e4] sm:$0xf]  ;;  %v13215_v21 = vld [vmem:[%s25878_s3 + $0x11f8] sm:$0xf0] }
 0x5ef   :  { %v21312_v41 = vadd.f32 %v3906_v37, %v21001_v58  ;;  %v13197_v58 = vld [vmem:[%s25878_s3 + $0x11d0] sm:$0xf]  ;;  %v13078_v37 = vor.u32 %v17100_v31, %v13077_v39  ;;  %v17126_v31 = vld [vmem:[%s25878_s3 + $0x11c4] sm:$0xf0] }
 0x5f0   :  { %v13198_v24 = vor.u32 %v17130_v34, %v13197_v58  ;;  %v17097_v34 = vld [vmem:[%s25878_s3 + $0x10e4] sm:$0xf]  ;;  %v13189_v39 = vld [vmem:[%s25878_s3 + $0x11b0] sm:$0xf] }
 0x5f2   :  { %4657 = vmatpush.bf16.msrb.mxu3 %v13198_v24  ;;  %v13079_v24 = vld [vmem:[%s25878_s3 + $0x10f8] sm:$0xf0] }
 0x5f3   :  { %v3893_v63 = vpop.f32.mrf.mxu3 }
 0x5f4   :  { %v21315_v42 = vadd.f32 %v3893_v63, %v20998_v47  ;;  %v3919_v43 = vpop.f32.mrf.mxu2  ;;  %v13173_v47 = vld [vmem:[%s25878_s3 + $0x11a0] sm:$0xf]  ;;  %v13130_v63 = vor.u32 %v17109_v46, %v13127_v45  ;;  %v13191_v46 = vld [vmem:[%s25878_s3 + $0x11c8] sm:$0xf0] }
 0x5f5   :  { %v21318_v53 = vadd.f32 %v3919_v43, %v20977_v33  ;;  %v3882_v19 = vpop.f32.mrf.mxu1  ;;  %v17124_v33 = vld [vmem:[%s25878_s3 + $0x11b4] sm:$0xf0]  ;;  %v17103_v43 = vld [vmem:[%s25878_s3 + $0x1114] sm:$0xf] }
 0x5f6   :  { %v3908_v25 = vpop.f32.mrf.mxu0  ;;  %v13174_v20 = vor.u32 %v17124_v33, %v13173_v47  ;;  %v13103_v19 = vld [vmem:[%s25878_s3 + $0x1128] sm:$0xf0]  ;;  %v13082_v47 = vor.u32 %v17097_v34, %v13079_v24  ;;  %v13157_v33 = vld [vmem:[%s25878_s3 + $0x1178] sm:$0xf]  ;;  %v13165_v34 = vld [vmem:[%s25878_s3 + $0x1180] sm:$0xf] }
 0x5f7   :  { %v12977_v25 = vld [vmem:[%s25875_s0 + $0xb] sm:$0x1]  ;;  %v13106_v58 = vor.u32 %v17103_v43, %v13103_v19  ;;  %v17095_v43 = vld [vmem:[%s25878_s3 + $0x10cc] sm:$0xf0]  ;;  %v17092_v19 = vld [vmem:[%s25878_s3 + $0x10bc] sm:$0xf] }
 0x5f8   :  { %4658 = vmatpush.bf16.msrb.mxu3 %v13174_v20  ;;  %v17119_v20 = vld [vmem:[%s25878_s3 + $0x118c] sm:$0xf0]  ;;  %v17120_v24 = vld [vmem:[%s25878_s3 + $0x1194] sm:$0xf0] }
 0x5f9   :  { %v13158_v48 = vor.u32 %v17119_v20, %v13157_v33  ;;  %v13166_v33 = vor.u32 %v17120_v24, %v13165_v34  ;;  %v17117_v20 = vld [vmem:[%s25878_s3 + $0x1184] sm:$0xf]  ;;  %v17166_v34 = vld [vmem:[%s25878_s3 + $0x1304] sm:$0xf0] }
 0x5fb   :  { %v3895_v50 = vpop.f32.mrf.mxu3 }
 0x5fc   :  { %v3921_v32 = vpop.f32.mrf.mxu2  ;;  %4659 = vmatpush.bf16.msrb.mxu3 %v13150_v52  ;;  %v13159_v50 = vld [vmem:[%s25878_s3 + $0x1190] sm:$0xf0]  ;;  %v17094_v52 = vld [vmem:[%s25878_s3 + $0x10c4] sm:$0xf0] }
 0x5fd   :  { %v3932_v51 = vpop.f32.mrf.mxu1  ;;  %v13162_v32 = vor.u32 %v17116_v26, %v13159_v50  ;;  %v13167_v26 = vld [vmem:[%s25878_s3 + $0x1198] sm:$0xf0]  ;;  %v13037_v50 = vld [vmem:[%s25878_s3 + $0x1088] sm:$0xf] }
 0x5fe   :  { %v21339_v54 = vadd.f32 %v3932_v51, %v21016_v59  ;;  %v3969_v56 = vpop.f32.mrf.mxu0  ;;  %v17112_v59 = vld [vmem:[%s25878_s3 + $0x1154] sm:$0xf0]  ;;  %v13053_v51 = vld [vmem:[%s25878_s3 + $0x10b0] sm:$0xf] }
 0x5ff   :  { %v3970_v7 = vadd.f32 %v21030_v9, %v3969_v56  ;;  %v13126_v11 = vor.u32 %v17112_v59, %v13125_v61  ;;  %v17091_v56 = vld [vmem:[%s25878_s3 + $0x10b4] sm:$0xf]  ;;  %v17113_v61 = vld [vmem:[%s25878_s3 + $0x115c] sm:$0xf0] }
 0x600   :  { %v13058_v59 = vor.u32 %v17091_v56, %v13055_v13  ;;  %v13134_v55 = vor.u32 %v17113_v61, %v13133_v3  ;;  %v13039_v56 = vld [vmem:[%s25878_s3 + $0x10a0] sm:$0xf0]  ;;  %v17114_v13 = vld [vmem:[%s25878_s3 + $0x1164] sm:$0xf0] }
 0x601   :  { %v3973_v4 = vmax.f32 %v3970_v7, 0.0  ;;  %4660 = vmatpush.bf16.msrb.mxu3 %v13126_v11  ;;  %v13054_v7 = vor.u32 %v17094_v52, %v13053_v51  ;;  %v17107_v11 = vld [vmem:[%s25878_s3 + $0x112c] sm:$0xf0]  ;;  %v17086_v51 = vld [vmem:[%s25878_s3 + $0x108c] sm:$0xf] }
 0x602   :  { %v13042_v3 = vor.u32 %v17086_v51, %v13039_v56  ;;  %v13441_v51 = vld [vmem:[%s25878_s3 + $0x1368] sm:$0xf0]  ;;  %v17179_v56 = vld [vmem:[%s25878_s3 + $0x136c] sm:$0xf0] }
 0x603   :  { %v3974_v17 = vpack.c.bf16 %v3973_v4, %v3973_v4  ;;  %v3945_v57 = vpop.f32.mrf.mxu3  ;;  %v13135_v4 = vld [vmem:[%s25878_s3 + $0x1160] sm:$0xf0] }
 0x604   :  { %v21373_v62 = vadd.f32 %v3945_v57, %v21025_v1  ;;  %v17125_v1 = vld [vmem:[%s25878_s3 + $0x11bc] sm:$0xf0]  ;;  %v13138_v60 = vor.u32 %v17110_v0, %v13135_v4  ;;  %v17085_v57 = vld [vmem:[%s25878_s3 + $0x1084] sm:$0xf] }
 0x605   :  { %4272 = vmatmul.bf16.vlgmr.msrb.gmra.mxu2 %v3974_v17  ;;  %4285 = vmatmul.bf16.vlgmr.msra.gmra.mxu0 %v3974_v17  ;;  %v3934_v16 = vpop.f32.mrf.mxu1  ;;  %v13182_v35 = vor.u32 %v17125_v1, %v13181_v22  ;;  %v13213_v22 = vld [vmem:[%s25878_s3 + $0x11e0] sm:$0xf]  ;;  %v17132_v1 = vld [vmem:[%s25878_s3 + $0x11f4] sm:$0xf0] }
 0x606   :  { %4298 = vmatmul.bf16.vlgmr.msra.gmra.mxu1 %v3974_v17  ;;  %4311 = vmatmul.bf16.vlgmr.msra.gmra.mxu3 %v3974_v17  ;;  %v3971_v44 = vpop.f32.mrf.mxu0  ;;  %v13114_v16 = vor.u32 %v17104_v14, %v13111_v40  ;;  %v13117_v4 = vld [vmem:[%s25878_s3 + $0x1120] sm:$0xf] }
 0x607   :  { %4670 = vmatpush.bf16.msra.mxu1 %v13202_v29  ;;  %4683 = vmatpush.bf16.msrb.mxu2 %v13206_v10  ;;  %v13034_v10 = vor.u32 %v17085_v57, %v13031_v6  ;;  %v13214_v44 = vor.u32 %v17132_v1, %v13213_v22  ;;  %v13119_v57 = vld [vmem:[%s25878_s3 + $0x1138] sm:$0xf0]  ;;  %v13093_v6 = vld [vmem:[%s25878_s3 + $0x10f0] sm:$0xf]  ;;  %v13069_v40 = vld [vmem:[%s25878_s3 + $0x10c0] sm:$0xf] }
 0x608   :  { %4696 = vmatpush.bf16.msra.mxu0 %v13210_v12  ;;  %4661 = vmatpush.bf16.msrb.mxu3 %v13102_v28  ;;  %v13110_v12 = vor.u32 %v17107_v11, %v13109_v8  ;;  %v17101_v28 = vld [vmem:[%s25878_s3 + $0x10fc] sm:$0xf0]  ;;  %v17102_v8 = vld [vmem:[%s25878_s3 + $0x1104] sm:$0xf0]  ;;  %v17099_v11 = vld [vmem:[%s25878_s3 + $0x10f4] sm:$0xf] }
 0x609   :  { %v17096_v22 = vld [vmem:[%s25878_s3 + $0x10d4] sm:$0xf0] }
 0x60a   :  { %v13070_v1 = vor.u32 %v17096_v22, %v13069_v40  ;;  %v13369_v40 = vld [vmem:[%s25878_s3 + $0x12d8] sm:$0xf0] }
 0x60b   :  { %v3947_v38 = vpop.f32.mrf.mxu3  ;;  %4671 = vmatpush.bf16.msra.mxu1 %v13178_v15  ;;  %4684 = vmatpush.bf16.msrb.mxu2 %v13182_v35  ;;  %v13218_v15 = vor.u32 %v17129_v18, %v13215_v21  ;;  %v13086_v35 = vor.u32 %v17101_v28, %v13085_v23  ;;  %v13071_v18 = vld [vmem:[%s25878_s3 + $0x10d8] sm:$0xf0]  ;;  %v13045_v21 = vld [vmem:[%s25878_s3 + $0x1090] sm:$0xf]  ;;  %v17090_v23 = vld [vmem:[%s25878_s3 + $0x10a4] sm:$0xf0] }
 0x60c   :  { %4697 = vmatpush.bf16.msra.mxu0 %v13186_v30  ;;  %4662 = vmatpush.bf16.msrb.mxu3 %v13078_v37  ;;  %v13087_v30 = vld [vmem:[%s25878_s3 + $0x1100] sm:$0xf0]  ;;  %v17123_v37 = vld [vmem:[%s25878_s3 + $0x11b4] sm:$0xf] }
 0x60d   :  { %v13090_v38 = vor.u32 %v17098_v27, %v13087_v30  ;;  %v13194_v45 = vor.u32 %v17123_v37, %v13191_v46  ;;  %v17087_v28 = vld [vmem:[%s25878_s3 + $0x1094] sm:$0xf]  ;;  %v13047_v27 = vld [vmem:[%s25878_s3 + $0x10a8] sm:$0xf0] }
 0x60f   :  { %4672 = vmatpush.bf16.msra.mxu1 %v13154_v36  ;;  %4685 = vmatpush.bf16.msrb.mxu2 %v13158_v48  ;;  %v13190_v36 = vor.u32 %v17126_v31, %v13189_v39  ;;  %v13170_v48 = vor.u32 %v17117_v20, %v13167_v26  ;;  %v13046_v31 = vor.u32 %v17090_v23, %v13045_v21  ;;  %v17151_v21 = vld [vmem:[%s25878_s3 + $0x1294] sm:$0xf]  ;;  %v13423_v23 = vld [vmem:[%s25878_s3 + $0x1328] sm:$0xf] }
 0x610   :  { %4698 = vmatpush.bf16.msra.mxu0 %v13162_v32  ;;  %4663 = vmatpush.bf16.msrb.mxu3 %v13054_v7  ;;  %v17089_v32 = vld [vmem:[%s25878_s3 + $0x109c] sm:$0xf0]  ;;  %v13141_v7 = vld [vmem:[%s25878_s3 + $0x1150] sm:$0xf] }
 0x611   :  { %v13038_v52 = vor.u32 %v17089_v32, %v13037_v50  ;;  %v13142_v61 = vor.u32 %v17114_v13, %v13141_v7  ;;  %v17175_v32 = vld [vmem:[%s25878_s3 + $0x1354] sm:$0xf]  ;;  %v17176_v13 = vld [vmem:[%s25878_s3 + $0x135c] sm:$0xf] }
 0x613   :  { %4673 = vmatpush.bf16.msra.mxu1 %v13130_v63  ;;  %4686 = vmatpush.bf16.msrb.mxu2 %v13134_v55  ;;  %v13061_v63 = vld [vmem:[%s25878_s3 + $0x10b8] sm:$0xf]  ;;  %v13143_v55 = vld [vmem:[%s25878_s3 + $0x1168] sm:$0xf0] }
 0x614   :  { %4699 = vmatpush.bf16.msra.mxu0 %v13138_v60  ;;  %v17108_v60 = vld [vmem:[%s25878_s3 + $0x1134] sm:$0xf0] }
 0x615   :  { %4324 = vmatmul.bf16.vlgmr.msra.gmra.mxu2 %v3974_v17  ;;  %4337 = vmatmul.bf16.vlgmr.msrb.gmra.mxu0 %v3974_v17  ;;  %v17088_v17 = vld [vmem:[%s25878_s3 + $0x1094] sm:$0xf0] }
 0x616   :  { %12978 = vmatmul.msk.bf16.vlgmr.msrb.gmra.mxu1 %vm35_vm1, %v12977_v25  ;;  %v13030_v29 = vor.u32 %v17088_v17, %v13029_v5  ;;  %v13062_v25 = vor.u32 %v17095_v43, %v13061_v63  ;;  %v17105_v5 = vld [vmem:[%s25878_s3 + $0x1124] sm:$0xf]  ;;  %v13118_v17 = vor.u32 %v17108_v60, %v13117_v4  ;;  %v17178_v43 = vld [vmem:[%s25878_s3 + $0x1364] sm:$0xf0] }
 0x617   :  { %4674 = vmatpush.bf16.msra.mxu1 %v13106_v58  ;;  %4687 = vmatpush.bf16.msrb.mxu2 %v13110_v12  ;;  %v13063_v58 = vld [vmem:[%s25878_s3 + $0x10d0] sm:$0xf0]  ;;  %v13094_v12 = vor.u32 %v17102_v8, %v13093_v6  ;;  %v17169_v60 = vld [vmem:[%s25878_s3 + $0x1324] sm:$0xf] }
 0x618   :  { %4664 = vmatpush.bf16.msrb.mxu3 %v13030_v29  ;;  %4700 = vmatpush.bf16.msra.mxu0 %v13114_v16  ;;  %v13122_v29 = vor.u32 %v17105_v5, %v13119_v57  ;;  %v17093_v16 = vld [vmem:[%s25878_s3 + $0x10c4] sm:$0xf]  ;;  %v13417_v5 = vld [vmem:[%s25878_s3 + $0x1338] sm:$0xf0] }
 0x619   :  { %v13420_v8 = vor.u32 %v17169_v60, %v13417_v5  ;;  %v13351_v60 = vld [vmem:[%s25878_s3 + $0x1298] sm:$0xf]  ;;  %v17155_v5 = vld [vmem:[%s25878_s3 + $0x12ac] sm:$0xf0] }
 0x61b   :  { %4675 = vmatpush.bf16.msra.mxu1 %v13082_v47  ;;  %4688 = vmatpush.bf16.msrb.mxu2 %v13086_v35  ;;  %v13066_v47 = vor.u32 %v17092_v19, %v13063_v58  ;;  %v13391_v58 = vld [vmem:[%s25878_s3 + $0x12f0] sm:$0xf] }
 0x61c   :  { %4709 = vmatpush.bf16.msra.mxu3 %v13214_v44  ;;  %4701 = vmatpush.bf16.msra.mxu0 %v13090_v38  ;;  %v13050_v38 = vor.u32 %v17087_v28, %v13047_v27  ;;  %v13392_v20 = vor.u32 %v17166_v34, %v13391_v58  ;;  %v17173_v28 = vld [vmem:[%s25878_s3 + $0x133c] sm:$0xf0]  ;;  %v13401_v34 = vld [vmem:[%s25878_s3 + $0x1310] sm:$0xf0] }
 0x61f   :  { %4676 = vmatpush.bf16.msra.mxu1 %v13058_v59  ;;  %4689 = vmatpush.bf16.msrb.mxu2 %v13062_v25  ;;  %v17111_v59 = vld [vmem:[%s25878_s3 + $0x1154] sm:$0xf] }
 0x620   :  { %4710 = vmatpush.bf16.msra.mxu3 %v13190_v36  ;;  %4702 = vmatpush.bf16.msra.mxu0 %v13066_v47  ;;  %v13146_v0 = vor.u32 %v17111_v59, %v13143_v55  ;;  %v13444_v55 = vor.u32 %v17175_v32, %v13441_v51  ;;  %v13375_v32 = vld [vmem:[%s25878_s3 + $0x12c8] sm:$0xf]  ;;  %v17161_v51 = vld [vmem:[%s25878_s3 + $0x12dc] sm:$0xf0] }
 0x623   :  { %4677 = vmatpush.bf16.msra.mxu1 %v13034_v10  ;;  %4690 = vmatpush.bf16.msrb.mxu2 %v13038_v52  ;;  %v13095_v10 = vld [vmem:[%s25878_s3 + $0x1108] sm:$0xf0]  ;;  %v13367_v52 = vld [vmem:[%s25878_s3 + $0x12c0] sm:$0xf] }
 0x624   :  { %4711 = vmatpush.bf16.msra.mxu3 %v13166_v33  ;;  %4703 = vmatpush.bf16.msra.mxu0 %v13042_v3  ;;  %v13098_v14 = vor.u32 %v17099_v11, %v13095_v10  ;;  %v13449_v3 = vld [vmem:[%s25878_s3 + $0x1370] sm:$0xf0]  ;;  %v13393_v11 = vld [vmem:[%s25878_s3 + $0x1308] sm:$0xf0] }
 0x625   :  { %v13452_v57 = vor.u32 %v17176_v13, %v13449_v3  ;;  %v17136_v3 = vld [vmem:[%s25878_s3 + $0x1214] sm:$0xf0] }
 0x627   :  { %4722 = vmatpush.bf16.msrb.mxu1 %v13218_v15  ;;  %4753 = vmatpush.bf16.msra.mxu2 %v17889_v2  ;;  %v13074_v15 = vor.u32 %v17093_v16, %v13071_v18  ;;  %v13219_v16 = vld [vmem:[%s25875_s0 + $0xc] sm:$0x1]  ;;  %v17154_v18 = vld [vmem:[%s25878_s3 + $0x12a4] sm:$0xf0] }
 0x628   :  { %4712 = vmatpush.bf16.msra.mxu3 %v13142_v61 }
 0x62b   :  { %4723 = vmatpush.bf16.msrb.mxu1 %v13194_v45 }
 0x62c   :  { %4713 = vmatpush.bf16.msra.mxu3 %v13118_v17 }
 0x62f   :  { %4724 = vmatpush.bf16.msrb.mxu1 %v13170_v48 }
 0x630   :  { %4714 = vmatpush.bf16.msra.mxu3 %v13094_v12 }
 0x633   :  { %4725 = vmatpush.bf16.msrb.mxu1 %v13146_v0 }
 0x634   :  { %4715 = vmatpush.bf16.msra.mxu3 %v13070_v1  ;;  %v13343_v1 = vld [vmem:[%s25878_s3 + $0x1290] sm:$0xf] }
 0x637   :  { %4726 = vmatpush.bf16.msrb.mxu1 %v13122_v29 }
 0x638   :  { %4716 = vmatpush.bf16.msra.mxu3 %v13046_v31  ;;  %v17170_v31 = vld [vmem:[%s25878_s3 + $0x132c] sm:$0xf] }
 0x63b   :  { %4727 = vmatpush.bf16.msrb.mxu1 %v13098_v14  ;;  %v17157_v14 = vld [vmem:[%s25878_s3 + $0x12c4] sm:$0xf] }
 0x63c   :  { %v13372_v22 = vor.u32 %v17157_v14, %v13369_v40  ;;  %v13327_v40 = vld [vmem:[%s25878_s3 + $0x1268] sm:$0xf] }
 0x63f   :  { %4728 = vmatpush.bf16.msrb.mxu1 %v13074_v15  ;;  %v13345_v15 = vld [vmem:[%s25878_s3 + $0x12a8] sm:$0xf0] }
 0x640   :  { %v13348_v27 = vor.u32 %v17151_v21, %v13345_v15  ;;  %v13431_v21 = vld [vmem:[%s25878_s3 + $0x1330] sm:$0xf] }
 0x643   :  { %4729 = vmatpush.bf16.msrb.mxu1 %v13050_v38  ;;  %v13425_v38 = vld [vmem:[%s25878_s3 + $0x1340] sm:$0xf0] }
 0x682   :  { %v4286_v44 = vpop.f32.mrf.mxu0 }
 0x683   :  { %v21621_v35 = vadd.f32 %v4286_v44, %v21315_v42  ;;  %v4299_v30 = vpop.f32.mrf.mxu1  ;;  %v13344_v44 = vor.u32 %v17154_v18, %v13343_v1  ;;  %v13329_v18 = vld [vmem:[%s25878_s3 + $0x1280] sm:$0xf0] }
 0x684   :  { %v21624_v39 = vadd.f32 %v4299_v30, %v21312_v41  ;;  %v13439_v41 = vld [vmem:[%s25878_s3 + $0x1350] sm:$0xf]  ;;  %v13424_v30 = vor.u32 %v17173_v28, %v13423_v23  ;;  %v17171_v28 = vld [vmem:[%s25878_s3 + $0x1334] sm:$0xf] }
 0x685   :  { %v13440_v19 = vor.u32 %v17178_v43, %v13439_v41  ;;  %v13321_v43 = vld [vmem:[%s25878_s3 + $0x1278] sm:$0xf0] }
 0x687   :  { %5050 = vmatpush.bf16.msrb.mxu0 %v13440_v19 }
 0x688   :  { %v4273_v36 = vpop.f32.mrf.mxu2 }
 0x689   :  { %v21627_v37 = vadd.f32 %v4273_v36, %v21309_v49  ;;  %v4312_v46 = vpop.f32.mrf.mxu3  ;;  %v13415_v49 = vld [vmem:[%s25878_s3 + $0x1320] sm:$0xf]  ;;  %v13428_v36 = vor.u32 %v17170_v31, %v13425_v38  ;;  %v13303_v31 = vld [vmem:[%s25878_s3 + $0x1238] sm:$0xf]  ;;  %v17143_v38 = vld [vmem:[%s25878_s3 + $0x124c] sm:$0xf0] }
 0x68a   :  { %v21630_v45 = vadd.f32 %v4312_v46, %v21318_v53  ;;  %v4288_v42 = vpop.f32.mrf.mxu0  ;;  %v17172_v53 = vld [vmem:[%s25878_s3 + $0x1334] sm:$0xf0]  ;;  %v13319_v46 = vld [vmem:[%s25878_s3 + $0x1260] sm:$0xf] }
 0x68b   :  { %v4301_v63 = vpop.f32.mrf.mxu1  ;;  %v13416_v25 = vor.u32 %v17172_v53, %v13415_v49  ;;  %v17148_v42 = vld [vmem:[%s25878_s3 + $0x1274] sm:$0xf0]  ;;  %v17167_v53 = vld [vmem:[%s25878_s3 + $0x130c] sm:$0xf0] }
 0x68c   :  { %v17145_v63 = vld [vmem:[%s25878_s3 + $0x1264] sm:$0xf]  ;;  %v13320_v41 = vor.u32 %v17148_v42, %v13319_v46  ;;  %v13399_v49 = vld [vmem:[%s25878_s3 + $0x12f8] sm:$0xf]  ;;  %v13304_v46 = vor.u32 %v17143_v38, %v13303_v31  ;;  %v13305_v42 = vld [vmem:[%s25878_s3 + $0x1250] sm:$0xf0] }
 0x68d   :  { %5051 = vmatpush.bf16.msrb.mxu0 %v13416_v25  ;;  %v13324_v19 = vor.u32 %v17145_v63, %v13321_v43  ;;  %v17164_v25 = vld [vmem:[%s25878_s3 + $0x12fc] sm:$0xf]  ;;  %v13400_v58 = vor.u32 %v17167_v53, %v13399_v49  ;;  %v13407_v63 = vld [vmem:[%s25878_s3 + $0x1300] sm:$0xf]  ;;  %v17165_v49 = vld [vmem:[%s25878_s3 + $0x1304] sm:$0xf] }
 0x68e   :  { %v13409_v53 = vld [vmem:[%s25878_s3 + $0x1318] sm:$0xf0]  ;;  %v13681_v38 = vld [vmem:[%s25878_s3 + $0x14d0] sm:$0xf] }
 0x690   :  { %v4275_v24 = vpop.f32.mrf.mxu2 }
 0x691   :  { %v4314_v47 = vpop.f32.mrf.mxu3  ;;  %5052 = vmatpush.bf16.msrb.mxu0 %v13392_v20  ;;  %v13404_v24 = vor.u32 %v17164_v25, %v13401_v34  ;;  %v17139_v20 = vld [vmem:[%s25878_s3 + $0x1234] sm:$0xf]  ;;  %v13412_v25 = vor.u32 %v17165_v49, %v13409_v53  ;;  %v17137_v34 = vld [vmem:[%s25878_s3 + $0x121c] sm:$0xf0] }
 0x692   :  { %v4338_v33 = vpop.f32.mrf.mxu0  ;;  %v13295_v47 = vld [vmem:[%s25878_s3 + $0x1230] sm:$0xf] }
 0x693   :  { %v21651_v26 = vadd.f32 %v4338_v33, %v21373_v62  ;;  %v4362_v48 = vpop.f32.mrf.mxu1  ;;  %v17160_v62 = vld [vmem:[%s25878_s3 + $0x12d4] sm:$0xf0]  ;;  %v17142_v33 = vld [vmem:[%s25878_s3 + $0x1244] sm:$0xf0] }
 0x694   :  { %v4363_v50 = vadd.f32 %v21030_v9, %v4362_v48  ;;  %v13447_v9 = vld [vmem:[%s25878_s3 + $0x1358] sm:$0xf]  ;;  %v13368_v0 = vor.u32 %v17160_v62, %v13367_v52  ;;  %v13296_v48 = vor.u32 %v17142_v33, %v13295_v47  ;;  %v13376_v62 = vor.u32 %v17161_v51, %v13375_v32  ;;  %v13281_v33 = vld [vmem:[%s25878_s3 + $0x1220] sm:$0xf0]  ;;  %v17159_v51 = vld [vmem:[%s25878_s3 + $0x12d4] sm:$0xf] }
 0x695   :  { %v13448_v17 = vor.u32 %v17179_v56, %v13447_v9  ;;  %v17158_v9 = vld [vmem:[%s25878_s3 + $0x12cc] sm:$0xf]  ;;  %v13377_v56 = vld [vmem:[%s25878_s3 + $0x12e0] sm:$0xf0] }
 0x696   :  { %v4366_v7 = vmax.f32 %v4363_v50, 0.0  ;;  %5053 = vmatpush.bf16.msrb.mxu0 %v13368_v0  ;;  %v13297_v50 = vld [vmem:[%s25878_s3 + $0x1248] sm:$0xf0]  ;;  %v13380_v13 = vor.u32 %v17158_v9, %v13377_v56  ;;  %v13359_v9 = vld [vmem:[%s25878_s3 + $0x12a0] sm:$0xf] }
 0x697   :  { %v13300_v52 = vor.u32 %v17139_v20, %v13297_v50  ;;  %v13383_v20 = vld [vmem:[%s25878_s3 + $0x12d0] sm:$0xf]  ;;  %v17156_v56 = vld [vmem:[%s25878_s3 + $0x12b4] sm:$0xf0] }
 0x698   :  { %v4367_v61 = vpack.c.bf16 %v4366_v7, %v4366_v7  ;;  %v4325_v59 = vpop.f32.mrf.mxu2  ;;  %v13271_v7 = vld [vmem:[%s25878_s3 + $0x1200] sm:$0xf] }
 0x699   :  { %v21679_v4 = vadd.f32 %v4325_v59, %v21339_v54  ;;  %v17163_v54 = vld [vmem:[%s25878_s3 + $0x12f4] sm:$0xf]  ;;  %v13273_v59 = vld [vmem:[%s25878_s3 + $0x1218] sm:$0xf0] }
 0x69a   :  { %4665 = vmatmul.bf16.vlgmr.msrb.gmra.mxu3 %v4367_v61  ;;  %4678 = vmatmul.bf16.vlgmr.msra.gmra.mxu1 %v4367_v61  ;;  %v4340_v29 = vpop.f32.mrf.mxu0  ;;  %v13396_v12 = vor.u32 %v17163_v54, %v13393_v11 }
 0x69b   :  { %4691 = vmatmul.bf16.vlgmr.msrb.gmra.mxu2 %v4367_v61  ;;  %4704 = vmatmul.bf16.vlgmr.msra.gmra.mxu0 %v4367_v61  ;;  %v4364_v6 = vpop.f32.mrf.mxu1  ;;  %v13353_v29 = vld [vmem:[%s25878_s3 + $0x12b0] sm:$0xf0] }
 0x69c   :  { %5063 = vmatpush.bf16.msrb.mxu2 %v13444_v55  ;;  %5076 = vmatpush.bf16.msrb.mxu3 %v13448_v17  ;;  %v13272_v55 = vor.u32 %v17136_v3, %v13271_v7  ;;  %v17152_v17 = vld [vmem:[%s25878_s3 + $0x129c] sm:$0xf]  ;;  %v13455_v6 = vld [vmem:[%s25878_s3 + $0x1360] sm:$0xf]  ;;  %v17153_v7 = vld [vmem:[%s25878_s3 + $0x12a4] sm:$0xf] }
 0x69d   :  { %5089 = vmatpush.bf16.msra.mxu1 %v13452_v57  ;;  %5054 = vmatpush.bf16.msrb.mxu0 %v13344_v44  ;;  %v13352_v57 = vor.u32 %v17155_v5, %v13351_v60  ;;  %v13356_v54 = vor.u32 %v17152_v17, %v13353_v29  ;;  %v17174_v44 = vld [vmem:[%s25878_s3 + $0x1344] sm:$0xf0]  ;;  %v13361_v3 = vld [vmem:[%s25878_s3 + $0x12b8] sm:$0xf0]  ;;  %v13337_v17 = vld [vmem:[%s25878_s3 + $0x1288] sm:$0xf0] }
 0x69e   :  { %v13432_v23 = vor.u32 %v17174_v44, %v13431_v21 }
 0x6a0   :  { %v4327_v10 = vpop.f32.mrf.mxu2  ;;  %5064 = vmatpush.bf16.msrb.mxu2 %v13420_v8  ;;  %5077 = vmatpush.bf16.msrb.mxu3 %v13424_v30  ;;  %v17180_v8 = vld [vmem:[%s25878_s3 + $0x1374] sm:$0xf0] }
 0x6a1   :  { %5090 = vmatpush.bf16.msra.mxu1 %v13428_v36  ;;  %5055 = vmatpush.bf16.msrb.mxu0 %v13320_v41  ;;  %v13456_v11 = vor.u32 %v17180_v8, %v13455_v6  ;;  %v17177_v10 = vld [vmem:[%s25878_s3 + $0x1364] sm:$0xf]  ;;  %v17140_v36 = vld [vmem:[%s25878_s3 + $0x123c] sm:$0xf]  ;;  %v17168_v41 = vld [vmem:[%s25878_s3 + $0x1314] sm:$0xf0] }
 0x6a2   :  { %v13308_v43 = vor.u32 %v17140_v36, %v13305_v42  ;;  %v13311_v8 = vld [vmem:[%s25878_s3 + $0x1240] sm:$0xf]  ;;  %v17220_v42 = vld [vmem:[%s25878_s3 + $0x14b4] sm:$0xf0] }
 0x6a4   :  { %5065 = vmatpush.bf16.msrb.mxu2 %v13396_v12  ;;  %5078 = vmatpush.bf16.msrb.mxu3 %v13400_v58  ;;  %v13457_v12 = vld [vmem:[%s25878_s3 + $0x1378] sm:$0xf0]  ;;  %v13279_v58 = vld [vmem:[%s25878_s3 + $0x1208] sm:$0xf] }
 0x6a5   :  { %5091 = vmatpush.bf16.msra.mxu1 %v13404_v24  ;;  %5056 = vmatpush.bf16.msrb.mxu0 %v13296_v48  ;;  %v13460_v14 = vor.u32 %v17177_v10, %v13457_v12  ;;  %v17134_v24 = vld [vmem:[%s25878_s3 + $0x120c] sm:$0xf]  ;;  %v13280_v47 = vor.u32 %v17137_v34, %v13279_v58  ;;  %v17162_v48 = vld [vmem:[%s25878_s3 + $0x12e4] sm:$0xf0]  ;;  %v17141_v10 = vld [vmem:[%s25878_s3 + $0x1244] sm:$0xf] }
 0x6a6   :  { %v13284_v50 = vor.u32 %v17134_v24, %v13281_v33  ;;  %v13384_v32 = vor.u32 %v17162_v48, %v13383_v20  ;;  %v13683_v33 = vld [vmem:[%s25878_s3 + $0x14e8] sm:$0xf0]  ;;  %v17208_v20 = vld [vmem:[%s25878_s3 + $0x1454] sm:$0xf0] }
 0x6a7   :  { %v13689_v48 = vld [vmem:[%s25878_s3 + $0x14d8] sm:$0xf] }
 0x6a8   :  { %5066 = vmatpush.bf16.msrb.mxu2 %v13372_v22  ;;  %5079 = vmatpush.bf16.msrb.mxu3 %v13376_v62  ;;  %v17149_v22 = vld [vmem:[%s25878_s3 + $0x127c] sm:$0xf0] }
 0x6a9   :  { %5092 = vmatpush.bf16.msra.mxu1 %v13380_v13  ;;  %5057 = vmatpush.bf16.msrb.mxu0 %v13272_v55  ;;  %v13328_v1 = vor.u32 %v17149_v22, %v13327_v40  ;;  %v13360_v13 = vor.u32 %v17156_v56, %v13359_v9  ;;  %v17150_v55 = vld [vmem:[%s25878_s3 + $0x1284] sm:$0xf0]  ;;  %v13287_v40 = vld [vmem:[%s25878_s3 + $0x1210] sm:$0xf] }
 0x6aa   :  { %4717 = vmatmul.bf16.vlgmr.msra.gmra.mxu3 %v4367_v61  ;;  %4730 = vmatmul.bf16.vlgmr.msrb.gmra.mxu1 %v4367_v61  ;;  %v17133_v61 = vld [vmem:[%s25878_s3 + $0x1204] sm:$0xf] }
 0x6ab   :  { %13220 = vmatmul.msk.bf16.vlgmr.msra.gmra.mxu2 %vm35_vm1, %v13219_v16  ;;  %v13276_v0 = vor.u32 %v17133_v61, %v13273_v59  ;;  %v17146_v16 = vld [vmem:[%s25878_s3 + $0x126c] sm:$0xf]  ;;  %v13364_v61 = vor.u32 %v17153_v7, %v13361_v3  ;;  %v13335_v59 = vld [vmem:[%s25878_s3 + $0x1270] sm:$0xf]  ;;  %v17217_v7 = vld [vmem:[%s25878_s3 + $0x14a4] sm:$0xf] }
 0x6ac   :  { %5067 = vmatpush.bf16.msrb.mxu2 %v13348_v27  ;;  %5080 = vmatpush.bf16.msrb.mxu3 %v13352_v57  ;;  %v13332_v15 = vor.u32 %v17146_v16, %v13329_v18  ;;  %v13433_v27 = vld [vmem:[%s25878_s3 + $0x1348] sm:$0xf0]  ;;  %v13336_v5 = vor.u32 %v17150_v55, %v13335_v59  ;;  %v17135_v16 = vld [vmem:[%s25878_s3 + $0x1214] sm:$0xf] }
 0x6ad   :  { %5093 = vmatpush.bf16.msra.mxu1 %v13356_v54  ;;  %5102 = vmatpush.bf16.msra.mxu0 %v13456_v11  ;;  %v13436_v30 = vor.u32 %v17171_v28, %v13433_v27  ;;  %v17144_v54 = vld [vmem:[%s25878_s3 + $0x1254] sm:$0xf0] }
 0x6ae   :  { %v13312_v12 = vor.u32 %v17144_v54, %v13311_v8  ;;  %v13461_v54 = vld [vmem:[%s25875_s0 + $0xd] sm:$0x1] }
 0x6b0   :  { %5068 = vmatpush.bf16.msrb.mxu2 %v13324_v19  ;;  %5081 = vmatpush.bf16.msrb.mxu3 %v13328_v1  ;;  %v13408_v19 = vor.u32 %v17168_v41, %v13407_v63  ;;  %v13289_v1 = vld [vmem:[%s25878_s3 + $0x1228] sm:$0xf0] }
 0x6b1   :  { %5094 = vmatpush.bf16.msra.mxu1 %v13332_v15  ;;  %5103 = vmatpush.bf16.msra.mxu0 %v13432_v23  ;;  %v13292_v27 = vor.u32 %v17135_v16, %v13289_v1 }
 0x6b4   :  { %5069 = vmatpush.bf16.msrb.mxu2 %v13300_v52  ;;  %5082 = vmatpush.bf16.msrb.mxu3 %v13304_v46  ;;  %v13385_v52 = vld [vmem:[%s25878_s3 + $0x12e8] sm:$0xf0]  ;;  %v13657_v46 = vld [vmem:[%s25878_s3 + $0x14a0] sm:$0xf] }
 0x6b5   :  { %5095 = vmatpush.bf16.msra.mxu1 %v13308_v43  ;;  %5104 = vmatpush.bf16.msra.mxu0 %v13408_v19  ;;  %v13388_v62 = vor.u32 %v17159_v51, %v13385_v52  ;;  %v13658_v41 = vor.u32 %v17220_v42, %v13657_v46  ;;  %v13633_v43 = vld [vmem:[%s25878_s3 + $0x1470] sm:$0xf]  ;;  %v17214_v19 = vld [vmem:[%s25878_s3 + $0x1484] sm:$0xf0]  ;;  %v17224_v51 = vld [vmem:[%s25878_s3 + $0x14dc] sm:$0xf] }
 0x6b6   :  { %v13634_v53 = vor.u32 %v17214_v19, %v13633_v43  ;;  %v13691_v52 = vld [vmem:[%s25878_s3 + $0x14f0] sm:$0xf0]  ;;  %v17212_v46 = vld [vmem:[%s25878_s3 + $0x147c] sm:$0xf]  ;;  %v13537_v19 = vld [vmem:[%s25878_s3 + $0x13b0] sm:$0xf] }
 0x6b8   :  { %5070 = vmatpush.bf16.msrb.mxu2 %v13276_v0  ;;  %5083 = vmatpush.bf16.msrb.mxu3 %v13280_v47  ;;  %v17147_v0 = vld [vmem:[%s25878_s3 + $0x1274] sm:$0xf] }
 0x6b9   :  { %5096 = vmatpush.bf16.msra.mxu1 %v13284_v50  ;;  %5105 = vmatpush.bf16.msra.mxu0 %v13384_v32  ;;  %v13340_v6 = vor.u32 %v17147_v0, %v13337_v17  ;;  %v17223_v47 = vld [vmem:[%s25878_s3 + $0x14d4] sm:$0xf]  ;;  %v17227_v50 = vld [vmem:[%s25878_s3 + $0x14ec] sm:$0xf0] }
 0x6ba   :  { %v13686_v9 = vor.u32 %v17223_v47, %v13683_v33  ;;  %v13690_v3 = vor.u32 %v17227_v50, %v13689_v48  ;;  %v17209_v47 = vld [vmem:[%s25878_s3 + $0x145c] sm:$0xf0]  ;;  %v13619_v48 = vld [vmem:[%s25878_s3 + $0x1460] sm:$0xf0] }
 0x6bb   :  { %v13513_v50 = vld [vmem:[%s25878_s3 + $0x1380] sm:$0xf] }
 0x6bc   :  { %5115 = vmatpush.bf16.msra.mxu2 %v13460_v14  ;;  %5146 = vmatpush.bf16.msra.mxu3 %v17889_v2 }
 0x6bd   :  { %5106 = vmatpush.bf16.msra.mxu0 %v13360_v13  ;;  %v13659_v13 = vld [vmem:[%s25878_s3 + $0x14b8] sm:$0xf0] }
 0x6be   :  { %v13662_v0 = vor.u32 %v17217_v7, %v13659_v13  ;;  %v13593_v7 = vld [vmem:[%s25878_s3 + $0x1418] sm:$0xf]  ;;  %v17203_v13 = vld [vmem:[%s25878_s3 + $0x142c] sm:$0xf0] }
 0x6c0   :  { %5116 = vmatpush.bf16.msra.mxu2 %v13436_v30 }
 0x6c1   :  { %5107 = vmatpush.bf16.msra.mxu0 %v13336_v5  ;;  %v13635_v5 = vld [vmem:[%s25878_s3 + $0x1488] sm:$0xf0] }
 0x6c4   :  { %5117 = vmatpush.bf16.msra.mxu2 %v13412_v25 }
 0x6c5   :  { %5108 = vmatpush.bf16.msra.mxu0 %v13312_v12  ;;  %v17199_v12 = vld [vmem:[%s25878_s3 + $0x1414] sm:$0xf] }
 0x6c8   :  { %5118 = vmatpush.bf16.msra.mxu2 %v13388_v62 }
 0x6cc   :  { %5119 = vmatpush.bf16.msra.mxu2 %v13364_v61  ;;  %v13694_v61 = vor.u32 %v17224_v51, %v13691_v52  ;;  %v17184_v51 = vld [vmem:[%s25878_s3 + $0x1394] sm:$0xf0]  ;;  %v17181_v52 = vld [vmem:[%s25878_s3 + $0x1384] sm:$0xf] }
 0x6d0   :  { %5120 = vmatpush.bf16.msra.mxu2 %v13340_v6  ;;  %v13611_v6 = vld [vmem:[%s25878_s3 + $0x1458] sm:$0xf0] }
 0x717   :  { %v4679_v60 = vpop.f32.mrf.mxu1 }
 0x718   :  { %v21909_v57 = vadd.f32 %v4679_v60, %v21621_v35  ;;  %v4705_v29 = vpop.f32.mrf.mxu0  ;;  %v13313_v35 = vld [vmem:[%s25878_s3 + $0x1258] sm:$0xf0]  ;;  %v17211_v60 = vld [vmem:[%s25878_s3 + $0x1474] sm:$0xf] }
 0x719   :  { %v21918_v11 = vadd.f32 %v4705_v29, %v21630_v45  ;;  %v13316_v14 = vor.u32 %v17141_v10, %v13313_v35  ;;  %v17138_v45 = vld [vmem:[%s25878_s3 + $0x1224] sm:$0xf0]  ;;  %v13638_v17 = vor.u32 %v17211_v60, %v13635_v5  ;;  %v17205_v29 = vld [vmem:[%s25878_s3 + $0x1444] sm:$0xf]  ;;  %v13585_v10 = vld [vmem:[%s25878_s3 + $0x1410] sm:$0xf] }
 0x71a   :  { %v13288_v23 = vor.u32 %v17138_v45, %v13287_v40  ;;  %v13614_v8 = vor.u32 %v17205_v29, %v13611_v6  ;;  %v17202_v35 = vld [vmem:[%s25878_s3 + $0x1424] sm:$0xf0]  ;;  %v13587_v40 = vld [vmem:[%s25878_s3 + $0x1428] sm:$0xf0]  ;;  %v13699_v29 = vld [vmem:[%s25878_s3 + $0x14f8] sm:$0xf0] }
 0x71b   :  { %5121 = vmatpush.bf16.msra.mxu2 %v13316_v14  ;;  %v13586_v14 = vor.u32 %v17202_v35, %v13585_v10  ;;  %v13665_v45 = vld [vmem:[%s25878_s3 + $0x14a8] sm:$0xf]  ;;  %v13590_v16 = vor.u32 %v17199_v12, %v13587_v40  ;;  %v17194_v10 = vld [vmem:[%s25878_s3 + $0x13ec] sm:$0xf]  ;;  %v13571_v12 = vld [vmem:[%s25878_s3 + $0x1400] sm:$0xf0] }
 0x71c   :  { %5109 = vmatpush.bf16.msra.mxu0 %v13288_v23  ;;  %v17222_v40 = vld [vmem:[%s25878_s3 + $0x14c4] sm:$0xf0] }
 0x71d   :  { %v4666_v22 = vpop.f32.mrf.mxu3 }
 0x71e   :  { %v21939_v18 = vadd.f32 %v4666_v22, %v21627_v37  ;;  %v4692_v21 = vpop.f32.mrf.mxu2  ;;  %v17226_v37 = vld [vmem:[%s25878_s3 + $0x14e4] sm:$0xf0]  ;;  %v17221_v22 = vld [vmem:[%s25878_s3 + $0x14bc] sm:$0xf0] }
 0x71f   :  { %v21942_v44 = vadd.f32 %v4692_v21, %v21624_v39  ;;  %v4681_v15 = vpop.f32.mrf.mxu1  ;;  %5122 = vmatpush.bf16.msra.mxu2 %v13292_v27  ;;  %v13682_v36 = vor.u32 %v17226_v37, %v13681_v38  ;;  %v13666_v1 = vor.u32 %v17221_v22, %v13665_v45  ;;  %v17218_v21 = vld [vmem:[%s25878_s3 + $0x14ac] sm:$0xf]  ;;  %v17196_v27 = vld [vmem:[%s25878_s3 + $0x13f4] sm:$0xf0]  ;;  %v13563_v38 = vld [vmem:[%s25878_s3 + $0x13f8] sm:$0xf0]  ;;  %v13574_v45 = vor.u32 %v17194_v10, %v13571_v12 }
 0x720   :  { %v4707_v28 = vpop.f32.mrf.mxu0  ;;  %v13667_v15 = vld [vmem:[%s25878_s3 + $0x14c0] sm:$0xf0]  ;;  %v13531_v12 = vld [vmem:[%s25878_s3 + $0x13a8] sm:$0xf0] }
 0x721   :  { %5443 = vmatpush.bf16.msrb.mxu1 %v13682_v36  ;;  %v13670_v23 = vor.u32 %v17218_v21, %v13667_v15  ;;  %v13561_v28 = vld [vmem:[%s25878_s3 + $0x13e0] sm:$0xf]  ;;  %v17215_v36 = vld [vmem:[%s25878_s3 + $0x148c] sm:$0xf0]  ;;  %v13545_v15 = vld [vmem:[%s25878_s3 + $0x13b8] sm:$0xf] }
 0x725   :  { %v4668_v30 = vpop.f32.mrf.mxu3  ;;  %5444 = vmatpush.bf16.msrb.mxu1 %v13658_v41  ;;  %v13643_v41 = vld [vmem:[%s25878_s3 + $0x1490] sm:$0xf0] }
 0x726   :  { %v4694_v31 = vpop.f32.mrf.mxu2  ;;  %v17193_v30 = vld [vmem:[%s25878_s3 + $0x13e4] sm:$0xf]  ;;  %v13646_v43 = vor.u32 %v17212_v46, %v13643_v41  ;;  %v13651_v46 = vld [vmem:[%s25878_s3 + $0x1498] sm:$0xf0]  ;;  %v13521_v41 = vld [vmem:[%s25878_s3 + $0x1388] sm:$0xf] }
 0x727   :  { %v4731_v39 = vpop.f32.mrf.mxu1  ;;  %v13562_v31 = vor.u32 %v17196_v27, %v13561_v28  ;;  %v13566_v37 = vor.u32 %v17193_v30, %v13563_v38  ;;  %v17188_v28 = vld [vmem:[%s25878_s3 + $0x13bc] sm:$0xf]  ;;  %v13547_v30 = vld [vmem:[%s25878_s3 + $0x13d0] sm:$0xf0]  ;;  %v17216_v38 = vld [vmem:[%s25878_s3 + $0x1494] sm:$0xf0] }
 0x728   :  { %v21957_v63 = vadd.f32 %v4731_v39, %v21651_v26  ;;  %v21971_v26 = vld [vmem:[%s25877_s2] ss:$0 sm:$0xff]  ;;  %v13641_v39 = vld [vmem:[%s25878_s3 + $0x1478] sm:$0xf] }
 0x729   :  { %5445 = vmatpush.bf16.msrb.mxu1 %v13634_v53  ;;  %v13642_v42 = vor.u32 %v17215_v36, %v13641_v39  ;;  %v17187_v53 = vld [vmem:[%s25878_s3 + $0x13b4] sm:$0xf]  ;;  %v17213_v36 = vld [vmem:[%s25878_s3 + $0x1484] sm:$0xf] }
 0x72d   :  { %v4718_v49 = vpop.f32.mrf.mxu3 }
 0x72e   :  { %v21966_v25 = vadd.f32 %v4718_v49, %v21679_v4  ;;  %v4755_v58 = vpop.f32.mrf.mxu2  ;;  %v13609_v4 = vld [vmem:[%s25878_s3 + $0x1440] sm:$0xf]  ;;  %v17190_v49 = vld [vmem:[%s25878_s3 + $0x13c4] sm:$0xf0] }
 0x72f   :  { %v4756_v34 = vadd.f32 %v21971_v26, %v4755_v58  ;;  %v4733_v24 = vpop.f32.mrf.mxu1  ;;  %v13610_v56 = vor.u32 %v17208_v20, %v13609_v4  ;;  %v13538_v58 = vor.u32 %v17190_v49, %v13537_v19  ;;  %v17206_v20 = vld [vmem:[%s25878_s3 + $0x144c] sm:$0xf] }
 0x730   :  { %v13617_v24 = vld [vmem:[%s25878_s3 + $0x1448] sm:$0xf]  ;;  %v17182_v19 = vld [vmem:[%s25878_s3 + $0x138c] sm:$0xf] }
 0x731   :  { %v4759_v32 = vmax.f32 %v4756_v34, 0.0  ;;  %5446 = vmatpush.bf16.msrb.mxu1 %v13610_v56  ;;  %v13539_v34 = vld [vmem:[%s25878_s3 + $0x13c8] sm:$0xf0]  ;;  %v13618_v4 = vor.u32 %v17209_v47, %v13617_v24 }
 0x732   :  { %v13542_v33 = vor.u32 %v17187_v53, %v13539_v34  ;;  %v13523_v53 = vld [vmem:[%s25878_s3 + $0x13a0] sm:$0xf0]  ;;  %v17210_v34 = vld [vmem:[%s25878_s3 + $0x1464] sm:$0xf0] }
 0x733   :  { %v4760_v62 = vpack.c.bf16 %v4759_v32, %v4759_v32  ;;  %v13622_v32 = vor.u32 %v17206_v20, %v13619_v48  ;;  %v13526_v24 = vor.u32 %v17182_v19, %v13523_v53  ;;  %v13601_v48 = vld [vmem:[%s25878_s3 + $0x1420] sm:$0xf]  ;;  %v13925_v53 = vld [vmem:[%s25878_s3 + $0x1668] sm:$0xf0] }
 0x735   :  { %5058 = vmatmul.bf16.vlgmr.msrb.gmra.mxu0 %v4760_v62  ;;  %5071 = vmatmul.bf16.vlgmr.msrb.gmra.mxu2 %v4760_v62  ;;  %v4720_v59 = vpop.f32.mrf.mxu3 }
 0x736   :  { %5084 = vmatmul.bf16.vlgmr.msrb.gmra.mxu3 %v4760_v62  ;;  %5097 = vmatmul.bf16.vlgmr.msra.gmra.mxu1 %v4760_v62  ;;  %v4757_v55 = vpop.f32.mrf.mxu2  ;;  %v13595_v59 = vld [vmem:[%s25878_s3 + $0x1430] sm:$0xf0] }
 0x737   :  { %5456 = vmatpush.bf16.msrb.mxu3 %v13686_v9  ;;  %5469 = vmatpush.bf16.msrb.mxu0 %v13690_v3  ;;  %v13514_v9 = vor.u32 %v17184_v51, %v13513_v50  ;;  %v17200_v3 = vld [vmem:[%s25878_s3 + $0x141c] sm:$0xf]  ;;  %v13697_v55 = vld [vmem:[%s25878_s3 + $0x14e0] sm:$0xf]  ;;  %v17204_v50 = vld [vmem:[%s25878_s3 + $0x1434] sm:$0xf0] }
 0x738   :  { %5482 = vmatpush.bf16.msrb.mxu2 %v13694_v61  ;;  %5447 = vmatpush.bf16.msrb.mxu1 %v13586_v14  ;;  %v13594_v61 = vor.u32 %v17203_v13, %v13593_v7  ;;  %v13598_v60 = vor.u32 %v17200_v3, %v13595_v59  ;;  %v13673_v14 = vld [vmem:[%s25878_s3 + $0x14b0] sm:$0xf]  ;;  %v13602_v51 = vor.u32 %v17204_v50, %v13601_v48  ;;  %v17195_v7 = vld [vmem:[%s25878_s3 + $0x13f4] sm:$0xf]  ;;  %v17265_v50 = vld [vmem:[%s25878_s3 + $0x1624] sm:$0xf] }
 0x739   :  { %v13674_v22 = vor.u32 %v17222_v40, %v13673_v14 }
 0x73b   :  { %5457 = vmatpush.bf16.msrb.mxu3 %v13662_v0  ;;  %5470 = vmatpush.bf16.msrb.mxu0 %v13666_v1  ;;  %v17228_v0 = vld [vmem:[%s25878_s3 + $0x14f4] sm:$0xf0]  ;;  %v13675_v1 = vld [vmem:[%s25878_s3 + $0x14c8] sm:$0xf0] }
 0x73c   :  { %5483 = vmatpush.bf16.msrb.mxu2 %v13670_v23  ;;  %5448 = vmatpush.bf16.msrb.mxu1 %v13562_v31  ;;  %v13698_v5 = vor.u32 %v17228_v0, %v13697_v55  ;;  %v17191_v23 = vld [vmem:[%s25878_s3 + $0x13cc] sm:$0xf0]  ;;  %v13649_v31 = vld [vmem:[%s25878_s3 + $0x1480] sm:$0xf] }
 0x73d   :  { %v13546_v27 = vor.u32 %v17191_v23, %v13545_v15  ;;  %v13650_v39 = vor.u32 %v17216_v38, %v13649_v31  ;;  %v17268_v31 = vld [vmem:[%s25878_s3 + $0x1634] sm:$0xf0] }
 0x73f   :  { %5458 = vmatpush.bf16.msrb.mxu3 %v13638_v17  ;;  %5471 = vmatpush.bf16.msrb.mxu0 %v13642_v42  ;;  %v17225_v17 = vld [vmem:[%s25878_s3 + $0x14e4] sm:$0xf]  ;;  %v13654_v42 = vor.u32 %v17213_v36, %v13651_v46  ;;  %v17262_v36 = vld [vmem:[%s25878_s3 + $0x1604] sm:$0xf0] }
 0x740   :  { %5484 = vmatpush.bf16.msrb.mxu2 %v13646_v43  ;;  %5449 = vmatpush.bf16.msrb.mxu1 %v13538_v58  ;;  %v13702_v6 = vor.u32 %v17225_v17, %v13699_v29  ;;  %v17185_v43 = vld [vmem:[%s25878_s3 + $0x139c] sm:$0xf0]  ;;  %v13625_v58 = vld [vmem:[%s25878_s3 + $0x1450] sm:$0xf]  ;;  %v17189_v29 = vld [vmem:[%s25878_s3 + $0x13c4] sm:$0xf] }
 0x741   :  { %v13522_v49 = vor.u32 %v17185_v43, %v13521_v41  ;;  %v13626_v47 = vor.u32 %v17210_v34, %v13625_v58  ;;  %v13851_v58 = vld [vmem:[%s25878_s3 + $0x15c0] sm:$0xf]  ;;  %v13931_v34 = vld [vmem:[%s25878_s3 + $0x1658] sm:$0xf] }
 0x743   :  { %5459 = vmatpush.bf16.msrb.mxu3 %v13614_v8  ;;  %5472 = vmatpush.bf16.msrb.mxu0 %v13618_v4  ;;  %v13569_v8 = vld [vmem:[%s25878_s3 + $0x13e8] sm:$0xf]  ;;  %v13627_v4 = vld [vmem:[%s25878_s3 + $0x1468] sm:$0xf0] }
 0x744   :  { %5485 = vmatpush.bf16.msrb.mxu2 %v13622_v32  ;;  %5450 = vmatpush.bf16.msrb.mxu1 %v13514_v9  ;;  %v17201_v32 = vld [vmem:[%s25878_s3 + $0x1424] sm:$0xf]  ;;  %v13577_v9 = vld [vmem:[%s25878_s3 + $0x13f0] sm:$0xf] }
 0x745   :  { %5110 = vmatmul.bf16.vlgmr.msra.gmra.mxu0 %v4760_v62  ;;  %5123 = vmatmul.bf16.vlgmr.msra.gmra.mxu2 %v4760_v62  ;;  %v13515_v62 = vld [vmem:[%s25878_s3 + $0x1398] sm:$0xf0] }
 0x746   :  { %13462 = vmatmul.msk.bf16.vlgmr.msra.gmra.mxu3 %vm35_vm1, %v13461_v54  ;;  %v13518_v56 = vor.u32 %v17181_v52, %v13515_v62  ;;  %v17197_v54 = vld [vmem:[%s25878_s3 + $0x13fc] sm:$0xf0]  ;;  %v13603_v52 = vld [vmem:[%s25878_s3 + $0x1438] sm:$0xf0] }
 0x747   :  { %5460 = vmatpush.bf16.msrb.mxu3 %v13590_v16  ;;  %5473 = vmatpush.bf16.msrb.mxu0 %v13594_v61  ;;  %v13570_v35 = vor.u32 %v17197_v54, %v13569_v8  ;;  %v17219_v16 = vld [vmem:[%s25878_s3 + $0x14b4] sm:$0xf]  ;;  %v13606_v62 = vor.u32 %v17201_v32, %v13603_v52  ;;  %v13579_v61 = vld [vmem:[%s25878_s3 + $0x1408] sm:$0xf0]  ;;  %v13529_v54 = vld [vmem:[%s25878_s3 + $0x1390] sm:$0xf] }
 0x748   :  { %5486 = vmatpush.bf16.msrb.mxu2 %v13598_v60  ;;  %5495 = vmatpush.bf16.msra.mxu1 %v13698_v5  ;;  %v13678_v21 = vor.u32 %v17219_v16, %v13675_v1  ;;  %v13582_v0 = vor.u32 %v17195_v7, %v13579_v61  ;;  %v13553_v60 = vld [vmem:[%s25878_s3 + $0x13c0] sm:$0xf]  ;;  %v17192_v5 = vld [vmem:[%s25878_s3 + $0x13d4] sm:$0xf0]  ;;  %v13901_v32 = vld [vmem:[%s25878_s3 + $0x1638] sm:$0xf0] }
 0x749   :  { %v13907_v7 = vld [vmem:[%s25878_s3 + $0x1628] sm:$0xf]  ;;  %v17266_v61 = vld [vmem:[%s25878_s3 + $0x162c] sm:$0xf] }
 0x74b   :  { %5461 = vmatpush.bf16.msrb.mxu3 %v13566_v37  ;;  %5474 = vmatpush.bf16.msrb.mxu0 %v13570_v35  ;;  %v13550_v37 = vor.u32 %v17188_v28, %v13547_v30  ;;  %v17183_v35 = vld [vmem:[%s25878_s3 + $0x1394] sm:$0xf]  ;;  %v13923_v28 = vld [vmem:[%s25878_s3 + $0x1650] sm:$0xf]  ;;  %v13899_v30 = vld [vmem:[%s25878_s3 + $0x1620] sm:$0xf] }
 0x74c   :  { %5487 = vmatpush.bf16.msrb.mxu2 %v13574_v45  ;;  %5496 = vmatpush.bf16.msra.mxu1 %v13674_v22 }
 0x74f   :  { %5462 = vmatpush.bf16.msrb.mxu3 %v13542_v33  ;;  %5475 = vmatpush.bf16.msrb.mxu0 %v13546_v27  ;;  %v17207_v33 = vld [vmem:[%s25878_s3 + $0x1454] sm:$0xf] }
 0x750   :  { %5488 = vmatpush.bf16.msrb.mxu2 %v13550_v37  ;;  %5497 = vmatpush.bf16.msra.mxu1 %v13650_v39  ;;  %v13630_v20 = vor.u32 %v17207_v33, %v13627_v4  ;;  %v13900_v37 = vor.u32 %v17268_v31, %v13899_v30  ;;  %v13875_v39 = vld [vmem:[%s25878_s3 + $0x15f0] sm:$0xf]  ;;  %v17272_v33 = vld [vmem:[%s25878_s3 + $0x165c] sm:$0xf]  ;;  %v13933_v4 = vld [vmem:[%s25878_s3 + $0x1670] sm:$0xf0] }
 0x751   :  { %v17260_v30 = vld [vmem:[%s25878_s3 + $0x15fc] sm:$0xf] }
 0x753   :  { %5463 = vmatpush.bf16.msrb.mxu3 %v13518_v56  ;;  %5476 = vmatpush.bf16.msrb.mxu0 %v13522_v49  ;;  %v17198_v56 = vld [vmem:[%s25878_s3 + $0x1404] sm:$0xf0]  ;;  %v17271_v49 = vld [vmem:[%s25878_s3 + $0x1654] sm:$0xf] }
 0x754   :  { %5489 = vmatpush.bf16.msrb.mxu2 %v13526_v24  ;;  %5498 = vmatpush.bf16.msra.mxu1 %v13626_v47  ;;  %v13578_v3 = vor.u32 %v17198_v56, %v13577_v9  ;;  %v17275_v24 = vld [vmem:[%s25878_s3 + $0x166c] sm:$0xf0]  ;;  %v13928_v48 = vor.u32 %v17271_v49, %v13925_v53  ;;  %v17250_v56 = vld [vmem:[%s25878_s3 + $0x15a4] sm:$0xf0]  ;;  %v17257_v49 = vld [vmem:[%s25878_s3 + $0x15dc] sm:$0xf0] }
 0x755   :  { %v13932_v52 = vor.u32 %v17275_v24, %v13931_v34  ;;  %v13827_v9 = vld [vmem:[%s25878_s3 + $0x1590] sm:$0xf]  ;;  %v13861_v34 = vld [vmem:[%s25878_s3 + $0x15e0] sm:$0xf0] }
 0x757   :  { %5508 = vmatpush.bf16.msra.mxu3 %v13702_v6  ;;  %5539 = vmatpush.bf16.msra.mxu0 %v17889_v2  ;;  %v13554_v6 = vor.u32 %v17192_v5, %v13553_v60  ;;  %v13904_v60 = vor.u32 %v17265_v50, %v13901_v32  ;;  %v17259_v5 = vld [vmem:[%s25878_s3 + $0x15f4] sm:$0xf]  ;;  %v13835_v50 = vld [vmem:[%s25878_s3 + $0x1598] sm:$0xf]  ;;  %v17251_v32 = vld [vmem:[%s25878_s3 + $0x15ac] sm:$0xf0] }
 0x758   :  { %5499 = vmatpush.bf16.msra.mxu1 %v13602_v51 }
 0x75b   :  { %5509 = vmatpush.bf16.msra.mxu3 %v13678_v21  ;;  %v13534_v21 = vor.u32 %v17183_v35, %v13531_v12  ;;  %v17253_v12 = vld [vmem:[%s25878_s3 + $0x15c4] sm:$0xf] }
 0x75c   :  { %5500 = vmatpush.bf16.msra.mxu1 %v13578_v3  ;;  %v17269_v3 = vld [vmem:[%s25878_s3 + $0x163c] sm:$0xf0] }
 0x75f   :  { %5510 = vmatpush.bf16.msra.mxu3 %v13654_v42  ;;  %v13876_v42 = vor.u32 %v17262_v36, %v13875_v39  ;;  %v13779_v36 = vld [vmem:[%s25878_s3 + $0x1530] sm:$0xf] }
 0x760   :  { %5501 = vmatpush.bf16.msra.mxu1 %v13554_v6  ;;  %v13908_v6 = vor.u32 %v17269_v3, %v13907_v7  ;;  %v17273_v3 = vld [vmem:[%s25878_s3 + $0x1664] sm:$0xf] }
 0x763   :  { %5511 = vmatpush.bf16.msra.mxu3 %v13630_v20 }
 0x767   :  { %5512 = vmatpush.bf16.msra.mxu3 %v13606_v62  ;;  %v13936_v62 = vor.u32 %v17272_v33, %v13933_v4  ;;  %v17232_v33 = vld [vmem:[%s25878_s3 + $0x1514] sm:$0xf0]  ;;  %v17229_v4 = vld [vmem:[%s25878_s3 + $0x1504] sm:$0xf] }
 0x76b   :  { %5513 = vmatpush.bf16.msra.mxu3 %v13582_v0 }
 0x7b2   :  { %v5059_v13 = vpop.f32.mrf.mxu0 }
 0x7b3   :  { %v22226_v59 = vadd.f32 %v5059_v13, %v21939_v18  ;;  %v5098_v55 = vpop.f32.mrf.mxu1  ;;  %v13555_v18 = vld [vmem:[%s25878_s3 + $0x13d8] sm:$0xf0] }
 0x7b4   :  { %v22235_v17 = vadd.f32 %v5098_v55, %v21918_v11  ;;  %v13558_v8 = vor.u32 %v17189_v29, %v13555_v18  ;;  %v17186_v11 = vld [vmem:[%s25878_s3 + $0x13a4] sm:$0xf0]  ;;  %v13909_v55 = vld [vmem:[%s25878_s3 + $0x1640] sm:$0xf0]  ;;  %v13828_v29 = vor.u32 %v17250_v56, %v13827_v9  ;;  %v13877_v18 = vld [vmem:[%s25878_s3 + $0x1608] sm:$0xf0] }
 0x7b5   :  { %v13530_v16 = vor.u32 %v17186_v11, %v13529_v54  ;;  %v13803_v54 = vld [vmem:[%s25878_s3 + $0x1560] sm:$0xf]  ;;  %v17244_v11 = vld [vmem:[%s25878_s3 + $0x1574] sm:$0xf0]  ;;  %v13837_v9 = vld [vmem:[%s25878_s3 + $0x15b0] sm:$0xf0] }
 0x7b6   :  { %5514 = vmatpush.bf16.msra.mxu3 %v13558_v8  ;;  %v13912_v8 = vor.u32 %v17266_v61, %v13909_v55  ;;  %v13804_v35 = vor.u32 %v17244_v11, %v13803_v54  ;;  %v13939_v56 = vld [vmem:[%s25878_s3 + $0x1660] sm:$0xf]  ;;  %v13941_v61 = vld [vmem:[%s25878_s3 + $0x1678] sm:$0xf0]  ;;  %v17270_v54 = vld [vmem:[%s25878_s3 + $0x1644] sm:$0xf0] }
 0x7b7   :  { %5502 = vmatpush.bf16.msra.mxu1 %v13530_v16  ;;  %v17247_v16 = vld [vmem:[%s25878_s3 + $0x1594] sm:$0xf] }
 0x7b8   :  { %v5072_v10 = vpop.f32.mrf.mxu2 }
 0x7b9   :  { %v22256_v14 = vadd.f32 %v5072_v10, %v21909_v57  ;;  %v5085_v40 = vpop.f32.mrf.mxu3  ;;  %v17274_v57 = vld [vmem:[%s25878_s3 + $0x1664] sm:$0xf0]  ;;  %v13880_v10 = vor.u32 %v17259_v5, %v13877_v18  ;;  %v17245_v5 = vld [vmem:[%s25878_s3 + $0x157c] sm:$0xf0] }
 0x7ba   :  { %v22259_v45 = vadd.f32 %v5085_v40, %v21942_v44  ;;  %v5061_v22 = vpop.f32.mrf.mxu0  ;;  %5515 = vmatpush.bf16.msra.mxu3 %v13534_v21  ;;  %v13924_v27 = vor.u32 %v17274_v57, %v13923_v28  ;;  %v13853_v40 = vld [vmem:[%s25878_s3 + $0x15d8] sm:$0xf0]  ;;  %v13703_v21 = vld [vmem:[%s25875_s0 + $0xe] sm:$0x1] }
 0x7bb   :  { %v5100_v1 = vpop.f32.mrf.mxu1  ;;  %v13856_v22 = vor.u32 %v17253_v12, %v13853_v40  ;;  %v13805_v28 = vld [vmem:[%s25878_s3 + $0x1578] sm:$0xf0]  ;;  %v13917_v12 = vld [vmem:[%s25878_s3 + $0x1648] sm:$0xf0] }
 0x7bc   :  { %5836 = vmatpush.bf16.msra.mxu2 %v13924_v27  ;;  %v13829_v1 = vld [vmem:[%s25878_s3 + $0x15a8] sm:$0xf0]  ;;  %v17263_v27 = vld [vmem:[%s25878_s3 + $0x160c] sm:$0xf0] }
 0x7c0   :  { %v5074_v15 = vpop.f32.mrf.mxu2  ;;  %5837 = vmatpush.bf16.msra.mxu2 %v13900_v37  ;;  %v13885_v37 = vld [vmem:[%s25878_s3 + $0x1610] sm:$0xf0] }
 0x7c1   :  { %v5087_v23 = vpop.f32.mrf.mxu3  ;;  %v13832_v15 = vor.u32 %v17247_v16, %v13829_v1  ;;  %v13888_v39 = vor.u32 %v17260_v30, %v13885_v37  ;;  %v17239_v16 = vld [vmem:[%s25878_s3 + $0x154c] sm:$0xf0]  ;;  %v17236_v1 = vld [vmem:[%s25878_s3 + $0x153c] sm:$0xf]  ;;  %v13763_v37 = vld [vmem:[%s25878_s3 + $0x1508] sm:$0xf] }
 0x7c2   :  { %v5111_v44 = vpop.f32.mrf.mxu0  ;;  %v17241_v23 = vld [vmem:[%s25878_s3 + $0x1564] sm:$0xf]  ;;  %v13893_v30 = vld [vmem:[%s25878_s3 + $0x1618] sm:$0xf0] }
 0x7c3   :  { %v22274_v38 = vadd.f32 %v5111_v44, %v21966_v25  ;;  %v13808_v57 = vor.u32 %v17241_v23, %v13805_v28  ;;  %v13883_v44 = vld [vmem:[%s25878_s3 + $0x15f8] sm:$0xf]  ;;  %v13891_v23 = vld [vmem:[%s25878_s3 + $0x1600] sm:$0xf] }
 0x7c4   :  { %5838 = vmatpush.bf16.msra.mxu2 %v13876_v42  ;;  %v13884_v31 = vor.u32 %v17263_v27, %v13883_v44  ;;  %v17235_v42 = vld [vmem:[%s25878_s3 + $0x1534] sm:$0xf]  ;;  %v17264_v28 = vld [vmem:[%s25878_s3 + $0x1614] sm:$0xf0]  ;;  %v17261_v27 = vld [vmem:[%s25878_s3 + $0x1604] sm:$0xf] }
 0x7c5   :  { %v13892_v44 = vor.u32 %v17264_v28, %v13891_v23  ;;  %v17310_v23 = vld [vmem:[%s25878_s3 + $0x1784] sm:$0xf0] }
 0x7c8   :  { %v5124_v46 = vpop.f32.mrf.mxu2 }
 0x7c9   :  { %v22283_v41 = vadd.f32 %v5124_v46, %v21957_v63  ;;  %v5148_v43 = vpop.f32.mrf.mxu3  ;;  %v17256_v63 = vld [vmem:[%s25878_s3 + $0x15d4] sm:$0xf0]  ;;  %v17238_v46 = vld [vmem:[%s25878_s3 + $0x1544] sm:$0xf0] }
 0x7ca   :  { %v5149_v25 = vadd.f32 %v21971_v26, %v5148_v43  ;;  %v5113_v19 = vpop.f32.mrf.mxu0  ;;  %v13852_v51 = vor.u32 %v17256_v63, %v13851_v58  ;;  %v13780_v43 = vor.u32 %v17238_v46, %v13779_v36  ;;  %v17254_v63 = vld [vmem:[%s25878_s3 + $0x15cc] sm:$0xf] }
 0x7cb   :  { %v13859_v19 = vld [vmem:[%s25878_s3 + $0x15c8] sm:$0xf]  ;;  %v13864_v24 = vor.u32 %v17254_v63, %v13861_v34  ;;  %v17230_v36 = vld [vmem:[%s25878_s3 + $0x150c] sm:$0xf]  ;;  %v13843_v34 = vld [vmem:[%s25878_s3 + $0x15a0] sm:$0xf] }
 0x7cc   :  { %v5152_v47 = vmax.f32 %v5149_v25, 0.0  ;;  %5839 = vmatpush.bf16.msra.mxu2 %v13852_v51  ;;  %v13781_v25 = vld [vmem:[%s25878_s3 + $0x1548] sm:$0xf0]  ;;  %v13860_v58 = vor.u32 %v17257_v49, %v13859_v19 }
 0x7cd   :  { %v13784_v53 = vor.u32 %v17235_v42, %v13781_v25  ;;  %v13765_v42 = vld [vmem:[%s25878_s3 + $0x1520] sm:$0xf0]  ;;  %v17258_v25 = vld [vmem:[%s25878_s3 + $0x15e4] sm:$0xf0] }
 0x7ce   :  { %v5153_v20 = vpack.c.bf16 %v5152_v47, %v5152_v47  ;;  %v13755_v47 = vld [vmem:[%s25878_s3 + $0x1500] sm:$0xf]  ;;  %v13768_v19 = vor.u32 %v17230_v36, %v13765_v42  ;;  %v14167_v36 = vld [vmem:[%s25878_s3 + $0x17e8] sm:$0xf0]  ;;  %v17323_v42 = vld [vmem:[%s25878_s3 + $0x17ec] sm:$0xf0] }
 0x7d0   :  { %5451 = vmatmul.bf16.vlgmr.msrb.gmra.mxu1 %v5153_v20  ;;  %5464 = vmatmul.bf16.vlgmr.msrb.gmra.mxu3 %v5153_v20  ;;  %v5126_v13 = vpop.f32.mrf.mxu2 }
 0x7d1   :  { %5477 = vmatmul.bf16.vlgmr.msrb.gmra.mxu0 %v5153_v20  ;;  %5490 = vmatmul.bf16.vlgmr.msrb.gmra.mxu2 %v5153_v20  ;;  %v5150_v0 = vpop.f32.mrf.mxu3  ;;  %v17276_v13 = vld [vmem:[%s25878_s3 + $0x1674] sm:$0xf0] }
 0x7d2   :  { %5849 = vmatpush.bf16.msrb.mxu0 %v13928_v48  ;;  %5862 = vmatpush.bf16.msrb.mxu1 %v13932_v52  ;;  %v13757_v48 = vld [vmem:[%s25878_s3 + $0x1518] sm:$0xf0]  ;;  %v13836_v52 = vor.u32 %v17251_v32, %v13835_v50  ;;  %v13940_v55 = vor.u32 %v17276_v13, %v13939_v56  ;;  %v13944_v0 = vor.u32 %v17273_v3, %v13941_v61  ;;  %v17246_v50 = vld [vmem:[%s25878_s3 + $0x1584] sm:$0xf0]  ;;  %v17243_v32 = vld [vmem:[%s25878_s3 + $0x1574] sm:$0xf] }
 0x7d3   :  { %5875 = vmatpush.bf16.msrb.mxu3 %v13936_v62  ;;  %5840 = vmatpush.bf16.msra.mxu2 %v13828_v29  ;;  %v13760_v51 = vor.u32 %v17229_v4, %v13757_v48  ;;  %v17248_v62 = vld [vmem:[%s25878_s3 + $0x159c] sm:$0xf]  ;;  %v17242_v29 = vld [vmem:[%s25878_s3 + $0x156c] sm:$0xf]  ;;  %v13819_v48 = vld [vmem:[%s25878_s3 + $0x1570] sm:$0xf] }
 0x7d4   :  { %v13840_v7 = vor.u32 %v17248_v62, %v13837_v9  ;;  %v13845_v4 = vld [vmem:[%s25878_s3 + $0x15b8] sm:$0xf0]  ;;  %v13795_v9 = vld [vmem:[%s25878_s3 + $0x1540] sm:$0xf]  ;;  %v17240_v56 = vld [vmem:[%s25878_s3 + $0x1554] sm:$0xf0] }
 0x7d5   :  { %v13796_v13 = vor.u32 %v17240_v56, %v13795_v9  ;;  %v13797_v3 = vld [vmem:[%s25878_s3 + $0x1558] sm:$0xf0]  ;;  %v13771_v61 = vld [vmem:[%s25878_s3 + $0x1510] sm:$0xf]  ;;  %v17307_v56 = vld [vmem:[%s25878_s3 + $0x1774] sm:$0xf] }
 0x7d6   :  { %5850 = vmatpush.bf16.msrb.mxu0 %v13904_v60  ;;  %5863 = vmatpush.bf16.msrb.mxu1 %v13908_v6  ;;  %v13811_v60 = vld [vmem:[%s25878_s3 + $0x1568] sm:$0xf]  ;;  %v13813_v6 = vld [vmem:[%s25878_s3 + $0x1580] sm:$0xf0] }
 0x7d7   :  { %5876 = vmatpush.bf16.msrb.mxu3 %v13912_v8  ;;  %5841 = vmatpush.bf16.msra.mxu2 %v13804_v35  ;;  %v13812_v18 = vor.u32 %v17245_v5, %v13811_v60  ;;  %v13915_v8 = vld [vmem:[%s25878_s3 + $0x1630] sm:$0xf]  ;;  %v13816_v11 = vor.u32 %v17242_v29, %v13813_v6  ;;  %v17267_v35 = vld [vmem:[%s25878_s3 + $0x1634] sm:$0xf]  ;;  %v17234_v60 = vld [vmem:[%s25878_s3 + $0x1524] sm:$0xf0] }
 0x7d8   :  { %v13920_v40 = vor.u32 %v17267_v35, %v13917_v12  ;;  %v17231_v5 = vld [vmem:[%s25878_s3 + $0x1514] sm:$0xf]  ;;  %v13773_v29 = vld [vmem:[%s25878_s3 + $0x1528] sm:$0xf0] }
 0x7da   :  { %5851 = vmatpush.bf16.msrb.mxu0 %v13880_v10  ;;  %5864 = vmatpush.bf16.msrb.mxu1 %v13884_v31  ;;  %v13916_v10 = vor.u32 %v17270_v54, %v13915_v8  ;;  %v13896_v31 = vor.u32 %v17261_v27, %v13893_v30  ;;  %v13772_v54 = vor.u32 %v17234_v60, %v13771_v61 }
 0x7db   :  { %5877 = vmatpush.bf16.msrb.mxu3 %v13888_v39  ;;  %5842 = vmatpush.bf16.msra.mxu2 %v13780_v43  ;;  %v17233_v39 = vld [vmem:[%s25878_s3 + $0x151c] sm:$0xf0]  ;;  %v13867_v43 = vld [vmem:[%s25878_s3 + $0x15d0] sm:$0xf] }
 0x7dc   :  { %v13764_v46 = vor.u32 %v17233_v39, %v13763_v37  ;;  %v13868_v49 = vor.u32 %v17258_v25, %v13867_v43  ;;  %v17319_v39 = vld [vmem:[%s25878_s3 + $0x17d4] sm:$0xf]  ;;  %v17320_v25 = vld [vmem:[%s25878_s3 + $0x17dc] sm:$0xf] }
 0x7de   :  { %5852 = vmatpush.bf16.msrb.mxu0 %v13856_v22  ;;  %5865 = vmatpush.bf16.msrb.mxu1 %v13860_v58  ;;  %v13787_v22 = vld [vmem:[%s25878_s3 + $0x1538] sm:$0xf]  ;;  %v13869_v58 = vld [vmem:[%s25878_s3 + $0x15e8] sm:$0xf0] }
 0x7df   :  { %5878 = vmatpush.bf16.msrb.mxu3 %v13864_v24  ;;  %v17252_v24 = vld [vmem:[%s25878_s3 + $0x15b4] sm:$0xf0] }
 0x7e0   :  { %5503 = vmatmul.bf16.vlgmr.msra.gmra.mxu1 %v5153_v20  ;;  %5516 = vmatmul.bf16.vlgmr.msra.gmra.mxu3 %v5153_v20  ;;  %v13756_v20 = vor.u32 %v17232_v33, %v13755_v47  ;;  %v17249_v47 = vld [vmem:[%s25878_s3 + $0x15a4] sm:$0xf]  ;;  %v13844_v33 = vor.u32 %v17252_v24, %v13843_v34  ;;  %v14143_v34 = vld [vmem:[%s25878_s3 + $0x17b8] sm:$0xf0] }
 0x7e1   :  { %13704 = vmatmul.msk.bf16.vlgmr.msra.gmra.mxu0 %vm35_vm1, %v13703_v21  ;;  %v13788_v21 = vor.u32 %v17239_v16, %v13787_v22  ;;  %v17322_v16 = vld [vmem:[%s25878_s3 + $0x17e4] sm:$0xf0] }
 0x7e2   :  { %5853 = vmatpush.bf16.msrb.mxu0 %v13832_v15  ;;  %5843 = vmatpush.bf16.msra.mxu2 %v13756_v20  ;;  %v13789_v15 = vld [vmem:[%s25878_s3 + $0x1550] sm:$0xf0]  ;;  %v13848_v20 = vor.u32 %v17249_v47, %v13845_v4 }
 0x7e3   :  { %5866 = vmatpush.bf16.msrb.mxu1 %v13836_v52  ;;  %5879 = vmatpush.bf16.msrb.mxu3 %v13840_v7  ;;  %v13820_v52 = vor.u32 %v17246_v50, %v13819_v48  ;;  %v17237_v7 = vld [vmem:[%s25878_s3 + $0x1544] sm:$0xf]  ;;  %v17298_v48 = vld [vmem:[%s25878_s3 + $0x1724] sm:$0xf0] }
 0x7e4   :  { %v14149_v50 = vld [vmem:[%s25878_s3 + $0x17a8] sm:$0xf] }
 0x7e6   :  { %5854 = vmatpush.bf16.msrb.mxu0 %v13808_v57  ;;  %5888 = vmatpush.bf16.msrb.mxu2 %v13940_v55  ;;  %v13792_v57 = vor.u32 %v17236_v1, %v13789_v15  ;;  %v14117_v15 = vld [vmem:[%s25878_s3 + $0x1770] sm:$0xf] }
 0x7e7   :  { %5867 = vmatpush.bf16.msrb.mxu1 %v13812_v18  ;;  %5880 = vmatpush.bf16.msrb.mxu3 %v13816_v11  ;;  %v13776_v11 = vor.u32 %v17231_v5, %v13773_v29  ;;  %v14118_v27 = vor.u32 %v17310_v23, %v14117_v15  ;;  %v14127_v23 = vld [vmem:[%s25878_s3 + $0x1790] sm:$0xf0] }
 0x7ea   :  { %5855 = vmatpush.bf16.msrb.mxu0 %v13784_v53  ;;  %5889 = vmatpush.bf16.msrb.mxu2 %v13916_v10  ;;  %v17255_v53 = vld [vmem:[%s25878_s3 + $0x15d4] sm:$0xf] }
 0x7eb   :  { %5868 = vmatpush.bf16.msrb.mxu1 %v13788_v21  ;;  %5881 = vmatpush.bf16.msrb.mxu3 %v13792_v57  ;;  %v13872_v63 = vor.u32 %v17255_v53, %v13869_v58  ;;  %v14170_v58 = vor.u32 %v17319_v39, %v14167_v36  ;;  %v14101_v39 = vld [vmem:[%s25878_s3 + $0x1748] sm:$0xf]  ;;  %v17305_v36 = vld [vmem:[%s25878_s3 + $0x175c] sm:$0xf0] }
 0x7ee   :  { %5856 = vmatpush.bf16.msrb.mxu0 %v13760_v51  ;;  %5890 = vmatpush.bf16.msrb.mxu2 %v13892_v44  ;;  %v13821_v51 = vld [vmem:[%s25878_s3 + $0x1588] sm:$0xf0] }
 0x7ef   :  { %5869 = vmatpush.bf16.msrb.mxu1 %v13764_v46  ;;  %5882 = vmatpush.bf16.msrb.mxu3 %v13768_v19  ;;  %v13824_v62 = vor.u32 %v17243_v32, %v13821_v51  ;;  %v14093_v46 = vld [vmem:[%s25878_s3 + $0x1740] sm:$0xf]  ;;  %v14175_v19 = vld [vmem:[%s25878_s3 + $0x17f0] sm:$0xf0]  ;;  %v17314_v51 = vld [vmem:[%s25878_s3 + $0x17ac] sm:$0xf] }
 0x7f0   :  { %v14178_v4 = vor.u32 %v17320_v25, %v14175_v19  ;;  %v13997_v25 = vld [vmem:[%s25878_s3 + $0x1680] sm:$0xf]  ;;  %v17280_v19 = vld [vmem:[%s25878_s3 + $0x1694] sm:$0xf0] }
 0x7f2   :  { %5901 = vmatpush.bf16.msra.mxu0 %v13944_v0  ;;  %5891 = vmatpush.bf16.msrb.mxu2 %v13868_v49  ;;  %v13800_v0 = vor.u32 %v17237_v7, %v13797_v3 }
 0x7f3   :  { %5932 = vmatpush.bf16.msra.mxu1 %v17889_v2 }
 0x7f6   :  { %5902 = vmatpush.bf16.msra.mxu0 %v13920_v40  ;;  %5892 = vmatpush.bf16.msrb.mxu2 %v13844_v33 }
 0x7fa   :  { %5903 = vmatpush.bf16.msra.mxu0 %v13896_v31  ;;  %5893 = vmatpush.bf16.msrb.mxu2 %v13820_v52  ;;  %v14151_v52 = vld [vmem:[%s25878_s3 + $0x17c0] sm:$0xf0] }
 0x7fb   :  { %v14154_v61 = vor.u32 %v17314_v51, %v14151_v52  ;;  %v14183_v51 = vld [vmem:[%s25878_s3 + $0x17f8] sm:$0xf0] }
 0x7fe   :  { %5904 = vmatpush.bf16.msra.mxu0 %v13872_v63  ;;  %5894 = vmatpush.bf16.msrb.mxu2 %v13796_v13  ;;  %v17313_v63 = vld [vmem:[%s25878_s3 + $0x17a4] sm:$0xf]  ;;  %v14119_v13 = vld [vmem:[%s25878_s3 + $0x1788] sm:$0xf0] }
 0x7ff   :  { %v14146_v9 = vor.u32 %v17313_v63, %v14143_v34  ;;  %v14122_v5 = vor.u32 %v17307_v56, %v14119_v13  ;;  %v14077_v63 = vld [vmem:[%s25878_s3 + $0x1718] sm:$0xf]  ;;  %v17299_v34 = vld [vmem:[%s25878_s3 + $0x172c] sm:$0xf0]  ;;  %v17293_v56 = vld [vmem:[%s25878_s3 + $0x16fc] sm:$0xf0] }
 0x802   :  { %5905 = vmatpush.bf16.msra.mxu0 %v13848_v20  ;;  %5895 = vmatpush.bf16.msrb.mxu2 %v13772_v54  ;;  %v14069_v20 = vld [vmem:[%s25878_s3 + $0x1710] sm:$0xf]  ;;  %v14095_v54 = vld [vmem:[%s25878_s3 + $0x1758] sm:$0xf0] }
 0x803   :  { %v14070_v7 = vor.u32 %v17298_v48, %v14069_v20  ;;  %v14079_v20 = vld [vmem:[%s25878_s3 + $0x1730] sm:$0xf0]  ;;  %v14181_v48 = vld [vmem:[%s25878_s3 + $0x17e0] sm:$0xf] }
 0x806   :  { %5906 = vmatpush.bf16.msra.mxu0 %v13824_v62 }
 0x80a   :  { %5907 = vmatpush.bf16.msra.mxu0 %v13800_v0  ;;  %v17292_v0 = vld [vmem:[%s25878_s3 + $0x16f4] sm:$0xf0] }
 0x80e   :  { %5908 = vmatpush.bf16.msra.mxu0 %v13776_v11 }
 0x84d   :  { %v5452_v55 = vpop.f32.mrf.mxu1 }
 0x84e   :  { %v22562_v18 = vadd.f32 %v5452_v55, %v22226_v59  ;;  %v5478_v6 = vpop.f32.mrf.mxu0  ;;  %v14045_v55 = vld [vmem:[%s25878_s3 + $0x16e0] sm:$0xf] }
 0x84f   :  { %v22565_v8 = vadd.f32 %v5478_v6, %v22259_v45  ;;  %v14165_v45 = vld [vmem:[%s25878_s3 + $0x17d0] sm:$0xf]  ;;  %v14046_v29 = vor.u32 %v17292_v0, %v14045_v55  ;;  %v17301_v6 = vld [vmem:[%s25878_s3 + $0x1744] sm:$0xf]  ;;  %v17318_v55 = vld [vmem:[%s25878_s3 + $0x17c4] sm:$0xf0] }
 0x850   :  { %v14166_v1 = vor.u32 %v17322_v16, %v14165_v45  ;;  %v14098_v11 = vor.u32 %v17301_v6, %v14095_v54  ;;  %v17289_v45 = vld [vmem:[%s25878_s3 + $0x16e4] sm:$0xf]  ;;  %v14047_v16 = vld [vmem:[%s25878_s3 + $0x16f8] sm:$0xf0]  ;;  %v14029_v54 = vld [vmem:[%s25878_s3 + $0x16b8] sm:$0xf] }
 0x852   :  { %6229 = vmatpush.bf16.msra.mxu3 %v14166_v1  ;;  %v14050_v1 = vor.u32 %v17289_v45, %v14047_v16  ;;  %v17312_v45 = vld [vmem:[%s25878_s3 + $0x1794] sm:$0xf0] }
 0x853   :  { %v5465_v10 = vpop.f32.mrf.mxu3 }
 0x854   :  { %v22568_v35 = vadd.f32 %v5465_v10, %v22256_v14  ;;  %v5491_v12 = vpop.f32.mrf.mxu2  ;;  %v14141_v14 = vld [vmem:[%s25878_s3 + $0x17a0] sm:$0xf]  ;;  %v17295_v10 = vld [vmem:[%s25878_s3 + $0x1714] sm:$0xf] }
 0x855   :  { %v22571_v40 = vadd.f32 %v5491_v12, %v22235_v17  ;;  %v5454_v59 = vpop.f32.mrf.mxu1  ;;  %v17316_v17 = vld [vmem:[%s25878_s3 + $0x17b4] sm:$0xf0]  ;;  %v14071_v12 = vld [vmem:[%s25878_s3 + $0x1728] sm:$0xf0] }
 0x856   :  { %v5480_v22 = vpop.f32.mrf.mxu0  ;;  %v14142_v21 = vor.u32 %v17316_v17, %v14141_v14  ;;  %v13945_v59 = vld [vmem:[%s25875_s0 + $0xf] sm:$0x1]  ;;  %v14125_v14 = vld [vmem:[%s25878_s3 + $0x1778] sm:$0xf]  ;;  %v17311_v17 = vld [vmem:[%s25878_s3 + $0x178c] sm:$0xf0] }
 0x857   :  { %v14074_v22 = vor.u32 %v17295_v10, %v14071_v12  ;;  %v14126_v15 = vor.u32 %v17311_v17, %v14125_v14  ;;  %v17284_v10 = vld [vmem:[%s25878_s3 + $0x16bc] sm:$0xf]  ;;  %v17309_v14 = vld [vmem:[%s25878_s3 + $0x1784] sm:$0xf] }
 0x858   :  { %6230 = vmatpush.bf16.msra.mxu3 %v14142_v21  ;;  %v17308_v21 = vld [vmem:[%s25878_s3 + $0x177c] sm:$0xf] }
 0x859   :  { %v14135_v17 = vld [vmem:[%s25878_s3 + $0x1798] sm:$0xf0] }
 0x85b   :  { %v5467_v28 = vpop.f32.mrf.mxu3 }
 0x85c   :  { %v5493_v57 = vpop.f32.mrf.mxu2  ;;  %6231 = vmatpush.bf16.msra.mxu3 %v14118_v27  ;;  %v14130_v28 = vor.u32 %v17308_v21, %v14127_v23  ;;  %v17283_v27 = vld [vmem:[%s25878_s3 + $0x16b4] sm:$0xf]  ;;  %v14138_v21 = vor.u32 %v17309_v14, %v14135_v17  ;;  %v17281_v23 = vld [vmem:[%s25878_s3 + $0x169c] sm:$0xf0] }
 0x85d   :  { %v5504_v44 = vpop.f32.mrf.mxu1  ;;  %v14021_v57 = vld [vmem:[%s25878_s3 + $0x16b0] sm:$0xf] }
 0x85e   :  { %v22592_v30 = vadd.f32 %v5504_v44, %v22274_v38  ;;  %v5541_v31 = vpop.f32.mrf.mxu0  ;;  %v17304_v38 = vld [vmem:[%s25878_s3 + $0x1754] sm:$0xf0]  ;;  %v17286_v44 = vld [vmem:[%s25878_s3 + $0x16c4] sm:$0xf0] }
 0x85f   :  { %v5542_v37 = vadd.f32 %v21971_v26, %v5541_v31  ;;  %v14173_v26 = vld [vmem:[%s25878_s3 + $0x17d8] sm:$0xf]  ;;  %v14094_v24 = vor.u32 %v17304_v38, %v14093_v46  ;;  %v14022_v31 = vor.u32 %v17286_v44, %v14021_v57  ;;  %v14102_v38 = vor.u32 %v17305_v36, %v14101_v39  ;;  %v14007_v44 = vld [vmem:[%s25878_s3 + $0x16a0] sm:$0xf0]  ;;  %v17303_v36 = vld [vmem:[%s25878_s3 + $0x1754] sm:$0xf] }
 0x860   :  { %v14174_v33 = vor.u32 %v17323_v42, %v14173_v26  ;;  %v17302_v26 = vld [vmem:[%s25878_s3 + $0x174c] sm:$0xf]  ;;  %v14103_v42 = vld [vmem:[%s25878_s3 + $0x1760] sm:$0xf0] }
 0x861   :  { %v5545_v43 = vmax.f32 %v5542_v37, 0.0  ;;  %6232 = vmatpush.bf16.msra.mxu3 %v14094_v24  ;;  %v14023_v37 = vld [vmem:[%s25878_s3 + $0x16c8] sm:$0xf0] }
 0x862   :  { %v14026_v46 = vor.u32 %v17283_v27, %v14023_v37  ;;  %v14109_v27 = vld [vmem:[%s25878_s3 + $0x1750] sm:$0xf] }
 0x863   :  { %v5546_v49 = vpack.c.bf16 %v5545_v43, %v5545_v43  ;;  %v5517_v53 = vpop.f32.mrf.mxu3  ;;  %v14106_v43 = vor.u32 %v17302_v26, %v14103_v42  ;;  %v14085_v26 = vld [vmem:[%s25878_s3 + $0x1720] sm:$0xf]  ;;  %v17300_v42 = vld [vmem:[%s25878_s3 + $0x1734] sm:$0xf0] }
 0x864   :  { %v22626_v47 = vadd.f32 %v5517_v53, %v22283_v41  ;;  %v17317_v41 = vld [vmem:[%s25878_s3 + $0x17bc] sm:$0xf0]  ;;  %v13998_v53 = vor.u32 %v17280_v19, %v13997_v25  ;;  %v14086_v25 = vor.u32 %v17300_v42, %v14085_v26  ;;  %v14087_v19 = vld [vmem:[%s25878_s3 + $0x1738] sm:$0xf0] }
 0x865   :  { %5844 = vmatmul.bf16.vlgmr.msra.gmra.mxu2 %v5546_v49  ;;  %5857 = vmatmul.bf16.vlgmr.msrb.gmra.mxu0 %v5546_v49  ;;  %v5506_v32 = vpop.f32.mrf.mxu1  ;;  %v14150_v3 = vor.u32 %v17317_v41, %v14149_v50  ;;  %v17321_v41 = vld [vmem:[%s25878_s3 + $0x17e4] sm:$0xf] }
 0x866   :  { %5870 = vmatmul.bf16.vlgmr.msrb.gmra.mxu1 %v5546_v49  ;;  %5883 = vmatmul.bf16.vlgmr.msrb.gmra.mxu3 %v5546_v49  ;;  %v5543_v62 = vpop.f32.mrf.mxu0  ;;  %v17324_v32 = vld [vmem:[%s25878_s3 + $0x17f4] sm:$0xf0] }
 0x867   :  { %6242 = vmatpush.bf16.msrb.mxu1 %v14170_v58  ;;  %6255 = vmatpush.bf16.msra.mxu2 %v14174_v33  ;;  %v13999_v58 = vld [vmem:[%s25878_s3 + $0x1698] sm:$0xf0]  ;;  %v14078_v33 = vor.u32 %v17299_v34, %v14077_v63  ;;  %v14182_v52 = vor.u32 %v17324_v32, %v14181_v48  ;;  %v14186_v62 = vor.u32 %v17321_v41, %v14183_v51  ;;  %v17291_v63 = vld [vmem:[%s25878_s3 + $0x16f4] sm:$0xf]  ;;  %v14063_v34 = vld [vmem:[%s25878_s3 + $0x1708] sm:$0xf0] }
 0x868   :  { %6268 = vmatpush.bf16.msrb.mxu0 %v14178_v4  ;;  %6233 = vmatpush.bf16.msra.mxu3 %v14070_v7  ;;  %v17296_v4 = vld [vmem:[%s25878_s3 + $0x171c] sm:$0xf]  ;;  %v17290_v7 = vld [vmem:[%s25878_s3 + $0x16ec] sm:$0xf]  ;;  %v17285_v48 = vld [vmem:[%s25878_s3 + $0x16c4] sm:$0xf] }
 0x869   :  { %v14082_v50 = vor.u32 %v17296_v4, %v14079_v20  ;;  %v14037_v4 = vld [vmem:[%s25878_s3 + $0x16c0] sm:$0xf]  ;;  %v17288_v20 = vld [vmem:[%s25878_s3 + $0x16d4] sm:$0xf0]  ;;  %v14039_v32 = vld [vmem:[%s25878_s3 + $0x16d8] sm:$0xf0] }
 0x86a   :  { %v14013_v41 = vld [vmem:[%s25878_s3 + $0x1690] sm:$0xf] }
 0x86b   :  { %v5519_v60 = vpop.f32.mrf.mxu3  ;;  %6243 = vmatpush.bf16.msrb.mxu1 %v14146_v9  ;;  %6256 = vmatpush.bf16.msra.mxu2 %v14150_v3  ;;  %v14053_v9 = vld [vmem:[%s25878_s3 + $0x16e8] sm:$0xf]  ;;  %v14055_v3 = vld [vmem:[%s25878_s3 + $0x1700] sm:$0xf0] }
 0x86c   :  { %6269 = vmatpush.bf16.msrb.mxu0 %v14154_v61  ;;  %6234 = vmatpush.bf16.msra.mxu3 %v14046_v29  ;;  %v14054_v13 = vor.u32 %v17293_v56, %v14053_v9  ;;  %v14157_v61 = vld [vmem:[%s25878_s3 + $0x17b0] sm:$0xf]  ;;  %v14058_v0 = vor.u32 %v17290_v7, %v14055_v3  ;;  %v14159_v29 = vld [vmem:[%s25878_s3 + $0x17c8] sm:$0xf0]  ;;  %v17279_v9 = vld [vmem:[%s25878_s3 + $0x1694] sm:$0xf] }
 0x86d   :  { %v14158_v60 = vor.u32 %v17318_v55, %v14157_v61  ;;  %v14015_v56 = vld [vmem:[%s25878_s3 + $0x16a8] sm:$0xf0] }
 0x86e   :  { %v14018_v55 = vor.u32 %v17279_v9, %v14015_v56  ;;  %v14391_v9 = vld [vmem:[%s25878_s3 + $0x1928] sm:$0xf]  ;;  %v17365_v56 = vld [vmem:[%s25878_s3 + $0x193c] sm:$0xf0] }
 0x86f   :  { %6244 = vmatpush.bf16.msrb.mxu1 %v14122_v5  ;;  %6257 = vmatpush.bf16.msra.mxu2 %v14126_v15  ;;  %v17315_v5 = vld [vmem:[%s25878_s3 + $0x17b4] sm:$0xf]  ;;  %v14005_v15 = vld [vmem:[%s25878_s3 + $0x1688] sm:$0xf] }
 0x870   :  { %6270 = vmatpush.bf16.msrb.mxu0 %v14130_v28  ;;  %6235 = vmatpush.bf16.msra.mxu3 %v14022_v31  ;;  %v14162_v6 = vor.u32 %v17315_v5, %v14159_v29  ;;  %v17278_v28 = vld [vmem:[%s25878_s3 + $0x168c] sm:$0xf]  ;;  %v14006_v57 = vor.u32 %v17281_v23, %v14005_v15  ;;  %v17306_v31 = vld [vmem:[%s25878_s3 + $0x1764] sm:$0xf0]  ;;  %v17367_v23 = vld [vmem:[%s25878_s3 + $0x1954] sm:$0xf] }
 0x871   :  { %v14010_v37 = vor.u32 %v17278_v28, %v14007_v44  ;;  %v14110_v39 = vor.u32 %v17306_v31, %v14109_v27  ;;  %v14409_v28 = vld [vmem:[%s25878_s3 + $0x1968] sm:$0xf0]  ;;  %v14415_v44 = vld [vmem:[%s25878_s3 + $0x1958] sm:$0xf]  ;;  %v17371_v27 = vld [vmem:[%s25878_s3 + $0x196c] sm:$0xf0] }
 0x873   :  { %6245 = vmatpush.bf16.msrb.mxu1 %v14098_v11  ;;  %6258 = vmatpush.bf16.msra.mxu2 %v14102_v38  ;;  %v17287_v11 = vld [vmem:[%s25878_s3 + $0x16cc] sm:$0xf0] }
 0x874   :  { %6271 = vmatpush.bf16.msrb.mxu0 %v14106_v43  ;;  %6236 = vmatpush.bf16.msra.mxu3 %v13998_v53  ;;  %v14030_v12 = vor.u32 %v17287_v11, %v14029_v54  ;;  %v17297_v43 = vld [vmem:[%s25878_s3 + $0x1724] sm:$0xf]  ;;  %v14061_v53 = vld [vmem:[%s25878_s3 + $0x16f0] sm:$0xf]  ;;  %v17370_v54 = vld [vmem:[%s25878_s3 + $0x1964] sm:$0xf0] }
 0x875   :  { %5896 = vmatmul.bf16.vlgmr.msrb.gmra.mxu2 %v5546_v49  ;;  %5909 = vmatmul.bf16.vlgmr.msra.gmra.mxu0 %v5546_v49  ;;  %v17277_v49 = vld [vmem:[%s25878_s3 + $0x1684] sm:$0xf] }
 0x876   :  { %13946 = vmatmul.msk.bf16.vlgmr.msra.gmra.mxu1 %vm35_vm1, %v13945_v59  ;;  %v14002_v24 = vor.u32 %v17277_v49, %v13999_v58  ;;  %v14031_v59 = vld [vmem:[%s25878_s3 + $0x16d0] sm:$0xf0]  ;;  %v14090_v49 = vor.u32 %v17297_v43, %v14087_v19  ;;  %v17294_v58 = vld [vmem:[%s25878_s3 + $0x1704] sm:$0xf0]  ;;  %v17361_v43 = vld [vmem:[%s25878_s3 + $0x1924] sm:$0xf]  ;;  %v14416_v19 = vor.u32 %v17371_v27, %v14415_v44 }
 0x877   :  { %6246 = vmatpush.bf16.msrb.mxu1 %v14074_v22  ;;  %6259 = vmatpush.bf16.msra.mxu2 %v14078_v33  ;;  %v14133_v22 = vld [vmem:[%s25878_s3 + $0x1780] sm:$0xf]  ;;  %v14034_v16 = vor.u32 %v17284_v10, %v14031_v59  ;;  %v14066_v33 = vor.u32 %v17291_v63, %v14063_v34  ;;  %v17358_v59 = vld [vmem:[%s25878_s3 + $0x1904] sm:$0xf0]  ;;  %v14361_v34 = vld [vmem:[%s25878_s3 + $0x1908] sm:$0xf0] }
 0x878   :  { %6272 = vmatpush.bf16.msrb.mxu0 %v14082_v50  ;;  %6281 = vmatpush.bf16.msrb.mxu3 %v14182_v52  ;;  %v14038_v50 = vor.u32 %v17288_v20, %v14037_v4  ;;  %v14042_v52 = vor.u32 %v17285_v48, %v14039_v32  ;;  %v17349_v4 = vld [vmem:[%s25878_s3 + $0x18c4] sm:$0xf]  ;;  %v14337_v20 = vld [vmem:[%s25878_s3 + $0x18d8] sm:$0xf0]  ;;  %v14311_v32 = vld [vmem:[%s25878_s3 + $0x1890] sm:$0xf] }
 0x879   :  { %v14340_v48 = vor.u32 %v17349_v4, %v14337_v20  ;;  %v17350_v27 = vld [vmem:[%s25878_s3 + $0x18cc] sm:$0xf]  ;;  %v14425_v4 = vld [vmem:[%s25878_s3 + $0x1978] sm:$0xf0] }
 0x87b   :  { %6247 = vmatpush.bf16.msrb.mxu1 %v14050_v1  ;;  %6260 = vmatpush.bf16.msra.mxu2 %v14054_v13  ;;  %v14134_v1 = vor.u32 %v17312_v45, %v14133_v22 }
 0x87c   :  { %6273 = vmatpush.bf16.msrb.mxu0 %v14058_v0  ;;  %6282 = vmatpush.bf16.msrb.mxu3 %v14158_v60 }
 0x87f   :  { %6248 = vmatpush.bf16.msrb.mxu1 %v14026_v46  ;;  %6261 = vmatpush.bf16.msra.mxu2 %v14030_v12  ;;  %v14111_v46 = vld [vmem:[%s25878_s3 + $0x1768] sm:$0xf0]  ;;  %v14359_v12 = vld [vmem:[%s25878_s3 + $0x18f0] sm:$0xf] }
 0x880   :  { %6274 = vmatpush.bf16.msrb.mxu0 %v14034_v16  ;;  %6283 = vmatpush.bf16.msrb.mxu3 %v14134_v1  ;;  %v14114_v38 = vor.u32 %v17303_v36, %v14111_v46  ;;  %v14360_v1 = vor.u32 %v17358_v59, %v14359_v12  ;;  %v17356_v12 = vld [vmem:[%s25878_s3 + $0x18fc] sm:$0xf] }
 0x883   :  { %6249 = vmatpush.bf16.msrb.mxu1 %v14002_v24  ;;  %6262 = vmatpush.bf16.msra.mxu2 %v14006_v57  ;;  %v14062_v24 = vor.u32 %v17294_v58, %v14061_v53  ;;  %v17352_v57 = vld [vmem:[%s25878_s3 + $0x18d4] sm:$0xf0] }
 0x884   :  { %6275 = vmatpush.bf16.msrb.mxu0 %v14010_v37  ;;  %6284 = vmatpush.bf16.msrb.mxu3 %v14110_v39  ;;  %v17368_v37 = vld [vmem:[%s25878_s3 + $0x195c] sm:$0xf]  ;;  %v14417_v39 = vld [vmem:[%s25878_s3 + $0x1970] sm:$0xf0] }
 0x887   :  { %6294 = vmatpush.bf16.msra.mxu1 %v14186_v62  ;;  %6325 = vmatpush.bf16.msrb.mxu2 %v17889_v2  ;;  %v17282_v62 = vld [vmem:[%s25878_s3 + $0x16a4] sm:$0xf0] }
 0x888   :  { %6285 = vmatpush.bf16.msrb.mxu3 %v14086_v25  ;;  %v14014_v61 = vor.u32 %v17282_v62, %v14013_v41  ;;  %v14385_v25 = vld [vmem:[%s25878_s3 + $0x1938] sm:$0xf0]  ;;  %v17346_v41 = vld [vmem:[%s25878_s3 + $0x18a4] sm:$0xf0]  ;;  %v14313_v62 = vld [vmem:[%s25878_s3 + $0x18a8] sm:$0xf0] }
 0x889   :  { %v14388_v63 = vor.u32 %v17361_v43, %v14385_v25  ;;  %v14319_v25 = vld [vmem:[%s25878_s3 + $0x1898] sm:$0xf] }
 0x88b   :  { %6295 = vmatpush.bf16.msra.mxu1 %v14162_v6 }
 0x88c   :  { %6286 = vmatpush.bf16.msrb.mxu3 %v14062_v24 }
 0x88f   :  { %6296 = vmatpush.bf16.msra.mxu1 %v14138_v21  ;;  %v22909_v21 = vld [vmem:[%s25877_s2] ss:$0 sm:$0xff] }
 0x890   :  { %6287 = vmatpush.bf16.msrb.mxu3 %v14038_v50  ;;  %v14187_v50 = vld [vmem:[%s25875_s0 + $0x10] sm:$0x1] }
 0x893   :  { %6297 = vmatpush.bf16.msra.mxu1 %v14114_v38  ;;  %v14412_v38 = vor.u32 %v17367_v23, %v14409_v28  ;;  %v14265_v23 = vld [vmem:[%s25878_s3 + $0x1848] sm:$0xf0]  ;;  %v14343_v28 = vld [vmem:[%s25878_s3 + $0x18c8] sm:$0xf] }
 0x894   :  { %6288 = vmatpush.bf16.msrb.mxu3 %v14014_v61  ;;  %v14392_v61 = vor.u32 %v17365_v56, %v14391_v9 }
 0x897   :  { %6298 = vmatpush.bf16.msra.mxu1 %v14090_v49  ;;  %v14420_v49 = vor.u32 %v17368_v37, %v14417_v39  ;;  %v14239_v37 = vld [vmem:[%s25878_s3 + $0x1800] sm:$0xf] }
 0x89b   :  { %6299 = vmatpush.bf16.msra.mxu1 %v14066_v33 }
 0x89f   :  { %6300 = vmatpush.bf16.msra.mxu1 %v14042_v52  ;;  %v14312_v52 = vor.u32 %v17346_v41, %v14311_v32  ;;  %v17338_v32 = vld [vmem:[%s25878_s3 + $0x186c] sm:$0xf] }
 0x8a3   :  { %6301 = vmatpush.bf16.msra.mxu1 %v14018_v55  ;;  %v17362_v55 = vld [vmem:[%s25878_s3 + $0x192c] sm:$0xf] }
 0x8e2   :  { %v5858_v51 = vpop.f32.mrf.mxu0 }
 0x8e3   :  { %v22874_v7 = vadd.f32 %v5858_v51, %v22568_v35  ;;  %v5871_v13 = vpop.f32.mrf.mxu1  ;;  %v17343_v51 = vld [vmem:[%s25878_s3 + $0x1894] sm:$0xf] }
 0x8e4   :  { %v22877_v3 = vadd.f32 %v5871_v13, %v22565_v8  ;;  %v14407_v8 = vld [vmem:[%s25878_s3 + $0x1950] sm:$0xf]  ;;  %v14316_v13 = vor.u32 %v17343_v51, %v14313_v62  ;;  %v14297_v51 = vld [vmem:[%s25878_s3 + $0x1880] sm:$0xf0]  ;;  %v17366_v62 = vld [vmem:[%s25878_s3 + $0x1944] sm:$0xf0] }
 0x8e5   :  { %v14408_v11 = vor.u32 %v17370_v54, %v14407_v8  ;;  %v17337_v8 = vld [vmem:[%s25878_s3 + $0x1864] sm:$0xf]  ;;  %v14300_v9 = vor.u32 %v17338_v32, %v14297_v51  ;;  %v14257_v51 = vld [vmem:[%s25878_s3 + $0x1828] sm:$0xf0] }
 0x8e7   :  { %6622 = vmatpush.bf16.msra.mxu0 %v14408_v11  ;;  %v14289_v11 = vld [vmem:[%s25878_s3 + $0x1878] sm:$0xf0] }
 0x8e8   :  { %v5845_v0 = vpop.f32.mrf.mxu2 }
 0x8e9   :  { %v22880_v60 = vadd.f32 %v5845_v0, %v22562_v18  ;;  %v5884_v5 = vpop.f32.mrf.mxu3  ;;  %v14383_v18 = vld [vmem:[%s25878_s3 + $0x1920] sm:$0xf]  ;;  %v14393_v0 = vld [vmem:[%s25878_s3 + $0x1940] sm:$0xf0] }
 0x8ea   :  { %v22883_v29 = vadd.f32 %v5884_v5, %v22571_v40  ;;  %v5860_v35 = vpop.f32.mrf.mxu0  ;;  %v17364_v40 = vld [vmem:[%s25878_s3 + $0x1934] sm:$0xf0]  ;;  %v14396_v5 = vor.u32 %v17362_v55, %v14393_v0 }
 0x8eb   :  { %v5873_v6 = vpop.f32.mrf.mxu1  ;;  %v14384_v10 = vor.u32 %v17364_v40, %v14383_v18  ;;  %v14287_v35 = vld [vmem:[%s25878_s3 + $0x1860] sm:$0xf]  ;;  %v14292_v18 = vor.u32 %v17337_v8, %v14289_v11  ;;  %v14367_v40 = vld [vmem:[%s25878_s3 + $0x18f8] sm:$0xf]  ;;  %v14273_v8 = vld [vmem:[%s25878_s3 + $0x1850] sm:$0xf0] }
 0x8ec   :  { %v17340_v6 = vld [vmem:[%s25878_s3 + $0x1874] sm:$0xf0] }
 0x8ed   :  { %6623 = vmatpush.bf16.msra.mxu0 %v14384_v10  ;;  %v14288_v54 = vor.u32 %v17340_v6, %v14287_v35  ;;  %v17359_v10 = vld [vmem:[%s25878_s3 + $0x190c] sm:$0xf0]  ;;  %v14271_v0 = vld [vmem:[%s25878_s3 + $0x1838] sm:$0xf]  ;;  %v17332_v35 = vld [vmem:[%s25878_s3 + $0x183c] sm:$0xf] }
 0x8ee   :  { %v14368_v59 = vor.u32 %v17359_v10, %v14367_v40  ;;  %v17360_v11 = vld [vmem:[%s25878_s3 + $0x1914] sm:$0xf0]  ;;  %v17357_v10 = vld [vmem:[%s25878_s3 + $0x1904] sm:$0xf] }
 0x8f0   :  { %v5847_v22 = vpop.f32.mrf.mxu2 }
 0x8f1   :  { %v5886_v45 = vpop.f32.mrf.mxu3  ;;  %6624 = vmatpush.bf16.msra.mxu0 %v14360_v1  ;;  %v14369_v22 = vld [vmem:[%s25878_s3 + $0x1910] sm:$0xf0]  ;;  %v17334_v1 = vld [vmem:[%s25878_s3 + $0x1844] sm:$0xf0] }
 0x8f2   :  { %v5910_v16 = vpop.f32.mrf.mxu0  ;;  %v14372_v45 = vor.u32 %v17356_v12, %v14369_v22  ;;  %v14377_v12 = vld [vmem:[%s25878_s3 + $0x1918] sm:$0xf0]  ;;  %v14247_v22 = vld [vmem:[%s25878_s3 + $0x1808] sm:$0xf] }
 0x8f3   :  { %v22904_v14 = vadd.f32 %v5910_v16, %v22626_v47  ;;  %v5934_v17 = vpop.f32.mrf.mxu1  ;;  %v14335_v47 = vld [vmem:[%s25878_s3 + $0x18c0] sm:$0xf]  ;;  %v14263_v16 = vld [vmem:[%s25878_s3 + $0x1830] sm:$0xf] }
 0x8f4   :  { %v5935_v15 = vadd.f32 %v22909_v21, %v5934_v17  ;;  %v14336_v26 = vor.u32 %v17352_v57, %v14335_v47  ;;  %v17331_v17 = vld [vmem:[%s25878_s3 + $0x1834] sm:$0xf]  ;;  %v17353_v47 = vld [vmem:[%s25878_s3 + $0x18dc] sm:$0xf0] }
 0x8f5   :  { %v14268_v57 = vor.u32 %v17331_v17, %v14265_v23  ;;  %v14344_v44 = vor.u32 %v17353_v47, %v14343_v28  ;;  %v14249_v17 = vld [vmem:[%s25878_s3 + $0x1820] sm:$0xf0]  ;;  %v17354_v23 = vld [vmem:[%s25878_s3 + $0x18e4] sm:$0xf0] }
 0x8f6   :  { %v5938_v31 = vmax.f32 %v5935_v15, 0.0  ;;  %6625 = vmatpush.bf16.msra.mxu0 %v14336_v26  ;;  %v14264_v15 = vor.u32 %v17334_v1, %v14263_v16  ;;  %v17326_v16 = vld [vmem:[%s25878_s3 + $0x180c] sm:$0xf] }
 0x8f7   :  { %v14252_v28 = vor.u32 %v17326_v16, %v14249_v17  ;;  %v14651_v17 = vld [vmem:[%s25878_s3 + $0x1ae8] sm:$0xf0] }
 0x8f8   :  { %v5939_v36 = vpack.c.bf16 %v5938_v31, %v5938_v31  ;;  %v5897_v46 = vpop.f32.mrf.mxu2  ;;  %v14345_v31 = vld [vmem:[%s25878_s3 + $0x18e0] sm:$0xf0] }
 0x8f9   :  { %v22937_v42 = vadd.f32 %v5897_v46, %v22592_v30  ;;  %v17355_v30 = vld [vmem:[%s25878_s3 + $0x18f4] sm:$0xf]  ;;  %v14348_v39 = vor.u32 %v17350_v27, %v14345_v31  ;;  %v17325_v46 = vld [vmem:[%s25878_s3 + $0x1804] sm:$0xf]  ;;  %v14327_v31 = vld [vmem:[%s25878_s3 + $0x18a0] sm:$0xf] }
 0x8fa   :  { %6237 = vmatmul.bf16.vlgmr.msra.gmra.mxu3 %v5939_v36  ;;  %6250 = vmatmul.bf16.vlgmr.msrb.gmra.mxu1 %v5939_v36  ;;  %v5912_v53 = vpop.f32.mrf.mxu0  ;;  %v14364_v33 = vor.u32 %v17355_v30, %v14361_v34  ;;  %v17372_v30 = vld [vmem:[%s25878_s3 + $0x1974] sm:$0xf0] }
 0x8fb   :  { %6263 = vmatmul.bf16.vlgmr.msra.gmra.mxu2 %v5939_v36  ;;  %6276 = vmatmul.bf16.vlgmr.msrb.gmra.mxu0 %v5939_v36  ;;  %v5936_v58 = vpop.f32.mrf.mxu1 }
 0x8fc   :  { %6635 = vmatpush.bf16.msra.mxu2 %v14412_v38  ;;  %6648 = vmatpush.bf16.msra.mxu3 %v14416_v19  ;;  %v14241_v38 = vld [vmem:[%s25878_s3 + $0x1818] sm:$0xf0]  ;;  %v17347_v19 = vld [vmem:[%s25878_s3 + $0x18ac] sm:$0xf0]  ;;  %v14321_v58 = vld [vmem:[%s25878_s3 + $0x18b0] sm:$0xf0] }
 0x8fd   :  { %6661 = vmatpush.bf16.msrb.mxu1 %v14420_v49  ;;  %6626 = vmatpush.bf16.msra.mxu0 %v14312_v52  ;;  %v14244_v43 = vor.u32 %v17325_v46, %v14241_v38  ;;  %v17344_v49 = vld [vmem:[%s25878_s3 + $0x189c] sm:$0xf]  ;;  %v14320_v53 = vor.u32 %v17347_v19, %v14319_v25  ;;  %v14399_v52 = vld [vmem:[%s25878_s3 + $0x1930] sm:$0xf]  ;;  %v17339_v25 = vld [vmem:[%s25878_s3 + $0x1874] sm:$0xf] }
 0x8fe   :  { %v14324_v34 = vor.u32 %v17344_v49, %v14321_v58  ;;  %v14400_v56 = vor.u32 %v17366_v62, %v14399_v52  ;;  %v14329_v46 = vld [vmem:[%s25878_s3 + $0x18b8] sm:$0xf0] }
 0x900   :  { %v5899_v24 = vpop.f32.mrf.mxu2  ;;  %6636 = vmatpush.bf16.msra.mxu2 %v14388_v63  ;;  %6649 = vmatpush.bf16.msra.mxu3 %v14392_v61  ;;  %v14423_v63 = vld [vmem:[%s25878_s3 + $0x1960] sm:$0xf]  ;;  %v14401_v61 = vld [vmem:[%s25878_s3 + $0x1948] sm:$0xf0] }
 0x901   :  { %6662 = vmatpush.bf16.msrb.mxu1 %v14396_v5  ;;  %6627 = vmatpush.bf16.msra.mxu0 %v14288_v54  ;;  %v14424_v24 = vor.u32 %v17372_v30, %v14423_v63  ;;  %v17335_v5 = vld [vmem:[%s25878_s3 + $0x184c] sm:$0xf0]  ;;  %v14375_v54 = vld [vmem:[%s25878_s3 + $0x1900] sm:$0xf] }
 0x902   :  { %v14272_v6 = vor.u32 %v17335_v5, %v14271_v0  ;;  %v14376_v40 = vor.u32 %v17360_v11, %v14375_v54  ;;  %v17412_v54 = vld [vmem:[%s25878_s3 + $0x1ab4] sm:$0xf0] }
 0x904   :  { %6637 = vmatpush.bf16.msra.mxu2 %v14364_v33  ;;  %6650 = vmatpush.bf16.msra.mxu3 %v14368_v59  ;;  %v17369_v33 = vld [vmem:[%s25878_s3 + $0x1964] sm:$0xf]  ;;  %v14380_v59 = vor.u32 %v17357_v10, %v14377_v12  ;;  %v17406_v10 = vld [vmem:[%s25878_s3 + $0x1a84] sm:$0xf0] }
 0x905   :  { %6663 = vmatpush.bf16.msrb.mxu1 %v14372_v45  ;;  %6628 = vmatpush.bf16.msra.mxu0 %v14264_v15  ;;  %v14428_v20 = vor.u32 %v17369_v33, %v14425_v4  ;;  %v17329_v45 = vld [vmem:[%s25878_s3 + $0x181c] sm:$0xf0]  ;;  %v14351_v15 = vld [vmem:[%s25878_s3 + $0x18d0] sm:$0xf]  ;;  %v17333_v4 = vld [vmem:[%s25878_s3 + $0x1844] sm:$0xf] }
 0x906   :  { %v14248_v1 = vor.u32 %v17329_v45, %v14247_v22  ;;  %v14352_v47 = vor.u32 %v17354_v23, %v14351_v15  ;;  %v14577_v15 = vld [vmem:[%s25878_s3 + $0x1a40] sm:$0xf]  ;;  %v14657_v23 = vld [vmem:[%s25878_s3 + $0x1ad8] sm:$0xf] }
 0x908   :  { %6638 = vmatpush.bf16.msra.mxu2 %v14340_v48  ;;  %6651 = vmatpush.bf16.msra.mxu3 %v14344_v44  ;;  %v14295_v48 = vld [vmem:[%s25878_s3 + $0x1868] sm:$0xf]  ;;  %v14353_v44 = vld [vmem:[%s25878_s3 + $0x18e8] sm:$0xf0] }
 0x909   :  { %6664 = vmatpush.bf16.msrb.mxu1 %v14348_v39  ;;  %v17345_v39 = vld [vmem:[%s25878_s3 + $0x18a4] sm:$0xf] }
 0x90a   :  { %6289 = vmatmul.bf16.vlgmr.msrb.gmra.mxu3 %v5939_v36  ;;  %6302 = vmatmul.bf16.vlgmr.msra.gmra.mxu1 %v5939_v36  ;;  %v17328_v36 = vld [vmem:[%s25878_s3 + $0x1814] sm:$0xf0]  ;;  %v14332_v38 = vor.u32 %v17345_v39, %v14329_v46  ;;  %v17409_v39 = vld [vmem:[%s25878_s3 + $0x1aa4] sm:$0xf] }
 0x90b   :  { %14188 = vmatmul.msk.bf16.vlgmr.msrb.gmra.mxu2 %vm35_vm1, %v14187_v50  ;;  %v14240_v26 = vor.u32 %v17328_v36, %v14239_v37  ;;  %v17341_v50 = vld [vmem:[%s25878_s3 + $0x187c] sm:$0xf0]  ;;  %v17348_v37 = vld [vmem:[%s25878_s3 + $0x18b4] sm:$0xf0] }
 0x90c   :  { %6639 = vmatpush.bf16.msra.mxu2 %v14316_v13  ;;  %6652 = vmatpush.bf16.msra.mxu3 %v14320_v53  ;;  %v14296_v41 = vor.u32 %v17341_v50, %v14295_v48  ;;  %v17363_v13 = vld [vmem:[%s25878_s3 + $0x1934] sm:$0xf]  ;;  %v14328_v36 = vor.u32 %v17348_v37, %v14327_v31  ;;  %v14305_v53 = vld [vmem:[%s25878_s3 + $0x1888] sm:$0xf0]  ;;  %v14255_v50 = vld [vmem:[%s25878_s3 + $0x1810] sm:$0xf] }
 0x90d   :  { %6629 = vmatpush.bf16.msra.mxu0 %v14240_v26  ;;  %6665 = vmatpush.bf16.msrb.mxu1 %v14324_v34  ;;  %v14404_v55 = vor.u32 %v17363_v13, %v14401_v61  ;;  %v14303_v26 = vld [vmem:[%s25878_s3 + $0x1870] sm:$0xf]  ;;  %v14308_v30 = vor.u32 %v17339_v25, %v14305_v53  ;;  %v14279_v34 = vld [vmem:[%s25878_s3 + $0x1840] sm:$0xf] }
 0x910   :  { %6640 = vmatpush.bf16.msra.mxu2 %v14292_v18  ;;  %6653 = vmatpush.bf16.msra.mxu3 %v14296_v41  ;;  %v14276_v18 = vor.u32 %v17332_v35, %v14273_v8  ;;  %v17327_v41 = vld [vmem:[%s25878_s3 + $0x1814] sm:$0xf]  ;;  %v14649_v35 = vld [vmem:[%s25878_s3 + $0x1ad0] sm:$0xf]  ;;  %v14625_v8 = vld [vmem:[%s25878_s3 + $0x1aa0] sm:$0xf] }
 0x911   :  { %6674 = vmatpush.bf16.msrb.mxu0 %v14424_v24  ;;  %6666 = vmatpush.bf16.msrb.mxu1 %v14300_v9  ;;  %v17336_v24 = vld [vmem:[%s25878_s3 + $0x1854] sm:$0xf0] }
 0x914   :  { %6641 = vmatpush.bf16.msra.mxu2 %v14268_v57  ;;  %6654 = vmatpush.bf16.msra.mxu3 %v14272_v6  ;;  %v17351_v57 = vld [vmem:[%s25878_s3 + $0x18d4] sm:$0xf] }
 0x915   :  { %6675 = vmatpush.bf16.msrb.mxu0 %v14400_v56  ;;  %6667 = vmatpush.bf16.msrb.mxu1 %v14276_v18  ;;  %v14356_v27 = vor.u32 %v17351_v57, %v14353_v44  ;;  %v14626_v18 = vor.u32 %v17412_v54, %v14625_v8  ;;  %v17416_v57 = vld [vmem:[%s25878_s3 + $0x1adc] sm:$0xf]  ;;  %v14659_v44 = vld [vmem:[%s25878_s3 + $0x1af0] sm:$0xf0] }
 0x916   :  { %v17404_v8 = vld [vmem:[%s25878_s3 + $0x1a7c] sm:$0xf] }
 0x918   :  { %6642 = vmatpush.bf16.msra.mxu2 %v14244_v43  ;;  %6655 = vmatpush.bf16.msra.mxu3 %v14248_v1  ;;  %v17342_v43 = vld [vmem:[%s25878_s3 + $0x1884] sm:$0xf0]  ;;  %v17415_v1 = vld [vmem:[%s25878_s3 + $0x1ad4] sm:$0xf] }
 0x919   :  { %6676 = vmatpush.bf16.msrb.mxu0 %v14376_v40  ;;  %6668 = vmatpush.bf16.msrb.mxu1 %v14252_v28  ;;  %v14304_v49 = vor.u32 %v17342_v43, %v14303_v26  ;;  %v14601_v40 = vld [vmem:[%s25878_s3 + $0x1a70] sm:$0xf]  ;;  %v14654_v31 = vor.u32 %v17415_v1, %v14651_v17  ;;  %v17401_v1 = vld [vmem:[%s25878_s3 + $0x1a5c] sm:$0xf0] }
 0x91a   :  { %v17419_v28 = vld [vmem:[%s25878_s3 + $0x1aec] sm:$0xf0] }
 0x91b   :  { %v14658_v46 = vor.u32 %v17419_v28, %v14657_v23  ;;  %v14587_v23 = vld [vmem:[%s25878_s3 + $0x1a60] sm:$0xf0]  ;;  %v14481_v28 = vld [vmem:[%s25878_s3 + $0x1980] sm:$0xf] }
 0x91c   :  { %6687 = vmatpush.bf16.msrb.mxu2 %v14428_v20  ;;  %6718 = vmatpush.bf16.msrb.mxu3 %v17889_v2  ;;  %v14280_v20 = vor.u32 %v17336_v24, %v14279_v34  ;;  %v14429_v24 = vld [vmem:[%s25875_s0 + $0x11] sm:$0x1] }
 0x91d   :  { %6677 = vmatpush.bf16.msrb.mxu0 %v14352_v47 }
 0x920   :  { %6688 = vmatpush.bf16.msrb.mxu2 %v14404_v55  ;;  %v14260_v55 = vor.u32 %v17327_v41, %v14257_v51 }
 0x921   :  { %6678 = vmatpush.bf16.msrb.mxu0 %v14328_v36  ;;  %v14627_v36 = vld [vmem:[%s25878_s3 + $0x1ab8] sm:$0xf0] }
 0x922   :  { %v14630_v25 = vor.u32 %v17409_v39, %v14627_v36  ;;  %v14561_v39 = vld [vmem:[%s25878_s3 + $0x1a18] sm:$0xf]  ;;  %v17395_v36 = vld [vmem:[%s25878_s3 + $0x1a2c] sm:$0xf0] }
 0x924   :  { %6689 = vmatpush.bf16.msrb.mxu2 %v14380_v59  ;;  %v14602_v59 = vor.u32 %v17406_v10, %v14601_v40  ;;  %v14505_v10 = vld [vmem:[%s25878_s3 + $0x19b0] sm:$0xf] }
 0x925   :  { %6679 = vmatpush.bf16.msrb.mxu0 %v14304_v49  ;;  %v14603_v49 = vld [vmem:[%s25878_s3 + $0x1a88] sm:$0xf0] }
 0x928   :  { %6690 = vmatpush.bf16.msrb.mxu2 %v14356_v27 }
 0x929   :  { %6680 = vmatpush.bf16.msrb.mxu0 %v14280_v20  ;;  %v17391_v20 = vld [vmem:[%s25878_s3 + $0x1a14] sm:$0xf] }
 0x92c   :  { %6691 = vmatpush.bf16.msrb.mxu2 %v14332_v38  ;;  %v14662_v38 = vor.u32 %v17416_v57, %v14659_v44  ;;  %v17376_v57 = vld [vmem:[%s25878_s3 + $0x1994] sm:$0xf0]  ;;  %v17373_v44 = vld [vmem:[%s25878_s3 + $0x1984] sm:$0xf] }
 0x930   :  { %6692 = vmatpush.bf16.msrb.mxu2 %v14308_v30  ;;  %v14579_v30 = vld [vmem:[%s25878_s3 + $0x1a58] sm:$0xf0] }
 0x977   :  { %v6251_v19 = vpop.f32.mrf.mxu1 }
 0x978   :  { %v23167_v58 = vadd.f32 %v6251_v19, %v22874_v7  ;;  %v6277_v63 = vpop.f32.mrf.mxu0  ;;  %v14281_v7 = vld [vmem:[%s25878_s3 + $0x1858] sm:$0xf0]  ;;  %v17403_v19 = vld [vmem:[%s25878_s3 + $0x1a74] sm:$0xf] }
 0x979   :  { %v23176_v33 = vadd.f32 %v6277_v63, %v22883_v29  ;;  %v14284_v48 = vor.u32 %v17333_v4, %v14281_v7  ;;  %v17330_v29 = vld [vmem:[%s25878_s3 + $0x1824] sm:$0xf0]  ;;  %v14606_v53 = vor.u32 %v17403_v19, %v14603_v49  ;;  %v17397_v63 = vld [vmem:[%s25878_s3 + $0x1a44] sm:$0xf]  ;;  %v14553_v4 = vld [vmem:[%s25878_s3 + $0x1a10] sm:$0xf] }
 0x97a   :  { %v14256_v13 = vor.u32 %v17330_v29, %v14255_v50  ;;  %v14582_v34 = vor.u32 %v17397_v63, %v14579_v30  ;;  %v17394_v7 = vld [vmem:[%s25878_s3 + $0x1a24] sm:$0xf0]  ;;  %v14555_v50 = vld [vmem:[%s25878_s3 + $0x1a28] sm:$0xf0]  ;;  %v14667_v63 = vld [vmem:[%s25878_s3 + $0x1af8] sm:$0xf0] }
 0x97b   :  { %6693 = vmatpush.bf16.msrb.mxu2 %v14284_v48  ;;  %v14554_v48 = vor.u32 %v17394_v7, %v14553_v4  ;;  %v14633_v29 = vld [vmem:[%s25878_s3 + $0x1aa8] sm:$0xf]  ;;  %v14558_v41 = vor.u32 %v17391_v20, %v14555_v50  ;;  %v17386_v4 = vld [vmem:[%s25878_s3 + $0x19ec] sm:$0xf]  ;;  %v14539_v20 = vld [vmem:[%s25878_s3 + $0x1a00] sm:$0xf0] }
 0x97c   :  { %6681 = vmatpush.bf16.msrb.mxu0 %v14256_v13  ;;  %v17414_v50 = vld [vmem:[%s25878_s3 + $0x1ac4] sm:$0xf0] }
 0x97d   :  { %v6238_v32 = vpop.f32.mrf.mxu3 }
 0x97e   :  { %v23197_v52 = vadd.f32 %v6238_v32, %v22880_v60  ;;  %v6264_v62 = vpop.f32.mrf.mxu2  ;;  %v17418_v60 = vld [vmem:[%s25878_s3 + $0x1ae4] sm:$0xf0]  ;;  %v17413_v32 = vld [vmem:[%s25878_s3 + $0x1abc] sm:$0xf0] }
 0x97f   :  { %v23200_v9 = vadd.f32 %v6264_v62, %v22877_v3  ;;  %v6253_v56 = vpop.f32.mrf.mxu1  ;;  %6694 = vmatpush.bf16.msrb.mxu2 %v14260_v55  ;;  %v14650_v6 = vor.u32 %v17418_v60, %v14649_v35  ;;  %v14634_v51 = vor.u32 %v17413_v32, %v14633_v29  ;;  %v17410_v62 = vld [vmem:[%s25878_s3 + $0x1aac] sm:$0xf]  ;;  %v17388_v55 = vld [vmem:[%s25878_s3 + $0x19f4] sm:$0xf0]  ;;  %v14531_v35 = vld [vmem:[%s25878_s3 + $0x19f8] sm:$0xf0]  ;;  %v14542_v29 = vor.u32 %v17386_v4, %v14539_v20 }
 0x980   :  { %v6279_v61 = vpop.f32.mrf.mxu0  ;;  %v14635_v56 = vld [vmem:[%s25878_s3 + $0x1ac0] sm:$0xf0]  ;;  %v14499_v20 = vld [vmem:[%s25878_s3 + $0x19a8] sm:$0xf0] }
 0x981   :  { %7015 = vmatpush.bf16.msra.mxu1 %v14650_v6  ;;  %v14638_v13 = vor.u32 %v17410_v62, %v14635_v56  ;;  %v14529_v61 = vld [vmem:[%s25878_s3 + $0x19e0] sm:$0xf]  ;;  %v17407_v6 = vld [vmem:[%s25878_s3 + $0x1a8c] sm:$0xf0]  ;;  %v14513_v56 = vld [vmem:[%s25878_s3 + $0x19b8] sm:$0xf] }
 0x985   :  { %v6240_v0 = vpop.f32.mrf.mxu3  ;;  %7016 = vmatpush.bf16.msra.mxu1 %v14626_v18  ;;  %v14611_v18 = vld [vmem:[%s25878_s3 + $0x1a90] sm:$0xf0] }
 0x986   :  { %v6266_v5 = vpop.f32.mrf.mxu2  ;;  %v17385_v0 = vld [vmem:[%s25878_s3 + $0x19e4] sm:$0xf]  ;;  %v14614_v40 = vor.u32 %v17404_v8, %v14611_v18  ;;  %v14619_v8 = vld [vmem:[%s25878_s3 + $0x1a98] sm:$0xf0]  ;;  %v14489_v18 = vld [vmem:[%s25878_s3 + $0x1988] sm:$0xf] }
 0x987   :  { %v6303_v3 = vpop.f32.mrf.mxu1  ;;  %v14530_v5 = vor.u32 %v17388_v55, %v14529_v61  ;;  %v14534_v60 = vor.u32 %v17385_v0, %v14531_v35  ;;  %v17380_v61 = vld [vmem:[%s25878_s3 + $0x19bc] sm:$0xf]  ;;  %v14515_v0 = vld [vmem:[%s25878_s3 + $0x19d0] sm:$0xf0]  ;;  %v17408_v35 = vld [vmem:[%s25878_s3 + $0x1a94] sm:$0xf0] }
 0x988   :  { %v23215_v11 = vadd.f32 %v6303_v3, %v22904_v14  ;;  %v14609_v3 = vld [vmem:[%s25878_s3 + $0x1a78] sm:$0xf] }
 0x989   :  { %7017 = vmatpush.bf16.msra.mxu1 %v14602_v59  ;;  %v14610_v54 = vor.u32 %v17407_v6, %v14609_v3  ;;  %v17379_v59 = vld [vmem:[%s25878_s3 + $0x19b4] sm:$0xf]  ;;  %v17405_v6 = vld [vmem:[%s25878_s3 + $0x1a84] sm:$0xf] }
 0x98d   :  { %v6290_v12 = vpop.f32.mrf.mxu3 }
 0x98e   :  { %v23224_v22 = vadd.f32 %v6290_v12, %v22937_v42  ;;  %v6327_v45 = vpop.f32.mrf.mxu2  ;;  %v17400_v42 = vld [vmem:[%s25878_s3 + $0x1a54] sm:$0xf0]  ;;  %v17382_v12 = vld [vmem:[%s25878_s3 + $0x19c4] sm:$0xf0] }
 0x98f   :  { %v6328_v14 = vadd.f32 %v22909_v21, %v6327_v45  ;;  %v6305_v16 = vpop.f32.mrf.mxu1  ;;  %v14578_v37 = vor.u32 %v17400_v42, %v14577_v15  ;;  %v14506_v45 = vor.u32 %v17382_v12, %v14505_v10  ;;  %v17398_v42 = vld [vmem:[%s25878_s3 + $0x1a4c] sm:$0xf] }
 0x990   :  { %v14585_v16 = vld [vmem:[%s25878_s3 + $0x1a48] sm:$0xf]  ;;  %v17374_v10 = vld [vmem:[%s25878_s3 + $0x198c] sm:$0xf] }
 0x991   :  { %v6331_v47 = vmax.f32 %v6328_v14, 0.0  ;;  %7018 = vmatpush.bf16.msra.mxu1 %v14578_v37  ;;  %v14507_v14 = vld [vmem:[%s25878_s3 + $0x19c8] sm:$0xf0]  ;;  %v14586_v15 = vor.u32 %v17401_v1, %v14585_v16 }
 0x992   :  { %v14510_v17 = vor.u32 %v17379_v59, %v14507_v14  ;;  %v14491_v59 = vld [vmem:[%s25878_s3 + $0x19a0] sm:$0xf0]  ;;  %v17402_v14 = vld [vmem:[%s25878_s3 + $0x1a64] sm:$0xf0] }
 0x993   :  { %v6332_v27 = vpack.c.bf16 %v6331_v47, %v6331_v47  ;;  %v14590_v47 = vor.u32 %v17398_v42, %v14587_v23  ;;  %v14494_v16 = vor.u32 %v17374_v10, %v14491_v59  ;;  %v14569_v23 = vld [vmem:[%s25878_s3 + $0x1a20] sm:$0xf]  ;;  %v14893_v59 = vld [vmem:[%s25878_s3 + $0x1c68] sm:$0xf0] }
 0x995   :  { %6630 = vmatmul.bf16.vlgmr.msra.gmra.mxu0 %v6332_v27  ;;  %6643 = vmatmul.bf16.vlgmr.msra.gmra.mxu2 %v6332_v27  ;;  %v6292_v26 = vpop.f32.mrf.mxu3 }
 0x996   :  { %6656 = vmatmul.bf16.vlgmr.msra.gmra.mxu3 %v6332_v27  ;;  %6669 = vmatmul.bf16.vlgmr.msrb.gmra.mxu1 %v6332_v27  ;;  %v6329_v43 = vpop.f32.mrf.mxu2  ;;  %v14563_v26 = vld [vmem:[%s25878_s3 + $0x1a30] sm:$0xf0] }
 0x997   :  { %7028 = vmatpush.bf16.msra.mxu3 %v14654_v31  ;;  %7041 = vmatpush.bf16.msra.mxu0 %v14658_v46  ;;  %v14482_v31 = vor.u32 %v17376_v57, %v14481_v28  ;;  %v17392_v46 = vld [vmem:[%s25878_s3 + $0x1a1c] sm:$0xf]  ;;  %v14665_v43 = vld [vmem:[%s25878_s3 + $0x1ae0] sm:$0xf]  ;;  %v17396_v28 = vld [vmem:[%s25878_s3 + $0x1a34] sm:$0xf0] }
 0x998   :  { %7054 = vmatpush.bf16.msra.mxu2 %v14662_v38  ;;  %7019 = vmatpush.bf16.msra.mxu1 %v14554_v48  ;;  %v14562_v38 = vor.u32 %v17395_v36, %v14561_v39  ;;  %v14566_v19 = vor.u32 %v17392_v46, %v14563_v26  ;;  %v14641_v48 = vld [vmem:[%s25878_s3 + $0x1ab0] sm:$0xf]  ;;  %v14570_v57 = vor.u32 %v17396_v28, %v14569_v23  ;;  %v17387_v39 = vld [vmem:[%s25878_s3 + $0x19f4] sm:$0xf]  ;;  %v17457_v23 = vld [vmem:[%s25878_s3 + $0x1c24] sm:$0xf] }
 0x999   :  { %v14642_v32 = vor.u32 %v17414_v50, %v14641_v48  ;;  %v14869_v28 = vld [vmem:[%s25878_s3 + $0x1c38] sm:$0xf0] }
 0x99b   :  { %7029 = vmatpush.bf16.msra.mxu3 %v14630_v25  ;;  %7042 = vmatpush.bf16.msra.mxu0 %v14634_v51  ;;  %v17420_v25 = vld [vmem:[%s25878_s3 + $0x1af4] sm:$0xf0]  ;;  %v14643_v51 = vld [vmem:[%s25878_s3 + $0x1ac8] sm:$0xf0] }
 0x99c   :  { %7055 = vmatpush.bf16.msra.mxu2 %v14638_v13  ;;  %7020 = vmatpush.bf16.msra.mxu1 %v14530_v5  ;;  %v14666_v49 = vor.u32 %v17420_v25, %v14665_v43  ;;  %v17383_v13 = vld [vmem:[%s25878_s3 + $0x19cc] sm:$0xf0]  ;;  %v14617_v5 = vld [vmem:[%s25878_s3 + $0x1a80] sm:$0xf] }
 0x99d   :  { %v14514_v55 = vor.u32 %v17383_v13, %v14513_v56  ;;  %v14618_v3 = vor.u32 %v17408_v35, %v14617_v5  ;;  %v17460_v5 = vld [vmem:[%s25878_s3 + $0x1c34] sm:$0xf0] }
 0x99f   :  { %7030 = vmatpush.bf16.msra.mxu3 %v14606_v53  ;;  %7043 = vmatpush.bf16.msra.mxu0 %v14610_v54  ;;  %v17417_v53 = vld [vmem:[%s25878_s3 + $0x1ae4] sm:$0xf]  ;;  %v14622_v54 = vor.u32 %v17405_v6, %v14619_v8  ;;  %v17454_v6 = vld [vmem:[%s25878_s3 + $0x1c04] sm:$0xf0] }
 0x9a0   :  { %7056 = vmatpush.bf16.msra.mxu2 %v14614_v40  ;;  %7021 = vmatpush.bf16.msra.mxu1 %v14506_v45  ;;  %v14670_v30 = vor.u32 %v17417_v53, %v14667_v63  ;;  %v17377_v40 = vld [vmem:[%s25878_s3 + $0x199c] sm:$0xf0]  ;;  %v14593_v45 = vld [vmem:[%s25878_s3 + $0x1a50] sm:$0xf]  ;;  %v17381_v63 = vld [vmem:[%s25878_s3 + $0x19c4] sm:$0xf] }
 0x9a1   :  { %v14490_v12 = vor.u32 %v17377_v40, %v14489_v18  ;;  %v14594_v1 = vor.u32 %v17402_v14, %v14593_v45  ;;  %v14819_v45 = vld [vmem:[%s25878_s3 + $0x1bc0] sm:$0xf]  ;;  %v17467_v14 = vld [vmem:[%s25878_s3 + $0x1c6c] sm:$0xf0] }
 0x9a3   :  { %7031 = vmatpush.bf16.msra.mxu3 %v14582_v34  ;;  %7044 = vmatpush.bf16.msra.mxu0 %v14586_v15  ;;  %v14537_v34 = vld [vmem:[%s25878_s3 + $0x19e8] sm:$0xf]  ;;  %v14595_v15 = vld [vmem:[%s25878_s3 + $0x1a68] sm:$0xf0] }
 0x9a4   :  { %7057 = vmatpush.bf16.msra.mxu2 %v14590_v47  ;;  %7022 = vmatpush.bf16.msra.mxu1 %v14482_v31  ;;  %v17393_v47 = vld [vmem:[%s25878_s3 + $0x1a24] sm:$0xf]  ;;  %v14545_v31 = vld [vmem:[%s25878_s3 + $0x19f0] sm:$0xf] }
 0x9a5   :  { %6682 = vmatmul.bf16.vlgmr.msrb.gmra.mxu0 %v6332_v27  ;;  %6695 = vmatmul.bf16.vlgmr.msrb.gmra.mxu2 %v6332_v27  ;;  %v14483_v27 = vld [vmem:[%s25878_s3 + $0x1998] sm:$0xf0] }
 0x9a6   :  { %14430 = vmatmul.msk.bf16.vlgmr.msrb.gmra.mxu3 %vm35_vm1, %v14429_v24  ;;  %v14486_v37 = vor.u32 %v17373_v44, %v14483_v27  ;;  %v17389_v24 = vld [vmem:[%s25878_s3 + $0x19fc] sm:$0xf0]  ;;  %v14571_v44 = vld [vmem:[%s25878_s3 + $0x1a38] sm:$0xf0] }
 0x9a7   :  { %7032 = vmatpush.bf16.msra.mxu3 %v14558_v41  ;;  %7045 = vmatpush.bf16.msra.mxu0 %v14562_v38  ;;  %v14538_v7 = vor.u32 %v17389_v24, %v14537_v34  ;;  %v17411_v41 = vld [vmem:[%s25878_s3 + $0x1ab4] sm:$0xf]  ;;  %v14574_v27 = vor.u32 %v17393_v47, %v14571_v44  ;;  %v14547_v38 = vld [vmem:[%s25878_s3 + $0x1a08] sm:$0xf0]  ;;  %v14497_v24 = vld [vmem:[%s25878_s3 + $0x1990] sm:$0xf] }
 0x9a8   :  { %7058 = vmatpush.bf16.msra.mxu2 %v14566_v19  ;;  %7067 = vmatpush.bf16.msrb.mxu1 %v14666_v49  ;;  %v14646_v62 = vor.u32 %v17411_v41, %v14643_v51  ;;  %v14550_v25 = vor.u32 %v17387_v39, %v14547_v38  ;;  %v14521_v19 = vld [vmem:[%s25878_s3 + $0x19c0] sm:$0xf]  ;;  %v17384_v49 = vld [vmem:[%s25878_s3 + $0x19d4] sm:$0xf0]  ;;  %v14877_v38 = vld [vmem:[%s25878_s3 + $0x1c40] sm:$0xf0] }
 0x9ab   :  { %7033 = vmatpush.bf16.msra.mxu3 %v14534_v60  ;;  %7046 = vmatpush.bf16.msra.mxu0 %v14538_v7  ;;  %v14518_v60 = vor.u32 %v17380_v61, %v14515_v0  ;;  %v17375_v7 = vld [vmem:[%s25878_s3 + $0x1994] sm:$0xf]  ;;  %v14891_v61 = vld [vmem:[%s25878_s3 + $0x1c50] sm:$0xf]  ;;  %v14867_v0 = vld [vmem:[%s25878_s3 + $0x1c20] sm:$0xf] }
 0x9ac   :  { %7059 = vmatpush.bf16.msra.mxu2 %v14542_v29  ;;  %7068 = vmatpush.bf16.msrb.mxu1 %v14642_v32 }
 0x9af   :  { %7034 = vmatpush.bf16.msra.mxu3 %v14510_v17  ;;  %7047 = vmatpush.bf16.msra.mxu0 %v14514_v55  ;;  %v17399_v17 = vld [vmem:[%s25878_s3 + $0x1a54] sm:$0xf] }
 0x9b0   :  { %7060 = vmatpush.bf16.msra.mxu2 %v14518_v60  ;;  %7069 = vmatpush.bf16.msrb.mxu1 %v14618_v3  ;;  %v14598_v42 = vor.u32 %v17399_v17, %v14595_v15  ;;  %v14868_v60 = vor.u32 %v17460_v5, %v14867_v0  ;;  %v14843_v3 = vld [vmem:[%s25878_s3 + $0x1bf0] sm:$0xf]  ;;  %v14901_v17 = vld [vmem:[%s25878_s3 + $0x1c70] sm:$0xf0] }
 0x9b1   :  { %v14853_v5 = vld [vmem:[%s25878_s3 + $0x1c10] sm:$0xf0] }
 0x9b3   :  { %7035 = vmatpush.bf16.msra.mxu3 %v14486_v37  ;;  %7048 = vmatpush.bf16.msra.mxu0 %v14490_v12  ;;  %v17390_v37 = vld [vmem:[%s25878_s3 + $0x1a04] sm:$0xf0]  ;;  %v17463_v12 = vld [vmem:[%s25878_s3 + $0x1c54] sm:$0xf] }
 0x9b4   :  { %7061 = vmatpush.bf16.msra.mxu2 %v14494_v16  ;;  %7070 = vmatpush.bf16.msrb.mxu1 %v14594_v1  ;;  %v14546_v46 = vor.u32 %v17390_v37, %v14545_v31  ;;  %v17464_v1 = vld [vmem:[%s25878_s3 + $0x1c5c] sm:$0xf]  ;;  %v17442_v31 = vld [vmem:[%s25878_s3 + $0x1ba4] sm:$0xf0] }
 0x9b5   :  { %v14904_v44 = vor.u32 %v17464_v1, %v14901_v17  ;;  %v14875_v37 = vld [vmem:[%s25878_s3 + $0x1c28] sm:$0xf]  ;;  %v17421_v1 = vld [vmem:[%s25878_s3 + $0x1b04] sm:$0xf] }
 0x9b7   :  { %7080 = vmatpush.bf16.msrb.mxu3 %v14670_v30  ;;  %7111 = vmatpush.bf16.msrb.mxu0 %v17889_v2  ;;  %v14522_v30 = vor.u32 %v17384_v49, %v14521_v19  ;;  %v17451_v19 = vld [vmem:[%s25878_s3 + $0x1bf4] sm:$0xf] }
 0x9b8   :  { %7071 = vmatpush.bf16.msrb.mxu1 %v14570_v57 }
 0x9bb   :  { %7081 = vmatpush.bf16.msrb.mxu3 %v14646_v62  ;;  %v14502_v62 = vor.u32 %v17375_v7, %v14499_v20  ;;  %v17445_v7 = vld [vmem:[%s25878_s3 + $0x1bc4] sm:$0xf]  ;;  %v14821_v20 = vld [vmem:[%s25878_s3 + $0x1bd8] sm:$0xf0] }
 0x9bc   :  { %7072 = vmatpush.bf16.msrb.mxu1 %v14546_v46  ;;  %v17458_v46 = vld [vmem:[%s25878_s3 + $0x1c2c] sm:$0xf] }
 0x9bf   :  { %7082 = vmatpush.bf16.msrb.mxu3 %v14622_v54  ;;  %v14844_v54 = vor.u32 %v17454_v6, %v14843_v3  ;;  %v14747_v3 = vld [vmem:[%s25878_s3 + $0x1b30] sm:$0xf]  ;;  %v17430_v6 = vld [vmem:[%s25878_s3 + $0x1b44] sm:$0xf0] }
 0x9c0   :  { %7073 = vmatpush.bf16.msrb.mxu1 %v14522_v30  ;;  %v14880_v30 = vor.u32 %v17458_v46, %v14877_v38 }
 0x9c3   :  { %7083 = vmatpush.bf16.msrb.mxu3 %v14598_v42  ;;  %v14896_v42 = vor.u32 %v17463_v12, %v14893_v59 }
 0x9c7   :  { %7084 = vmatpush.bf16.msrb.mxu3 %v14574_v27  ;;  %v14795_v27 = vld [vmem:[%s25878_s3 + $0x1b90] sm:$0xf] }
 0x9c8   :  { %v14796_v49 = vor.u32 %v17442_v31, %v14795_v27  ;;  %v14907_v27 = vld [vmem:[%s25878_s3 + $0x1c60] sm:$0xf] }
 0x9cb   :  { %7085 = vmatpush.bf16.msrb.mxu3 %v14550_v25  ;;  %v14872_v25 = vor.u32 %v17457_v23, %v14869_v28  ;;  %v17443_v23 = vld [vmem:[%s25878_s3 + $0x1bac] sm:$0xf0] }
 0xa12   :  { %v6631_v36 = vpop.f32.mrf.mxu0 }
 0xa13   :  { %v23479_v26 = vadd.f32 %v6631_v36, %v23197_v52  ;;  %v6670_v43 = vpop.f32.mrf.mxu1  ;;  %v14523_v52 = vld [vmem:[%s25878_s3 + $0x19d8] sm:$0xf0]  ;;  %v17461_v36 = vld [vmem:[%s25878_s3 + $0x1c3c] sm:$0xf0] }
 0xa14   :  { %v23488_v53 = vadd.f32 %v6670_v43, %v23176_v33  ;;  %v14526_v34 = vor.u32 %v17381_v63, %v14523_v52  ;;  %v17378_v33 = vld [vmem:[%s25878_s3 + $0x19a4] sm:$0xf0]  ;;  %v14845_v63 = vld [vmem:[%s25878_s3 + $0x1c08] sm:$0xf0]  ;;  %v14876_v52 = vor.u32 %v17461_v36, %v14875_v37  ;;  %v17468_v37 = vld [vmem:[%s25878_s3 + $0x1c74] sm:$0xf0] }
 0xa15   :  { %v14498_v41 = vor.u32 %v17378_v33, %v14497_v24  ;;  %v17436_v24 = vld [vmem:[%s25878_s3 + $0x1b74] sm:$0xf0]  ;;  %v14848_v33 = vor.u32 %v17451_v19, %v14845_v63  ;;  %v14909_v36 = vld [vmem:[%s25878_s3 + $0x1c78] sm:$0xf0]  ;;  %v14908_v46 = vor.u32 %v17468_v37, %v14907_v27  ;;  %v17434_v19 = vld [vmem:[%s25878_s3 + $0x1b6c] sm:$0xf] }
 0xa16   :  { %7086 = vmatpush.bf16.msrb.mxu3 %v14526_v34  ;;  %v14771_v34 = vld [vmem:[%s25878_s3 + $0x1b60] sm:$0xf]  ;;  %v14781_v63 = vld [vmem:[%s25878_s3 + $0x1b80] sm:$0xf0]  ;;  %v14765_v37 = vld [vmem:[%s25878_s3 + $0x1b58] sm:$0xf0] }
 0xa17   :  { %7074 = vmatpush.bf16.msrb.mxu1 %v14498_v41  ;;  %v14797_v41 = vld [vmem:[%s25878_s3 + $0x1ba8] sm:$0xf0]  ;;  %v17429_v27 = vld [vmem:[%s25878_s3 + $0x1b44] sm:$0xf] }
 0xa18   :  { %v6644_v4 = vpop.f32.mrf.mxu2 }
 0xa19   :  { %v23509_v48 = vadd.f32 %v6644_v4, %v23167_v58  ;;  %v6657_v50 = vpop.f32.mrf.mxu3  ;;  %v17466_v58 = vld [vmem:[%s25878_s3 + $0x1c64] sm:$0xf0]  ;;  %v14772_v4 = vor.u32 %v17436_v24, %v14771_v34  ;;  %v14784_v34 = vor.u32 %v17434_v19, %v14781_v63 }
 0xa1a   :  { %v23512_v29 = vadd.f32 %v6657_v50, %v23200_v9  ;;  %v6633_v32 = vpop.f32.mrf.mxu0  ;;  %7087 = vmatpush.bf16.msrb.mxu3 %v14502_v62  ;;  %v14892_v55 = vor.u32 %v17466_v58, %v14891_v61  ;;  %v14824_v50 = vor.u32 %v17445_v7, %v14821_v20  ;;  %v14851_v58 = vld [vmem:[%s25878_s3 + $0x1bf8] sm:$0xf] }
 0xa1b   :  { %v6672_v51 = vpop.f32.mrf.mxu1  ;;  %v17439_v32 = vld [vmem:[%s25878_s3 + $0x1b94] sm:$0xf]  ;;  %v14755_v20 = vld [vmem:[%s25878_s3 + $0x1b38] sm:$0xf] }
 0xa1c   :  { %7408 = vmatpush.bf16.msrb.mxu2 %v14892_v55  ;;  %v14671_v51 = vld [vmem:[%s25875_s0 + $0x12] sm:$0x1]  ;;  %v14800_v62 = vor.u32 %v17439_v32, %v14797_v41  ;;  %v17452_v55 = vld [vmem:[%s25878_s3 + $0x1bfc] sm:$0xf] }
 0xa1d   :  { %v17428_v32 = vld [vmem:[%s25878_s3 + $0x1b3c] sm:$0xf] }
 0xa20   :  { %v6646_v56 = vpop.f32.mrf.mxu2  ;;  %7409 = vmatpush.bf16.msrb.mxu2 %v14868_v60  ;;  %v14856_v60 = vor.u32 %v17452_v55, %v14853_v5  ;;  %v17425_v5 = vld [vmem:[%s25878_s3 + $0x1b1c] sm:$0xf0] }
 0xa21   :  { %v6659_v13 = vpop.f32.mrf.mxu3  ;;  %v17433_v56 = vld [vmem:[%s25878_s3 + $0x1b64] sm:$0xf] }
 0xa22   :  { %v6683_v9 = vpop.f32.mrf.mxu0  ;;  %v14773_v13 = vld [vmem:[%s25878_s3 + $0x1b78] sm:$0xf0] }
 0xa23   :  { %v23527_v35 = vadd.f32 %v6683_v9, %v23224_v22  ;;  %v14776_v61 = vor.u32 %v17433_v56, %v14773_v13  ;;  %v17455_v9 = vld [vmem:[%s25878_s3 + $0x1c0c] sm:$0xf0]  ;;  %v17456_v56 = vld [vmem:[%s25878_s3 + $0x1c14] sm:$0xf0] }
 0xa24   :  { %7410 = vmatpush.bf16.msrb.mxu2 %v14844_v54  ;;  %v14852_v0 = vor.u32 %v17455_v9, %v14851_v58  ;;  %v14748_v54 = vor.u32 %v17430_v6, %v14747_v3  ;;  %v17453_v58 = vld [vmem:[%s25878_s3 + $0x1c04] sm:$0xf]  ;;  %v14861_v9 = vld [vmem:[%s25878_s3 + $0x1c18] sm:$0xf0] }
 0xa25   :  { %v14864_v55 = vor.u32 %v17453_v58, %v14861_v9  ;;  %v14733_v6 = vld [vmem:[%s25878_s3 + $0x1b20] sm:$0xf0] }
 0xa28   :  { %v6696_v8 = vpop.f32.mrf.mxu2 }
 0xa29   :  { %v23536_v18 = vadd.f32 %v6696_v8, %v23215_v11  ;;  %v6720_v40 = vpop.f32.mrf.mxu3  ;;  %v17448_v11 = vld [vmem:[%s25878_s3 + $0x1bd4] sm:$0xf0]  ;;  %v17427_v8 = vld [vmem:[%s25878_s3 + $0x1b34] sm:$0xf] }
 0xa2a   :  { %v6721_v22 = vadd.f32 %v22909_v21, %v6720_v40  ;;  %v6685_v10 = vpop.f32.mrf.mxu0  ;;  %v14899_v21 = vld [vmem:[%s25878_s3 + $0x1c58] sm:$0xf]  ;;  %v14820_v47 = vor.u32 %v17448_v11, %v14819_v45  ;;  %v14749_v40 = vld [vmem:[%s25878_s3 + $0x1b48] sm:$0xf0]  ;;  %v14829_v11 = vld [vmem:[%s25878_s3 + $0x1be0] sm:$0xf0] }
 0xa2b   :  { %v14900_v57 = vor.u32 %v17467_v14, %v14899_v21  ;;  %v17449_v10 = vld [vmem:[%s25878_s3 + $0x1bdc] sm:$0xf0]  ;;  %v14752_v12 = vor.u32 %v17427_v8, %v14749_v40  ;;  %v17446_v45 = vld [vmem:[%s25878_s3 + $0x1bcc] sm:$0xf]  ;;  %v14835_v8 = vld [vmem:[%s25878_s3 + $0x1bd0] sm:$0xf] }
 0xa2c   :  { %v6724_v16 = vmax.f32 %v6721_v22, 0.0  ;;  %7411 = vmatpush.bf16.msrb.mxu2 %v14820_v47  ;;  %v14827_v22 = vld [vmem:[%s25878_s3 + $0x1bc8] sm:$0xf]  ;;  %v14832_v21 = vor.u32 %v17446_v45, %v14829_v11  ;;  %v14723_v14 = vld [vmem:[%s25878_s3 + $0x1b00] sm:$0xf] }
 0xa2d   :  { %v14828_v59 = vor.u32 %v17449_v10, %v14827_v22  ;;  %v17447_v10 = vld [vmem:[%s25878_s3 + $0x1bd4] sm:$0xf]  ;;  %v14811_v45 = vld [vmem:[%s25878_s3 + $0x1ba0] sm:$0xf]  ;;  %v17444_v11 = vld [vmem:[%s25878_s3 + $0x1bb4] sm:$0xf0] }
 0xa2e   :  { %v6725_v15 = vpack.c.bf16 %v6724_v16, %v6724_v16  ;;  %v17424_v16 = vld [vmem:[%s25878_s3 + $0x1b14] sm:$0xf0] }
 0xa2f   :  { %v14724_v17 = vor.u32 %v17424_v16, %v14723_v14  ;;  %v14812_v14 = vor.u32 %v17444_v11, %v14811_v45  ;;  %v14813_v16 = vld [vmem:[%s25878_s3 + $0x1bb8] sm:$0xf0]  ;;  %v17505_v45 = vld [vmem:[%s25878_s3 + $0x1da4] sm:$0xf] }
 0xa30   :  { %7023 = vmatmul.bf16.vlgmr.msra.gmra.mxu1 %v6725_v15  ;;  %7036 = vmatmul.bf16.vlgmr.msra.gmra.mxu3 %v6725_v15  ;;  %v6698_v39 = vpop.f32.mrf.mxu2  ;;  %v15111_v11 = vld [vmem:[%s25878_s3 + $0x1db8] sm:$0xf0] }
 0xa31   :  { %7049 = vmatmul.bf16.vlgmr.msra.gmra.mxu0 %v6725_v15  ;;  %7062 = vmatmul.bf16.vlgmr.msra.gmra.mxu2 %v6725_v15  ;;  %v6722_v43 = vpop.f32.mrf.mxu3  ;;  %v17465_v39 = vld [vmem:[%s25878_s3 + $0x1c64] sm:$0xf] }
 0xa32   :  { %7421 = vmatpush.bf16.msra.mxu0 %v14896_v42  ;;  %7434 = vmatpush.bf16.msra.mxu1 %v14900_v57  ;;  %v14803_v42 = vld [vmem:[%s25878_s3 + $0x1b98] sm:$0xf]  ;;  %v17440_v57 = vld [vmem:[%s25878_s3 + $0x1b9c] sm:$0xf]  ;;  %v14912_v38 = vor.u32 %v17465_v39, %v14909_v36  ;;  %v14779_v43 = vld [vmem:[%s25878_s3 + $0x1b68] sm:$0xf] }
 0xa33   :  { %7447 = vmatpush.bf16.msra.mxu3 %v14904_v44  ;;  %7412 = vmatpush.bf16.msrb.mxu2 %v14796_v49  ;;  %v14804_v47 = vor.u32 %v17443_v23, %v14803_v42  ;;  %v14805_v44 = vld [vmem:[%s25878_s3 + $0x1bb0] sm:$0xf0]  ;;  %v14789_v23 = vld [vmem:[%s25878_s3 + $0x1b88] sm:$0xf0]  ;;  %v14739_v39 = vld [vmem:[%s25878_s3 + $0x1b10] sm:$0xf] }
 0xa34   :  { %v14808_v31 = vor.u32 %v17440_v57, %v14805_v44  ;;  %v17435_v42 = vld [vmem:[%s25878_s3 + $0x1b74] sm:$0xf]  ;;  %v14763_v57 = vld [vmem:[%s25878_s3 + $0x1b40] sm:$0xf]  ;;  %v17432_v44 = vld [vmem:[%s25878_s3 + $0x1b54] sm:$0xf0] }
 0xa36   :  { %7422 = vmatpush.bf16.msra.mxu0 %v14872_v25  ;;  %7435 = vmatpush.bf16.msra.mxu1 %v14876_v52  ;;  %v17437_v25 = vld [vmem:[%s25878_s3 + $0x1b7c] sm:$0xf0]  ;;  %v14883_v52 = vld [vmem:[%s25878_s3 + $0x1c30] sm:$0xf] }
 0xa37   :  { %7448 = vmatpush.bf16.msra.mxu3 %v14880_v30  ;;  %7413 = vmatpush.bf16.msrb.mxu2 %v14772_v4  ;;  %v14780_v49 = vor.u32 %v17437_v25, %v14779_v43  ;;  %v17462_v30 = vld [vmem:[%s25878_s3 + $0x1c44] sm:$0xf0]  ;;  %v14885_v4 = vld [vmem:[%s25878_s3 + $0x1c48] sm:$0xf0]  ;;  %v17423_v43 = vld [vmem:[%s25878_s3 + $0x1b14] sm:$0xf] }
 0xa38   :  { %v14884_v24 = vor.u32 %v17462_v30, %v14883_v52  ;;  %v14741_v25 = vld [vmem:[%s25878_s3 + $0x1b28] sm:$0xf0] }
 0xa39   :  { %v14744_v30 = vor.u32 %v17423_v43, %v14741_v25 }
 0xa3a   :  { %7423 = vmatpush.bf16.msra.mxu0 %v14848_v33  ;;  %7436 = vmatpush.bf16.msra.mxu1 %v14852_v0  ;;  %v17459_v33 = vld [vmem:[%s25878_s3 + $0x1c34] sm:$0xf]  ;;  %v14731_v0 = vld [vmem:[%s25878_s3 + $0x1b08] sm:$0xf] }
 0xa3b   :  { %7449 = vmatpush.bf16.msra.mxu3 %v14856_v60  ;;  %7414 = vmatpush.bf16.msrb.mxu2 %v14748_v54  ;;  %v14888_v7 = vor.u32 %v17459_v33, %v14885_v4  ;;  %v17422_v60 = vld [vmem:[%s25878_s3 + $0x1b0c] sm:$0xf]  ;;  %v14732_v3 = vor.u32 %v17425_v5, %v14731_v0  ;;  %v17450_v54 = vld [vmem:[%s25878_s3 + $0x1be4] sm:$0xf0]  ;;  %v17511_v5 = vld [vmem:[%s25878_s3 + $0x1dd4] sm:$0xf] }
 0xa3c   :  { %v14736_v40 = vor.u32 %v17422_v60, %v14733_v6  ;;  %v14836_v22 = vor.u32 %v17450_v54, %v14835_v8  ;;  %v15135_v60 = vld [vmem:[%s25878_s3 + $0x1de8] sm:$0xf0]  ;;  %v15141_v6 = vld [vmem:[%s25878_s3 + $0x1dd8] sm:$0xf]  ;;  %v17515_v8 = vld [vmem:[%s25878_s3 + $0x1dec] sm:$0xf0] }
 0xa3e   :  { %7424 = vmatpush.bf16.msra.mxu0 %v14824_v50  ;;  %7437 = vmatpush.bf16.msra.mxu1 %v14828_v59  ;;  %v17431_v50 = vld [vmem:[%s25878_s3 + $0x1b4c] sm:$0xf0] }
 0xa3f   :  { %7450 = vmatpush.bf16.msra.mxu3 %v14832_v21  ;;  %7415 = vmatpush.bf16.msrb.mxu2 %v14724_v17  ;;  %v14756_v41 = vor.u32 %v17431_v50, %v14755_v20  ;;  %v17441_v21 = vld [vmem:[%s25878_s3 + $0x1ba4] sm:$0xf]  ;;  %v14787_v17 = vld [vmem:[%s25878_s3 + $0x1b70] sm:$0xf]  ;;  %v17514_v20 = vld [vmem:[%s25878_s3 + $0x1de4] sm:$0xf0] }
 0xa40   :  { %7075 = vmatmul.bf16.vlgmr.msrb.gmra.mxu1 %v6725_v15  ;;  %7088 = vmatmul.bf16.vlgmr.msrb.gmra.mxu3 %v6725_v15  ;;  %v14725_v15 = vld [vmem:[%s25878_s3 + $0x1b18] sm:$0xf0] }
 0xa41   :  { %14672 = vmatmul.msk.bf16.vlgmr.msrb.gmra.mxu0 %vm35_vm1, %v14671_v51  ;;  %v14728_v28 = vor.u32 %v17421_v1, %v14725_v15  ;;  %v14757_v51 = vld [vmem:[%s25878_s3 + $0x1b50] sm:$0xf0]  ;;  %v14816_v1 = vor.u32 %v17441_v21, %v14813_v16  ;;  %v17438_v15 = vld [vmem:[%s25878_s3 + $0x1b84] sm:$0xf0]  ;;  %v15142_v16 = vor.u32 %v17515_v8, %v15141_v6  ;;  %v17494_v8 = vld [vmem:[%s25878_s3 + $0x1d4c] sm:$0xf] }
 0xa42   :  { %7425 = vmatpush.bf16.msra.mxu0 %v14800_v62  ;;  %7438 = vmatpush.bf16.msra.mxu1 %v14804_v47  ;;  %v14859_v62 = vld [vmem:[%s25878_s3 + $0x1c00] sm:$0xf]  ;;  %v14760_v13 = vor.u32 %v17428_v32, %v14757_v51  ;;  %v14792_v47 = vor.u32 %v17435_v42, %v14789_v23  ;;  %v17502_v51 = vld [vmem:[%s25878_s3 + $0x1d84] sm:$0xf0] }
 0xa43   :  { %7451 = vmatpush.bf16.msra.mxu3 %v14808_v31  ;;  %7460 = vmatpush.bf16.msra.mxu2 %v14908_v46  ;;  %v14764_v31 = vor.u32 %v17432_v44, %v14763_v57  ;;  %v14768_v46 = vor.u32 %v17429_v27, %v14765_v37  ;;  %v15117_v42 = vld [vmem:[%s25878_s3 + $0x1da8] sm:$0xf]  ;;  %v15114_v44 = vor.u32 %v17505_v45, %v15111_v11  ;;  %v17499_v27 = vld [vmem:[%s25878_s3 + $0x1d74] sm:$0xf]  ;;  %v15087_v37 = vld [vmem:[%s25878_s3 + $0x1d88] sm:$0xf0] }
 0xa44   :  { %v15090_v25 = vor.u32 %v17499_v27, %v15087_v37  ;;  %v14967_v45 = vld [vmem:[%s25878_s3 + $0x1c98] sm:$0xf0]  ;;  %v15045_v11 = vld [vmem:[%s25878_s3 + $0x1d18] sm:$0xf]  ;;  %v15021_v27 = vld [vmem:[%s25878_s3 + $0x1ce8] sm:$0xf] }
 0xa45   :  { %v17482_v37 = vld [vmem:[%s25878_s3 + $0x1cec] sm:$0xf] }
 0xa46   :  { %7426 = vmatpush.bf16.msra.mxu0 %v14776_v61  ;;  %7439 = vmatpush.bf16.msra.mxu1 %v14780_v49  ;;  %v14860_v61 = vor.u32 %v17456_v56, %v14859_v62 }
 0xa47   :  { %7452 = vmatpush.bf16.msra.mxu3 %v14784_v34  ;;  %7461 = vmatpush.bf16.msra.mxu2 %v14884_v24 }
 0xa4a   :  { %7427 = vmatpush.bf16.msra.mxu0 %v14752_v12  ;;  %7440 = vmatpush.bf16.msra.mxu1 %v14756_v41  ;;  %v14837_v12 = vld [vmem:[%s25878_s3 + $0x1be8] sm:$0xf0]  ;;  %v15085_v41 = vld [vmem:[%s25878_s3 + $0x1d70] sm:$0xf] }
 0xa4b   :  { %7453 = vmatpush.bf16.msra.mxu3 %v14760_v13  ;;  %7462 = vmatpush.bf16.msra.mxu2 %v14860_v61  ;;  %v14840_v59 = vor.u32 %v17447_v10, %v14837_v12  ;;  %v15086_v61 = vor.u32 %v17502_v51, %v15085_v41  ;;  %v17500_v41 = vld [vmem:[%s25878_s3 + $0x1d7c] sm:$0xf] }
 0xa4e   :  { %7428 = vmatpush.bf16.msra.mxu0 %v14728_v28  ;;  %7441 = vmatpush.bf16.msra.mxu1 %v14732_v3  ;;  %v14788_v28 = vor.u32 %v17438_v15, %v14787_v17  ;;  %v17496_v3 = vld [vmem:[%s25878_s3 + $0x1d54] sm:$0xf0]  ;;  %v15037_v17 = vld [vmem:[%s25878_s3 + $0x1d10] sm:$0xf]  ;;  %v17490_v15 = vld [vmem:[%s25878_s3 + $0x1d24] sm:$0xf0] }
 0xa4f   :  { %7454 = vmatpush.bf16.msra.mxu3 %v14736_v40  ;;  %7463 = vmatpush.bf16.msra.mxu2 %v14836_v22  ;;  %v17512_v40 = vld [vmem:[%s25878_s3 + $0x1ddc] sm:$0xf]  ;;  %v15143_v22 = vld [vmem:[%s25878_s3 + $0x1df0] sm:$0xf0] }
 0xa52   :  { %7473 = vmatpush.bf16.msrb.mxu0 %v14912_v38  ;;  %7504 = vmatpush.bf16.msrb.mxu1 %v17889_v2  ;;  %v17426_v38 = vld [vmem:[%s25878_s3 + $0x1b24] sm:$0xf0] }
 0xa53   :  { %7464 = vmatpush.bf16.msra.mxu2 %v14812_v14  ;;  %v14740_v52 = vor.u32 %v17426_v38, %v14739_v39  ;;  %v17484_v38 = vld [vmem:[%s25878_s3 + $0x1cf4] sm:$0xf0] }
 0xa56   :  { %7474 = vmatpush.bf16.msrb.mxu0 %v14888_v7 }
 0xa57   :  { %7465 = vmatpush.bf16.msra.mxu2 %v14788_v28  ;;  %v17506_v28 = vld [vmem:[%s25878_s3 + $0x1dac] sm:$0xf] }
 0xa5a   :  { %7475 = vmatpush.bf16.msrb.mxu0 %v14864_v55  ;;  %v23850_v55 = vld [vmem:[%s25877_s2] ss:$0 sm:$0xff] }
 0xa5b   :  { %7466 = vmatpush.bf16.msra.mxu2 %v14764_v31  ;;  %v15038_v31 = vor.u32 %v17490_v15, %v15037_v17  ;;  %v17488_v17 = vld [vmem:[%s25878_s3 + $0x1d1c] sm:$0xf]  ;;  %v15047_v15 = vld [vmem:[%s25878_s3 + $0x1d30] sm:$0xf0] }
 0xa5e   :  { %7476 = vmatpush.bf16.msrb.mxu0 %v14840_v59  ;;  %v15138_v59 = vor.u32 %v17511_v5, %v15135_v60  ;;  %v14991_v5 = vld [vmem:[%s25878_s3 + $0x1cc8] sm:$0xf0]  ;;  %v15069_v60 = vld [vmem:[%s25878_s3 + $0x1d48] sm:$0xf] }
 0xa5f   :  { %7467 = vmatpush.bf16.msra.mxu2 %v14740_v52  ;;  %v17493_v52 = vld [vmem:[%s25878_s3 + $0x1d44] sm:$0xf] }
 0xa62   :  { %7477 = vmatpush.bf16.msrb.mxu0 %v14816_v1  ;;  %v15146_v1 = vor.u32 %v17512_v40, %v15143_v22  ;;  %v14965_v22 = vld [vmem:[%s25878_s3 + $0x1c80] sm:$0xf] }
 0xa66   :  { %7478 = vmatpush.bf16.msrb.mxu0 %v14792_v47  ;;  %v15119_v47 = vld [vmem:[%s25878_s3 + $0x1dc0] sm:$0xf0] }
 0xa6a   :  { %7479 = vmatpush.bf16.msrb.mxu0 %v14768_v46  ;;  %v15013_v46 = vld [vmem:[%s25878_s3 + $0x1ce0] sm:$0xf] }
 0xa6e   :  { %7480 = vmatpush.bf16.msrb.mxu0 %v14744_v30  ;;  %v15063_v30 = vld [vmem:[%s25878_s3 + $0x1d58] sm:$0xf0] }
 0xaad   :  { %v7024_v36 = vpop.f32.mrf.mxu1 }
 0xaae   :  { %v23815_v19 = vadd.f32 %v7024_v36, %v23479_v26  ;;  %v7050_v49 = vpop.f32.mrf.mxu0  ;;  %v15122_v36 = vor.u32 %v17506_v28, %v15119_v47  ;;  %v17513_v28 = vld [vmem:[%s25878_s3 + $0x1de4] sm:$0xf]  ;;  %v15151_v47 = vld [vmem:[%s25878_s3 + $0x1df8] sm:$0xf0] }
 0xaaf   :  { %v23818_v63 = vadd.f32 %v7050_v49, %v23512_v29  ;;  %v15133_v29 = vld [vmem:[%s25878_s3 + $0x1dd0] sm:$0xf]  ;;  %v15014_v49 = vor.u32 %v17484_v38, %v15013_v46  ;;  %v17510_v38 = vld [vmem:[%s25878_s3 + $0x1dc4] sm:$0xf0] }
 0xab0   :  { %v15134_v50 = vor.u32 %v17514_v20, %v15133_v29  ;;  %v17481_v20 = vld [vmem:[%s25878_s3 + $0x1ce4] sm:$0xf]  ;;  %v15125_v46 = vld [vmem:[%s25878_s3 + $0x1db0] sm:$0xf] }
 0xab2   :  { %7801 = vmatpush.bf16.msrb.mxu3 %v15134_v50  ;;  %v15015_v50 = vld [vmem:[%s25878_s3 + $0x1cf8] sm:$0xf0] }
 0xab3   :  { %v7037_v34 = vpop.f32.mrf.mxu3 }
 0xab4   :  { %v23821_v24 = vadd.f32 %v7037_v34, %v23509_v48  ;;  %v7063_v33 = vpop.f32.mrf.mxu2  ;;  %v15109_v48 = vld [vmem:[%s25878_s3 + $0x1da0] sm:$0xf]  ;;  %v15066_v34 = vor.u32 %v17493_v52, %v15063_v30  ;;  %v15127_v52 = vld [vmem:[%s25878_s3 + $0x1dc8] sm:$0xf0] }
 0xab5   :  { %v23824_v4 = vadd.f32 %v7063_v33, %v23488_v53  ;;  %v7026_v26 = vpop.f32.mrf.mxu1  ;;  %v17508_v53 = vld [vmem:[%s25878_s3 + $0x1db4] sm:$0xf0]  ;;  %v17487_v33 = vld [vmem:[%s25878_s3 + $0x1d14] sm:$0xf] }
 0xab6   :  { %v7052_v7 = vpop.f32.mrf.mxu0  ;;  %v15110_v32 = vor.u32 %v17508_v53, %v15109_v48  ;;  %v15039_v26 = vld [vmem:[%s25878_s3 + $0x1d28] sm:$0xf0]  ;;  %v15018_v48 = vor.u32 %v17481_v20, %v15015_v50  ;;  %v15093_v53 = vld [vmem:[%s25878_s3 + $0x1d78] sm:$0xf]  ;;  %v15101_v20 = vld [vmem:[%s25878_s3 + $0x1d80] sm:$0xf] }
 0xab7   :  { %v14913_v7 = vld [vmem:[%s25875_s0 + $0x13] sm:$0x1]  ;;  %v15042_v29 = vor.u32 %v17487_v33, %v15039_v26  ;;  %v17476_v26 = vld [vmem:[%s25878_s3 + $0x1cbc] sm:$0xf]  ;;  %v17504_v50 = vld [vmem:[%s25878_s3 + $0x1d94] sm:$0xf0] }
 0xab8   :  { %7802 = vmatpush.bf16.msrb.mxu3 %v15110_v32  ;;  %v17503_v32 = vld [vmem:[%s25878_s3 + $0x1d8c] sm:$0xf0] }
 0xab9   :  { %v15094_v51 = vor.u32 %v17503_v32, %v15093_v53  ;;  %v17479_v33 = vld [vmem:[%s25878_s3 + $0x1ccc] sm:$0xf0]  ;;  %v15102_v53 = vor.u32 %v17504_v50, %v15101_v20  ;;  %v17501_v32 = vld [vmem:[%s25878_s3 + $0x1d84] sm:$0xf]  ;;  %v17550_v20 = vld [vmem:[%s25878_s3 + $0x1f04] sm:$0xf0] }
 0xabb   :  { %v7039_v62 = vpop.f32.mrf.mxu3 }
 0xabc   :  { %v7065_v56 = vpop.f32.mrf.mxu2  ;;  %7803 = vmatpush.bf16.msrb.mxu3 %v15086_v61  ;;  %v15095_v62 = vld [vmem:[%s25878_s3 + $0x1d90] sm:$0xf0]  ;;  %v17478_v61 = vld [vmem:[%s25878_s3 + $0x1cc4] sm:$0xf0] }
 0xabd   :  { %v7076_v13 = vpop.f32.mrf.mxu1  ;;  %v15098_v56 = vor.u32 %v17500_v41, %v15095_v62  ;;  %v15103_v41 = vld [vmem:[%s25878_s3 + $0x1d98] sm:$0xf0]  ;;  %v14973_v62 = vld [vmem:[%s25878_s3 + $0x1c88] sm:$0xf] }
 0xabe   :  { %v23845_v58 = vadd.f32 %v7076_v13, %v23527_v35  ;;  %v7113_v9 = vpop.f32.mrf.mxu0  ;;  %v15061_v35 = vld [vmem:[%s25878_s3 + $0x1d40] sm:$0xf]  ;;  %v14989_v13 = vld [vmem:[%s25878_s3 + $0x1cb0] sm:$0xf] }
 0xabf   :  { %v7114_v0 = vadd.f32 %v23850_v55, %v7113_v9  ;;  %v15062_v21 = vor.u32 %v17496_v3, %v15061_v35  ;;  %v17475_v9 = vld [vmem:[%s25878_s3 + $0x1cb4] sm:$0xf]  ;;  %v17497_v35 = vld [vmem:[%s25878_s3 + $0x1d5c] sm:$0xf0] }
 0xac0   :  { %v14994_v3 = vor.u32 %v17475_v9, %v14991_v5  ;;  %v15070_v6 = vor.u32 %v17497_v35, %v15069_v60  ;;  %v14975_v9 = vld [vmem:[%s25878_s3 + $0x1ca0] sm:$0xf0]  ;;  %v17498_v5 = vld [vmem:[%s25878_s3 + $0x1d64] sm:$0xf0] }
 0xac1   :  { %v7117_v54 = vmax.f32 %v7114_v0, 0.0  ;;  %7804 = vmatpush.bf16.msrb.mxu3 %v15062_v21  ;;  %v14990_v0 = vor.u32 %v17478_v61, %v14989_v13  ;;  %v17491_v21 = vld [vmem:[%s25878_s3 + $0x1d2c] sm:$0xf0]  ;;  %v17470_v13 = vld [vmem:[%s25878_s3 + $0x1c8c] sm:$0xf] }
 0xac2   :  { %v14978_v60 = vor.u32 %v17470_v13, %v14975_v9  ;;  %v15377_v13 = vld [vmem:[%s25878_s3 + $0x1f68] sm:$0xf0]  ;;  %v15383_v9 = vld [vmem:[%s25878_s3 + $0x1f58] sm:$0xf] }
 0xac3   :  { %v7118_v10 = vpack.c.bf16 %v7117_v54, %v7117_v54  ;;  %v7089_v12 = vpop.f32.mrf.mxu3  ;;  %v15071_v54 = vld [vmem:[%s25878_s3 + $0x1d60] sm:$0xf0] }
 0xac4   :  { %v23884_v14 = vadd.f32 %v7089_v12, %v23536_v18  ;;  %v17509_v18 = vld [vmem:[%s25878_s3 + $0x1dbc] sm:$0xf0]  ;;  %v15074_v40 = vor.u32 %v17494_v8, %v15071_v54  ;;  %v17469_v12 = vld [vmem:[%s25878_s3 + $0x1c84] sm:$0xf] }
 0xac5   :  { %7416 = vmatmul.bf16.vlgmr.msrb.gmra.mxu2 %v7118_v10  ;;  %7429 = vmatmul.bf16.vlgmr.msra.gmra.mxu0 %v7118_v10  ;;  %v7078_v23 = vpop.f32.mrf.mxu1  ;;  %v15118_v39 = vor.u32 %v17509_v18, %v15117_v42  ;;  %v15149_v42 = vld [vmem:[%s25878_s3 + $0x1de0] sm:$0xf]  ;;  %v17516_v18 = vld [vmem:[%s25878_s3 + $0x1df4] sm:$0xf0] }
 0xac6   :  { %7442 = vmatmul.bf16.vlgmr.msra.gmra.mxu1 %v7118_v10  ;;  %7455 = vmatmul.bf16.vlgmr.msra.gmra.mxu3 %v7118_v10  ;;  %v7115_v57 = vpop.f32.mrf.mxu0  ;;  %v15050_v23 = vor.u32 %v17488_v17, %v15047_v15  ;;  %v15053_v54 = vld [vmem:[%s25878_s3 + $0x1d20] sm:$0xf] }
 0xac7   :  { %7814 = vmatpush.bf16.msra.mxu1 %v15138_v59  ;;  %7827 = vmatpush.bf16.msrb.mxu2 %v15142_v16  ;;  %v14970_v16 = vor.u32 %v17469_v12, %v14967_v45  ;;  %v15150_v57 = vor.u32 %v17516_v18, %v15149_v42  ;;  %v15055_v12 = vld [vmem:[%s25878_s3 + $0x1d38] sm:$0xf0]  ;;  %v15029_v45 = vld [vmem:[%s25878_s3 + $0x1cf0] sm:$0xf]  ;;  %v15005_v15 = vld [vmem:[%s25878_s3 + $0x1cc0] sm:$0xf] }
 0xac8   :  { %7840 = vmatpush.bf16.msra.mxu0 %v15146_v1  ;;  %7805 = vmatpush.bf16.msrb.mxu3 %v15038_v31  ;;  %v15046_v1 = vor.u32 %v17491_v21, %v15045_v11  ;;  %v17485_v31 = vld [vmem:[%s25878_s3 + $0x1cfc] sm:$0xf0]  ;;  %v17486_v11 = vld [vmem:[%s25878_s3 + $0x1d04] sm:$0xf0]  ;;  %v17483_v21 = vld [vmem:[%s25878_s3 + $0x1cf4] sm:$0xf] }
 0xac9   :  { %v17480_v42 = vld [vmem:[%s25878_s3 + $0x1cd4] sm:$0xf0] }
 0xaca   :  { %v15006_v18 = vor.u32 %v17480_v42, %v15005_v15  ;;  %v17541_v15 = vld [vmem:[%s25878_s3 + $0x1ec4] sm:$0xf]  ;;  %v15305_v42 = vld [vmem:[%s25878_s3 + $0x1ed8] sm:$0xf0] }
 0xacb   :  { %v7091_v43 = vpop.f32.mrf.mxu3  ;;  %7815 = vmatpush.bf16.msra.mxu1 %v15114_v44  ;;  %7828 = vmatpush.bf16.msrb.mxu2 %v15118_v39  ;;  %v15154_v44 = vor.u32 %v17513_v28, %v15151_v47  ;;  %v15022_v39 = vor.u32 %v17485_v31, %v15021_v27  ;;  %v15007_v28 = vld [vmem:[%s25878_s3 + $0x1cd8] sm:$0xf0]  ;;  %v14981_v47 = vld [vmem:[%s25878_s3 + $0x1c90] sm:$0xf]  ;;  %v17474_v27 = vld [vmem:[%s25878_s3 + $0x1ca4] sm:$0xf0] }
 0xacc   :  { %7841 = vmatpush.bf16.msra.mxu0 %v15122_v36  ;;  %7806 = vmatpush.bf16.msrb.mxu3 %v15014_v49  ;;  %v15023_v36 = vld [vmem:[%s25878_s3 + $0x1d00] sm:$0xf0]  ;;  %v17507_v49 = vld [vmem:[%s25878_s3 + $0x1db4] sm:$0xf] }
 0xacd   :  { %v15026_v43 = vor.u32 %v17482_v37, %v15023_v36  ;;  %v15130_v30 = vor.u32 %v17507_v49, %v15127_v52  ;;  %v17471_v31 = vld [vmem:[%s25878_s3 + $0x1c94] sm:$0xf]  ;;  %v14983_v37 = vld [vmem:[%s25878_s3 + $0x1ca8] sm:$0xf0] }
 0xacf   :  { %7816 = vmatpush.bf16.msra.mxu1 %v15090_v25  ;;  %7829 = vmatpush.bf16.msrb.mxu2 %v15094_v51  ;;  %v15126_v25 = vor.u32 %v17510_v38, %v15125_v46  ;;  %v15106_v51 = vor.u32 %v17501_v32, %v15103_v41  ;;  %v14982_v38 = vor.u32 %v17474_v27, %v14981_v47  ;;  %v17538_v47 = vld [vmem:[%s25878_s3 + $0x1ea4] sm:$0xf0]  ;;  %v15281_v27 = vld [vmem:[%s25878_s3 + $0x1ea8] sm:$0xf0] }
 0xad0   :  { %7842 = vmatpush.bf16.msra.mxu0 %v15098_v56  ;;  %7807 = vmatpush.bf16.msrb.mxu3 %v14990_v0  ;;  %v17473_v56 = vld [vmem:[%s25878_s3 + $0x1c9c] sm:$0xf0]  ;;  %v15077_v0 = vld [vmem:[%s25878_s3 + $0x1d50] sm:$0xf] }
 0xad1   :  { %v14974_v61 = vor.u32 %v17473_v56, %v14973_v62  ;;  %v15078_v35 = vor.u32 %v17498_v5, %v15077_v0  ;;  %v17559_v56 = vld [vmem:[%s25878_s3 + $0x1f54] sm:$0xf]  ;;  %v17563_v0 = vld [vmem:[%s25878_s3 + $0x1f6c] sm:$0xf0] }
 0xad3   :  { %7817 = vmatpush.bf16.msra.mxu1 %v15066_v34  ;;  %7830 = vmatpush.bf16.msrb.mxu2 %v15070_v6  ;;  %v14997_v34 = vld [vmem:[%s25878_s3 + $0x1cb8] sm:$0xf]  ;;  %v15079_v6 = vld [vmem:[%s25878_s3 + $0x1d68] sm:$0xf0] }
 0xad4   :  { %7843 = vmatpush.bf16.msra.mxu0 %v15074_v40  ;;  %v17492_v40 = vld [vmem:[%s25878_s3 + $0x1d34] sm:$0xf0] }
 0xad5   :  { %7468 = vmatmul.bf16.vlgmr.msra.gmra.mxu2 %v7118_v10  ;;  %7481 = vmatmul.bf16.vlgmr.msrb.gmra.mxu0 %v7118_v10  ;;  %v17472_v10 = vld [vmem:[%s25878_s3 + $0x1c94] sm:$0xf0] }
 0xad6   :  { %14914 = vmatmul.msk.bf16.vlgmr.msrb.gmra.mxu1 %vm35_vm1, %v14913_v7  ;;  %v14966_v59 = vor.u32 %v17472_v10, %v14965_v22  ;;  %v14998_v7 = vor.u32 %v17479_v33, %v14997_v34  ;;  %v17489_v22 = vld [vmem:[%s25878_s3 + $0x1d24] sm:$0xf]  ;;  %v15054_v10 = vor.u32 %v17492_v40, %v15053_v54  ;;  %v17562_v33 = vld [vmem:[%s25878_s3 + $0x1f64] sm:$0xf0] }
 0xad7   :  { %7818 = vmatpush.bf16.msra.mxu1 %v15042_v29  ;;  %7831 = vmatpush.bf16.msrb.mxu2 %v15046_v1  ;;  %v14999_v29 = vld [vmem:[%s25878_s3 + $0x1cd0] sm:$0xf0]  ;;  %v15030_v1 = vor.u32 %v17486_v11, %v15029_v45 }
 0xad8   :  { %7808 = vmatpush.bf16.msrb.mxu3 %v14966_v59  ;;  %7844 = vmatpush.bf16.msra.mxu0 %v15050_v23  ;;  %v15058_v59 = vor.u32 %v17489_v22, %v15055_v12  ;;  %v17477_v23 = vld [vmem:[%s25878_s3 + $0x1cc4] sm:$0xf]  ;;  %v15384_v12 = vor.u32 %v17563_v0, %v15383_v9  ;;  %v17542_v0 = vld [vmem:[%s25878_s3 + $0x1ecc] sm:$0xf] }
 0xad9   :  { %v17553_v22 = vld [vmem:[%s25878_s3 + $0x1f24] sm:$0xf] }
 0xadb   :  { %7819 = vmatpush.bf16.msra.mxu1 %v15018_v48  ;;  %7832 = vmatpush.bf16.msrb.mxu2 %v15022_v39  ;;  %v15002_v48 = vor.u32 %v17476_v26, %v14999_v29  ;;  %v15327_v29 = vld [vmem:[%s25878_s3 + $0x1ef0] sm:$0xf] }
 0xadc   :  { %7853 = vmatpush.bf16.msra.mxu3 %v15150_v57  ;;  %7845 = vmatpush.bf16.msra.mxu0 %v15026_v43  ;;  %v14986_v43 = vor.u32 %v17471_v31, %v14983_v37  ;;  %v15328_v32 = vor.u32 %v17550_v20, %v15327_v29  ;;  %v15359_v31 = vld [vmem:[%s25878_s3 + $0x1f28] sm:$0xf]  ;;  %v17557_v37 = vld [vmem:[%s25878_s3 + $0x1f3c] sm:$0xf0]  ;;  %v17548_v29 = vld [vmem:[%s25878_s3 + $0x1efc] sm:$0xf] }
 0xadf   :  { %7820 = vmatpush.bf16.msra.mxu1 %v14994_v3  ;;  %7833 = vmatpush.bf16.msrb.mxu2 %v14998_v7  ;;  %v17495_v3 = vld [vmem:[%s25878_s3 + $0x1d54] sm:$0xf] }
 0xae0   :  { %7854 = vmatpush.bf16.msra.mxu3 %v15126_v25  ;;  %7846 = vmatpush.bf16.msra.mxu0 %v15002_v48  ;;  %v15082_v8 = vor.u32 %v17495_v3, %v15079_v6 }
 0xae3   :  { %7821 = vmatpush.bf16.msra.mxu1 %v14970_v16  ;;  %7834 = vmatpush.bf16.msrb.mxu2 %v14974_v61  ;;  %v15031_v16 = vld [vmem:[%s25878_s3 + $0x1d08] sm:$0xf0]  ;;  %v15303_v61 = vld [vmem:[%s25878_s3 + $0x1ec0] sm:$0xf] }
 0xae4   :  { %7855 = vmatpush.bf16.msra.mxu3 %v15102_v53  ;;  %7847 = vmatpush.bf16.msra.mxu0 %v14978_v60  ;;  %v15034_v17 = vor.u32 %v17483_v21, %v15031_v16  ;;  %v17560_v60 = vld [vmem:[%s25878_s3 + $0x1f5c] sm:$0xf]  ;;  %v15329_v16 = vld [vmem:[%s25878_s3 + $0x1f08] sm:$0xf0] }
 0xae7   :  { %7866 = vmatpush.bf16.msrb.mxu1 %v15154_v44  ;;  %7897 = vmatpush.bf16.msra.mxu2 %v17889_v2  ;;  %v15010_v44 = vor.u32 %v17477_v23, %v15007_v28  ;;  %v15308_v23 = vor.u32 %v17541_v15, %v15305_v42  ;;  %v15279_v28 = vld [vmem:[%s25878_s3 + $0x1e90] sm:$0xf]  ;;  %v15393_v15 = vld [vmem:[%s25878_s3 + $0x1f78] sm:$0xf0] }
 0xae8   :  { %7856 = vmatpush.bf16.msra.mxu3 %v15078_v35  ;;  %v15385_v35 = vld [vmem:[%s25878_s3 + $0x1f70] sm:$0xf0] }
 0xaeb   :  { %7867 = vmatpush.bf16.msrb.mxu1 %v15130_v30 }
 0xaec   :  { %7857 = vmatpush.bf16.msra.mxu3 %v15054_v10  ;;  %v15353_v10 = vld [vmem:[%s25878_s3 + $0x1f38] sm:$0xf0] }
 0xaed   :  { %v15356_v21 = vor.u32 %v17553_v22, %v15353_v10  ;;  %v15287_v10 = vld [vmem:[%s25878_s3 + $0x1e98] sm:$0xf] }
 0xaef   :  { %7868 = vmatpush.bf16.msrb.mxu1 %v15106_v51 }
 0xaf0   :  { %7858 = vmatpush.bf16.msra.mxu3 %v15030_v1 }
 0xaf3   :  { %7869 = vmatpush.bf16.msrb.mxu1 %v15082_v8  ;;  %v15380_v8 = vor.u32 %v17559_v56, %v15377_v13  ;;  %v15233_v56 = vld [vmem:[%s25878_s3 + $0x1e48] sm:$0xf0]  ;;  %v15311_v13 = vld [vmem:[%s25878_s3 + $0x1ec8] sm:$0xf] }
 0xaf4   :  { %7859 = vmatpush.bf16.msra.mxu3 %v15006_v18  ;;  %v15155_v18 = vld [vmem:[%s25875_s0 + $0x14] sm:$0x1] }
 0xaf7   :  { %7870 = vmatpush.bf16.msrb.mxu1 %v15058_v59  ;;  %v15388_v59 = vor.u32 %v17560_v60, %v15385_v35  ;;  %v15207_v60 = vld [vmem:[%s25878_s3 + $0x1e00] sm:$0xf] }
 0xaf8   :  { %7860 = vmatpush.bf16.msra.mxu3 %v14982_v38  ;;  %v15360_v38 = vor.u32 %v17557_v37, %v15359_v31 }
 0xafb   :  { %7871 = vmatpush.bf16.msrb.mxu1 %v15034_v17 }
 0xaff   :  { %7872 = vmatpush.bf16.msrb.mxu1 %v15010_v44  ;;  %v15280_v44 = vor.u32 %v17538_v47, %v15279_v28  ;;  %v17530_v28 = vld [vmem:[%s25878_s3 + $0x1e6c] sm:$0xf] }
 0xb03   :  { %7873 = vmatpush.bf16.msrb.mxu1 %v14986_v43  ;;  %v17554_v43 = vld [vmem:[%s25878_s3 + $0x1f2c] sm:$0xf] }
 0xb42   :  { %v7430_v57 = vpop.f32.mrf.mxu0 }
 0xb43   :  { %v24132_v39 = vadd.f32 %v7430_v57, %v23821_v24  ;;  %v7443_v36 = vpop.f32.mrf.mxu1  ;;  %v17535_v57 = vld [vmem:[%s25878_s3 + $0x1e94] sm:$0xf] }
 0xb44   :  { %v24135_v46 = vadd.f32 %v7443_v36, %v23818_v63  ;;  %v15375_v63 = vld [vmem:[%s25878_s3 + $0x1f50] sm:$0xf]  ;;  %v15284_v36 = vor.u32 %v17535_v57, %v15281_v27  ;;  %v15265_v57 = vld [vmem:[%s25878_s3 + $0x1e80] sm:$0xf0]  ;;  %v17558_v27 = vld [vmem:[%s25878_s3 + $0x1f44] sm:$0xf0] }
 0xb45   :  { %v15376_v26 = vor.u32 %v17562_v33, %v15375_v63  ;;  %v17529_v63 = vld [vmem:[%s25878_s3 + $0x1e64] sm:$0xf]  ;;  %v15268_v31 = vor.u32 %v17530_v28, %v15265_v57  ;;  %v15225_v57 = vld [vmem:[%s25878_s3 + $0x1e28] sm:$0xf0] }
 0xb47   :  { %8194 = vmatpush.bf16.msrb.mxu0 %v15376_v26  ;;  %v15257_v26 = vld [vmem:[%s25878_s3 + $0x1e78] sm:$0xf0] }
 0xb48   :  { %v7417_v25 = vpop.f32.mrf.mxu2 }
 0xb49   :  { %v24138_v49 = vadd.f32 %v7417_v25, %v23815_v19  ;;  %v7456_v52 = vpop.f32.mrf.mxu3  ;;  %v15351_v19 = vld [vmem:[%s25878_s3 + $0x1f20] sm:$0xf]  ;;  %v15361_v25 = vld [vmem:[%s25878_s3 + $0x1f40] sm:$0xf0] }
 0xb4a   :  { %v24141_v30 = vadd.f32 %v7456_v52, %v23824_v4  ;;  %v7432_v24 = vpop.f32.mrf.mxu0  ;;  %v17556_v4 = vld [vmem:[%s25878_s3 + $0x1f34] sm:$0xf0]  ;;  %v15364_v52 = vor.u32 %v17554_v43, %v15361_v25 }
 0xb4b   :  { %v7445_v34 = vpop.f32.mrf.mxu1  ;;  %v15352_v7 = vor.u32 %v17556_v4, %v15351_v19  ;;  %v15255_v24 = vld [vmem:[%s25878_s3 + $0x1e60] sm:$0xf]  ;;  %v15260_v19 = vor.u32 %v17529_v63, %v15257_v26  ;;  %v15335_v4 = vld [vmem:[%s25878_s3 + $0x1ef8] sm:$0xf]  ;;  %v15241_v63 = vld [vmem:[%s25878_s3 + $0x1e50] sm:$0xf0] }
 0xb4c   :  { %v17532_v34 = vld [vmem:[%s25878_s3 + $0x1e74] sm:$0xf0] }
 0xb4d   :  { %8195 = vmatpush.bf16.msrb.mxu0 %v15352_v7  ;;  %v15256_v33 = vor.u32 %v17532_v34, %v15255_v24  ;;  %v17551_v7 = vld [vmem:[%s25878_s3 + $0x1f0c] sm:$0xf0]  ;;  %v15239_v25 = vld [vmem:[%s25878_s3 + $0x1e38] sm:$0xf]  ;;  %v17524_v24 = vld [vmem:[%s25878_s3 + $0x1e3c] sm:$0xf] }
 0xb4e   :  { %v15336_v20 = vor.u32 %v17551_v7, %v15335_v4  ;;  %v17552_v26 = vld [vmem:[%s25878_s3 + $0x1f14] sm:$0xf0]  ;;  %v17549_v7 = vld [vmem:[%s25878_s3 + $0x1f04] sm:$0xf] }
 0xb50   :  { %v7419_v50 = vpop.f32.mrf.mxu2 }
 0xb51   :  { %v7458_v48 = vpop.f32.mrf.mxu3  ;;  %8196 = vmatpush.bf16.msrb.mxu0 %v15328_v32  ;;  %v15337_v50 = vld [vmem:[%s25878_s3 + $0x1f10] sm:$0xf0]  ;;  %v17526_v32 = vld [vmem:[%s25878_s3 + $0x1e44] sm:$0xf0] }
 0xb52   :  { %v7482_v53 = vpop.f32.mrf.mxu0  ;;  %v15340_v48 = vor.u32 %v17548_v29, %v15337_v50  ;;  %v15345_v29 = vld [vmem:[%s25878_s3 + $0x1f18] sm:$0xf0]  ;;  %v15215_v50 = vld [vmem:[%s25878_s3 + $0x1e08] sm:$0xf] }
 0xb53   :  { %v24162_v41 = vadd.f32 %v7482_v53, %v23884_v14  ;;  %v7506_v51 = vpop.f32.mrf.mxu1  ;;  %v17544_v14 = vld [vmem:[%s25878_s3 + $0x1ed4] sm:$0xf0]  ;;  %v15231_v53 = vld [vmem:[%s25878_s3 + $0x1e30] sm:$0xf] }
 0xb54   :  { %v7507_v62 = vadd.f32 %v23850_v55, %v7506_v51  ;;  %v15304_v54 = vor.u32 %v17544_v14, %v15303_v61  ;;  %v17523_v51 = vld [vmem:[%s25878_s3 + $0x1e34] sm:$0xf]  ;;  %v17545_v61 = vld [vmem:[%s25878_s3 + $0x1edc] sm:$0xf0] }
 0xb55   :  { %v15236_v14 = vor.u32 %v17523_v51, %v15233_v56  ;;  %v15312_v9 = vor.u32 %v17545_v61, %v15311_v13  ;;  %v15217_v51 = vld [vmem:[%s25878_s3 + $0x1e20] sm:$0xf0]  ;;  %v17546_v56 = vld [vmem:[%s25878_s3 + $0x1ee4] sm:$0xf0] }
 0xb56   :  { %v7510_v5 = vmax.f32 %v7507_v62, 0.0  ;;  %8197 = vmatpush.bf16.msrb.mxu0 %v15304_v54  ;;  %v15232_v62 = vor.u32 %v17526_v32, %v15231_v53  ;;  %v17518_v53 = vld [vmem:[%s25878_s3 + $0x1e0c] sm:$0xf] }
 0xb57   :  { %v15220_v13 = vor.u32 %v17518_v53, %v15217_v51  ;;  %v15619_v51 = vld [vmem:[%s25878_s3 + $0x20e8] sm:$0xf0] }
 0xb58   :  { %v7511_v3 = vpack.c.bf16 %v7510_v5, %v7510_v5  ;;  %v7469_v6 = vpop.f32.mrf.mxu2  ;;  %v15313_v5 = vld [vmem:[%s25878_s3 + $0x1ee0] sm:$0xf0] }
 0xb59   :  { %v24190_v40 = vadd.f32 %v7469_v6, %v23845_v58  ;;  %v17547_v58 = vld [vmem:[%s25878_s3 + $0x1ef4] sm:$0xf]  ;;  %v15316_v35 = vor.u32 %v17542_v0, %v15313_v5  ;;  %v17517_v6 = vld [vmem:[%s25878_s3 + $0x1e04] sm:$0xf]  ;;  %v15295_v5 = vld [vmem:[%s25878_s3 + $0x1ea0] sm:$0xf] }
 0xb5a   :  { %7809 = vmatmul.bf16.vlgmr.msrb.gmra.mxu3 %v7511_v3  ;;  %7822 = vmatmul.bf16.vlgmr.msra.gmra.mxu1 %v7511_v3  ;;  %v7484_v45 = vpop.f32.mrf.mxu0  ;;  %v15332_v17 = vor.u32 %v17547_v58, %v15329_v16  ;;  %v17564_v58 = vld [vmem:[%s25878_s3 + $0x1f74] sm:$0xf0] }
 0xb5b   :  { %7835 = vmatmul.bf16.vlgmr.msrb.gmra.mxu2 %v7511_v3  ;;  %7848 = vmatmul.bf16.vlgmr.msra.gmra.mxu0 %v7511_v3  ;;  %v7508_v11 = vpop.f32.mrf.mxu1 }
 0xb5c   :  { %8207 = vmatpush.bf16.msrb.mxu2 %v15380_v8  ;;  %8220 = vmatpush.bf16.msrb.mxu3 %v15384_v12  ;;  %v15209_v8 = vld [vmem:[%s25878_s3 + $0x1e18] sm:$0xf0]  ;;  %v17539_v12 = vld [vmem:[%s25878_s3 + $0x1eac] sm:$0xf0]  ;;  %v15289_v11 = vld [vmem:[%s25878_s3 + $0x1eb0] sm:$0xf0] }
 0xb5d   :  { %8233 = vmatpush.bf16.msra.mxu1 %v15388_v59  ;;  %8198 = vmatpush.bf16.msrb.mxu0 %v15280_v44  ;;  %v15212_v22 = vor.u32 %v17517_v6, %v15209_v8  ;;  %v17536_v59 = vld [vmem:[%s25878_s3 + $0x1e9c] sm:$0xf]  ;;  %v15288_v45 = vor.u32 %v17539_v12, %v15287_v10  ;;  %v15367_v44 = vld [vmem:[%s25878_s3 + $0x1f30] sm:$0xf]  ;;  %v17531_v10 = vld [vmem:[%s25878_s3 + $0x1e74] sm:$0xf] }
 0xb5e   :  { %v15292_v16 = vor.u32 %v17536_v59, %v15289_v11  ;;  %v15368_v37 = vor.u32 %v17558_v27, %v15367_v44  ;;  %v15297_v6 = vld [vmem:[%s25878_s3 + $0x1eb8] sm:$0xf0] }
 0xb60   :  { %v7471_v1 = vpop.f32.mrf.mxu2  ;;  %8208 = vmatpush.bf16.msrb.mxu2 %v15356_v21  ;;  %8221 = vmatpush.bf16.msrb.mxu3 %v15360_v38  ;;  %v15391_v21 = vld [vmem:[%s25878_s3 + $0x1f60] sm:$0xf]  ;;  %v15369_v38 = vld [vmem:[%s25878_s3 + $0x1f48] sm:$0xf0] }
 0xb61   :  { %8234 = vmatpush.bf16.msra.mxu1 %v15364_v52  ;;  %8199 = vmatpush.bf16.msrb.mxu0 %v15256_v33  ;;  %v15392_v1 = vor.u32 %v17564_v58, %v15391_v21  ;;  %v17527_v52 = vld [vmem:[%s25878_s3 + $0x1e4c] sm:$0xf0]  ;;  %v15343_v33 = vld [vmem:[%s25878_s3 + $0x1f00] sm:$0xf] }
 0xb62   :  { %v15240_v34 = vor.u32 %v17527_v52, %v15239_v25  ;;  %v15344_v4 = vor.u32 %v17552_v26, %v15343_v33  ;;  %v17604_v33 = vld [vmem:[%s25878_s3 + $0x20b4] sm:$0xf0] }
 0xb64   :  { %8209 = vmatpush.bf16.msrb.mxu2 %v15332_v17  ;;  %8222 = vmatpush.bf16.msrb.mxu3 %v15336_v20  ;;  %v17561_v17 = vld [vmem:[%s25878_s3 + $0x1f64] sm:$0xf]  ;;  %v15348_v20 = vor.u32 %v17549_v7, %v15345_v29  ;;  %v17598_v7 = vld [vmem:[%s25878_s3 + $0x2084] sm:$0xf0] }
 0xb65   :  { %8235 = vmatpush.bf16.msra.mxu1 %v15340_v48  ;;  %8200 = vmatpush.bf16.msrb.mxu0 %v15232_v62  ;;  %v15396_v42 = vor.u32 %v17561_v17, %v15393_v15  ;;  %v17521_v48 = vld [vmem:[%s25878_s3 + $0x1e1c] sm:$0xf0]  ;;  %v15319_v62 = vld [vmem:[%s25878_s3 + $0x1ed0] sm:$0xf]  ;;  %v17525_v15 = vld [vmem:[%s25878_s3 + $0x1e44] sm:$0xf] }
 0xb66   :  { %v15216_v32 = vor.u32 %v17521_v48, %v15215_v50  ;;  %v15320_v61 = vor.u32 %v17546_v56, %v15319_v62  ;;  %v15545_v62 = vld [vmem:[%s25878_s3 + $0x2040] sm:$0xf]  ;;  %v17611_v56 = vld [vmem:[%s25878_s3 + $0x20ec] sm:$0xf0] }
 0xb68   :  { %8210 = vmatpush.bf16.msrb.mxu2 %v15308_v23  ;;  %8223 = vmatpush.bf16.msrb.mxu3 %v15312_v9  ;;  %v15263_v23 = vld [vmem:[%s25878_s3 + $0x1e68] sm:$0xf]  ;;  %v15321_v9 = vld [vmem:[%s25878_s3 + $0x1ee8] sm:$0xf0] }
 0xb69   :  { %8236 = vmatpush.bf16.msra.mxu1 %v15316_v35  ;;  %v17537_v35 = vld [vmem:[%s25878_s3 + $0x1ea4] sm:$0xf] }
 0xb6a   :  { %7861 = vmatmul.bf16.vlgmr.msra.gmra.mxu3 %v7511_v3  ;;  %7874 = vmatmul.bf16.vlgmr.msrb.gmra.mxu1 %v7511_v3  ;;  %v17520_v3 = vld [vmem:[%s25878_s3 + $0x1e14] sm:$0xf0]  ;;  %v15300_v8 = vor.u32 %v17537_v35, %v15297_v6  ;;  %v15595_v35 = vld [vmem:[%s25878_s3 + $0x20b8] sm:$0xf0] }
 0xb6b   :  { %15156 = vmatmul.msk.bf16.vlgmr.msra.gmra.mxu2 %vm35_vm1, %v15155_v18  ;;  %v15208_v54 = vor.u32 %v17520_v3, %v15207_v60  ;;  %v17533_v18 = vld [vmem:[%s25878_s3 + $0x1e7c] sm:$0xf0]  ;;  %v17540_v60 = vld [vmem:[%s25878_s3 + $0x1eb4] sm:$0xf0] }
 0xb6c   :  { %8211 = vmatpush.bf16.msrb.mxu2 %v15284_v36  ;;  %8224 = vmatpush.bf16.msrb.mxu3 %v15288_v45  ;;  %v15264_v47 = vor.u32 %v17533_v18, %v15263_v23  ;;  %v17555_v36 = vld [vmem:[%s25878_s3 + $0x1f34] sm:$0xf]  ;;  %v15296_v3 = vor.u32 %v17540_v60, %v15295_v5  ;;  %v15273_v45 = vld [vmem:[%s25878_s3 + $0x1e88] sm:$0xf0]  ;;  %v15223_v18 = vld [vmem:[%s25878_s3 + $0x1e10] sm:$0xf] }
 0xb6d   :  { %8201 = vmatpush.bf16.msrb.mxu0 %v15208_v54  ;;  %8237 = vmatpush.bf16.msra.mxu1 %v15292_v16  ;;  %v15372_v43 = vor.u32 %v17555_v36, %v15369_v38  ;;  %v15271_v54 = vld [vmem:[%s25878_s3 + $0x1e70] sm:$0xf]  ;;  %v15276_v58 = vor.u32 %v17531_v10, %v15273_v45  ;;  %v15247_v16 = vld [vmem:[%s25878_s3 + $0x1e40] sm:$0xf]  ;;  %v17601_v60 = vld [vmem:[%s25878_s3 + $0x20a4] sm:$0xf] }
 0xb6e   :  { %v17595_v10 = vld [vmem:[%s25878_s3 + $0x2074] sm:$0xf]  ;;  %v17589_v45 = vld [vmem:[%s25878_s3 + $0x2044] sm:$0xf] }
 0xb70   :  { %8212 = vmatpush.bf16.msrb.mxu2 %v15260_v19  ;;  %8225 = vmatpush.bf16.msrb.mxu3 %v15264_v47  ;;  %v15244_v19 = vor.u32 %v17524_v24, %v15241_v63  ;;  %v17519_v47 = vld [vmem:[%s25878_s3 + $0x1e14] sm:$0xf]  ;;  %v15617_v24 = vld [vmem:[%s25878_s3 + $0x20d0] sm:$0xf]  ;;  %v15593_v63 = vld [vmem:[%s25878_s3 + $0x20a0] sm:$0xf] }
 0xb71   :  { %8246 = vmatpush.bf16.msra.mxu0 %v15392_v1  ;;  %8238 = vmatpush.bf16.msra.mxu1 %v15268_v31  ;;  %v17528_v1 = vld [vmem:[%s25878_s3 + $0x1e54] sm:$0xf0] }
 0xb74   :  { %8213 = vmatpush.bf16.msrb.mxu2 %v15236_v14  ;;  %8226 = vmatpush.bf16.msrb.mxu3 %v15240_v34  ;;  %v17543_v14 = vld [vmem:[%s25878_s3 + $0x1ed4] sm:$0xf] }
 0xb75   :  { %8247 = vmatpush.bf16.msra.mxu0 %v15368_v37  ;;  %8239 = vmatpush.bf16.msra.mxu1 %v15244_v19  ;;  %v15324_v0 = vor.u32 %v17543_v14, %v15321_v9  ;;  %v15594_v19 = vor.u32 %v17604_v33, %v15593_v63  ;;  %v15627_v14 = vld [vmem:[%s25878_s3 + $0x20f0] sm:$0xf0] }
 0xb76   :  { %v15579_v33 = vld [vmem:[%s25878_s3 + $0x2090] sm:$0xf0] }
 0xb78   :  { %8214 = vmatpush.bf16.msrb.mxu2 %v15212_v22  ;;  %8227 = vmatpush.bf16.msrb.mxu3 %v15216_v32  ;;  %v17534_v22 = vld [vmem:[%s25878_s3 + $0x1e84] sm:$0xf0]  ;;  %v17607_v32 = vld [vmem:[%s25878_s3 + $0x20d4] sm:$0xf] }
 0xb79   :  { %8248 = vmatpush.bf16.msra.mxu0 %v15344_v4  ;;  %8240 = vmatpush.bf16.msra.mxu1 %v15220_v13  ;;  %v15272_v59 = vor.u32 %v17534_v22, %v15271_v54  ;;  %v15569_v4 = vld [vmem:[%s25878_s3 + $0x2070] sm:$0xf]  ;;  %v15598_v22 = vor.u32 %v17601_v60, %v15595_v35  ;;  %v17584_v35 = vld [vmem:[%s25878_s3 + $0x201c] sm:$0xf] }
 0xb7a   :  { %v17587_v60 = vld [vmem:[%s25878_s3 + $0x202c] sm:$0xf0] }
 0xb7c   :  { %8259 = vmatpush.bf16.msra.mxu2 %v15396_v42  ;;  %8290 = vmatpush.bf16.msra.mxu3 %v17889_v2  ;;  %v15248_v42 = vor.u32 %v17528_v1, %v15247_v16  ;;  %v15397_v16 = vld [vmem:[%s25875_s0 + $0x15] sm:$0x1]  ;;  %v15521_v1 = vld [vmem:[%s25878_s3 + $0x2010] sm:$0xf] }
 0xb7d   :  { %8249 = vmatpush.bf16.msra.mxu0 %v15320_v61  ;;  %v17608_v61 = vld [vmem:[%s25878_s3 + $0x20dc] sm:$0xf] }
 0xb7e   :  { %v15630_v6 = vor.u32 %v17608_v61, %v15627_v14  ;;  %v17565_v61 = vld [vmem:[%s25878_s3 + $0x1f84] sm:$0xf]  ;;  %v15451_v14 = vld [vmem:[%s25878_s3 + $0x1f98] sm:$0xf0] }
 0xb80   :  { %8260 = vmatpush.bf16.msra.mxu2 %v15372_v43  ;;  %v15228_v43 = vor.u32 %v17519_v47, %v15225_v57  ;;  %v17602_v57 = vld [vmem:[%s25878_s3 + $0x20ac] sm:$0xf] }
 0xb81   :  { %8250 = vmatpush.bf16.msra.mxu0 %v15296_v3 }
 0xb84   :  { %8261 = vmatpush.bf16.msra.mxu2 %v15348_v20  ;;  %v15570_v20 = vor.u32 %v17598_v7, %v15569_v4  ;;  %v15473_v4 = vld [vmem:[%s25878_s3 + $0x1fb0] sm:$0xf]  ;;  %v17574_v7 = vld [vmem:[%s25878_s3 + $0x1fc4] sm:$0xf0] }
 0xb85   :  { %8251 = vmatpush.bf16.msra.mxu0 %v15272_v59 }
 0xb88   :  { %8262 = vmatpush.bf16.msra.mxu2 %v15324_v0  ;;  %v15622_v0 = vor.u32 %v17607_v32, %v15619_v51 }
 0xb89   :  { %8252 = vmatpush.bf16.msra.mxu0 %v15248_v42 }
 0xb8c   :  { %8263 = vmatpush.bf16.msra.mxu2 %v15300_v8 }
 0xb90   :  { %8264 = vmatpush.bf16.msra.mxu2 %v15276_v58 }
 0xbd7   :  { %v7823_v12 = vpop.f32.mrf.mxu1 }
 0xbd8   :  { %v24420_v11 = vadd.f32 %v7823_v12, %v24132_v39  ;;  %v7849_v21 = vpop.f32.mrf.mxu0  ;;  %v15249_v39 = vld [vmem:[%s25878_s3 + $0x1e58] sm:$0xf0]  ;;  %v15571_v12 = vld [vmem:[%s25878_s3 + $0x2088] sm:$0xf0] }
 0xbd9   :  { %v24429_v17 = vadd.f32 %v7849_v21, %v24141_v30  ;;  %v15252_v23 = vor.u32 %v17525_v15, %v15249_v39  ;;  %v17522_v30 = vld [vmem:[%s25878_s3 + $0x1e24] sm:$0xf0]  ;;  %v15574_v59 = vor.u32 %v17595_v10, %v15571_v12  ;;  %v15547_v21 = vld [vmem:[%s25878_s3 + $0x2058] sm:$0xf0]  ;;  %v17583_v39 = vld [vmem:[%s25878_s3 + $0x2014] sm:$0xf] }
 0xbda   :  { %v15224_v36 = vor.u32 %v17522_v30, %v15223_v18  ;;  %v15550_v58 = vor.u32 %v17589_v45, %v15547_v21  ;;  %v17586_v15 = vld [vmem:[%s25878_s3 + $0x2024] sm:$0xf0]  ;;  %v17605_v30 = vld [vmem:[%s25878_s3 + $0x20bc] sm:$0xf0]  ;;  %v17609_v12 = vld [vmem:[%s25878_s3 + $0x20e4] sm:$0xf] }
 0xbdb   :  { %8265 = vmatpush.bf16.msra.mxu2 %v15252_v23  ;;  %v15522_v42 = vor.u32 %v17586_v15, %v15521_v1  ;;  %v15523_v23 = vld [vmem:[%s25878_s3 + $0x2028] sm:$0xf0]  ;;  %v15601_v18 = vld [vmem:[%s25878_s3 + $0x20a8] sm:$0xf]  ;;  %v15507_v15 = vld [vmem:[%s25878_s3 + $0x2000] sm:$0xf0] }
 0xbdc   :  { %8253 = vmatpush.bf16.msra.mxu0 %v15224_v36  ;;  %v15602_v47 = vor.u32 %v17605_v30, %v15601_v18  ;;  %v15497_v36 = vld [vmem:[%s25878_s3 + $0x1fe0] sm:$0xf]  ;;  %v15505_v21 = vld [vmem:[%s25878_s3 + $0x1fe8] sm:$0xf]  ;;  %v17603_v30 = vld [vmem:[%s25878_s3 + $0x20b4] sm:$0xf] }
 0xbdd   :  { %v7810_v28 = vpop.f32.mrf.mxu3 }
 0xbde   :  { %v24450_v44 = vadd.f32 %v7810_v28, %v24138_v49  ;;  %v7836_v27 = vpop.f32.mrf.mxu2  ;;  %v17610_v49 = vld [vmem:[%s25878_s3 + $0x20e4] sm:$0xf0]  ;;  %v15526_v28 = vor.u32 %v17583_v39, %v15523_v23  ;;  %v15609_v39 = vld [vmem:[%s25878_s3 + $0x20b0] sm:$0xf] }
 0xbdf   :  { %v24453_v31 = vadd.f32 %v7836_v27, %v24135_v46  ;;  %v7825_v37 = vpop.f32.mrf.mxu1  ;;  %8266 = vmatpush.bf16.msra.mxu2 %v15228_v43  ;;  %v15618_v34 = vor.u32 %v17610_v49, %v15617_v24  ;;  %v15603_v27 = vld [vmem:[%s25878_s3 + $0x20c0] sm:$0xf0]  ;;  %v15577_v49 = vld [vmem:[%s25878_s3 + $0x2078] sm:$0xf] }
 0xbe0   :  { %v7851_v38 = vpop.f32.mrf.mxu0  ;;  %v15606_v37 = vor.u32 %v17602_v57, %v15603_v27  ;;  %v17577_v43 = vld [vmem:[%s25878_s3 + $0x1fe4] sm:$0xf]  ;;  %v15481_v57 = vld [vmem:[%s25878_s3 + $0x1fb8] sm:$0xf]  ;;  %v17575_v27 = vld [vmem:[%s25878_s3 + $0x1fcc] sm:$0xf0] }
 0xbe1   :  { %8587 = vmatpush.bf16.msrb.mxu1 %v15618_v34  ;;  %v17580_v38 = vld [vmem:[%s25878_s3 + $0x1ff4] sm:$0xf0]  ;;  %v17596_v34 = vld [vmem:[%s25878_s3 + $0x207c] sm:$0xf] }
 0xbe5   :  { %v7812_v25 = vpop.f32.mrf.mxu3  ;;  %8588 = vmatpush.bf16.msrb.mxu1 %v15594_v19  ;;  %v15582_v19 = vor.u32 %v17596_v34, %v15579_v33  ;;  %v17569_v33 = vld [vmem:[%s25878_s3 + $0x1f9c] sm:$0xf0] }
 0xbe6   :  { %v7838_v52 = vpop.f32.mrf.mxu2  ;;  %v15498_v25 = vor.u32 %v17580_v38, %v15497_v36  ;;  %v15482_v36 = vor.u32 %v17575_v27, %v15481_v57  ;;  %v15483_v38 = vld [vmem:[%s25878_s3 + $0x1fd0] sm:$0xf0]  ;;  %v15859_v27 = vld [vmem:[%s25878_s3 + $0x2250] sm:$0xf] }
 0xbe7   :  { %v7875_v46 = vpop.f32.mrf.mxu1  ;;  %v15499_v52 = vld [vmem:[%s25878_s3 + $0x1ff8] sm:$0xf0] }
 0xbe8   :  { %v24468_v26 = vadd.f32 %v7875_v46, %v24162_v41  ;;  %v15502_v24 = vor.u32 %v17577_v43, %v15499_v52  ;;  %v17599_v46 = vld [vmem:[%s25878_s3 + $0x208c] sm:$0xf0]  ;;  %v15585_v43 = vld [vmem:[%s25878_s3 + $0x2080] sm:$0xf] }
 0xbe9   :  { %8589 = vmatpush.bf16.msrb.mxu1 %v15570_v20  ;;  %v15578_v63 = vor.u32 %v17599_v46, %v15577_v49  ;;  %v15474_v20 = vor.u32 %v17574_v7, %v15473_v4  ;;  %v17597_v49 = vld [vmem:[%s25878_s3 + $0x2084] sm:$0xf]  ;;  %v15587_v46 = vld [vmem:[%s25878_s3 + $0x2098] sm:$0xf0] }
 0xbea   :  { %v15590_v34 = vor.u32 %v17597_v49, %v15587_v46  ;;  %v15459_v7 = vld [vmem:[%s25878_s3 + $0x1fa0] sm:$0xf0] }
 0xbed   :  { %v7862_v29 = vpop.f32.mrf.mxu3 }
 0xbee   :  { %v24477_v50 = vadd.f32 %v7862_v29, %v24190_v40  ;;  %v7899_v48 = vpop.f32.mrf.mxu2  ;;  %v17592_v40 = vld [vmem:[%s25878_s3 + $0x2054] sm:$0xf0]  ;;  %v17571_v29 = vld [vmem:[%s25878_s3 + $0x1fb4] sm:$0xf] }
 0xbef   :  { %v7900_v41 = vadd.f32 %v23850_v55, %v7899_v48  ;;  %v7877_v53 = vpop.f32.mrf.mxu1  ;;  %v15625_v55 = vld [vmem:[%s25878_s3 + $0x20d8] sm:$0xf]  ;;  %v15546_v5 = vor.u32 %v17592_v40, %v15545_v62  ;;  %v15475_v48 = vld [vmem:[%s25878_s3 + $0x1fc8] sm:$0xf0]  ;;  %v15555_v40 = vld [vmem:[%s25878_s3 + $0x2060] sm:$0xf0] }
 0xbf0   :  { %v15626_v3 = vor.u32 %v17611_v56, %v15625_v55  ;;  %v17593_v53 = vld [vmem:[%s25878_s3 + $0x205c] sm:$0xf0]  ;;  %v15478_v32 = vor.u32 %v17571_v29, %v15475_v48  ;;  %v17590_v62 = vld [vmem:[%s25878_s3 + $0x204c] sm:$0xf]  ;;  %v15561_v29 = vld [vmem:[%s25878_s3 + $0x2050] sm:$0xf] }
 0xbf1   :  { %v7903_v13 = vmax.f32 %v7900_v41, 0.0  ;;  %8590 = vmatpush.bf16.msrb.mxu1 %v15546_v5  ;;  %v15553_v41 = vld [vmem:[%s25878_s3 + $0x2048] sm:$0xf]  ;;  %v15449_v55 = vld [vmem:[%s25878_s3 + $0x1f80] sm:$0xf]  ;;  %v15558_v56 = vor.u32 %v17590_v62, %v15555_v40 }
 0xbf2   :  { %v15554_v51 = vor.u32 %v17593_v53, %v15553_v41  ;;  %v15529_v5 = vld [vmem:[%s25878_s3 + $0x2018] sm:$0xf]  ;;  %v17591_v53 = vld [vmem:[%s25878_s3 + $0x2054] sm:$0xf]  ;;  %v15537_v62 = vld [vmem:[%s25878_s3 + $0x2020] sm:$0xf] }
 0xbf3   :  { %v7904_v9 = vpack.c.bf16 %v7903_v13, %v7903_v13  ;;  %v17568_v13 = vld [vmem:[%s25878_s3 + $0x1f94] sm:$0xf0] }
 0xbf4   :  { %v17588_v40 = vld [vmem:[%s25878_s3 + $0x2034] sm:$0xf0] }
 0xbf5   :  { %8202 = vmatmul.bf16.vlgmr.msrb.gmra.mxu0 %v7904_v9  ;;  %8215 = vmatmul.bf16.vlgmr.msrb.gmra.mxu2 %v7904_v9  ;;  %v7864_v8 = vpop.f32.mrf.mxu3 }
 0xbf6   :  { %8228 = vmatmul.bf16.vlgmr.msrb.gmra.mxu3 %v7904_v9  ;;  %8241 = vmatmul.bf16.vlgmr.msra.gmra.mxu1 %v7904_v9  ;;  %v7901_v54 = vpop.f32.mrf.mxu2  ;;  %v15633_v8 = vld [vmem:[%s25878_s3 + $0x20e0] sm:$0xf] }
 0xbf7   :  { %8600 = vmatpush.bf16.msrb.mxu3 %v15622_v0  ;;  %8613 = vmatpush.bf16.msrb.mxu0 %v15626_v3  ;;  %v15454_v0 = vor.u32 %v17565_v61, %v15451_v14  ;;  %v15530_v3 = vor.u32 %v17587_v60, %v15529_v5  ;;  %v17612_v54 = vld [vmem:[%s25878_s3 + $0x20f4] sm:$0xf0]  ;;  %v15513_v14 = vld [vmem:[%s25878_s3 + $0x1ff0] sm:$0xf] }
 0xbf8   :  { %8626 = vmatpush.bf16.msrb.mxu2 %v15630_v6  ;;  %8591 = vmatpush.bf16.msrb.mxu1 %v15522_v42  ;;  %v15531_v6 = vld [vmem:[%s25878_s3 + $0x2030] sm:$0xf0]  ;;  %v15634_v10 = vor.u32 %v17612_v54, %v15633_v8  ;;  %v17606_v42 = vld [vmem:[%s25878_s3 + $0x20c4] sm:$0xf0]  ;;  %v15489_v54 = vld [vmem:[%s25878_s3 + $0x1fc0] sm:$0xf] }
 0xbf9   :  { %v15610_v18 = vor.u32 %v17606_v42, %v15609_v39 }
 0xbfb   :  { %8601 = vmatpush.bf16.msrb.mxu3 %v15598_v22  ;;  %8614 = vmatpush.bf16.msrb.mxu0 %v15602_v47  ;;  %v15534_v22 = vor.u32 %v17584_v35, %v15531_v6  ;;  %v15515_v35 = vld [vmem:[%s25878_s3 + $0x2008] sm:$0xf0] }
 0xbfc   :  { %8627 = vmatpush.bf16.msrb.mxu2 %v15606_v37  ;;  %8592 = vmatpush.bf16.msrb.mxu1 %v15498_v25  ;;  %v17572_v37 = vld [vmem:[%s25878_s3 + $0x1fbc] sm:$0xf]  ;;  %v17600_v25 = vld [vmem:[%s25878_s3 + $0x2094] sm:$0xf0] }
 0xbfd   :  { %v15486_v52 = vor.u32 %v17572_v37, %v15483_v38  ;;  %v17652_v38 = vld [vmem:[%s25878_s3 + $0x2234] sm:$0xf0] }
 0xbff   :  { %8602 = vmatpush.bf16.msrb.mxu3 %v15574_v59  ;;  %8615 = vmatpush.bf16.msrb.mxu0 %v15578_v63  ;;  %v15635_v59 = vld [vmem:[%s25878_s3 + $0x20f8] sm:$0xf0]  ;;  %v15457_v63 = vld [vmem:[%s25878_s3 + $0x1f88] sm:$0xf] }
 0xc00   :  { %8628 = vmatpush.bf16.msrb.mxu2 %v15582_v19  ;;  %8593 = vmatpush.bf16.msrb.mxu1 %v15474_v20  ;;  %v15638_v45 = vor.u32 %v17609_v12, %v15635_v59  ;;  %v17566_v19 = vld [vmem:[%s25878_s3 + $0x1f8c] sm:$0xf]  ;;  %v15458_v4 = vor.u32 %v17569_v33, %v15457_v63  ;;  %v17594_v20 = vld [vmem:[%s25878_s3 + $0x2064] sm:$0xf0]  ;;  %v17573_v12 = vld [vmem:[%s25878_s3 + $0x1fc4] sm:$0xf] }
 0xc01   :  { %v15462_v48 = vor.u32 %v17566_v19, %v15459_v7  ;;  %v15562_v41 = vor.u32 %v17594_v20, %v15561_v29  ;;  %v15861_v7 = vld [vmem:[%s25878_s3 + $0x2268] sm:$0xf0]  ;;  %v17640_v29 = vld [vmem:[%s25878_s3 + $0x21d4] sm:$0xf0] }
 0xc02   :  { %v15867_v20 = vld [vmem:[%s25878_s3 + $0x2258] sm:$0xf] }
 0xc03   :  { %8603 = vmatpush.bf16.msrb.mxu3 %v15550_v58  ;;  %8616 = vmatpush.bf16.msrb.mxu0 %v15554_v51  ;;  %v17581_v58 = vld [vmem:[%s25878_s3 + $0x1ffc] sm:$0xf0] }
 0xc04   :  { %8629 = vmatpush.bf16.msrb.mxu2 %v15558_v56  ;;  %v15506_v1 = vor.u32 %v17581_v58, %v15505_v21  ;;  %v15538_v56 = vor.u32 %v17588_v40, %v15537_v62  ;;  %v15465_v21 = vld [vmem:[%s25878_s3 + $0x1f90] sm:$0xf]  ;;  %v17649_v40 = vld [vmem:[%s25878_s3 + $0x2224] sm:$0xf] }
 0xc05   :  { %8254 = vmatmul.bf16.vlgmr.msra.gmra.mxu0 %v7904_v9  ;;  %8267 = vmatmul.bf16.vlgmr.msra.gmra.mxu2 %v7904_v9  ;;  %v15450_v9 = vor.u32 %v17568_v13, %v15449_v55  ;;  %v17585_v55 = vld [vmem:[%s25878_s3 + $0x2024] sm:$0xf]  ;;  %v15539_v13 = vld [vmem:[%s25878_s3 + $0x2038] sm:$0xf0] }
 0xc06   :  { %15398 = vmatmul.msk.bf16.vlgmr.msra.gmra.mxu3 %vm35_vm1, %v15397_v16  ;;  %v17578_v16 = vld [vmem:[%s25878_s3 + $0x1fec] sm:$0xf]  ;;  %v15542_v61 = vor.u32 %v17585_v55, %v15539_v13  ;;  %v15837_v55 = vld [vmem:[%s25878_s3 + $0x2238] sm:$0xf0] }
 0xc07   :  { %8604 = vmatpush.bf16.msrb.mxu3 %v15526_v28  ;;  %8594 = vmatpush.bf16.msrb.mxu1 %v15450_v9  ;;  %v15510_v23 = vor.u32 %v17578_v16, %v15507_v15  ;;  %v15611_v28 = vld [vmem:[%s25878_s3 + $0x20c8] sm:$0xf0]  ;;  %v17582_v9 = vld [vmem:[%s25878_s3 + $0x2004] sm:$0xf0]  ;;  %v17567_v16 = vld [vmem:[%s25878_s3 + $0x1f94] sm:$0xf] }
 0xc08   :  { %8617 = vmatpush.bf16.msrb.mxu0 %v15530_v3  ;;  %8630 = vmatpush.bf16.msrb.mxu2 %v15534_v22  ;;  %v15614_v47 = vor.u32 %v17603_v30, %v15611_v28  ;;  %v15514_v60 = vor.u32 %v17582_v9, %v15513_v14  ;;  %v17576_v22 = vld [vmem:[%s25878_s3 + $0x1fd4] sm:$0xf0]  ;;  %v15763_v14 = vld [vmem:[%s25878_s3 + $0x2190] sm:$0xf]  ;;  %v17634_v9 = vld [vmem:[%s25878_s3 + $0x21a4] sm:$0xf0] }
 0xc09   :  { %v15490_v59 = vor.u32 %v17576_v22, %v15489_v54  ;;  %v15840_v54 = vor.u32 %v17649_v40, %v15837_v55  ;;  %v17643_v22 = vld [vmem:[%s25878_s3 + $0x21f4] sm:$0xf]  ;;  %v15771_v40 = vld [vmem:[%s25878_s3 + $0x2198] sm:$0xf]  ;;  %v17635_v55 = vld [vmem:[%s25878_s3 + $0x21ac] sm:$0xf0] }
 0xc0b   :  { %8605 = vmatpush.bf16.msrb.mxu3 %v15502_v24  ;;  %8639 = vmatpush.bf16.msra.mxu1 %v15634_v10  ;;  %v15586_v24 = vor.u32 %v17600_v25, %v15585_v43 }
 0xc0c   :  { %8618 = vmatpush.bf16.msrb.mxu0 %v15506_v1  ;;  %8631 = vmatpush.bf16.msrb.mxu2 %v15510_v23  ;;  %v15467_v1 = vld [vmem:[%s25878_s3 + $0x1fa8] sm:$0xf0] }
 0xc0d   :  { %v15470_v28 = vor.u32 %v17567_v16, %v15467_v1  ;;  %v17637_v1 = vld [vmem:[%s25878_s3 + $0x21c4] sm:$0xf] }
 0xc0f   :  { %8606 = vmatpush.bf16.msrb.mxu3 %v15478_v32  ;;  %8640 = vmatpush.bf16.msra.mxu1 %v15610_v18  ;;  %v15563_v32 = vld [vmem:[%s25878_s3 + $0x2068] sm:$0xf0] }
 0xc10   :  { %8619 = vmatpush.bf16.msrb.mxu0 %v15482_v36  ;;  %8632 = vmatpush.bf16.msrb.mxu2 %v15486_v52  ;;  %v15566_v51 = vor.u32 %v17591_v53, %v15563_v32  ;;  %v15835_v36 = vld [vmem:[%s25878_s3 + $0x2220] sm:$0xf]  ;;  %v15811_v52 = vld [vmem:[%s25878_s3 + $0x21f0] sm:$0xf]  ;;  %v17656_v53 = vld [vmem:[%s25878_s3 + $0x225c] sm:$0xf] }
 0xc11   :  { %v15836_v25 = vor.u32 %v17652_v38, %v15835_v36  ;;  %v15869_v32 = vld [vmem:[%s25878_s3 + $0x2270] sm:$0xf0]  ;;  %v17644_v36 = vld [vmem:[%s25878_s3 + $0x21fc] sm:$0xf] }
 0xc13   :  { %8607 = vmatpush.bf16.msrb.mxu3 %v15454_v0  ;;  %8641 = vmatpush.bf16.msra.mxu1 %v15586_v24  ;;  %v17579_v0 = vld [vmem:[%s25878_s3 + $0x1ff4] sm:$0xf]  ;;  %v17646_v24 = vld [vmem:[%s25878_s3 + $0x2204] sm:$0xf0] }
 0xc14   :  { %8620 = vmatpush.bf16.msrb.mxu0 %v15458_v4  ;;  %8633 = vmatpush.bf16.msrb.mxu2 %v15462_v48  ;;  %v15518_v8 = vor.u32 %v17579_v0, %v15515_v35  ;;  %v15812_v46 = vor.u32 %v17646_v24, %v15811_v52  ;;  %v17655_v4 = vld [vmem:[%s25878_s3 + $0x2254] sm:$0xf]  ;;  %v17659_v48 = vld [vmem:[%s25878_s3 + $0x226c] sm:$0xf0]  ;;  %v15843_v0 = vld [vmem:[%s25878_s3 + $0x2228] sm:$0xf] }
 0xc15   :  { %v15864_v62 = vor.u32 %v17655_v4, %v15861_v7  ;;  %v15868_v13 = vor.u32 %v17659_v48, %v15867_v20  ;;  %v17650_v35 = vld [vmem:[%s25878_s3 + $0x222c] sm:$0xf]  ;;  %v15715_v24 = vld [vmem:[%s25878_s3 + $0x2130] sm:$0xf]  ;;  %v17641_v4 = vld [vmem:[%s25878_s3 + $0x21dc] sm:$0xf0] }
 0xc16   :  { %v15797_v20 = vld [vmem:[%s25878_s3 + $0x21e0] sm:$0xf0] }
 0xc17   :  { %8652 = vmatpush.bf16.msra.mxu3 %v15638_v45  ;;  %8642 = vmatpush.bf16.msra.mxu1 %v15562_v41 }
 0xc18   :  { %8683 = vmatpush.bf16.msra.mxu0 %v17889_v2 }
 0xc1b   :  { %8653 = vmatpush.bf16.msra.mxu3 %v15614_v47  ;;  %8643 = vmatpush.bf16.msra.mxu1 %v15538_v56 }
 0xc1f   :  { %8654 = vmatpush.bf16.msra.mxu3 %v15590_v34  ;;  %8644 = vmatpush.bf16.msra.mxu1 %v15514_v60  ;;  %v17653_v60 = vld [vmem:[%s25878_s3 + $0x223c] sm:$0xf0] }
 0xc23   :  { %8655 = vmatpush.bf16.msra.mxu3 %v15566_v51  ;;  %8645 = vmatpush.bf16.msra.mxu1 %v15490_v59  ;;  %v15844_v59 = vor.u32 %v17653_v60, %v15843_v0  ;;  %v17657_v60 = vld [vmem:[%s25878_s3 + $0x2264] sm:$0xf] }
 0xc27   :  { %8656 = vmatpush.bf16.msra.mxu3 %v15542_v61  ;;  %v15872_v61 = vor.u32 %v17656_v53, %v15869_v32  ;;  %v17616_v53 = vld [vmem:[%s25878_s3 + $0x2114] sm:$0xf0]  ;;  %v17613_v32 = vld [vmem:[%s25878_s3 + $0x2104] sm:$0xf] }
 0xc2b   :  { %8657 = vmatpush.bf16.msra.mxu3 %v15518_v8 }
 0xc72   :  { %v8203_v5 = vpop.f32.mrf.mxu0 }
 0xc73   :  { %v24732_v3 = vadd.f32 %v8203_v5, %v24450_v44  ;;  %v8242_v6 = vpop.f32.mrf.mxu1  ;;  %v15491_v44 = vld [vmem:[%s25878_s3 + $0x1fd8] sm:$0xf0] }
 0xc74   :  { %v24741_v10 = vadd.f32 %v8242_v6, %v24429_v17  ;;  %v15494_v45 = vor.u32 %v17573_v12, %v15491_v44  ;;  %v17570_v17 = vld [vmem:[%s25878_s3 + $0x1fa4] sm:$0xf0]  ;;  %v15845_v6 = vld [vmem:[%s25878_s3 + $0x2240] sm:$0xf0]  ;;  %v15764_v12 = vor.u32 %v17634_v9, %v15763_v14  ;;  %v15813_v44 = vld [vmem:[%s25878_s3 + $0x2208] sm:$0xf0] }
 0xc75   :  { %v15466_v18 = vor.u32 %v17570_v17, %v15465_v21  ;;  %v15739_v21 = vld [vmem:[%s25878_s3 + $0x2160] sm:$0xf]  ;;  %v17628_v17 = vld [vmem:[%s25878_s3 + $0x2174] sm:$0xf0]  ;;  %v15773_v14 = vld [vmem:[%s25878_s3 + $0x21b0] sm:$0xf0] }
 0xc76   :  { %8658 = vmatpush.bf16.msra.mxu3 %v15494_v45  ;;  %v15848_v45 = vor.u32 %v17650_v35, %v15845_v6  ;;  %v15740_v16 = vor.u32 %v17628_v17, %v15739_v21  ;;  %v15875_v9 = vld [vmem:[%s25878_s3 + $0x2260] sm:$0xf]  ;;  %v15877_v35 = vld [vmem:[%s25878_s3 + $0x2278] sm:$0xf0]  ;;  %v17654_v21 = vld [vmem:[%s25878_s3 + $0x2244] sm:$0xf0] }
 0xc77   :  { %8646 = vmatpush.bf16.msra.mxu1 %v15466_v18  ;;  %v17631_v18 = vld [vmem:[%s25878_s3 + $0x2194] sm:$0xf] }
 0xc78   :  { %v8216_v58 = vpop.f32.mrf.mxu2 }
 0xc79   :  { %v24762_v15 = vadd.f32 %v8216_v58, %v24420_v11  ;;  %v8229_v39 = vpop.f32.mrf.mxu3  ;;  %v17658_v11 = vld [vmem:[%s25878_s3 + $0x2264] sm:$0xf0]  ;;  %v15816_v58 = vor.u32 %v17643_v22, %v15813_v44  ;;  %v17629_v22 = vld [vmem:[%s25878_s3 + $0x217c] sm:$0xf0] }
 0xc7a   :  { %v24765_v42 = vadd.f32 %v8229_v39, %v24453_v31  ;;  %v8205_v23 = vpop.f32.mrf.mxu0  ;;  %8659 = vmatpush.bf16.msra.mxu3 %v15470_v28  ;;  %v15860_v37 = vor.u32 %v17658_v11, %v15859_v27  ;;  %v15789_v39 = vld [vmem:[%s25878_s3 + $0x21d8] sm:$0xf0]  ;;  %v15639_v28 = vld [vmem:[%s25875_s0 + $0x16] sm:$0x1] }
 0xc7b   :  { %v8244_v30 = vpop.f32.mrf.mxu1  ;;  %v15792_v23 = vor.u32 %v17637_v1, %v15789_v39  ;;  %v15741_v27 = vld [vmem:[%s25878_s3 + $0x2178] sm:$0xf0]  ;;  %v15853_v1 = vld [vmem:[%s25878_s3 + $0x2248] sm:$0xf0] }
 0xc7c   :  { %8980 = vmatpush.bf16.msra.mxu2 %v15860_v37  ;;  %v15765_v30 = vld [vmem:[%s25878_s3 + $0x21a8] sm:$0xf0]  ;;  %v17647_v37 = vld [vmem:[%s25878_s3 + $0x220c] sm:$0xf0] }
 0xc80   :  { %v8218_v47 = vpop.f32.mrf.mxu2  ;;  %8981 = vmatpush.bf16.msra.mxu2 %v15836_v25  ;;  %v15821_v25 = vld [vmem:[%s25878_s3 + $0x2210] sm:$0xf0] }
 0xc81   :  { %v8231_v57 = vpop.f32.mrf.mxu3  ;;  %v15768_v47 = vor.u32 %v17631_v18, %v15765_v30  ;;  %v15824_v52 = vor.u32 %v17644_v36, %v15821_v25  ;;  %v17623_v18 = vld [vmem:[%s25878_s3 + $0x214c] sm:$0xf0]  ;;  %v17620_v30 = vld [vmem:[%s25878_s3 + $0x213c] sm:$0xf]  ;;  %v15699_v25 = vld [vmem:[%s25878_s3 + $0x2108] sm:$0xf] }
 0xc82   :  { %v8255_v31 = vpop.f32.mrf.mxu0  ;;  %v17625_v57 = vld [vmem:[%s25878_s3 + $0x2164] sm:$0xf]  ;;  %v15829_v36 = vld [vmem:[%s25878_s3 + $0x2218] sm:$0xf0] }
 0xc83   :  { %v24780_v43 = vadd.f32 %v8255_v31, %v24477_v50  ;;  %v24794_v50 = vld [vmem:[%s25877_s2] ss:$0 sm:$0xff]  ;;  %v15744_v11 = vor.u32 %v17625_v57, %v15741_v27  ;;  %v15819_v31 = vld [vmem:[%s25878_s3 + $0x21f8] sm:$0xf] }
 0xc84   :  { %8982 = vmatpush.bf16.msra.mxu2 %v15812_v46  ;;  %v15820_v38 = vor.u32 %v17647_v37, %v15819_v31  ;;  %v17619_v46 = vld [vmem:[%s25878_s3 + $0x2134] sm:$0xf]  ;;  %v15827_v57 = vld [vmem:[%s25878_s3 + $0x2200] sm:$0xf]  ;;  %v17648_v27 = vld [vmem:[%s25878_s3 + $0x2214] sm:$0xf0] }
 0xc85   :  { %v15828_v31 = vor.u32 %v17648_v27, %v15827_v57  ;;  %v17645_v37 = vld [vmem:[%s25878_s3 + $0x2204] sm:$0xf]  ;;  %v17694_v57 = vld [vmem:[%s25878_s3 + $0x2384] sm:$0xf0] }
 0xc88   :  { %v8268_v49 = vpop.f32.mrf.mxu2 }
 0xc89   :  { %v24789_v34 = vadd.f32 %v8268_v49, %v24468_v26  ;;  %v8292_v63 = vpop.f32.mrf.mxu3  ;;  %v15787_v26 = vld [vmem:[%s25878_s3 + $0x21c0] sm:$0xf]  ;;  %v17622_v49 = vld [vmem:[%s25878_s3 + $0x2144] sm:$0xf0] }
 0xc8a   :  { %v8293_v33 = vadd.f32 %v24794_v50, %v8292_v63  ;;  %v8257_v19 = vpop.f32.mrf.mxu0  ;;  %v15788_v56 = vor.u32 %v17640_v29, %v15787_v26  ;;  %v15716_v63 = vor.u32 %v17622_v49, %v15715_v24  ;;  %v17638_v29 = vld [vmem:[%s25878_s3 + $0x21cc] sm:$0xf] }
 0xc8b   :  { %v15795_v19 = vld [vmem:[%s25878_s3 + $0x21c8] sm:$0xf]  ;;  %v15800_v48 = vor.u32 %v17638_v29, %v15797_v20  ;;  %v17614_v24 = vld [vmem:[%s25878_s3 + $0x210c] sm:$0xf]  ;;  %v15779_v20 = vld [vmem:[%s25878_s3 + $0x21a0] sm:$0xf] }
 0xc8c   :  { %v8296_v41 = vmax.f32 %v8293_v33, 0.0  ;;  %8983 = vmatpush.bf16.msra.mxu2 %v15788_v56  ;;  %v15717_v33 = vld [vmem:[%s25878_s3 + $0x2148] sm:$0xf0]  ;;  %v15796_v26 = vor.u32 %v17641_v4, %v15795_v19 }
 0xc8d   :  { %v15720_v7 = vor.u32 %v17619_v46, %v15717_v33  ;;  %v15701_v46 = vld [vmem:[%s25878_s3 + $0x2120] sm:$0xf0]  ;;  %v17642_v33 = vld [vmem:[%s25878_s3 + $0x21e4] sm:$0xf0] }
 0xc8e   :  { %v8297_v51 = vpack.c.bf16 %v8296_v41, %v8296_v41  ;;  %v15691_v41 = vld [vmem:[%s25878_s3 + $0x2100] sm:$0xf]  ;;  %v15704_v19 = vor.u32 %v17614_v24, %v15701_v46  ;;  %v16103_v24 = vld [vmem:[%s25878_s3 + $0x23e8] sm:$0xf0]  ;;  %v16109_v46 = vld [vmem:[%s25878_s3 + $0x23d8] sm:$0xf] }
 0xc90   :  { %8595 = vmatmul.bf16.vlgmr.msrb.gmra.mxu1 %v8297_v51  ;;  %8608 = vmatmul.bf16.vlgmr.msrb.gmra.mxu3 %v8297_v51  ;;  %v8270_v5 = vpop.f32.mrf.mxu2 }
 0xc91   :  { %8621 = vmatmul.bf16.vlgmr.msrb.gmra.mxu0 %v8297_v51  ;;  %8634 = vmatmul.bf16.vlgmr.msrb.gmra.mxu2 %v8297_v51  ;;  %v8294_v8 = vpop.f32.mrf.mxu3  ;;  %v17660_v5 = vld [vmem:[%s25878_s3 + $0x2274] sm:$0xf0] }
 0xc92   :  { %8993 = vmatpush.bf16.msrb.mxu0 %v15864_v62  ;;  %9006 = vmatpush.bf16.msrb.mxu1 %v15868_v13  ;;  %v15693_v62 = vld [vmem:[%s25878_s3 + $0x2118] sm:$0xf0]  ;;  %v15772_v13 = vor.u32 %v17635_v55, %v15771_v40  ;;  %v15876_v6 = vor.u32 %v17660_v5, %v15875_v9  ;;  %v15880_v8 = vor.u32 %v17657_v60, %v15877_v35  ;;  %v17630_v40 = vld [vmem:[%s25878_s3 + $0x2184] sm:$0xf0]  ;;  %v17627_v55 = vld [vmem:[%s25878_s3 + $0x2174] sm:$0xf] }
 0xc93   :  { %9019 = vmatpush.bf16.msrb.mxu3 %v15872_v61  ;;  %8984 = vmatpush.bf16.msra.mxu2 %v15764_v12  ;;  %v15696_v56 = vor.u32 %v17613_v32, %v15693_v62  ;;  %v17632_v61 = vld [vmem:[%s25878_s3 + $0x219c] sm:$0xf]  ;;  %v17626_v12 = vld [vmem:[%s25878_s3 + $0x216c] sm:$0xf]  ;;  %v15755_v62 = vld [vmem:[%s25878_s3 + $0x2170] sm:$0xf] }
 0xc94   :  { %v15776_v0 = vor.u32 %v17632_v61, %v15773_v14  ;;  %v15781_v32 = vld [vmem:[%s25878_s3 + $0x21b8] sm:$0xf0]  ;;  %v15731_v14 = vld [vmem:[%s25878_s3 + $0x2140] sm:$0xf]  ;;  %v17624_v9 = vld [vmem:[%s25878_s3 + $0x2154] sm:$0xf0] }
 0xc95   :  { %v15732_v5 = vor.u32 %v17624_v9, %v15731_v14  ;;  %v15733_v60 = vld [vmem:[%s25878_s3 + $0x2158] sm:$0xf0]  ;;  %v15707_v35 = vld [vmem:[%s25878_s3 + $0x2110] sm:$0xf] }
 0xc96   :  { %8994 = vmatpush.bf16.msrb.mxu0 %v15840_v54  ;;  %9007 = vmatpush.bf16.msrb.mxu1 %v15844_v59  ;;  %v15747_v54 = vld [vmem:[%s25878_s3 + $0x2168] sm:$0xf]  ;;  %v15749_v59 = vld [vmem:[%s25878_s3 + $0x2180] sm:$0xf0] }
 0xc97   :  { %9020 = vmatpush.bf16.msrb.mxu3 %v15848_v45  ;;  %8985 = vmatpush.bf16.msra.mxu2 %v15740_v16  ;;  %v15748_v44 = vor.u32 %v17629_v22, %v15747_v54  ;;  %v15851_v45 = vld [vmem:[%s25878_s3 + $0x2230] sm:$0xf]  ;;  %v15752_v17 = vor.u32 %v17626_v12, %v15749_v59  ;;  %v17651_v16 = vld [vmem:[%s25878_s3 + $0x2234] sm:$0xf]  ;;  %v17618_v54 = vld [vmem:[%s25878_s3 + $0x2124] sm:$0xf0] }
 0xc98   :  { %v15856_v39 = vor.u32 %v17651_v16, %v15853_v1  ;;  %v17615_v22 = vld [vmem:[%s25878_s3 + $0x2114] sm:$0xf]  ;;  %v15709_v12 = vld [vmem:[%s25878_s3 + $0x2128] sm:$0xf0] }
 0xc9a   :  { %8995 = vmatpush.bf16.msrb.mxu0 %v15816_v58  ;;  %9008 = vmatpush.bf16.msrb.mxu1 %v15820_v38  ;;  %v15852_v58 = vor.u32 %v17654_v21, %v15851_v45  ;;  %v15832_v38 = vor.u32 %v17645_v37, %v15829_v36  ;;  %v15708_v21 = vor.u32 %v17618_v54, %v15707_v35  ;;  %v17676_v54 = vld [vmem:[%s25878_s3 + $0x22f4] sm:$0xf0] }
 0xc9b   :  { %9021 = vmatpush.bf16.msrb.mxu3 %v15824_v52  ;;  %8986 = vmatpush.bf16.msra.mxu2 %v15716_v63  ;;  %v17617_v52 = vld [vmem:[%s25878_s3 + $0x211c] sm:$0xf0]  ;;  %v15803_v63 = vld [vmem:[%s25878_s3 + $0x21d0] sm:$0xf] }
 0xc9c   :  { %v15700_v49 = vor.u32 %v17617_v52, %v15699_v25  ;;  %v15804_v4 = vor.u32 %v17642_v33, %v15803_v63  ;;  %v17703_v52 = vld [vmem:[%s25878_s3 + $0x23d4] sm:$0xf]  ;;  %v17707_v63 = vld [vmem:[%s25878_s3 + $0x23ec] sm:$0xf0] }
 0xc9e   :  { %8996 = vmatpush.bf16.msrb.mxu0 %v15792_v23  ;;  %9009 = vmatpush.bf16.msrb.mxu1 %v15796_v26  ;;  %v15723_v23 = vld [vmem:[%s25878_s3 + $0x2138] sm:$0xf]  ;;  %v15805_v26 = vld [vmem:[%s25878_s3 + $0x21e8] sm:$0xf0] }
 0xc9f   :  { %9022 = vmatpush.bf16.msrb.mxu3 %v15800_v48  ;;  %v17636_v48 = vld [vmem:[%s25878_s3 + $0x21b4] sm:$0xf0] }
 0xca0   :  { %8647 = vmatmul.bf16.vlgmr.msra.gmra.mxu1 %v8297_v51  ;;  %8660 = vmatmul.bf16.vlgmr.msra.gmra.mxu3 %v8297_v51  ;;  %v15692_v51 = vor.u32 %v17616_v53, %v15691_v41  ;;  %v17633_v41 = vld [vmem:[%s25878_s3 + $0x21a4] sm:$0xf]  ;;  %v15780_v53 = vor.u32 %v17636_v48, %v15779_v20  ;;  %v16079_v48 = vld [vmem:[%s25878_s3 + $0x23b8] sm:$0xf0] }
 0xca1   :  { %15640 = vmatmul.msk.bf16.vlgmr.msra.gmra.mxu0 %vm35_vm1, %v15639_v28  ;;  %v15724_v28 = vor.u32 %v17623_v18, %v15723_v23  ;;  %v17706_v18 = vld [vmem:[%s25878_s3 + $0x23e4] sm:$0xf0]  ;;  %v17697_v20 = vld [vmem:[%s25878_s3 + $0x23a4] sm:$0xf] }
 0xca2   :  { %8997 = vmatpush.bf16.msrb.mxu0 %v15768_v47  ;;  %8987 = vmatpush.bf16.msra.mxu2 %v15692_v51  ;;  %v15725_v47 = vld [vmem:[%s25878_s3 + $0x2150] sm:$0xf0]  ;;  %v15784_v51 = vor.u32 %v17633_v41, %v15781_v32  ;;  %v16110_v32 = vor.u32 %v17707_v63, %v16109_v46  ;;  %v16082_v9 = vor.u32 %v17697_v20, %v16079_v48  ;;  %v17686_v63 = vld [vmem:[%s25878_s3 + $0x234c] sm:$0xf]  ;;  %v15935_v20 = vld [vmem:[%s25878_s3 + $0x2298] sm:$0xf0] }
 0xca3   :  { %9010 = vmatpush.bf16.msrb.mxu1 %v15772_v13  ;;  %9023 = vmatpush.bf16.msrb.mxu3 %v15776_v0  ;;  %v15756_v13 = vor.u32 %v17630_v40, %v15755_v62  ;;  %v17621_v0 = vld [vmem:[%s25878_s3 + $0x2144] sm:$0xf]  ;;  %v16005_v62 = vld [vmem:[%s25878_s3 + $0x2310] sm:$0xf]  ;;  %v17682_v40 = vld [vmem:[%s25878_s3 + $0x2324] sm:$0xf0] }
 0xca4   :  { %v16013_v48 = vld [vmem:[%s25878_s3 + $0x2318] sm:$0xf] }
 0xca6   :  { %8998 = vmatpush.bf16.msrb.mxu0 %v15744_v11  ;;  %9032 = vmatpush.bf16.msrb.mxu2 %v15876_v6  ;;  %v15728_v11 = vor.u32 %v17620_v30, %v15725_v47  ;;  %v16053_v47 = vld [vmem:[%s25878_s3 + $0x2370] sm:$0xf] }
 0xca7   :  { %9011 = vmatpush.bf16.msrb.mxu1 %v15748_v44  ;;  %9024 = vmatpush.bf16.msrb.mxu3 %v15752_v17  ;;  %v15712_v17 = vor.u32 %v17615_v22, %v15709_v12  ;;  %v16054_v37 = vor.u32 %v17694_v57, %v16053_v47  ;;  %v17692_v47 = vld [vmem:[%s25878_s3 + $0x237c] sm:$0xf] }
 0xcaa   :  { %8999 = vmatpush.bf16.msrb.mxu0 %v15720_v7  ;;  %9033 = vmatpush.bf16.msrb.mxu2 %v15852_v58  ;;  %v17639_v7 = vld [vmem:[%s25878_s3 + $0x21d4] sm:$0xf] }
 0xcab   :  { %9012 = vmatpush.bf16.msrb.mxu1 %v15724_v28  ;;  %9025 = vmatpush.bf16.msrb.mxu3 %v15728_v11  ;;  %v15808_v29 = vor.u32 %v17639_v7, %v15805_v26 }
 0xcae   :  { %9000 = vmatpush.bf16.msrb.mxu0 %v15696_v56  ;;  %9034 = vmatpush.bf16.msrb.mxu2 %v15828_v31  ;;  %v15757_v56 = vld [vmem:[%s25878_s3 + $0x2188] sm:$0xf0] }
 0xcaf   :  { %9013 = vmatpush.bf16.msrb.mxu1 %v15700_v49  ;;  %9026 = vmatpush.bf16.msrb.mxu3 %v15704_v19  ;;  %v15760_v61 = vor.u32 %v17627_v55, %v15757_v56  ;;  %v16029_v49 = vld [vmem:[%s25878_s3 + $0x2340] sm:$0xf]  ;;  %v17704_v19 = vld [vmem:[%s25878_s3 + $0x23dc] sm:$0xf]  ;;  %v16085_v55 = vld [vmem:[%s25878_s3 + $0x23a8] sm:$0xf] }
 0xcb2   :  { %9045 = vmatpush.bf16.msra.mxu0 %v15880_v8  ;;  %9035 = vmatpush.bf16.msrb.mxu2 %v15804_v4  ;;  %v15736_v8 = vor.u32 %v17621_v0, %v15733_v60  ;;  %v16111_v4 = vld [vmem:[%s25878_s3 + $0x23f0] sm:$0xf0]  ;;  %v16055_v60 = vld [vmem:[%s25878_s3 + $0x2388] sm:$0xf0] }
 0xcb3   :  { %9076 = vmatpush.bf16.msra.mxu1 %v17889_v2  ;;  %v17691_v0 = vld [vmem:[%s25878_s3 + $0x2374] sm:$0xf] }
 0xcb4   :  { %v16058_v12 = vor.u32 %v17691_v0, %v16055_v60  ;;  %v15989_v0 = vld [vmem:[%s25878_s3 + $0x22e8] sm:$0xf]  ;;  %v17674_v60 = vld [vmem:[%s25878_s3 + $0x22ec] sm:$0xf] }
 0xcb6   :  { %9046 = vmatpush.bf16.msra.mxu0 %v15856_v39  ;;  %9036 = vmatpush.bf16.msrb.mxu2 %v15780_v53 }
 0xcba   :  { %9047 = vmatpush.bf16.msra.mxu0 %v15832_v38  ;;  %9037 = vmatpush.bf16.msrb.mxu2 %v15756_v13  ;;  %v17698_v13 = vld [vmem:[%s25878_s3 + $0x23ac] sm:$0xf] }
 0xcbe   :  { %9048 = vmatpush.bf16.msra.mxu0 %v15808_v29  ;;  %9038 = vmatpush.bf16.msrb.mxu2 %v15732_v5  ;;  %v16106_v29 = vor.u32 %v17703_v52, %v16103_v24  ;;  %v16006_v5 = vor.u32 %v17682_v40, %v16005_v62  ;;  %v15959_v52 = vld [vmem:[%s25878_s3 + $0x22c8] sm:$0xf0]  ;;  %v16037_v24 = vld [vmem:[%s25878_s3 + $0x2348] sm:$0xf]  ;;  %v17680_v62 = vld [vmem:[%s25878_s3 + $0x231c] sm:$0xf] }
 0xcbf   :  { %v16015_v40 = vld [vmem:[%s25878_s3 + $0x2330] sm:$0xf0] }
 0xcc2   :  { %9049 = vmatpush.bf16.msra.mxu0 %v15784_v51  ;;  %9039 = vmatpush.bf16.msrb.mxu2 %v15708_v21  ;;  %v16114_v51 = vor.u32 %v17704_v19, %v16111_v4  ;;  %v17685_v21 = vld [vmem:[%s25878_s3 + $0x2344] sm:$0xf]  ;;  %v15933_v4 = vld [vmem:[%s25878_s3 + $0x2280] sm:$0xf] }
 0xcc6   :  { %9050 = vmatpush.bf16.msra.mxu0 %v15760_v61  ;;  %v16087_v61 = vld [vmem:[%s25878_s3 + $0x23c0] sm:$0xf0] }
 0xcca   :  { %9051 = vmatpush.bf16.msra.mxu0 %v15736_v8  ;;  %v15981_v8 = vld [vmem:[%s25878_s3 + $0x22e0] sm:$0xf] }
 0xcce   :  { %9052 = vmatpush.bf16.msra.mxu0 %v15712_v17  ;;  %v16031_v17 = vld [vmem:[%s25878_s3 + $0x2358] sm:$0xf0] }
 0xd0d   :  { %v8596_v6 = vpop.f32.mrf.mxu1 }
 0xd0e   :  { %v25073_v44 = vadd.f32 %v8596_v6, %v24732_v3  ;;  %v8622_v59 = vpop.f32.mrf.mxu0  ;;  %v16090_v6 = vor.u32 %v17698_v13, %v16087_v61  ;;  %v17705_v13 = vld [vmem:[%s25878_s3 + $0x23e4] sm:$0xf]  ;;  %v16119_v61 = vld [vmem:[%s25878_s3 + $0x23f8] sm:$0xf0] }
 0xd0f   :  { %v25076_v45 = vadd.f32 %v8622_v59, %v24765_v42  ;;  %v16101_v42 = vld [vmem:[%s25878_s3 + $0x23d0] sm:$0xf]  ;;  %v15982_v59 = vor.u32 %v17676_v54, %v15981_v8  ;;  %v17702_v54 = vld [vmem:[%s25878_s3 + $0x23c4] sm:$0xf0] }
 0xd10   :  { %v16102_v30 = vor.u32 %v17706_v18, %v16101_v42  ;;  %v17673_v18 = vld [vmem:[%s25878_s3 + $0x22e4] sm:$0xf]  ;;  %v16093_v8 = vld [vmem:[%s25878_s3 + $0x23b0] sm:$0xf] }
 0xd12   :  { %9373 = vmatpush.bf16.msra.mxu3 %v16102_v30  ;;  %v15983_v30 = vld [vmem:[%s25878_s3 + $0x22f8] sm:$0xf0] }
 0xd13   :  { %v8609_v58 = vpop.f32.mrf.mxu3 }
 0xd14   :  { %v25079_v16 = vadd.f32 %v8609_v58, %v24762_v15  ;;  %v8635_v1 = vpop.f32.mrf.mxu2  ;;  %v16077_v15 = vld [vmem:[%s25878_s3 + $0x23a0] sm:$0xf]  ;;  %v16034_v58 = vor.u32 %v17685_v21, %v16031_v17  ;;  %v16095_v21 = vld [vmem:[%s25878_s3 + $0x23c8] sm:$0xf0] }
 0xd15   :  { %v25082_v39 = vadd.f32 %v8635_v1, %v24741_v10  ;;  %v8598_v3 = vpop.f32.mrf.mxu1  ;;  %v17700_v10 = vld [vmem:[%s25878_s3 + $0x23b4] sm:$0xf0]  ;;  %v17679_v1 = vld [vmem:[%s25878_s3 + $0x2314] sm:$0xf] }
 0xd16   :  { %v8624_v23 = vpop.f32.mrf.mxu0  ;;  %v16078_v28 = vor.u32 %v17700_v10, %v16077_v15  ;;  %v16007_v3 = vld [vmem:[%s25878_s3 + $0x2328] sm:$0xf0]  ;;  %v15986_v15 = vor.u32 %v17673_v18, %v15983_v30  ;;  %v16061_v10 = vld [vmem:[%s25878_s3 + $0x2378] sm:$0xf]  ;;  %v16069_v18 = vld [vmem:[%s25878_s3 + $0x2380] sm:$0xf] }
 0xd17   :  { %v15881_v23 = vld [vmem:[%s25875_s0 + $0x17] sm:$0x1]  ;;  %v16010_v42 = vor.u32 %v17679_v1, %v16007_v3  ;;  %v17671_v1 = vld [vmem:[%s25878_s3 + $0x22cc] sm:$0xf0]  ;;  %v17668_v3 = vld [vmem:[%s25878_s3 + $0x22bc] sm:$0xf] }
 0xd18   :  { %9374 = vmatpush.bf16.msra.mxu3 %v16078_v28  ;;  %v17695_v28 = vld [vmem:[%s25878_s3 + $0x238c] sm:$0xf0]  ;;  %v17696_v30 = vld [vmem:[%s25878_s3 + $0x2394] sm:$0xf0] }
 0xd19   :  { %v16062_v57 = vor.u32 %v17695_v28, %v16061_v10  ;;  %v16070_v10 = vor.u32 %v17696_v30, %v16069_v18  ;;  %v17693_v28 = vld [vmem:[%s25878_s3 + $0x2384] sm:$0xf] }
 0xd1b   :  { %v8611_v27 = vpop.f32.mrf.mxu3 }
 0xd1c   :  { %v8637_v11 = vpop.f32.mrf.mxu2  ;;  %9375 = vmatpush.bf16.msra.mxu3 %v16054_v37  ;;  %v16063_v27 = vld [vmem:[%s25878_s3 + $0x2390] sm:$0xf0]  ;;  %v17670_v37 = vld [vmem:[%s25878_s3 + $0x22c4] sm:$0xf0] }
 0xd1d   :  { %v8648_v31 = vpop.f32.mrf.mxu1  ;;  %v16066_v11 = vor.u32 %v17692_v47, %v16063_v27  ;;  %v16071_v47 = vld [vmem:[%s25878_s3 + $0x2398] sm:$0xf0]  ;;  %v15941_v27 = vld [vmem:[%s25878_s3 + $0x2288] sm:$0xf] }
 0xd1e   :  { %v25103_v36 = vadd.f32 %v8648_v31, %v24780_v43  ;;  %v8685_v38 = vpop.f32.mrf.mxu0  ;;  %v17688_v43 = vld [vmem:[%s25878_s3 + $0x2354] sm:$0xf0]  ;;  %v15957_v31 = vld [vmem:[%s25878_s3 + $0x22b0] sm:$0xf] }
 0xd1f   :  { %v8686_v25 = vadd.f32 %v24794_v50, %v8685_v38  ;;  %v16030_v41 = vor.u32 %v17688_v43, %v16029_v49  ;;  %v17667_v38 = vld [vmem:[%s25878_s3 + $0x22b4] sm:$0xf]  ;;  %v17689_v49 = vld [vmem:[%s25878_s3 + $0x235c] sm:$0xf0] }
 0xd20   :  { %v15962_v43 = vor.u32 %v17667_v38, %v15959_v52  ;;  %v16038_v46 = vor.u32 %v17689_v49, %v16037_v24  ;;  %v15943_v38 = vld [vmem:[%s25878_s3 + $0x22a0] sm:$0xf0]  ;;  %v17690_v52 = vld [vmem:[%s25878_s3 + $0x2364] sm:$0xf0] }
 0xd21   :  { %v8689_v33 = vmax.f32 %v8686_v25, 0.0  ;;  %9376 = vmatpush.bf16.msra.mxu3 %v16030_v41  ;;  %v15958_v25 = vor.u32 %v17670_v37, %v15957_v31  ;;  %v17683_v41 = vld [vmem:[%s25878_s3 + $0x232c] sm:$0xf0]  ;;  %v17662_v31 = vld [vmem:[%s25878_s3 + $0x228c] sm:$0xf] }
 0xd22   :  { %v15946_v24 = vor.u32 %v17662_v31, %v15943_v38  ;;  %v16271_v31 = vld [vmem:[%s25878_s3 + $0x24c0] sm:$0xf] }
 0xd23   :  { %v8690_v7 = vpack.c.bf16 %v8689_v33, %v8689_v33  ;;  %v8661_v26 = vpop.f32.mrf.mxu3  ;;  %v16039_v33 = vld [vmem:[%s25878_s3 + $0x2360] sm:$0xf0] }
 0xd24   :  { %v25137_v53 = vadd.f32 %v8661_v26, %v24789_v34  ;;  %v17701_v34 = vld [vmem:[%s25878_s3 + $0x23bc] sm:$0xf0]  ;;  %v16042_v19 = vor.u32 %v17686_v63, %v16039_v33  ;;  %v17661_v26 = vld [vmem:[%s25878_s3 + $0x2284] sm:$0xf] }
 0xd25   :  { %8988 = vmatmul.bf16.vlgmr.msra.gmra.mxu2 %v8690_v7  ;;  %9001 = vmatmul.bf16.vlgmr.msrb.gmra.mxu0 %v8690_v7  ;;  %v8650_v56 = vpop.f32.mrf.mxu1  ;;  %v16086_v35 = vor.u32 %v17701_v34, %v16085_v55  ;;  %v16117_v55 = vld [vmem:[%s25878_s3 + $0x23e0] sm:$0xf]  ;;  %v17708_v34 = vld [vmem:[%s25878_s3 + $0x23f4] sm:$0xf0] }
 0xd26   :  { %9014 = vmatmul.bf16.vlgmr.msrb.gmra.mxu1 %v8690_v7  ;;  %9027 = vmatmul.bf16.vlgmr.msrb.gmra.mxu3 %v8690_v7  ;;  %v8687_v14 = vpop.f32.mrf.mxu0  ;;  %v16018_v56 = vor.u32 %v17680_v62, %v16015_v40  ;;  %v16021_v33 = vld [vmem:[%s25878_s3 + $0x2320] sm:$0xf]  ;;  %v17672_v40 = vld [vmem:[%s25878_s3 + $0x22d4] sm:$0xf0] }
 0xd27   :  { %9386 = vmatpush.bf16.msrb.mxu1 %v16106_v29  ;;  %9399 = vmatpush.bf16.msra.mxu2 %v16110_v32  ;;  %v15938_v32 = vor.u32 %v17661_v26, %v15935_v20  ;;  %v16118_v14 = vor.u32 %v17708_v34, %v16117_v55  ;;  %v16023_v26 = vld [vmem:[%s25878_s3 + $0x2338] sm:$0xf0]  ;;  %v17678_v20 = vld [vmem:[%s25878_s3 + $0x2304] sm:$0xf0]  ;;  %v15973_v62 = vld [vmem:[%s25878_s3 + $0x22c0] sm:$0xf] }
 0xd28   :  { %9412 = vmatpush.bf16.msrb.mxu0 %v16114_v51  ;;  %9377 = vmatpush.bf16.msra.mxu3 %v16006_v5  ;;  %v16014_v51 = vor.u32 %v17683_v41, %v16013_v48  ;;  %v17677_v5 = vld [vmem:[%s25878_s3 + $0x22fc] sm:$0xf0]  ;;  %v17675_v48 = vld [vmem:[%s25878_s3 + $0x22f4] sm:$0xf]  ;;  %v15999_v41 = vld [vmem:[%s25878_s3 + $0x2308] sm:$0xf0] }
 0xd29   :  { %v17669_v55 = vld [vmem:[%s25878_s3 + $0x22c4] sm:$0xf]  ;;  %v15975_v34 = vld [vmem:[%s25878_s3 + $0x22d8] sm:$0xf0] }
 0xd2b   :  { %v8663_v22 = vpop.f32.mrf.mxu3  ;;  %9387 = vmatpush.bf16.msrb.mxu1 %v16082_v9  ;;  %9400 = vmatpush.bf16.msra.mxu2 %v16086_v35  ;;  %v16122_v9 = vor.u32 %v17705_v13, %v16119_v61  ;;  %v15990_v35 = vor.u32 %v17677_v5, %v15989_v0  ;;  %v15949_v13 = vld [vmem:[%s25878_s3 + $0x2290] sm:$0xf]  ;;  %v17663_v0 = vld [vmem:[%s25878_s3 + $0x2294] sm:$0xf]  ;;  %v15951_v5 = vld [vmem:[%s25878_s3 + $0x22a8] sm:$0xf0] }
 0xd2c   :  { %9413 = vmatpush.bf16.msrb.mxu0 %v16090_v6  ;;  %9378 = vmatpush.bf16.msra.mxu3 %v15982_v59  ;;  %v15991_v6 = vld [vmem:[%s25878_s3 + $0x2300] sm:$0xf0]  ;;  %v17699_v59 = vld [vmem:[%s25878_s3 + $0x23b4] sm:$0xf] }
 0xd2d   :  { %v15994_v22 = vor.u32 %v17674_v60, %v15991_v6  ;;  %v16098_v17 = vor.u32 %v17699_v59, %v16095_v21 }
 0xd2f   :  { %9388 = vmatpush.bf16.msrb.mxu1 %v16058_v12  ;;  %9401 = vmatpush.bf16.msra.mxu2 %v16062_v57  ;;  %v16094_v12 = vor.u32 %v17702_v54, %v16093_v8  ;;  %v16074_v57 = vor.u32 %v17693_v28, %v16071_v47  ;;  %v15954_v54 = vor.u32 %v17663_v0, %v15951_v5 }
 0xd30   :  { %9414 = vmatpush.bf16.msrb.mxu0 %v16066_v11  ;;  %9379 = vmatpush.bf16.msra.mxu3 %v15958_v25  ;;  %v17665_v11 = vld [vmem:[%s25878_s3 + $0x229c] sm:$0xf0]  ;;  %v16045_v25 = vld [vmem:[%s25878_s3 + $0x2350] sm:$0xf] }
 0xd31   :  { %v15942_v37 = vor.u32 %v17665_v11, %v15941_v27  ;;  %v16046_v49 = vor.u32 %v17690_v52, %v16045_v25  ;;  %v17751_v27 = vld [vmem:[%s25878_s3 + $0x2554] sm:$0xf]  ;;  %v16345_v11 = vld [vmem:[%s25878_s3 + $0x2568] sm:$0xf0]  ;;  %v17752_v25 = vld [vmem:[%s25878_s3 + $0x255c] sm:$0xf] }
 0xd32   :  { %v16353_v52 = vld [vmem:[%s25878_s3 + $0x2570] sm:$0xf0] }
 0xd33   :  { %9389 = vmatpush.bf16.msrb.mxu1 %v16034_v58  ;;  %9402 = vmatpush.bf16.msra.mxu2 %v16038_v46  ;;  %v15965_v58 = vld [vmem:[%s25878_s3 + $0x22b8] sm:$0xf]  ;;  %v16047_v46 = vld [vmem:[%s25878_s3 + $0x2368] sm:$0xf0] }
 0xd34   :  { %9415 = vmatpush.bf16.msrb.mxu0 %v16042_v19  ;;  %v17684_v19 = vld [vmem:[%s25878_s3 + $0x2334] sm:$0xf0] }
 0xd35   :  { %9040 = vmatmul.bf16.vlgmr.msrb.gmra.mxu2 %v8690_v7  ;;  %9053 = vmatmul.bf16.vlgmr.msra.gmra.mxu0 %v8690_v7  ;;  %v17664_v7 = vld [vmem:[%s25878_s3 + $0x2294] sm:$0xf0] }
 0xd36   :  { %15882 = vmatmul.msk.bf16.vlgmr.msra.gmra.mxu1 %vm35_vm1, %v15881_v23  ;;  %v15934_v29 = vor.u32 %v17664_v7, %v15933_v4  ;;  %v15966_v23 = vor.u32 %v17671_v1, %v15965_v58  ;;  %v17681_v4 = vld [vmem:[%s25878_s3 + $0x2324] sm:$0xf]  ;;  %v16022_v7 = vor.u32 %v17684_v19, %v16021_v33  ;;  %v17754_v58 = vld [vmem:[%s25878_s3 + $0x2564] sm:$0xf0]  ;;  %v16321_v19 = vld [vmem:[%s25878_s3 + $0x2538] sm:$0xf0] }
 0xd37   :  { %9390 = vmatpush.bf16.msrb.mxu1 %v16010_v42  ;;  %9403 = vmatpush.bf16.msra.mxu2 %v16014_v51  ;;  %v15967_v42 = vld [vmem:[%s25878_s3 + $0x22d0] sm:$0xf0]  ;;  %v16002_v51 = vor.u32 %v17675_v48, %v15999_v41  ;;  %v17745_v33 = vld [vmem:[%s25878_s3 + $0x2524] sm:$0xf] }
 0xd38   :  { %9380 = vmatpush.bf16.msra.mxu3 %v15934_v29  ;;  %9416 = vmatpush.bf16.msrb.mxu0 %v16018_v56  ;;  %v15997_v29 = vld [vmem:[%s25878_s3 + $0x22f0] sm:$0xf]  ;;  %v15974_v56 = vor.u32 %v17672_v40, %v15973_v62  ;;  %v16123_v40 = vld [vmem:[%s25875_s0 + $0x18] sm:$0x1] }
 0xd3b   :  { %9391 = vmatpush.bf16.msrb.mxu1 %v15986_v15  ;;  %9404 = vmatpush.bf16.msra.mxu2 %v15990_v35  ;;  %v15970_v15 = vor.u32 %v17668_v3, %v15967_v42  ;;  %v17742_v42 = vld [vmem:[%s25878_s3 + $0x2504] sm:$0xf0] }
 0xd3c   :  { %9425 = vmatpush.bf16.msrb.mxu3 %v16118_v14  ;;  %9417 = vmatpush.bf16.msrb.mxu0 %v15994_v22  ;;  %v15978_v14 = vor.u32 %v17669_v55, %v15975_v34  ;;  %v16247_v55 = vld [vmem:[%s25878_s3 + $0x2490] sm:$0xf]  ;;  %v17727_v34 = vld [vmem:[%s25878_s3 + $0x2494] sm:$0xf] }
 0xd3f   :  { %9392 = vmatpush.bf16.msrb.mxu1 %v15962_v43  ;;  %9405 = vmatpush.bf16.msra.mxu2 %v15966_v23  ;;  %v17687_v43 = vld [vmem:[%s25878_s3 + $0x2354] sm:$0xf]  ;;  %v16295_v23 = vld [vmem:[%s25878_s3 + $0x24f0] sm:$0xf] }
 0xd40   :  { %9426 = vmatpush.bf16.msrb.mxu3 %v16094_v12  ;;  %9418 = vmatpush.bf16.msrb.mxu0 %v15970_v15  ;;  %v16050_v63 = vor.u32 %v17687_v43, %v16047_v46  ;;  %v16348_v43 = vor.u32 %v17751_v27, %v16345_v11  ;;  %v17737_v27 = vld [vmem:[%s25878_s3 + $0x24dc] sm:$0xf0] }
 0xd43   :  { %9393 = vmatpush.bf16.msrb.mxu1 %v15938_v32  ;;  %9406 = vmatpush.bf16.msra.mxu2 %v15942_v37  ;;  %v15998_v32 = vor.u32 %v17678_v20, %v15997_v29  ;;  %v17755_v37 = vld [vmem:[%s25878_s3 + $0x256c] sm:$0xf0]  ;;  %v16324_v29 = vor.u32 %v17745_v33, %v16321_v19  ;;  %v16297_v20 = vld [vmem:[%s25878_s3 + $0x2508] sm:$0xf0]  ;;  %v17728_v19 = vld [vmem:[%s25878_s3 + $0x249c] sm:$0xf] }
 0xd44   :  { %9427 = vmatpush.bf16.msrb.mxu3 %v16070_v10  ;;  %9419 = vmatpush.bf16.msrb.mxu0 %v15946_v24  ;;  %v16296_v10 = vor.u32 %v17742_v42, %v16295_v23  ;;  %v16305_v23 = vld [vmem:[%s25878_s3 + $0x2510] sm:$0xf0]  ;;  %v17731_v33 = vld [vmem:[%s25878_s3 + $0x24ac] sm:$0xf0] }
 0xd47   :  { %9438 = vmatpush.bf16.msra.mxu1 %v16122_v9  ;;  %9469 = vmatpush.bf16.msrb.mxu2 %v17889_v2  ;;  %v16026_v2 = vor.u32 %v17681_v4, %v16023_v26  ;;  %v17666_v9 = vld [vmem:[%s25878_s3 + $0x22a4] sm:$0xf0] }
 0xd48   :  { %9428 = vmatpush.bf16.msrb.mxu3 %v16046_v49  ;;  %v15950_v8 = vor.u32 %v17666_v9, %v15949_v13  ;;  %v17749_v9 = vld [vmem:[%s25878_s3 + $0x253c] sm:$0xf0] }
 0xd4b   :  { %9439 = vmatpush.bf16.msra.mxu1 %v16098_v17 }
 0xd4c   :  { %9429 = vmatpush.bf16.msrb.mxu3 %v16022_v7  ;;  %v16356_v7 = vor.u32 %v17752_v25, %v16353_v52  ;;  %v17712_v25 = vld [vmem:[%s25878_s3 + $0x2414] sm:$0xf0]  ;;  %v17709_v52 = vld [vmem:[%s25878_s3 + $0x2404] sm:$0xf] }
 0xd4f   :  { %9440 = vmatpush.bf16.msra.mxu1 %v16074_v57 }
 0xd50   :  { %9430 = vmatpush.bf16.msrb.mxu3 %v15998_v32  ;;  %v17733_v32 = vld [vmem:[%s25878_s3 + $0x24c4] sm:$0xf] }
 0xd53   :  { %9441 = vmatpush.bf16.msra.mxu1 %v16050_v63 }
 0xd54   :  { %9431 = vmatpush.bf16.msrb.mxu3 %v15974_v56  ;;  %v17730_v56 = vld [vmem:[%s25878_s3 + $0x24a4] sm:$0xf0] }
 0xd55   :  { %v16248_v13 = vor.u32 %v17730_v56, %v16247_v55  ;;  %v16233_v55 = vld [vmem:[%s25878_s3 + $0x2480] sm:$0xf0]  ;;  %v16335_v56 = vld [vmem:[%s25878_s3 + $0x2530] sm:$0xf] }
 0xd57   :  { %9442 = vmatpush.bf16.msra.mxu1 %v16026_v2 }
 0xd58   :  { %9432 = vmatpush.bf16.msrb.mxu3 %v15950_v8  ;;  %v16329_v8 = vld [vmem:[%s25878_s3 + $0x2540] sm:$0xf0] }
 0xd5b   :  { %9443 = vmatpush.bf16.msra.mxu1 %v16002_v51  ;;  %v16273_v51 = vld [vmem:[%s25878_s3 + $0x24d8] sm:$0xf0] }
 0xd5c   :  { %v16276_v62 = vor.u32 %v17733_v32, %v16273_v51  ;;  %v16231_v32 = vld [vmem:[%s25878_s3 + $0x2468] sm:$0xf]  ;;  %v17725_v51 = vld [vmem:[%s25878_s3 + $0x247c] sm:$0xf0] }
 0xd5f   :  { %9444 = vmatpush.bf16.msra.mxu1 %v15978_v14  ;;  %v16327_v14 = vld [vmem:[%s25878_s3 + $0x2528] sm:$0xf] }
 0xd60   :  { %v16328_v5 = vor.u32 %v17749_v9, %v16327_v14  ;;  %v17747_v14 = vld [vmem:[%s25878_s3 + $0x2534] sm:$0xf]  ;;  %v16337_v9 = vld [vmem:[%s25878_s3 + $0x2548] sm:$0xf0] }
 0xd63   :  { %9445 = vmatpush.bf16.msra.mxu1 %v15954_v54 }
 0xda2   :  { %v9002_v61 = vpop.f32.mrf.mxu0 }
 0xda3   :  { %v25385_v60 = vadd.f32 %v9002_v61, %v25079_v16  ;;  %v9015_v35 = vpop.f32.mrf.mxu1  ;;  %v16249_v61 = vld [vmem:[%s25878_s3 + $0x24a8] sm:$0xf0] }
 0xda4   :  { %v25388_v6 = vadd.f32 %v9015_v35, %v25076_v45  ;;  %v16343_v45 = vld [vmem:[%s25878_s3 + $0x2550] sm:$0xf]  ;;  %v16252_v0 = vor.u32 %v17727_v34, %v16249_v61  ;;  %v17746_v35 = vld [vmem:[%s25878_s3 + $0x252c] sm:$0xf]  ;;  %v17750_v34 = vld [vmem:[%s25878_s3 + $0x2544] sm:$0xf0] }
 0xda5   :  { %v16344_v1 = vor.u32 %v17754_v58, %v16343_v45  ;;  %v16332_v54 = vor.u32 %v17746_v35, %v16329_v8  ;;  %v16225_v45 = vld [vmem:[%s25878_s3 + $0x2478] sm:$0xf0]  ;;  %v16336_v61 = vor.u32 %v17750_v34, %v16335_v56  ;;  %v17719_v35 = vld [vmem:[%s25878_s3 + $0x244c] sm:$0xf0] }
 0xda6   :  { %v17716_v8 = vld [vmem:[%s25878_s3 + $0x243c] sm:$0xf] }
 0xda7   :  { %9766 = vmatpush.bf16.msra.mxu0 %v16344_v1  ;;  %v16303_v1 = vld [vmem:[%s25878_s3 + $0x24f8] sm:$0xf] }
 0xda8   :  { %v8989_v22 = vpop.f32.mrf.mxu2 }
 0xda9   :  { %v25391_v12 = vadd.f32 %v8989_v22, %v25073_v44  ;;  %v9028_v59 = vpop.f32.mrf.mxu3  ;;  %v16319_v44 = vld [vmem:[%s25878_s3 + $0x2520] sm:$0xf] }
 0xdaa   :  { %v25394_v21 = vadd.f32 %v9028_v59, %v25082_v39  ;;  %v9004_v16 = vpop.f32.mrf.mxu0  ;;  %v17748_v39 = vld [vmem:[%s25878_s3 + $0x2534] sm:$0xf0]  ;;  %v16223_v22 = vld [vmem:[%s25878_s3 + $0x2460] sm:$0xf] }
 0xdab   :  { %v9017_v17 = vpop.f32.mrf.mxu1  ;;  %v16320_v3 = vor.u32 %v17748_v39, %v16319_v44  ;;  %v17724_v59 = vld [vmem:[%s25878_s3 + $0x2474] sm:$0xf0]  ;;  %v17721_v16 = vld [vmem:[%s25878_s3 + $0x2464] sm:$0xf]  ;;  %v17743_v44 = vld [vmem:[%s25878_s3 + $0x250c] sm:$0xf0] }
 0xdac   :  { %v16224_v17 = vor.u32 %v17724_v59, %v16223_v22  ;;  %v16228_v58 = vor.u32 %v17721_v16, %v16225_v45  ;;  %v17740_v39 = vld [vmem:[%s25878_s3 + $0x24fc] sm:$0xf]  ;;  %v16209_v22 = vld [vmem:[%s25878_s3 + $0x2450] sm:$0xf0]  ;;  %v16311_v59 = vld [vmem:[%s25878_s3 + $0x2500] sm:$0xf] }
 0xdad   :  { %9767 = vmatpush.bf16.msra.mxu0 %v16320_v3  ;;  %v16304_v3 = vor.u32 %v17743_v44, %v16303_v1  ;;  %v16308_v42 = vor.u32 %v17740_v39, %v16305_v23  ;;  %v17744_v16 = vld [vmem:[%s25878_s3 + $0x2514] sm:$0xf0]  ;;  %v16313_v1 = vld [vmem:[%s25878_s3 + $0x2518] sm:$0xf0]  ;;  %v16183_v39 = vld [vmem:[%s25878_s3 + $0x2408] sm:$0xf] }
 0xdae   :  { %v16312_v45 = vor.u32 %v17744_v16, %v16311_v59  ;;  %v17710_v23 = vld [vmem:[%s25878_s3 + $0x240c] sm:$0xf] }
 0xdaf   :  { %v17770_v59 = vld [vmem:[%s25880_s5 + $0x68] sm:$0xff] }
 0xdb0   :  { %v8991_v18 = vpop.f32.mrf.mxu2 }
 0xdb1   :  { %v9030_v30 = vpop.f32.mrf.mxu3  ;;  %9768 = vmatpush.bf16.msra.mxu0 %v16296_v10  ;;  %v16199_v18 = vld [vmem:[%s25878_s3 + $0x2430] sm:$0xf] }
 0xdb2   :  { %v9054_v15 = vpop.f32.mrf.mxu0  ;;  %v17718_v30 = vld [vmem:[%s25878_s3 + $0x2444] sm:$0xf0] }
 0xdb3   :  { %v25415_v28 = vadd.f32 %v9054_v15, %v25137_v53  ;;  %v9078_v47 = vpop.f32.mrf.mxu1  ;;  %v17736_v53 = vld [vmem:[%s25878_s3 + $0x24d4] sm:$0xf0]  ;;  %v17715_v15 = vld [vmem:[%s25878_s3 + $0x2434] sm:$0xf]  ;;  %v16200_v10 = vor.u32 %v17718_v30, %v16199_v18  ;;  %v16185_v18 = vld [vmem:[%s25878_s3 + $0x2420] sm:$0xf0] }
 0xdb4   :  { %v9079_v57 = vadd.f32 %v24794_v50, %v9078_v47  ;;  %v16351_v50 = vld [vmem:[%s25878_s3 + $0x2558] sm:$0xf]  ;;  %v16272_v46 = vor.u32 %v17736_v53, %v16271_v31  ;;  %v16201_v47 = vld [vmem:[%s25878_s3 + $0x2448] sm:$0xf0]  ;;  %v16287_v30 = vld [vmem:[%s25878_s3 + $0x24d0] sm:$0xf] }
 0xdb5   :  { %v16352_v4 = vor.u32 %v17755_v37, %v16351_v50  ;;  %v16204_v11 = vor.u32 %v17715_v15, %v16201_v47  ;;  %v17734_v53 = vld [vmem:[%s25878_s3 + $0x24cc] sm:$0xf]  ;;  %v16281_v50 = vld [vmem:[%s25878_s3 + $0x24e0] sm:$0xf0]  ;;  %v16175_v37 = vld [vmem:[%s25878_s3 + $0x2400] sm:$0xf] }
 0xdb6   :  { %v9082_v38 = vmax.f32 %v9079_v57, 0.0  ;;  %9769 = vmatpush.bf16.msra.mxu0 %v16272_v46  ;;  %v16279_v57 = vld [vmem:[%s25878_s3 + $0x24c8] sm:$0xf]  ;;  %v16255_v46 = vld [vmem:[%s25878_s3 + $0x2498] sm:$0xf] }
 0xdb7   :  { %v16280_v31 = vor.u32 %v17737_v27, %v16279_v57  ;;  %v17738_v15 = vld [vmem:[%s25878_s3 + $0x24e4] sm:$0xf0]  ;;  %v17735_v57 = vld [vmem:[%s25878_s3 + $0x24d4] sm:$0xf]  ;;  %v16289_v27 = vld [vmem:[%s25878_s3 + $0x24e8] sm:$0xf0] }
 0xdb8   :  { %v9083_v24 = vpack.c.bf16 %v9082_v38, %v9082_v38  ;;  %v9041_v49 = vpop.f32.mrf.mxu2  ;;  %v16284_v38 = vor.u32 %v17734_v53, %v16281_v50  ;;  %v16288_v47 = vor.u32 %v17738_v15, %v16287_v30  ;;  %v17732_v53 = vld [vmem:[%s25878_s3 + $0x24b4] sm:$0xf0]  ;;  %v17729_v50 = vld [vmem:[%s25878_s3 + $0x24a4] sm:$0xf] }
 0xdb9   :  { %v25443_v63 = vadd.f32 %v9041_v49, %v25103_v36  ;;  %v17739_v36 = vld [vmem:[%s25878_s3 + $0x24f4] sm:$0xf]  ;;  %v16176_v49 = vor.u32 %v17712_v25, %v16175_v37  ;;  %v17768_v30 = vld [vmem:[%s25880_s5 + $0x58] sm:$0xff] }
 0xdba   :  { %9381 = vmatmul.bf16.vlgmr.msra.gmra.mxu3 %v9083_v24  ;;  %9394 = vmatmul.bf16.vlgmr.msrb.gmra.mxu1 %v9083_v24  ;;  %v9056_v26 = vpop.f32.mrf.mxu0  ;;  %v16300_v41 = vor.u32 %v17739_v36, %v16297_v20  ;;  %v17753_v20 = vld [vmem:[%s25878_s3 + $0x2564] sm:$0xf] }
 0xdbb   :  { %9407 = vmatmul.bf16.vlgmr.msra.gmra.mxu2 %v9083_v24  ;;  %9420 = vmatmul.bf16.vlgmr.msrb.gmra.mxu0 %v9083_v24  ;;  %v9080_v2 = vpop.f32.mrf.mxu1  ;;  %v16359_v26 = vld [vmem:[%s25878_s3 + $0x2560] sm:$0xf] }
 0xdbc   :  { %9779 = vmatpush.bf16.msra.mxu2 %v16348_v43  ;;  %9792 = vmatpush.bf16.msra.mxu3 %v16352_v4  ;;  %v16256_v4 = vor.u32 %v17731_v33, %v16255_v46  ;;  %v17756_v2 = vld [vmem:[%s25878_s3 + $0x2574] sm:$0xf0]  ;;  %v16241_v33 = vld [vmem:[%s25878_s3 + $0x2488] sm:$0xf0] }
 0xdbd   :  { %9805 = vmatpush.bf16.msrb.mxu1 %v16356_v7  ;;  %9770 = vmatpush.bf16.msra.mxu0 %v16248_v13  ;;  %v16257_v7 = vld [vmem:[%s25878_s3 + $0x24b0] sm:$0xf0]  ;;  %v16360_v36 = vor.u32 %v17756_v2, %v16359_v26  ;;  %v16215_v26 = vld [vmem:[%s25878_s3 + $0x2440] sm:$0xf]  ;;  %v17720_v2 = vld [vmem:[%s25878_s3 + $0x2454] sm:$0xf0] }
 0xdc0   :  { %v9043_v48 = vpop.f32.mrf.mxu2  ;;  %9780 = vmatpush.bf16.msra.mxu2 %v16324_v29  ;;  %9793 = vmatpush.bf16.msra.mxu3 %v16328_v5  ;;  %v16260_v29 = vor.u32 %v17728_v19, %v16257_v7  ;;  %v16207_v5 = vld [vmem:[%s25878_s3 + $0x2438] sm:$0xf] }
 0xdc1   :  { %9806 = vmatpush.bf16.msrb.mxu1 %v16332_v54  ;;  %9771 = vmatpush.bf16.msra.mxu0 %v16224_v17  ;;  %v16361_v48 = vld [vmem:[%s25878_s3 + $0x2578] sm:$0xf0]  ;;  %v16208_v54 = vor.u32 %v17719_v35, %v16207_v5  ;;  %v16212_v17 = vor.u32 %v17716_v8, %v16209_v22  ;;  %v17763_v35 = vld [vmem:[%s25880_s5 + $0x30] sm:$0xff]  ;;  %v17762_v22 = vld [vmem:[%s25880_s5 + $0x28] sm:$0xff] }
 0xdc2   :  { %v17771_v8 = vld [vmem:[%s25880_s5 + $0x70] sm:$0xff] }
 0xdc4   :  { %9781 = vmatpush.bf16.msra.mxu2 %v16300_v41  ;;  %9794 = vmatpush.bf16.msra.mxu3 %v16304_v3  ;;  %v16364_v41 = vor.u32 %v17753_v20, %v16361_v48  ;;  %v17713_v3 = vld [vmem:[%s25878_s3 + $0x241c] sm:$0xf0]  ;;  %v16216_v20 = vor.u32 %v17720_v2, %v16215_v26  ;;  %v17782_v26 = vld [vmem:[%s25880_s5 + $0xc8] sm:$0xff] }
 0xdc5   :  { %9807 = vmatpush.bf16.msrb.mxu1 %v16308_v42  ;;  %9772 = vmatpush.bf16.msra.mxu0 %v16200_v10  ;;  %v16184_v42 = vor.u32 %v17713_v3, %v16183_v39  ;;  %v16188_v10 = vor.u32 %v17710_v23, %v16185_v18  ;;  %v17769_v39 = vld [vmem:[%s25880_s5 + $0x60] sm:$0xff]  ;;  %v17788_v23 = vld [vmem:[%s25880_s5 + $0xf8] sm:$0xff]  ;;  %v17794_v2 = vld [vmem:[%s25880_s5 + $0x128] sm:$0xff] }
 0xdc6   :  { %v17780_v18 = vld [vmem:[%s25880_s5 + $0xb8] sm:$0xff] }
 0xdc8   :  { %9782 = vmatpush.bf16.msra.mxu2 %v16276_v62  ;;  %9795 = vmatpush.bf16.msra.mxu3 %v16280_v31  ;;  %v17722_v62 = vld [vmem:[%s25878_s3 + $0x246c] sm:$0xf]  ;;  %v16263_v31 = vld [vmem:[%s25878_s3 + $0x24a0] sm:$0xf] }
 0xdc9   :  { %9808 = vmatpush.bf16.msrb.mxu1 %v16284_v38  ;;  %9773 = vmatpush.bf16.msra.mxu0 %v16176_v49  ;;  %v16236_v13 = vor.u32 %v17722_v62, %v16233_v55  ;;  %v16264_v37 = vor.u32 %v17732_v53, %v16263_v31  ;;  %v16265_v38 = vld [vmem:[%s25878_s3 + $0x24b8] sm:$0xf0]  ;;  %v17723_v49 = vld [vmem:[%s25878_s3 + $0x2474] sm:$0xf]  ;;  %v16193_v62 = vld [vmem:[%s25878_s3 + $0x2428] sm:$0xf0] }
 0xdca   :  { %9433 = vmatmul.bf16.vlgmr.msrb.gmra.mxu3 %v9083_v24  ;;  %9446 = vmatmul.bf16.vlgmr.msra.gmra.mxu1 %v9083_v24  ;;  %v16177_v24 = vld [vmem:[%s25878_s3 + $0x2418] sm:$0xf0]  ;;  %v16268_v25 = vor.u32 %v17729_v50, %v16265_v38  ;;  %v16244_v7 = vor.u32 %v17723_v49, %v16241_v33  ;;  %v17786_v31 = vld [vmem:[%s25880_s5 + $0xe8] sm:$0xff]  ;;  %v17785_v38 = vld [vmem:[%s25880_s5 + $0xe0] sm:$0xff] }
 0xdcb   :  { %16124 = vmatmul.msk.bf16.vlgmr.msrb.gmra.mxu2 %vm35_vm1, %v16123_v40  ;;  %v16180_v43 = vor.u32 %v17709_v52, %v16177_v24  ;;  %v16232_v40 = vor.u32 %v17725_v51, %v16231_v32  ;;  %v16239_v52 = vld [vmem:[%s25878_s3 + $0x2470] sm:$0xf]  ;;  %v17726_v24 = vld [vmem:[%s25878_s3 + $0x2484] sm:$0xf0]  ;;  %v17711_v51 = vld [vmem:[%s25878_s3 + $0x2414] sm:$0xf] }
 0xdcc   :  { %9783 = vmatpush.bf16.msra.mxu2 %v16252_v0  ;;  %9796 = vmatpush.bf16.msra.mxu3 %v16256_v4  ;;  %v16340_v0 = vor.u32 %v17747_v14, %v16337_v9  ;;  %v16240_v46 = vor.u32 %v17726_v24, %v16239_v52  ;;  %v16196_v14 = vor.u32 %v17711_v51, %v16193_v62  ;;  %v17758_v53 = vld [vmem:[%s25880_s5 + $0x8] sm:$0xff]  ;;  %v17796_v52 = vld [vmem:[%s25880_s5 + $0x138] sm:$0xff]  ;;  %v17777_v24 = vld [vmem:[%s25880_s5 + $0xa0] sm:$0xff] }
 0xdcd   :  { %9809 = vmatpush.bf16.msrb.mxu1 %v16260_v29  ;;  %9818 = vmatpush.bf16.msrb.mxu0 %v16360_v36  ;;  %v17717_v36 = vld [vmem:[%s25878_s3 + $0x2444] sm:$0xf]  ;;  %v17778_v50 = vld [vmem:[%s25880_s5 + $0xa8] sm:$0xff]  ;;  %v17783_v33 = vld [vmem:[%s25880_s5 + $0xd0] sm:$0xff] }
 0xdce   :  { %v17765_v49 = vld [vmem:[%s25880_s5 + $0x40] sm:$0xff] }
 0xdcf   :  { %v17773_v51 = vld [vmem:[%s25880_s5 + $0x80] sm:$0xff] }
 0xdd0   :  { %9784 = vmatpush.bf16.msra.mxu2 %v16228_v58  ;;  %9797 = vmatpush.bf16.msra.mxu3 %v16232_v40  ;;  %v17741_v58 = vld [vmem:[%s25878_s3 + $0x2504] sm:$0xf] }
 0xdd1   :  { %9810 = vmatpush.bf16.msrb.mxu1 %v16236_v13  ;;  %9819 = vmatpush.bf16.msrb.mxu0 %v16336_v61  ;;  %v16316_v44 = vor.u32 %v17741_v58, %v16313_v1  ;;  %v17801_v62 = vld [vmem:[%s25880_s5 + $0x160] sm:$0xff] }
 0xdd4   :  { %9785 = vmatpush.bf16.msra.mxu2 %v16204_v11  ;;  %9798 = vmatpush.bf16.msra.mxu3 %v16208_v54  ;;  %v16292_v11 = vor.u32 %v17735_v57, %v16289_v27  ;;  %v17759_v57 = vld [vmem:[%s25880_s5 + $0x10] sm:$0xff] }
 0xdd5   :  { %9811 = vmatpush.bf16.msrb.mxu1 %v16212_v17  ;;  %9820 = vmatpush.bf16.msrb.mxu0 %v16312_v45  ;;  %v17779_v27 = vld [vmem:[%s25880_s5 + $0xb0] sm:$0xff] }
 0xdd8   :  { %9786 = vmatpush.bf16.msra.mxu2 %v16180_v43  ;;  %9799 = vmatpush.bf16.msra.mxu3 %v16184_v42  ;;  %v17760_v42 = vld [vmem:[%s25880_s5 + $0x18] sm:$0xff] }
 0xdd9   :  { %9812 = vmatpush.bf16.msrb.mxu1 %v16188_v10  ;;  %9821 = vmatpush.bf16.msrb.mxu0 %v16288_v47  ;;  %v17787_v47 = vld [vmem:[%s25880_s5 + $0xf0] sm:$0xff] }
 0xddc   :  { %9831 = vmatpush.bf16.msrb.mxu2 %v16364_v41  ;;  %v16191_v41 = vld [vmem:[%s25878_s3 + $0x2410] sm:$0xf] }
 0xddd   :  { %9822 = vmatpush.bf16.msrb.mxu0 %v16264_v37  ;;  %v17766_v37 = vld [vmem:[%s25880_s5 + $0x48] sm:$0xff] }
 0xde0   :  { %9832 = vmatpush.bf16.msrb.mxu2 %v16340_v0  ;;  %v17764_v0 = vld [vmem:[%s25880_s5 + $0x38] sm:$0xff] }
 0xde1   :  { %9823 = vmatpush.bf16.msrb.mxu0 %v16240_v46  ;;  %10269 = vmatpush.bf16.msrb.mxu3 %v17764_v0  ;;  %v17795_v46 = vld [vmem:[%s25880_s5 + $0x130] sm:$0xff]  ;;  %v17797_v0 = vld [vmem:[%s25880_s5 + $0x140] sm:$0xff] }
 0xde4   :  { %9833 = vmatpush.bf16.msrb.mxu2 %v16316_v44  ;;  %v17761_v44 = vld [vmem:[%s25880_s5 + $0x20] sm:$0xff] }
 0xde5   :  { %9824 = vmatpush.bf16.msrb.mxu0 %v16216_v20  ;;  %10270 = vmatpush.bf16.msrb.mxu3 %v17763_v35  ;;  %v17781_v20 = vld [vmem:[%s25880_s5 + $0xc0] sm:$0xff] }
 0xde8   :  { %9834 = vmatpush.bf16.msrb.mxu2 %v16292_v11  ;;  %v17767_v11 = vld [vmem:[%s25880_s5 + $0x50] sm:$0xff] }
 0xde9   :  { %10271 = vmatpush.bf16.msrb.mxu3 %v17762_v22 }
 0xdec   :  { %9835 = vmatpush.bf16.msrb.mxu2 %v16268_v25  ;;  %v17757_v25 = vld [vmem:[%s25880_s5] sm:$0xff] }
 0xded   :  { %10272 = vmatpush.bf16.msrb.mxu3 %v17761_v44 }
 0xdf0   :  { %9836 = vmatpush.bf16.msrb.mxu2 %v16244_v7  ;;  %v17804_v7 = vld [vmem:[%s25880_s5 + $0x178] sm:$0xff] }
 0xdf1   :  { %10273 = vmatpush.bf16.msrb.mxu3 %v17760_v42 }
 0xdf5   :  { %10274 = vmatpush.bf16.msrb.mxu3 %v17759_v57 }
 0xdf9   :  { %10275 = vmatpush.bf16.msrb.mxu3 %v17758_v53 }
 0xdfd   :  { %10276 = vmatpush.bf16.msrb.mxu3 %v17757_v25 }
 0xe37   :  { %v9395_v43 = vpop.f32.mrf.mxu1 }
 0xe38   :  { %v25672_v19 = vadd.f32 %v9395_v43, %v25385_v60  ;;  %v9421_v4 = vpop.f32.mrf.mxu0  ;;  %v16217_v60 = vld [vmem:[%s25878_s3 + $0x2458] sm:$0xf0] }
 0xe39   :  { %v25681_v29 = vadd.f32 %v9421_v4, %v25394_v21  ;;  %v16220_v48 = vor.u32 %v17717_v36, %v16217_v60  ;;  %v17714_v21 = vld [vmem:[%s25878_s3 + $0x2424] sm:$0xf0]  ;;  %v17784_v43 = vld [vmem:[%s25880_s5 + $0xd8] sm:$0xff]  ;;  %v17775_v36 = vld [vmem:[%s25880_s5 + $0x90] sm:$0xff] }
 0xe3a   :  { %v16192_v13 = vor.u32 %v17714_v21, %v16191_v41  ;;  %v17776_v4 = vld [vmem:[%s25880_s5 + $0x98] sm:$0xff]  ;;  %v17803_v60 = vld [vmem:[%s25880_s5 + $0x170] sm:$0xff]  ;;  %v17774_v41 = vld [vmem:[%s25880_s5 + $0x88] sm:$0xff] }
 0xe3b   :  { %9837 = vmatpush.bf16.msrb.mxu2 %v16220_v48  ;;  %v17793_v48 = vld [vmem:[%s25880_s5 + $0x120] sm:$0xff]  ;;  %v17802_v21 = vld [vmem:[%s25880_s5 + $0x168] sm:$0xff] }
 0xe3c   :  { %9825 = vmatpush.bf16.msrb.mxu0 %v16192_v13  ;;  %v17790_v13 = vld [vmem:[%s25880_s5 + $0x108] sm:$0xff] }
 0xe3d   :  { %v9382_v32 = vpop.f32.mrf.mxu3 }
 0xe3e   :  { %v25702_v40 = vadd.f32 %v9382_v32, %v25391_v12  ;;  %v9408_v55 = vpop.f32.mrf.mxu2  ;;  %v17772_v12 = vld [vmem:[%s25880_s5 + $0x78] sm:$0xff] }
 0xe3f   :  { %v25705_v56 = vadd.f32 %v9408_v55, %v25388_v6  ;;  %v9397_v34 = vpop.f32.mrf.mxu1  ;;  %9838 = vmatpush.bf16.msrb.mxu2 %v16196_v14  ;;  %10282 = vmatpush.bf16.msra.mxu1 %v17772_v12  ;;  %v17792_v32 = vld [vmem:[%s25880_s5 + $0x118] sm:$0xff]  ;;  %v17791_v55 = vld [vmem:[%s25880_s5 + $0x110] sm:$0xff]  ;;  %v17789_v14 = vld [vmem:[%s25880_s5 + $0x100] sm:$0xff] }
 0xe40   :  { %v9423_v61 = vpop.f32.mrf.mxu0  ;;  %v17800_v34 = vld [vmem:[%s25880_s5 + $0x158] sm:$0xff]  ;;  %v30_v12 = vld [vmem:[%s25879_s4] sm:$0x3f] }
 0xe41   :  { %v17799_v61 = vld [vmem:[%s25880_s5 + $0x150] sm:$0xff]  ;;  %v9854_v35 = vperm.slane %v30_v12, 3  ;;  %v9855_v53 = vperm.slane %v30_v12, 4 }
 0xe43   :  { %10283 = vmatpush.bf16.msra.mxu1 %v17771_v8 }
 0xe45   :  { %v9384_v9 = vpop.f32.mrf.mxu3 }
 0xe46   :  { %v9410_v5 = vpop.f32.mrf.mxu2  ;;  %v17798_v9 = vld [vmem:[%s25880_s5 + $0x148] sm:$0xff] }
 0xe47   :  { %v9447_v6 = vpop.f32.mrf.mxu1  ;;  %10284 = vmatpush.bf16.msra.mxu1 %v17770_v59  ;;  %v9851_v5 = vperm.slane %v30_v12, 0 }
 0xe48   :  { %v25720_v54 = vadd.f32 %v9447_v6, %v25415_v28  ;;  %v17815_v28 = vld [vmem:[%s25877_s2] ss:$0 sm:$0xff]  ;;  %s10353_s2 = sshll.u32 %s17842_s8, 4  ;;  %s10354_s2 = int_to_ptr.vmem [resolvable:$true] %s10353_s2 }
 0xe4b   :  { %10285 = vmatpush.bf16.msra.mxu1 %v17769_v39  ;;  %v9853_v39 = vperm.slane %v30_v12, 2 }
 0xe4d   :  { %v9434_v16 = vpop.f32.mrf.mxu3 }
 0xe4e   :  { %v25729_v17 = vadd.f32 %v9434_v16, %v25443_v63  ;;  %v9471_v45 = vpop.f32.mrf.mxu2 }
 0xe4f   :  { %v9472_v58 = vadd.f32 %v17815_v28, %v9471_v45  ;;  %v9449_v1 = vpop.f32.mrf.mxu1  ;;  %10286 = vmatpush.bf16.msra.mxu1 %v17768_v30 }
 0xe51   :  { %v9475_v3 = vmax.f32 %v9472_v58, 0.0  ;;  %v9852_v58 = vperm.slane %v30_v12, 1 }
 0xe53   :  { %v9476_v63 = vpack.c.bf16 %v9475_v3, %v9475_v3  ;;  %10287 = vmatpush.bf16.msra.mxu1 %v17767_v11 }
 0xe55   :  { %9774 = vmatmul.bf16.vlgmr.msra.gmra.mxu0 %v9476_v63  ;;  %9787 = vmatmul.bf16.vlgmr.msra.gmra.mxu2 %v9476_v63  ;;  %v9436_v15 = vpop.f32.mrf.mxu3 }
 0xe56   :  { %9800 = vmatmul.bf16.vlgmr.msra.gmra.mxu3 %v9476_v63  ;;  %9813 = vmatmul.bf16.vlgmr.msrb.gmra.mxu1 %v9476_v63  ;;  %v9473_v10 = vpop.f32.mrf.mxu2 }
 0xe57   :  { %10308 = vmatpush.bf16.msra.mxu2 %v17788_v23  ;;  %10295 = vmatpush.bf16.msra.mxu0 %v17780_v18 }
 0xe58   :  { %10288 = vmatpush.bf16.msra.mxu1 %v17766_v37  ;;  %10321 = vmatpush.bf16.msra.mxu3 %v17796_v52 }
 0xe5b   :  { %10309 = vmatpush.bf16.msra.mxu2 %v17787_v47  ;;  %10296 = vmatpush.bf16.msra.mxu0 %v17779_v27 }
 0xe5c   :  { %10289 = vmatpush.bf16.msra.mxu1 %v17765_v49  ;;  %10322 = vmatpush.bf16.msra.mxu3 %v17795_v46 }
 0xe5f   :  { %10310 = vmatpush.bf16.msra.mxu2 %v17786_v31  ;;  %10297 = vmatpush.bf16.msra.mxu0 %v17778_v50 }
 0xe60   :  { %10334 = vmatpush.bf16.msrb.mxu1 %v17804_v7  ;;  %10323 = vmatpush.bf16.msra.mxu3 %v17794_v2  ;;  %v17807_v7 = vld [vmem:[%s25881_s6] ss:$0 sm:$0xff]  ;;  %s10355_s6 = sshll.u32 %s25882_s7, 4  ;;  %s10356_s6 = int_to_ptr.hbm [resolvable:$true] %s10355_s6 }
 0xe63   :  { %10311 = vmatpush.bf16.msra.mxu2 %v17785_v38  ;;  %10298 = vmatpush.bf16.msra.mxu0 %v17777_v24  ;;  %v9856_v38 = vperm.slane %v30_v12, 5 }
 0xe64   :  { %10335 = vmatpush.bf16.msrb.mxu1 %v17803_v60  ;;  %10324 = vmatpush.bf16.msra.mxu3 %v17793_v48 }
 0xe65   :  { %9826 = vmatmul.bf16.vlgmr.msrb.gmra.mxu0 %v9476_v63  ;;  %9839 = vmatmul.bf16.vlgmr.msrb.gmra.mxu2 %v9476_v63 }
 0xe67   :  { %10312 = vmatpush.bf16.msra.mxu2 %v17784_v43  ;;  %10299 = vmatpush.bf16.msra.mxu0 %v17776_v4 }
 0xe68   :  { %10336 = vmatpush.bf16.msrb.mxu1 %v17802_v21  ;;  %10325 = vmatpush.bf16.msra.mxu3 %v17792_v32 }
 0xe6b   :  { %10313 = vmatpush.bf16.msra.mxu2 %v17783_v33  ;;  %10300 = vmatpush.bf16.msra.mxu0 %v17775_v36 }
 0xe6c   :  { %10337 = vmatpush.bf16.msrb.mxu1 %v17801_v62  ;;  %10326 = vmatpush.bf16.msra.mxu3 %v17791_v55 }
 0xe6f   :  { %10314 = vmatpush.bf16.msra.mxu2 %v17782_v26  ;;  %10301 = vmatpush.bf16.msra.mxu0 %v17774_v41 }
 0xe70   :  { %10338 = vmatpush.bf16.msrb.mxu1 %v17800_v34  ;;  %10327 = vmatpush.bf16.msra.mxu3 %v17790_v13 }
 0xe73   :  { %10315 = vmatpush.bf16.msra.mxu2 %v17781_v20  ;;  %10302 = vmatpush.bf16.msra.mxu0 %v17773_v51 }
 0xe74   :  { %10339 = vmatpush.bf16.msrb.mxu1 %v17799_v61  ;;  %10328 = vmatpush.bf16.msra.mxu3 %v17789_v14 }
 0xe78   :  { %10340 = vmatpush.bf16.msrb.mxu1 %v17798_v9 }
 0xe7c   :  { %10341 = vmatpush.bf16.msrb.mxu1 %v17797_v0 }
 0xed2   :  { %v9775_v6 = vpop.f32.mrf.mxu0 }
 0xed3   :  { %v9844_v8 = vadd.f32 %v9775_v6, %v25702_v40  ;;  %v9814_v22 = vpop.f32.mrf.mxu1 }
 0xed4   :  { %v9847_v59 = vadd.f32 %v9814_v22, %v25681_v29 }
 0xed5   :  { %v9863_v16 = vadd.f32 %v9851_v5, %v9844_v8 }
 0xed6   :  { %v9866_v45 = vadd.f32 %v9854_v35, %v9847_v59 }
 0xed7   :  { %v9869_v28 = vmax.f32 %v9863_v16, 0.0 }
 0xed8   :  { %v9872_v1 = vmax.f32 %v9866_v45, 0.0  ;;  %v9788_v44 = vpop.f32.mrf.mxu2 }
 0xed9   :  { %v9875_v3 = vpack.c.bf16 %v9869_v28, %v9869_v28  ;;  %v9845_v63 = vadd.f32 %v9788_v44, %v25672_v19  ;;  %v9801_v23 = vpop.f32.mrf.mxu3 }
 0xeda   :  { %v9878_v42 = vpack.c.bf16 %v9872_v1, %v9872_v1  ;;  %v9846_v18 = vadd.f32 %v9801_v23, %v25705_v56  ;;  %v9777_v30 = vpop.f32.mrf.mxu0 }
 0xedb   :  { %v9864_v15 = vadd.f32 %v9852_v58, %v9845_v63  ;;  %v9816_v40 = vpop.f32.mrf.mxu1  ;;  %10277 = vmatmul.bf16.vlgmr.msrb.gmra.mxu3 %v9875_v3 }
 0xedc   :  { %v9865_v10 = vadd.f32 %v9853_v39, %v9846_v18  ;;  %10316 = vmatmul.bf16.vlgmr.msra.gmra.mxu2 %v9878_v42 }
 0xedd   :  { %v9870_v29 = vmax.f32 %v9864_v15, 0.0 }
 0xede   :  { %v9871_v47 = vmax.f32 %v9865_v10, 0.0 }
 0xedf   :  { %v9876_v57 = vpack.c.bf16 %v9870_v29, %v9870_v29 }
 0xee0   :  { %v9877_v27 = vpack.c.bf16 %v9871_v47, %v9871_v47  ;;  %v9790_v11 = vpop.f32.mrf.mxu2 }
 0xee1   :  { %v9803_v31 = vpop.f32.mrf.mxu3  ;;  %10290 = vmatmul.bf16.vlgmr.msra.gmra.mxu1 %v9876_v57 }
 0xee2   :  { %10303 = vmatmul.bf16.vlgmr.msra.gmra.mxu0 %v9877_v27  ;;  %v9827_v19 = vpop.f32.mrf.mxu0 }
 0xee3   :  { %v9848_v50 = vadd.f32 %v9827_v19, %v25729_v17 }
 0xee5   :  { %v9867_v37 = vadd.f32 %v9855_v53, %v9848_v50 }
 0xee7   :  { %v9873_v56 = vmax.f32 %v9867_v37, 0.0 }
 0xee8   :  { %v9840_v25 = vpop.f32.mrf.mxu2 }
 0xee9   :  { %v9879_v52 = vpack.c.bf16 %v9873_v56, %v9873_v56  ;;  %v9849_v24 = vadd.f32 %v9840_v25, %v25720_v54 }
 0xeea   :  { %v9829_v49 = vpop.f32.mrf.mxu0 }
 0xeeb   :  { %v9868_v43 = vadd.f32 %v9856_v38, %v9849_v24  ;;  %10329 = vmatmul.bf16.vlgmr.msra.gmra.mxu3 %v9879_v52 }
 0xeed   :  { %v9874_v46 = vmax.f32 %v9868_v43, 0.0 }
 0xeef   :  { %v9880_v33 = vpack.c.bf16 %v9874_v46, %v9874_v46 }
 0xef0   :  { %v9842_v4 = vpop.f32.mrf.mxu2 }
 0xef1   :  { %10342 = vmatmul.bf16.vlgmr.msrb.gmra.mxu1 %v9880_v33 }
 0xf5e   :  { %v10278_v26 = vpop.f32.mrf.mxu3  ;;  %v10291_v17 = vpop.f32.mrf.mxu1 }
 0xf5f   :  { %v10304_v2 = vpop.f32.mrf.mxu0  ;;  %v10317_v36 = vpop.f32.mrf.mxu2  ;;  %v10279_v60 = vadd.f32 %v17807_v7, %v10278_v26 }
 0xf61   :  { %v10292_v20 = vadd.f32 %v10291_v17, %v10279_v60 }
 0xf63   :  { %v10305_v32 = vadd.f32 %v10304_v2, %v10292_v20 }
 0xf65   :  { %v10318_v51 = vadd.f32 %v10317_v36, %v10305_v32 }
 0xf66   :  { %v10280_v48 = vpop.f32.mrf.mxu3  ;;  %v10293_v41 = vpop.f32.mrf.mxu1 }
 0xf67   :  { %v10306_v54 = vpop.f32.mrf.mxu0  ;;  %v10319_v21 = vpop.f32.mrf.mxu2 }
 0xf6e   :  { %v10330_v62 = vpop.f32.mrf.mxu3  ;;  %v10343_v55 = vpop.f32.mrf.mxu1 }
 0xf6f   :  { %v10331_v34 = vadd.f32 %v10330_v62, %v10318_v51 }
 0xf71   :  { %v10344_v13 = vadd.f32 %v10343_v55, %v10331_v34 }
 0xf73   :  { %10347 = vst [vmem:[#allocation2] sm:$0x3] %v10344_v13 }
 0xf74   :  { %10358 = dma.vmem_to_hbm [thread:$0]  %s10354_s2, 32, %s10356_s6, [#allocation3]  }
 0xf76   :  { %v10332_v61 = vpop.f32.mrf.mxu3  ;;  %v10345_v14 = vpop.f32.mrf.mxu1 }
 0xf77   :  { %17840 = dma.done.wait [#allocation3], 32  }
 0xf78   :  { %17841 = vsyncadd [#allocation3], 4294967264 }
 0xf79   :  { %10363 = vsyncpa [#allocation3], 1 }

</bundles_post_ra>
